<compile_context>
chip_gen: v7x
topology: tpu7x:2x2x1
jax: 0.10.0
libtpu: 0.0.40
codegen_flags: <defaults>
</compile_context>

<pallas_src>
import jax
import jax.numpy as jnp
from jax.experimental import pallas as pl
from jax.experimental.pallas import tpu as pltpu

_BN_EPS = 1e-5
_TN = 1024       # W1 column-tile / W2 row-tile width  ->  grid of 2 steps
_N1 = 2048       # layer-1 output width
_N2 = 1024       # layer-2 output width
_OUT_PAD = 128   # logits padded 10 -> 128 lanes (lane-dense final store)

# (fan_in, fan_out, has_batchnorm_after) per nn.Linear in the Sequential
_LAYER_DEFS = [
    (3072, 2048, True),   # Linear(3072, 2048) + BatchNorm1d(2048)
    (2048, 1024, False),  # Linear(2048, 1024) + Dropout (identity in eval)
    (1024, 256, True),    # Linear(1024, 256)  + BatchNorm1d(256)
    (256, 256, False),    # Linear(256, 256)   + Dropout
    (256, 256, True),     # Linear(256, 256)   + BatchNorm1d(256)
    (256, 32, False),     # Linear(256, 32)    + Dropout
    (32, 10, False),      # Linear(32, 10)
]


# ----------------------------------------------------------------------------
# Fused whole-network kernel
# ----------------------------------------------------------------------------
def net_kernel(x_ref, w1_ref, w2_ref, b2_ref, wt_ref, bt_ref, o_ref, acc_ref):
    j = pl.program_id(0)

    @pl.when(j == 0)
    def _():
        acc_ref[...] = jnp.zeros_like(acc_ref)

    # Layer-1 column tile j -> partial contribution to layer-2 (h1 never
    # leaves VMEM / vregs).
    h1 = jnp.dot(x_ref[...], w1_ref[0], preferred_element_type=jnp.float32)
    acc_ref[...] += jnp.dot(h1.astype(jnp.bfloat16), w2_ref[...],
                            preferred_element_type=jnp.float32)

    # Last step: add the (b1-folded) layer-2 bias and apply the collapsed
    # affine tail (layers 3..7) in a single matmul.
    @pl.when(j == pl.num_programs(0) - 1)
    def _():
        h2 = acc_ref[...] + b2_ref[...]
        out = jnp.dot(h2.astype(jnp.bfloat16), wt_ref[...],
                      preferred_element_type=jnp.float32) + bt_ref[...]
        o_ref[...] = out.astype(o_ref.dtype)


def net_forward_pallas(x_flat_bf16, fused):
    """x_flat_bf16: (B, 3072) bf16.  fused: (w1b, w2, b2, wt, bt)."""
    B, K = x_flat_bf16.shape
    w1b, w2, b2, wt, bt = fused
    n_tiles = w1b.shape[0]          # 2

    in_specs = [
        pl.BlockSpec((B, K), lambda j: (0, 0)),            # x: resident
        pl.BlockSpec((1, K, _TN), lambda j: (j, 0, 0)),    # W1 slab j (contiguous DMA)
        pl.BlockSpec((_TN, _N2), lambda j: (j, 0)),        # W2 row tile (contiguous)
        pl.BlockSpec((1, _N2), lambda j: (0, 0)),          # b2 (b1 folded in): resident
        pl.BlockSpec((_N2, _OUT_PAD), lambda j: (0, 0)),   # collapsed tail W: resident
        pl.BlockSpec((1, _OUT_PAD), lambda j: (0, 0)),     # collapsed tail b: resident
    ]

    out_pad = pl.pallas_call(
        net_kernel,
        out_shape=jax.ShapeDtypeStruct((B, _OUT_PAD), jnp.float32),
        grid_spec=pltpu.PrefetchScalarGridSpec(
            num_scalar_prefetch=0,
            grid=(n_tiles,),
            in_specs=in_specs,
            out_specs=pl.BlockSpec((B, _OUT_PAD), lambda j: (0, 0)),
            scratch_shapes=[pltpu.VMEM((B, _N2), jnp.float32)],  # h2 accumulator
        ),
        compiler_params=pltpu.CompilerParams(
            # carried accumulator + resident output across the axis -> arbitrary
            dimension_semantics=("arbitrary",),
            vmem_limit_bytes=32 << 20,
        ),
    )(x_flat_bf16, w1b, w2, b2, wt, bt)

    return out_pad[:, :10]


# ----------------------------------------------------------------------------
# Parameters
# ----------------------------------------------------------------------------
def init_net_params(key):
    """Per-layer f32 (W, b) with PyTorch nn.Linear default init."""
    params = []
    keys = jax.random.split(key, len(_LAYER_DEFS))
    for k, (fi, fo, _) in zip(keys, _LAYER_DEFS):
        kw, kb = jax.random.split(k)
        bound = 1.0 / (fi ** 0.5)
        w = jax.random.uniform(kw, (fi, fo), jnp.float32, -bound, bound)
        b = jax.random.uniform(kb, (fo,), jnp.float32, -bound, bound)
        params.append((w, b))
    return params


def build_fused_params(raw_params):
    """Fold BN, fold b1 into b2, collapse the affine tail, pre-block W1."""
    bn_scale = 1.0 / jnp.sqrt(1.0 + _BN_EPS)   # fresh BN eval: mean=0, var=1
    ws = [w for w, _ in raw_params]
    bs = [b for _, b in raw_params]

    # Fold eval-mode BatchNorm1d into the preceding Linear (layers 1, 3, 5).
    for i, (_, _, has_bn) in enumerate(_LAYER_DEFS):
        if has_bn:
            ws[i] = ws[i] * bn_scale
            bs[i] = bs[i] * bn_scale

    # Fold b1 into b2 (the net is affine: b1 @ W2 is a constant vector).
    b2 = bs[0] @ ws[1] + bs[1]

    # Collapse the all-affine tail (layers 3..7) into one (1024, 10) map.
    wt = ws[2]
    bt = bs[2]
    for w, b in zip(ws[3:], bs[3:]):
        wt = wt @ w
        bt = bt @ w + b

    # Pad the tail to 128 lanes so the final store is lane-dense.
    wt = jnp.pad(wt, ((0, 0), (0, _OUT_PAD - wt.shape[1])))
    bt = jnp.pad(bt, (0, _OUT_PAD - bt.shape[0]))

    # Pre-block W1 into (n_tiles, K, TN) so each streamed tile is contiguous.
    K = ws[0].shape[0]
    w1b = ws[0].reshape(K, _N1 // _TN, _TN).transpose(1, 0, 2)   # (2, 3072, 1024)

    return (w1b.astype(jnp.bfloat16),          # streamed, contiguous slabs
            ws[1].astype(jnp.bfloat16),        # streamed, contiguous row tiles
            b2.reshape(1, -1).astype(jnp.float32),
            wt.astype(jnp.bfloat16),
            bt.reshape(1, -1).astype(jnp.float32))


# ----------------------------------------------------------------------------
# Forward + references
# ----------------------------------------------------------------------------
@jax.jit
def net_forward(x_nchw, fused):
    B = x_nchw.shape[0]
    x = x_nchw.reshape(B, -1).astype(jnp.bfloat16)   # nn.Flatten + bf16 stream
    return net_forward_pallas(x, fused)


def net_forward_ref(x_nchw, fused):
    """Pure-JAX reference mirroring the kernel's exact bf16/f32 operation order."""
    w1b, w2, b2, wt, bt = fused
    B = x_nchw.shape[0]
    x = x_nchw.reshape(B, -1).astype(jnp.bfloat16)
    h2 = jnp.zeros((B, _N2), jnp.float32)
    for j in range(w1b.shape[0]):
        h1 = jnp.dot(x, w1b[j], preferred_element_type=jnp.float32)
        h2 = h2 + jnp.dot(h1.astype(jnp.bfloat16), w2[j * _TN:(j + 1) * _TN],
                          preferred_element_type=jnp.float32)
    h2 = h2 + b2
    out = jnp.dot(h2.astype(jnp.bfloat16), wt,
                  preferred_element_type=jnp.float32) + bt
    return out[:, :10]


def net_forward_torch_ref(x_nchw, raw_params):
    """Layer-by-layer f32 eval-mode reference (un-fused PyTorch semantics)."""
    bn_scale = 1.0 / jnp.sqrt(1.0 + _BN_EPS)
    h = x_nchw.reshape(x_nchw.shape[0], -1).astype(jnp.float32)
    for (w, b), (_, _, has_bn) in zip(raw_params, _LAYER_DEFS):
        h = h @ w + b
        if has_bn:
            h = h * bn_scale     # fresh BatchNorm1d, eval mode
        # Dropout is identity in eval mode.
    return h


# ----------------------------------------------------------------------------
if __name__ == "__main__":
    key = jax.random.PRNGKey(0)
    k_x, k_p = jax.random.split(key)

    # Module implies CIFAR-like input: 3072 = 3 * 32 * 32. Keep batch small.
    x = jax.random.normal(k_x, (2, 3, 32, 32), jnp.float32)
    raw_params = init_net_params(k_p)
    fused = build_fused_params(raw_params)

    out = jax.block_until_ready(net_forward(x, fused))
    assert out.shape == (2, 10), out.shape

    # Exact-structure reference (same bf16 weights, same op order).
    ref = net_forward_ref(x, fused)
    err = float(jnp.max(jnp.abs(out - ref)))
    assert jnp.allclose(out, ref, rtol=2e-3, atol=2e-3), err

    # f32, un-fused PyTorch-eval-semantics reference (validates BN fold,
    # b1 fold and affine tail collapse); loose tol covers bf16 weight casts.
    ref32 = net_forward_torch_ref(x, raw_params)
    err32 = float(jnp.max(jnp.abs(out - ref32)))
    assert jnp.allclose(out, ref32, atol=3e-2), err32

    print("KERNEL_OK")
</pallas_src>

<mosaic_0001>
module attributes {stable_mosaic.version = 11 : i64} {
  func.func @net_kernel(%arg0: i32, %arg1: memref<2x3072xbf16, #tpu.memory_space<vmem>>, %arg2: memref<1x3072x1024xbf16, #tpu.memory_space<vmem>>, %arg3: memref<1024x1024xbf16, #tpu.memory_space<vmem>>, %arg4: memref<1x1024xf32, #tpu.memory_space<vmem>>, %arg5: memref<1024x128xbf16, #tpu.memory_space<vmem>>, %arg6: memref<1x128xf32, #tpu.memory_space<vmem>>, %arg7: memref<2x128xf32, #tpu.memory_space<vmem>>, %arg8: memref<2x1024xf32, #tpu.memory_space<vmem>>) attributes {dimension_semantics = [#tpu.dimension_semantics<arbitrary>], iteration_bounds = array<i64: 2>, scalar_prefetch = 0 : i64, scratch_operands = 1 : i64, tpu.core_type = #tpu.core_type<tc>, window_params = [{pipeline_mode = #tpu.pipeline_mode<synchronous>, transform_indices = @transform_0, window_bounds = array<i64: 2, 3072>}, {transform_indices = @transform_1, window_bounds = array<i64: 1, 3072, 1024>}, {transform_indices = @transform_2, window_bounds = array<i64: 1024, 1024>}, {pipeline_mode = #tpu.pipeline_mode<synchronous>, transform_indices = @transform_3, window_bounds = array<i64: 1, 1024>}, {pipeline_mode = #tpu.pipeline_mode<synchronous>, transform_indices = @transform_4, window_bounds = array<i64: 1024, 128>}, {pipeline_mode = #tpu.pipeline_mode<synchronous>, transform_indices = @transform_5, window_bounds = array<i64: 1, 128>}, {pipeline_mode = #tpu.pipeline_mode<synchronous>, transform_indices = @transform_6, window_bounds = array<i64: 2, 128>}]} {
    %c0_i32 = arith.constant 0 : i32
    %0 = arith.cmpi eq, %arg0, %c0_i32 : i32
    %1 = arith.extui %0 : i1 to i32
    %c0_i32_0 = arith.constant 0 : i32
    %2 = arith.cmpi ne, %1, %c0_i32_0 : i32
    scf.if %2 {
      %cst_13 = arith.constant 0.000000e+00 : f32
      %16 = vector.broadcast %cst_13 : f32 to vector<2x1024xf32>
      %c0_14 = arith.constant 0 : index
      %c0_15 = arith.constant 0 : index
      %17 = vector.load %arg8[%c0_14, %c0_15] : memref<2x1024xf32, #tpu.memory_space<vmem>>, vector<2x1024xf32>
      tpu.vector_store %arg8[%c0_14, %c0_15], %16 {strides = array<i32>} : memref<2x1024xf32, #tpu.memory_space<vmem>>, vector<2x1024xf32>,
    } else {
    }
    %c0 = arith.constant 0 : index
    %c0_1 = arith.constant 0 : index
    %3 = vector.load %arg1[%c0, %c0_1] : memref<2x3072xbf16, #tpu.memory_space<vmem>>, vector<2x3072xbf16>
    %c0_2 = arith.constant 0 : index
    %c0_3 = arith.constant 0 : index
    %c0_4 = arith.constant 0 : index
    %4 = vector.load %arg2[%c0_2, %c0_3, %c0_4] : memref<1x3072x1024xbf16, #tpu.memory_space<vmem>>, vector<1x3072x1024xbf16>
    %5 = vector.shape_cast %4 : vector<1x3072x1024xbf16> to vector<3072x1024xbf16>
    %cst = arith.constant dense<0.000000e+00> : vector<2x1024xf32>
    %6 = tpu.matmul %3, %5, %cst {dimension_numbers = #tpu.dot_dimension_numbers<[1], [0], [0], [1], [0, 0, 1, 1], [], []>} : vector<2x3072xbf16>, vector<3072x1024xbf16>, vector<2x1024xf32> -> vector<2x1024xf32>
    %c0_5 = arith.constant 0 : index
    %c0_6 = arith.constant 0 : index
    %7 = vector.load %arg8[%c0_5, %c0_6] : memref<2x1024xf32, #tpu.memory_space<vmem>>, vector<2x1024xf32>
    %8 = arith.truncf %6 : vector<2x1024xf32> to vector<2x1024xbf16>
    %c0_7 = arith.constant 0 : index
    %c0_8 = arith.constant 0 : index
    %9 = vector.load %arg3[%c0_7, %c0_8] : memref<1024x1024xbf16, #tpu.memory_space<vmem>>, vector<1024x1024xbf16>
    %cst_9 = arith.constant dense<0.000000e+00> : vector<2x1024xf32>
    %10 = tpu.matmul %8, %9, %cst_9 {dimension_numbers = #tpu.dot_dimension_numbers<[1], [0], [0], [1], [0, 0, 1, 1], [], []>} : vector<2x1024xbf16>, vector<1024x1024xbf16>, vector<2x1024xf32> -> vector<2x1024xf32>
    %11 = arith.addf %7, %10 : vector<2x1024xf32>
    %c0_10 = arith.constant 0 : index
    %c0_11 = arith.constant 0 : index
    %12 = vector.load %arg8[%c0_10, %c0_11] : memref<2x1024xf32, #tpu.memory_space<vmem>>, vector<2x1024xf32>
    tpu.vector_store %arg8[%c0_10, %c0_11], %11 {strides = array<i32>} : memref<2x1024xf32, #tpu.memory_space<vmem>>, vector<2x1024xf32>,
    %c1_i32 = arith.constant 1 : i32
    %13 = arith.cmpi eq, %arg0, %c1_i32 : i32
    %14 = arith.extui %13 : i1 to i32
    %c0_i32_12 = arith.constant 0 : i32
    %15 = arith.cmpi ne, %14, %c0_i32_12 : i32
    scf.if %15 {
      %c0_13 = arith.constant 0 : index
      %c0_14 = arith.constant 0 : index
      %16 = vector.load %arg8[%c0_13, %c0_14] : memref<2x1024xf32, #tpu.memory_space<vmem>>, vector<2x1024xf32>
      %c0_15 = arith.constant 0 : index
      %c0_16 = arith.constant 0 : index
      %17 = vector.load %arg4[%c0_15, %c0_16] : memref<1x1024xf32, #tpu.memory_space<vmem>>, vector<1x1024xf32>
      %18 = vector.broadcast %17 : vector<1x1024xf32> to vector<2x1024xf32>
      %19 = arith.addf %16, %18 : vector<2x1024xf32>
      %20 = arith.truncf %19 : vector<2x1024xf32> to vector<2x1024xbf16>
      %c0_17 = arith.constant 0 : index
      %c0_18 = arith.constant 0 : index
      %21 = vector.load %arg5[%c0_17, %c0_18] : memref<1024x128xbf16, #tpu.memory_space<vmem>>, vector<1024x128xbf16>
      %cst_19 = arith.constant dense<0.000000e+00> : vector<2x128xf32>
      %22 = tpu.matmul %20, %21, %cst_19 {dimension_numbers = #tpu.dot_dimension_numbers<[1], [0], [0], [1], [0, 0, 1, 1], [], []>} : vector<2x1024xbf16>, vector<1024x128xbf16>, vector<2x128xf32> -> vector<2x128xf32>
      %c0_20 = arith.constant 0 : index
      %c0_21 = arith.constant 0 : index
      %23 = vector.load %arg6[%c0_20, %c0_21] : memref<1x128xf32, #tpu.memory_space<vmem>>, vector<1x128xf32>
      %24 = vector.broadcast %23 : vector<1x128xf32> to vector<2x128xf32>
      %25 = arith.addf %22, %24 : vector<2x128xf32>
      %c0_22 = arith.constant 0 : index
      %c0_23 = arith.constant 0 : index
      %26 = vector.load %arg7[%c0_22, %c0_23] : memref<2x128xf32, #tpu.memory_space<vmem>>, vector<2x128xf32>
      tpu.vector_store %arg7[%c0_22, %c0_23], %25 {strides = array<i32>} : memref<2x128xf32, #tpu.memory_space<vmem>>, vector<2x128xf32>,
    } else {
    }
    return
  }
  func.func @transform_0(%arg0: i32) -> (i32, i32) {
    %c0_i32 = arith.constant 0 : i32
    %c0_i32_0 = arith.constant 0 : i32
    %c0_i32_1 = arith.constant 0 : i32
    return %c0_i32, %c0_i32_0 : i32, i32
  }
  func.func @transform_1(%arg0: i32) -> (i32, i32, i32) {
    %c0_i32 = arith.constant 0 : i32
    %c0_i32_0 = arith.constant 0 : i32
    %c0_i32_1 = arith.constant 0 : i32
    return %arg0, %c0_i32, %c0_i32_0 : i32, i32, i32
  }
  func.func @transform_2(%arg0: i32) -> (i32, i32) {
    %c0_i32 = arith.constant 0 : i32
    %c0_i32_0 = arith.constant 0 : i32
    return %arg0, %c0_i32 : i32, i32
  }
  func.func @transform_3(%arg0: i32) -> (i32, i32) {
    %c0_i32 = arith.constant 0 : i32
    %c0_i32_0 = arith.constant 0 : i32
    %c0_i32_1 = arith.constant 0 : i32
    return %c0_i32, %c0_i32_0 : i32, i32
  }
  func.func @transform_4(%arg0: i32) -> (i32, i32) {
    %c0_i32 = arith.constant 0 : i32
    %c0_i32_0 = arith.constant 0 : i32
    %c0_i32_1 = arith.constant 0 : i32
    return %c0_i32, %c0_i32_0 : i32, i32
  }
  func.func @transform_5(%arg0: i32) -> (i32, i32) {
    %c0_i32 = arith.constant 0 : i32
    %c0_i32_0 = arith.constant 0 : i32
    %c0_i32_1 = arith.constant 0 : i32
    return %c0_i32, %c0_i32_0 : i32, i32
  }
  func.func @transform_6(%arg0: i32) -> (i32, i32) {
    %c0_i32 = arith.constant 0 : i32
    %c0_i32_0 = arith.constant 0 : i32
    %c0_i32_1 = arith.constant 0 : i32
    return %c0_i32, %c0_i32_0 : i32, i32
  }
}

</mosaic_0001>

<bundles_post_ra>
// kernel: net_forward.1
= control target key start
LH: loop header
LB: loop body
LE: loop exit
PB: predicated region body
PF: predicated region fallthrough
CT: control target
= control target key end

     0   :  { %s21951_s0 = inlined_call_operand.vmem [shape: bf16[2,3072], index: 0, kind: input, shape index: {}]   ;;  %s21952_s1 = inlined_call_operand.hbm [shape: bf16[2,3072,1024], index: 1, kind: input, shape index: {}]   ;;  %s21953_s2 = inlined_call_operand.hbm [shape: bf16[2048,1024], index: 2, kind: input, shape index: {}]   ;;  %s21954_s3 = inlined_call_operand.hbm [shape: f32[1,1024], index: 3, kind: input, shape index: {}]   ;;  %s21955_s4 = inlined_call_operand.hbm [shape: bf16[1024,128], index: 4, kind: input, shape index: {}]   ;;  %s21956_s5 = inlined_call_operand.hbm [shape: f32[1,128], index: 5, kind: input, shape index: {}]   ;;  %s21957_s6 = inlined_call_operand.hbm [shape: f32[2,128], index: 6, kind: output, shape index: {}]  }
   0x1   :  { %21961 = sst [smem:[#allocation18_spill]] %s21952_s1 }
   0x2   :  { %11 = vsyncpa [#allocation4], 0 }
   0x3   :  { %13 = vsyncpa [#allocation4 + $0x1], 0 }
   0x4   :  { %14 = vsyncpa [#allocation7], 0 }
   0x5   :  { %16 = vsyncpa [#allocation7 + $0x1], 0 }
   0x6   :  { %17 = vsyncpa [#allocation10], 0 }
   0x7   :  { %18 = vsyncpa [#allocation5], 0  ;;  %s19289_s21 = smov 0   ;;  %s19291_s22 = smov 0  }
   0x8   :  { %s19293_s23 = smov 0   ;;  %s19295_s24 = smov 0  }
   0x9 LB: > { %s19308_s25 = sadd.s32 4294967295, %s19239_s24   ;;  %p65_p0 = scmp.ne.s32.totalorder %s19231_s22, %s19227_s21  ;;  %s19239_s24 = sphi %s19295_s24, %s21978_s24   ;;  %s19235_s23 = sphi %s19293_s23, %s21977_s23   ;;  %s19231_s22 = sphi %s19291_s22, %s21976_s22   ;;  %s19227_s21 = sphi %s19289_s21, %s21975_s21  }
   0xa   : > { %p21958_p1 = scmp.eq.s32.totalorder %s19308_s25, 0  ;;  %p16412_p2 = scmp.ge.s32.totalorder %s19239_s24, 1 }
   0xb   : > { %p186_p3 = scmp.lt.s32.totalorder %s19239_s24, 3  ;;  %s19241_s28 = smov [#allocation8]  }
   0xc   : > { %p19317_p5 = por %p21958_p1, %p65_p0  ;;  %s202_s29 = sshll.u32 %s19241_s28, 4  ;;  %s203_s29 = int_to_ptr.vmem [resolvable:$true] %s202_s29 }
   0xd   : > { %p19321_p6 = pnand %p16412_p2, %p186_p3  ;;  %s19242_s30 = smov [#allocation9]  }
   0xe   : > { %s21962_s26 = scalar_select %p19317_p5, 1, 0 }
   0xf   : > { %s21963_s27 = scalar_select %p19321_p6, 1, 0 }
  0x10   : > { %p18883_p7 = pneg %p19321_p6  ;;  %s212_s7 = sshll.u32 %s19242_s30, 4  ;;  %s19333_s7 = int_to_ptr.vmem [resolvable:$true] %s212_s7 }
  0x11   : > { %s19243_s9 = smov [#allocation11]   ;;  %s19019_s13 = scalar_lea.hbm %s21954_s3, 128 }
  0x12   : > { %p19329_p8 = pnand %p18883_p7, %p21958_p1  ;;  %s19335_s10 = sshll.u32 %s19243_s9, 4  ;;  %s227_s10 = int_to_ptr.vmem [resolvable:$true] %s19335_s10 }
  0x13   : > { %p19020_p9 = scmp.ne.s32.totalorder %s21954_s3, %s19019_s13  ;;  %p19026_p13 = scmp.lt.u32.totalorder %s19019_s13, %s21954_s3 }
  0x14   : > { %p19345_p10 = pneg %p19329_p8 }
  0x16   : > { %p19022_p11 = pnand %p19345_p10, %p19020_p9 }
  0x18   : > { %p19023_p12 = pneg %p19022_p11 }
  0x1a   : > { %p19028_p0 = pnand %p19026_p13, %p19023_p12 }
  0x1c   : > { %19031 = shalt.err (!%p19028_p0)
}
  0x1d   : > { %s19032_s19 = scalar_lea.vmem %s203_s29, 128  ;;  %p19040_p4 = scmp.lt.s32.totalorder %s203_s29, %s203_s29 }
  0x1e   : > { %p19033_p2 = scmp.ne.s32.totalorder %s203_s29, %s19032_s19  ;;  %p19041_p1 = scmp.lt.s32.totalorder %s19032_s19, %s19032_s19 }
  0x20   : > { %p19035_p3 = pnand %p19033_p2, %p19345_p10  ;;  %p19042_p5 = por %p19041_p1, %p19040_p4 }
  0x22   : > { %p19036_p7 = pneg %p19035_p3 }
  0x24   : > { %p19043_p6 = pnand %p19042_p5, %p19036_p7 }
  0x26   : > { %19046 = shalt.err (!%p19043_p6)
}
  0x27   : > { %18886 = dma.hbm_to_vmem [thread:$0]  (!%p19329_p8), %s21954_s3, 128, %s203_s29, [#allocation7]  }
  0x28   : > { %s19047_s9 = scalar_lea.hbm %s21955_s4, 8192 }
  0x29   : > { %p19048_p9 = scmp.ne.s32.totalorder %s21955_s4, %s19047_s9  ;;  %p19054_p4 = scmp.lt.u32.totalorder %s19047_s9, %s21955_s4 }
  0x2b   : > { %p19050_p11 = pnand %p19048_p9, %p19345_p10 }
  0x2d   : > { %p19051_p1 = pneg %p19050_p11 }
  0x2f   : > { %p19056_p5 = pnand %p19054_p4, %p19051_p1 }
  0x31   : > { %19059 = shalt.err (!%p19056_p5)
}
  0x32   : > { %s19060_s29 = scalar_lea.vmem %s19333_s7, 8192  ;;  %p19068_p0 = scmp.lt.s32.totalorder %s19333_s7, %s19333_s7 }
  0x33   : > { %p19061_p6 = scmp.ne.s32.totalorder %s19333_s7, %s19060_s29  ;;  %p19069_p2 = scmp.lt.s32.totalorder %s19060_s29, %s19060_s29 }
  0x35   : > { %p19063_p12 = pnand %p19061_p6, %p19345_p10  ;;  %p19070_p3 = por %p19069_p2, %p19068_p0 }
  0x37   : > { %p19064_p13 = pneg %p19063_p12 }
  0x39   : > { %p19071_p7 = pnand %p19070_p3, %p19064_p13 }
  0x3b   : > { %19074 = shalt.err (!%p19071_p7)
}
  0x3c   : > { %s19244_s15 = smov 64   ;;  %s19245_s17 = smov 4  }
  0x3d   : > { %18889 = dma.hbm_to_vmem [thread:$0]  (!%p19329_p8), %s21955_s4, 8192, %s19333_s7, [#allocation10], %s19244_s15, %s19244_s15, %s19245_s17  }
  0x3e   : > { %s19075_s28 = scalar_lea.hbm %s21956_s5, 16 }
  0x3f   : > { %p19076_p9 = scmp.ne.s32.totalorder %s21956_s5, %s19075_s28  ;;  %p19082_p4 = scmp.lt.u32.totalorder %s19075_s28, %s21956_s5 }
  0x41   : > { %p19078_p11 = pnand %p19076_p9, %p19345_p10 }
  0x43   : > { %p19079_p1 = pneg %p19078_p11 }
  0x45   : > { %p19084_p5 = pnand %p19082_p4, %p19079_p1 }
  0x47   : > { %19087 = shalt.err (!%p19084_p5)
}
  0x48   : > { %s19088_s13 = scalar_lea.vmem %s227_s10, 16  ;;  %s19095_s7 = scalar_lea.vmem %s227_s10, 32 }
  0x49   : > { %p19089_p6 = scmp.ne.s32.totalorder %s227_s10, %s19088_s13  ;;  %p19096_p0 = scmp.lt.s32.totalorder %s227_s10, %s227_s10 }
  0x4a   : > { %p19097_p2 = scmp.lt.s32.totalorder %s19095_s7, %s19088_s13 }
  0x4b   : > { %p19091_p12 = pnand %p19089_p6, %p19345_p10 }
  0x4c   : > { %p19098_p3 = por %p19097_p2, %p19096_p0 }
  0x4d   : > { %p19092_p13 = pneg %p19091_p12 }
  0x4f   : > { %p19099_p7 = pnand %p19098_p3, %p19092_p13 }
  0x51   : > { %19102 = shalt.err (!%p19099_p7)
}
  0x52   : > { %18892 = dma.hbm_to_vmem [thread:$0]  (!%p19329_p8), %s21956_s5, 16, %s227_s10, [#allocation10]  }
  0x53   : > { %s19404_s16 = sadd.s32 1, %s19239_s24   ;;  %s52_s8 = sadd.s32 1, %s19235_s23 }
  0x54   : > { %s49_s15 = ssub.s32 %s19239_s24, %s19404_s16  ;;  %p59_p9 = scmp.ne.s32.totalorder %s19235_s23, %s19231_s22 }
  0x55   : > { %p50_p10 = scmp.eq.s32.totalorder %s49_s15, 0  ;;  %p60_p11 = scmp.eq.s32.totalorder %s19239_s24, 0 }
  0x56   : > { %p18903_p1 = scmp.lt.s32.totalorder %s19239_s24, 2  ;;  %s19417_s18 = sand.u32 1, %s19235_s23  }
  0x57   : > { %s19414_s17 = scalar_select %p50_p10, %s19235_s23, %s52_s8  }
  0x58   : > { %p61_p4 = por %p60_p11, %p59_p9  ;;  %s18860_s19 = smul.u32 12288, %s19417_s18 }
  0x59   : > { %s18861_s20 = smul.u32 196608, %s19239_s24  ;;  %s21967_s1 = sld [smem:[#allocation18_spill]] }
  0x5a   : > { %p19421_p8 = pnand %p18903_p1, %p61_p4  ;;  %s241_s9 = scalar_lea.vmem [#allocation3], %s18860_s19 }
  0x5b   : > { %s248_s11 = sshll.u32 %s241_s9, 4  ;;  %s258_s12 = sand.u32 1, %s19239_s24   ;;  %s19430_s11 = int_to_ptr.vmem [resolvable:$true] %s248_s11 }
  0x5c   : > { %s238_s13 = scalar_lea.sflag [#allocation4], %s19417_s18  ;;  %p19105_p6 = pneg %p19421_p8 }
  0x5f   : > { %s19428_s30 = scalar_lea.hbm %s21967_s1, %s18861_s20  ;;  %s19108_s15 = scalar_lea.hbm %s21967_s1, 393216 }
  0x60   : > { %s19103_s7 = scalar_lea.hbm %s19428_s30, 196608  ;;  %p19109_p0 = scmp.lt.u32.totalorder %s19428_s30, %s21967_s1 }
  0x61   : > { %p19104_p5 = scmp.ne.s32.totalorder %s19428_s30, %s19103_s7  ;;  %p19110_p2 = scmp.lt.u32.totalorder %s19108_s15, %s19103_s7 }
  0x62   : > { %p19112_p7 = scmp.lt.u32.totalorder %s19103_s7, %s19428_s30 }
  0x63   : > { %p19106_p12 = pnand %p19105_p6, %p19104_p5  ;;  %p19111_p3 = por %p19110_p2, %p19109_p0 }
  0x65   : > { %p19107_p13 = pneg %p19106_p12  ;;  %p19113_p10 = por %p19112_p7, %p19111_p3 }
  0x67   : > { %p19114_p9 = pnand %p19113_p10, %p19107_p13 }
  0x69   : > { %19117 = shalt.err (!%p19114_p9)
}
  0x6a   : > { %s19118_s19 = scalar_lea.vmem %s19430_s11, 196608  ;;  %s19246_s21 = smov [#allocation3]  }
  0x6b   : > { %p19119_p11 = scmp.ne.s32.totalorder %s19430_s11, %s19118_s19  ;;  %s19123_s28 = sshll.u32 %s19246_s21, 4  ;;  %s19124_s28 = int_to_ptr.vmem [resolvable:$false] %s19123_s28 }
  0x6c   : > { %s19125_s9 = scalar_lea.vmem %s19124_s28, 393216  ;;  %p19126_p5 = scmp.lt.s32.totalorder %s19430_s11, %s19124_s28 }
  0x6d   : > { %p19121_p1 = pnand %p19119_p11, %p19105_p6  ;;  %p19127_p12 = scmp.lt.s32.totalorder %s19125_s9, %s19118_s19 }
  0x6f   : > { %p19122_p4 = pneg %p19121_p1  ;;  %p19128_p0 = por %p19127_p12, %p19126_p5 }
  0x71   : > { %p19129_p2 = pnand %p19128_p0, %p19122_p4 }
  0x73   : > { %19132 = shalt.err (!%p19129_p2)
}
  0x74   : > { %s19247_s7 = smov 512   ;;  %s19248_s14 = smov 32  }
  0x75   : > { %18896 = dma.hbm_to_vmem [thread:$0]  (!%p19421_p8), %s19428_s30, 196608, %s19430_s11, %s238_s13, %s19247_s7, %s19247_s7, %s19248_s14  }
  0x76   : > { %s16418_s29 = sshll.u32 %s19417_s18, 12  ;;  %s18547_s15 = sshll.u32 %s19239_s24, 16 }
  0x77   : > { %s19469_s19 = scalar_lea.hbm %s21953_s2, %s18547_s15  ;;  %s262_s21 = scalar_lea.vmem [#allocation6], %s16418_s29 }
  0x78   : > { %s270_s28 = sshll.u32 %s262_s21, 4  ;;  %s19475_s9 = scalar_lea.sflag [#allocation7], %s258_s12  ;;  %s19471_s28 = int_to_ptr.vmem [resolvable:$true] %s270_s28 }
  0x79   : > { %s19133_s1 = scalar_lea.hbm %s19469_s19, 65536  ;;  %s19138_s11 = scalar_lea.hbm %s21953_s2, 131072 }
  0x7a   : > { %p19134_p13 = scmp.ne.s32.totalorder %s19469_s19, %s19133_s1  ;;  %p19139_p10 = scmp.lt.u32.totalorder %s19469_s19, %s21953_s2 }
  0x7b   : > { %p19140_p9 = scmp.lt.u32.totalorder %s19138_s11, %s19133_s1  ;;  %p19142_p1 = scmp.lt.u32.totalorder %s19133_s1, %s19469_s19 }
  0x7c   : > { %p19136_p3 = pnand %p19134_p13, %p19105_p6 }
  0x7d   : > { %p19141_p11 = por %p19140_p9, %p19139_p10 }
  0x7e   : > { %p19137_p7 = pneg %p19136_p3 }
  0x7f   : > { %p19143_p4 = por %p19142_p1, %p19141_p11 }
  0x81   : > { %p19144_p5 = pnand %p19143_p4, %p19137_p7 }
  0x83   : > { %19147 = shalt.err (!%p19144_p5)
}
  0x84   : > { %s19148_s24 = scalar_lea.vmem %s19471_s28, 65536  ;;  %s19249_s12 = smov [#allocation6]  }
  0x85   : > { %p19149_p12 = scmp.ne.s32.totalorder %s19471_s28, %s19148_s24  ;;  %s19153_s29 = sshll.u32 %s19249_s12, 4  ;;  %s19154_s29 = int_to_ptr.vmem [resolvable:$false] %s19153_s29 }
  0x86   : > { %s19155_s8 = scalar_lea.vmem %s19154_s29, 131072  ;;  %p19156_p13 = scmp.lt.s32.totalorder %s19471_s28, %s19154_s29 }
  0x87   : > { %p19151_p0 = pnand %p19149_p12, %p19105_p6  ;;  %p19157_p3 = scmp.lt.s32.totalorder %s19155_s8, %s19148_s24 }
  0x89   : > { %p19152_p2 = pneg %p19151_p0  ;;  %p19158_p10 = por %p19157_p3, %p19156_p13 }
  0x8b   : > { %p19159_p9 = pnand %p19158_p10, %p19152_p2 }
  0x8d   : > { %19162 = shalt.err (!%p19159_p9)
}
  0x8e   : > { %18899 = dma.hbm_to_vmem [thread:$0]  (!%p19421_p8), %s19469_s19, 65536, %s19471_s28, %s19475_s9, %s19247_s7, %s19247_s7, %s19248_s14  }
  0x8f   : > { %p21968_p6 = scmp.ne.s32.totalorder %s21963_s27, 0 }
  0x90   : > { %s284_s1 = sand.u32 (!%p21968_p6), 1, %s19231_s22   ;;  %p21969_p7 = scmp.ne.s32.totalorder (!%p21968_p6), %s21962_s26, 0 }
  0x91   : > { %282 = sbr.rel (%p21968_p6) target bundleno = 2749 (0xabd), region = 44  ;;  %s285_s21 = scalar_lea.sflag (!%p21968_p6), [#allocation4], %s284_s1 }
  0x92   : > { %s18862_s20 = smul.u32 (!%p21968_p6), 12288, %s284_s1 }
  0x94   : > { %s19507_s18 = scalar_lea.vmem (!%p21968_p6), [#allocation3], %s18862_s20 }
  0x98   : > { %19206 = dma.done.wait (%p21969_p7), %s285_s21, 196608  }
  0x99   : > { %19208 = vsyncadd (%p21969_p7), %s285_s21, 4294770688  ;;  %s293_s10 = sand.u32 1, %s19308_s25   ;;  %s16423_s30 = sshll.u32 %s284_s1, 12 }
  0x9a   : > { %s294_s7 = scalar_lea.sflag [#allocation7], %s293_s10  ;;  %s19514_s14 = scalar_lea.vmem [#allocation6], %s16423_s30 }
  0x9b   : > { %19210 = dma.done.wait (%p21969_p7), %s294_s7, 65536  }
  0x9c   : > { %19212 = vsyncadd (%p21969_p7), %s294_s7, 4294901760  ;;  %p21970_p8 = scmp.eq.s32.totalorder %s19308_s25, 0 }
  0x9e   : > { %19214 = dma.done.wait (%p21970_p8), [#allocation7], 128   ;;  %p21971_p11 = pmov %p21970_p8 }
  0x9f   : > { %p21972_p1 = pmov %p21970_p8 }
  0xa0   : > { %19216 = vsyncadd (%p21971_p11), [#allocation7], 4294967168 }
  0xa1   : > { %19218 = dma.done.wait (%p21972_p1), [#allocation10], 8208   ;;  %p21973_p4 = pmov %p21972_p1 }
  0xa2   : > { %p21974_p5 = scmp.ne.s32.totalorder %s19308_s25, 0 }
  0xa3   : > { %19220 = vsyncadd (%p21973_p4), [#allocation10], 4294959088  ;;  %v19250_v0 = vmov (!%p21974_p5), 0.0  }
  0xa4   : > { %343 = sbr.rel (%p21974_p5) target bundleno = 171 (0xab), region = 68  ;;  %344 = vst [vmem:[#allocation2] sm:$0xff] (!%p21974_p5), %v19250_v0  ;;  %345 = vst [vmem:[#allocation2 + $0x8] sm:$0xff] (!%p21974_p5), %v19250_v0 }
  0xab PF: > { %v349_v1 = vld [vmem:[%s19507_s18] sm:$0xff]  ;;  %v350_v3 = vld [vmem:[%s19507_s18 + $0x8] sm:$0xff]  ;;  %v19251_v33 = vmov 1966171168   ;;  %v1892_v35 = vlaneseq  ;;  %v19566_v60 = vld [vmem:[%s21951_s0] sm:$0xff]  ;;  %p18476_p12 = scmp.ne.s32.totalorder %s19308_s25, 1 }
  0xac   : > { %v353_v2 = vld [vmem:[%s19507_s18 + $0x20] sm:$0xff]  ;;  %v354_v5 = vld [vmem:[%s19507_s18 + $0x28] sm:$0xff]  ;;  %v1890_v34 = vunpack.c.l.s4 %v19251_v33 }
  0xad   : > { %v16429_v4 = vcombine.high %v349_v1, %v353_v2  ;;  %v16428_v6 = vcombine.low %v349_v1, %v353_v2  ;;  %v357_v7 = vld [vmem:[%s19507_s18 + $0x40] sm:$0xff]  ;;  %v16431_v9 = vcombine.high %v350_v3, %v354_v5  ;;  %v16430_v10 = vcombine.low %v350_v3, %v354_v5  ;;  %v358_v12 = vld [vmem:[%s19507_s18 + $0x48] sm:$0xff] }
  0xae   : > { %v361_v8 = vld [vmem:[%s19507_s18 + $0x60] sm:$0xff]  ;;  %v362_v13 = vld [vmem:[%s19507_s18 + $0x68] sm:$0xff]  ;;  %v1891_v44 = vunpack.c.0.s8 %v1890_v34  ;;  %v19552_v45 = vshrl.u32 %v1892_v35, 7 }
  0xaf   : > { %v16437_v11 = vcombine.high %v357_v7, %v361_v8  ;;  %v365_v14 = vld [vmem:[%s19507_s18 + $0x80] sm:$0xff]  ;;  %9739 = vmatprep.subr.bf16.mxu0 %v16429_v4  ;;  %v16439_v15 = vcombine.high %v358_v12, %v362_v13  ;;  %v366_v17 = vld [vmem:[%s19507_s18 + $0x88] sm:$0xff]  ;;  %10231 = vmatprep.subr.bf16.mxu1 %v16431_v9  ;;  %v16436_v19 = vcombine.low %v357_v7, %v361_v8 }
  0xb0   : > { %v369_v16 = vld [vmem:[%s19507_s18 + $0xa0] sm:$0xff]  ;;  %v370_v18 = vld [vmem:[%s19507_s18 + $0xa8] sm:$0xff]  ;;  %9740 = vmatpush1.bf16.msra.mxu0 %v16428_v6  ;;  %10232 = vmatpush1.bf16.msra.mxu1 %v16430_v10  ;;  %v16438_v20 = vcombine.low %v358_v12, %v362_v13  ;;  %v19559_v54 = vsub.s32 %v1891_v44, %v19552_v45 }
  0xb1   : > { %9741 = vmatprep.subr.bf16.mxu0 %v16437_v11  ;;  %v16445_v21 = vcombine.high %v365_v14, %v369_v16  ;;  %10233 = vmatprep.subr.bf16.mxu1 %v16439_v15  ;;  %v16447_v22 = vcombine.high %v366_v17, %v370_v18  ;;  %v373_v23 = vld [vmem:[%s19507_s18 + $0xc0] sm:$0xff]  ;;  %v374_v25 = vld [vmem:[%s19507_s18 + $0xc8] sm:$0xff]  ;;  %v16444_v27 = vcombine.low %v365_v14, %v369_v16 }
  0xb2   : > { %v377_v24 = vld [vmem:[%s19507_s18 + $0xe0] sm:$0xff]  ;;  %v378_v26 = vld [vmem:[%s19507_s18 + $0xe8] sm:$0xff]  ;;  %v16446_v28 = vcombine.low %v366_v17, %v370_v18  ;;  %v19572_v0 = vrot.slane %v19566_v60, %v19559_v54 }
  0xb3   : > { %v16453_v29 = vcombine.high %v373_v23, %v377_v24  ;;  %v16455_v30 = vcombine.high %v374_v25, %v378_v26  ;;  %v381_v31 = vld [vmem:[%s19507_s18 + $0x100] sm:$0xff]  ;;  %v382_v36 = vld [vmem:[%s19507_s18 + $0x108] sm:$0xff]  ;;  %v16452_v38 = vcombine.low %v373_v23, %v377_v24  ;;  %v16454_v39 = vcombine.low %v374_v25, %v378_v26 }
  0xb4   : > { %9742 = vmatpush1.bf16.msra.mxu0 %v16436_v19  ;;  %10234 = vmatpush1.bf16.msra.mxu1 %v16438_v20  ;;  %v385_v32 = vld [vmem:[%s19507_s18 + $0x120] sm:$0xff]  ;;  %v386_v37 = vld [vmem:[%s19507_s18 + $0x128] sm:$0xff]  ;;  %v1903_v4 = vcombine.high %v19572_v0, %v19572_v0 }
  0xb5   : > { %9743 = vmatprep.subr.bf16.mxu0 %v16445_v21  ;;  %10235 = vmatprep.subr.bf16.mxu1 %v16447_v22  ;;  %v16461_v40 = vcombine.high %v381_v31, %v385_v32  ;;  %v16463_v41 = vcombine.high %v382_v36, %v386_v37  ;;  %v389_v42 = vld [vmem:[%s19507_s18 + $0x140] sm:$0xff]  ;;  %v390_v46 = vld [vmem:[%s19507_s18 + $0x148] sm:$0xff]  ;;  %v16460_v48 = vcombine.low %v381_v31, %v385_v32 }
  0xb6   : > { %v393_v43 = vld [vmem:[%s19507_s18 + $0x160] sm:$0xff]  ;;  %v394_v47 = vld [vmem:[%s19507_s18 + $0x168] sm:$0xff]  ;;  %v16462_v49 = vcombine.low %v382_v36, %v386_v37  ;;  %v19581_v10 = vrot.slane %v1903_v4, %v19559_v54 }
  0xb7   : > { %v16469_v50 = vcombine.high %v389_v42, %v393_v43  ;;  %v16471_v51 = vcombine.high %v390_v46, %v394_v47  ;;  %v397_v52 = vld [vmem:[%s19507_s18 + $0x180] sm:$0xff]  ;;  %v398_v55 = vld [vmem:[%s19507_s18 + $0x188] sm:$0xff]  ;;  %v16468_v57 = vcombine.low %v389_v42, %v393_v43  ;;  %v16470_v58 = vcombine.low %v390_v46, %v394_v47 }
  0xb8   : > { %9744 = vmatpush1.bf16.msra.mxu0 %v16444_v27  ;;  %10236 = vmatpush1.bf16.msra.mxu1 %v16446_v28  ;;  %v401_v53 = vld [vmem:[%s19507_s18 + $0x1a0] sm:$0xff]  ;;  %v402_v56 = vld [vmem:[%s19507_s18 + $0x1a8] sm:$0xff] }
  0xb9   : > { %9745 = vmatprep.subr.bf16.mxu0 %v16453_v29  ;;  %10237 = vmatprep.subr.bf16.mxu1 %v16455_v30  ;;  %v16477_v59 = vcombine.high %v397_v52, %v401_v53  ;;  %v16479_v61 = vcombine.high %v398_v55, %v402_v56  ;;  %v405_v62 = vld [vmem:[%s19507_s18 + $0x1c0] sm:$0xff]  ;;  %v406_v1 = vld [vmem:[%s19507_s18 + $0x1c8] sm:$0xff]  ;;  %v16476_v3 = vcombine.low %v397_v52, %v401_v53 }
  0xba   : > { %v409_v63 = vld [vmem:[%s19507_s18 + $0x1e0] sm:$0xff]  ;;  %v410_v2 = vld [vmem:[%s19507_s18 + $0x1e8] sm:$0xff]  ;;  %v16478_v5 = vcombine.low %v398_v55, %v402_v56  ;;  %9771 = vmatprep.mubr.bf16.mxu0 %v19581_v10  ;;  %10263 = vmatprep.mubr.bf16.mxu1 %v19581_v10 }
  0xbb   : > { %v16485_v6 = vcombine.high %v405_v62, %v409_v63  ;;  %v16487_v7 = vcombine.high %v406_v1, %v410_v2  ;;  %v413_v8 = vld [vmem:[%s19507_s18 + $0x200] sm:$0xff]  ;;  %v414_v11 = vld [vmem:[%s19507_s18 + $0x208] sm:$0xff]  ;;  %v16484_v13 = vcombine.low %v405_v62, %v409_v63  ;;  %v16486_v14 = vcombine.low %v406_v1, %v410_v2 }
  0xbc   : > { %9746 = vmatpush1.bf16.msra.mxu0 %v16452_v38  ;;  %10238 = vmatpush1.bf16.msra.mxu1 %v16454_v39  ;;  %v417_v9 = vld [vmem:[%s19507_s18 + $0x220] sm:$0xff]  ;;  %v418_v12 = vld [vmem:[%s19507_s18 + $0x228] sm:$0xff] }
  0xbd   : > { %9747 = vmatprep.subr.bf16.mxu0 %v16461_v40  ;;  %10239 = vmatprep.subr.bf16.mxu1 %v16463_v41  ;;  %v16493_v15 = vcombine.high %v413_v8, %v417_v9  ;;  %v16495_v16 = vcombine.high %v414_v11, %v418_v12  ;;  %v421_v17 = vld [vmem:[%s19507_s18 + $0x240] sm:$0xff]  ;;  %v422_v19 = vld [vmem:[%s19507_s18 + $0x248] sm:$0xff]  ;;  %v16492_v21 = vcombine.low %v413_v8, %v417_v9 }
  0xbe   : > { %v425_v18 = vld [vmem:[%s19507_s18 + $0x260] sm:$0xff]  ;;  %v426_v20 = vld [vmem:[%s19507_s18 + $0x268] sm:$0xff]  ;;  %v16494_v22 = vcombine.low %v414_v11, %v418_v12 }
  0xbf   : > { %v16501_v23 = vcombine.high %v421_v17, %v425_v18  ;;  %v16503_v24 = vcombine.high %v422_v19, %v426_v20  ;;  %v429_v25 = vld [vmem:[%s19507_s18 + $0x280] sm:$0xff]  ;;  %v430_v27 = vld [vmem:[%s19507_s18 + $0x288] sm:$0xff]  ;;  %v16500_v29 = vcombine.low %v421_v17, %v425_v18  ;;  %v16502_v30 = vcombine.low %v422_v19, %v426_v20 }
  0xc0   : > { %9748 = vmatpush1.bf16.msra.mxu0 %v16460_v48  ;;  %10240 = vmatpush1.bf16.msra.mxu1 %v16462_v49  ;;  %v433_v26 = vld [vmem:[%s19507_s18 + $0x2a0] sm:$0xff]  ;;  %v434_v28 = vld [vmem:[%s19507_s18 + $0x2a8] sm:$0xff] }
  0xc1   : > { %9749 = vmatprep.subr.bf16.mxu0 %v16469_v50  ;;  %10241 = vmatprep.subr.bf16.mxu1 %v16471_v51  ;;  %v16509_v31 = vcombine.high %v429_v25, %v433_v26  ;;  %v16511_v32 = vcombine.high %v430_v27, %v434_v28  ;;  %v437_v33 = vld [vmem:[%s19507_s18 + $0x2c0] sm:$0xff]  ;;  %v438_v35 = vld [vmem:[%s19507_s18 + $0x2c8] sm:$0xff]  ;;  %v16508_v37 = vcombine.low %v429_v25, %v433_v26 }
  0xc2   : > { %v441_v34 = vld [vmem:[%s19507_s18 + $0x2e0] sm:$0xff]  ;;  %v442_v36 = vld [vmem:[%s19507_s18 + $0x2e8] sm:$0xff]  ;;  %v16510_v38 = vcombine.low %v430_v27, %v434_v28 }
  0xc3   : > { %v16517_v39 = vcombine.high %v437_v33, %v441_v34  ;;  %v16519_v40 = vcombine.high %v438_v35, %v442_v36  ;;  %v445_v41 = vld [vmem:[%s19507_s18 + $0x300] sm:$0xff]  ;;  %v446_v43 = vld [vmem:[%s19507_s18 + $0x308] sm:$0xff]  ;;  %v16516_v46 = vcombine.low %v437_v33, %v441_v34  ;;  %v16518_v47 = vcombine.low %v438_v35, %v442_v36 }
  0xc4   : > { %9750 = vmatpush1.bf16.msra.mxu0 %v16468_v57  ;;  %10242 = vmatpush1.bf16.msra.mxu1 %v16470_v58  ;;  %v449_v42 = vld [vmem:[%s19507_s18 + $0x320] sm:$0xff]  ;;  %v450_v44 = vld [vmem:[%s19507_s18 + $0x328] sm:$0xff]  ;;  %v19631_v33 = vcombine.high %v19581_v10, %v19581_v10 }
  0xc5   : > { %9751 = vmatprep.subr.bf16.mxu0 %v16477_v59  ;;  %10243 = vmatprep.subr.bf16.mxu1 %v16479_v61  ;;  %v16525_v48 = vcombine.high %v445_v41, %v449_v42  ;;  %v16527_v49 = vcombine.high %v446_v43, %v450_v44  ;;  %v453_v50 = vld [vmem:[%s19507_s18 + $0x340] sm:$0xff]  ;;  %v454_v52 = vld [vmem:[%s19507_s18 + $0x348] sm:$0xff]  ;;  %v16524_v55 = vcombine.low %v445_v41, %v449_v42 }
  0xc6   : > { %v457_v51 = vld [vmem:[%s19507_s18 + $0x360] sm:$0xff]  ;;  %v458_v53 = vld [vmem:[%s19507_s18 + $0x368] sm:$0xff]  ;;  %v16526_v56 = vcombine.low %v446_v43, %v450_v44 }
  0xc7   : > { %v16533_v57 = vcombine.high %v453_v50, %v457_v51  ;;  %v16535_v58 = vcombine.high %v454_v52, %v458_v53  ;;  %v461_v59 = vld [vmem:[%s19507_s18 + $0x380] sm:$0xff]  ;;  %v462_v62 = vld [vmem:[%s19507_s18 + $0x388] sm:$0xff]  ;;  %v16532_v1 = vcombine.low %v453_v50, %v457_v51  ;;  %v16534_v2 = vcombine.low %v454_v52, %v458_v53 }
  0xc8   : > { %9752 = vmatpush1.bf16.msra.mxu0 %v16476_v3  ;;  %10244 = vmatpush1.bf16.msra.mxu1 %v16478_v5  ;;  %v465_v61 = vld [vmem:[%s19507_s18 + $0x3a0] sm:$0xff]  ;;  %v466_v63 = vld [vmem:[%s19507_s18 + $0x3a8] sm:$0xff] }
  0xc9   : > { %9753 = vmatprep.subr.bf16.mxu0 %v16485_v6  ;;  %10245 = vmatprep.subr.bf16.mxu1 %v16487_v7  ;;  %v16541_v3 = vcombine.high %v461_v59, %v465_v61  ;;  %v16543_v4 = vcombine.high %v462_v62, %v466_v63  ;;  %v469_v5 = vld [vmem:[%s19507_s18 + $0x3c0] sm:$0xff]  ;;  %v470_v7 = vld [vmem:[%s19507_s18 + $0x3c8] sm:$0xff]  ;;  %v16540_v9 = vcombine.low %v461_v59, %v465_v61 }
  0xca   : > { %v473_v6 = vld [vmem:[%s19507_s18 + $0x3e0] sm:$0xff]  ;;  %v474_v8 = vld [vmem:[%s19507_s18 + $0x3e8] sm:$0xff]  ;;  %v16542_v11 = vcombine.low %v462_v62, %v466_v63 }
  0xcb   : > { %v16549_v12 = vcombine.high %v469_v5, %v473_v6  ;;  %v482_v17 = vld [vmem:[%s19507_s18 + $0x428] sm:$0xff]  ;;  %v16548_v18 = vcombine.low %v469_v5, %v473_v6  ;;  %v16550_v19 = vcombine.low %v470_v7, %v474_v8 }
  0xcc   : > { %9754 = vmatpush1.bf16.msra.mxu0 %v16484_v13  ;;  %10246 = vmatpush1.bf16.msra.mxu1 %v16486_v14  ;;  %v16551_v13 = vcombine.high %v470_v7, %v474_v8  ;;  %v477_v14 = vld [vmem:[%s19507_s18 + $0x400] sm:$0xff]  ;;  %v486_v25 = vld [vmem:[%s19507_s18 + $0x448] sm:$0xff] }
  0xcd   : > { %9755 = vmatprep.subr.bf16.mxu0 %v16493_v15  ;;  %10247 = vmatprep.subr.bf16.mxu1 %v16495_v16  ;;  %v481_v15 = vld [vmem:[%s19507_s18 + $0x420] sm:$0xff]  ;;  %v478_v16 = vld [vmem:[%s19507_s18 + $0x408] sm:$0xff] }
  0xce   : > { %v16557_v20 = vcombine.high %v477_v14, %v481_v15  ;;  %v490_v26 = vld [vmem:[%s19507_s18 + $0x468] sm:$0xff]  ;;  %v16556_v27 = vcombine.low %v477_v14, %v481_v15  ;;  %v16558_v28 = vcombine.low %v478_v16, %v482_v17 }
  0xcf   : > { %v498_v34 = vld [vmem:[%s19507_s18 + $0x4a8] sm:$0xff]  ;;  %v16566_v36 = vcombine.low %v486_v25, %v490_v26 }
  0xd0   : > { %9756 = vmatpush1.bf16.msra.mxu0 %v16492_v21  ;;  %10248 = vmatpush1.bf16.msra.mxu1 %v16494_v22  ;;  %v16559_v21 = vcombine.high %v478_v16, %v482_v17  ;;  %v485_v22 = vld [vmem:[%s19507_s18 + $0x440] sm:$0xff]  ;;  %v502_v41 = vld [vmem:[%s19507_s18 + $0x4c8] sm:$0xff] }
  0xd1   : > { %9757 = vmatprep.subr.bf16.mxu0 %v16501_v23  ;;  %10249 = vmatprep.subr.bf16.mxu1 %v16503_v24  ;;  %v489_v23 = vld [vmem:[%s19507_s18 + $0x460] sm:$0xff]  ;;  %v19623_v24 = vrot.slane %v19572_v0, %v19559_v54  ;;  %v494_v0 = vld [vmem:[%s19507_s18 + $0x488] sm:$0xff] }
  0xd2   : > { %v16564_v35 = vcombine.low %v485_v22, %v489_v23  ;;  %v506_v42 = vld [vmem:[%s19507_s18 + $0x4e8] sm:$0xff]  ;;  %v16574_v44 = vcombine.low %v494_v0, %v498_v34 }
  0xd3   : > { %v510_v50 = vld [vmem:[%s19507_s18 + $0x508] sm:$0xff]  ;;  %v16582_v53 = vcombine.low %v502_v41, %v506_v42 }
  0xd4   : > { %9758 = vmatpush1.bf16.msra.mxu0 %v16500_v29  ;;  %10250 = vmatpush1.bf16.msra.mxu1 %v16502_v30  ;;  %v16565_v29 = vcombine.high %v485_v22, %v489_v23  ;;  %v16567_v30 = vcombine.high %v486_v25, %v490_v26  ;;  %v514_v51 = vld [vmem:[%s19507_s18 + $0x528] sm:$0xff] }
  0xd5   : > { %9759 = vmatprep.subr.bf16.mxu0 %v16509_v31  ;;  %10251 = vmatprep.subr.bf16.mxu1 %v16511_v32  ;;  %v493_v31 = vld [vmem:[%s19507_s18 + $0x480] sm:$0xff]  ;;  %v518_v59 = vld [vmem:[%s19507_s18 + $0x548] sm:$0xff]  ;;  %v16590_v63 = vcombine.low %v510_v50, %v514_v51 }
  0xd6   : > { %v497_v32 = vld [vmem:[%s19507_s18 + $0x4a0] sm:$0xff]  ;;  %v522_v61 = vld [vmem:[%s19507_s18 + $0x568] sm:$0xff] }
  0xd7   : > { %v16572_v43 = vcombine.low %v493_v31, %v497_v32  ;;  %v526_v5 = vld [vmem:[%s19507_s18 + $0x588] sm:$0xff]  ;;  %v16598_v8 = vcombine.low %v518_v59, %v522_v61 }
  0xd8   : > { %9760 = vmatpush1.bf16.msra.mxu0 %v16508_v37  ;;  %10252 = vmatpush1.bf16.msra.mxu1 %v16510_v38  ;;  %v16573_v37 = vcombine.high %v493_v31, %v497_v32  ;;  %v16575_v38 = vcombine.high %v494_v0, %v498_v34  ;;  %v530_v6 = vld [vmem:[%s19507_s18 + $0x5a8] sm:$0xff] }
  0xd9   : > { %9761 = vmatprep.subr.bf16.mxu0 %v16517_v39  ;;  %10253 = vmatprep.subr.bf16.mxu1 %v16519_v40  ;;  %v501_v39 = vld [vmem:[%s19507_s18 + $0x4c0] sm:$0xff]  ;;  %v534_v14 = vld [vmem:[%s19507_s18 + $0x5c8] sm:$0xff]  ;;  %v16606_v17 = vcombine.low %v526_v5, %v530_v6 }
  0xda   : > { %v505_v40 = vld [vmem:[%s19507_s18 + $0x4e0] sm:$0xff]  ;;  %v538_v15 = vld [vmem:[%s19507_s18 + $0x5e8] sm:$0xff] }
  0xdb   : > { %v16580_v52 = vcombine.low %v501_v39, %v505_v40  ;;  %v542_v22 = vld [vmem:[%s19507_s18 + $0x608] sm:$0xff]  ;;  %v16614_v26 = vcombine.low %v534_v14, %v538_v15 }
  0xdc   : > { %9762 = vmatpush1.bf16.msra.mxu0 %v16516_v46  ;;  %10254 = vmatpush1.bf16.msra.mxu1 %v16518_v47  ;;  %v16581_v46 = vcombine.high %v501_v39, %v505_v40  ;;  %v16583_v47 = vcombine.high %v502_v41, %v506_v42  ;;  %v546_v23 = vld [vmem:[%s19507_s18 + $0x628] sm:$0xff] }
  0xdd   : > { %9763 = vmatprep.subr.bf16.mxu0 %v16525_v48  ;;  %10255 = vmatprep.subr.bf16.mxu1 %v16527_v49  ;;  %v509_v48 = vld [vmem:[%s19507_s18 + $0x500] sm:$0xff]  ;;  %v550_v31 = vld [vmem:[%s19507_s18 + $0x648] sm:$0xff]  ;;  %v16622_v34 = vcombine.low %v542_v22, %v546_v23 }
  0xde   : > { %v513_v49 = vld [vmem:[%s19507_s18 + $0x520] sm:$0xff]  ;;  %v554_v32 = vld [vmem:[%s19507_s18 + $0x668] sm:$0xff] }
  0xdf   : > { %v16588_v62 = vcombine.low %v509_v48, %v513_v49  ;;  %v558_v39 = vld [vmem:[%s19507_s18 + $0x688] sm:$0xff]  ;;  %v16630_v42 = vcombine.low %v550_v31, %v554_v32 }
  0xe0   : > { %9764 = vmatpush1.bf16.msra.mxu0 %v16524_v55  ;;  %10256 = vmatpush1.bf16.msra.mxu1 %v16526_v56  ;;  %v16589_v55 = vcombine.high %v509_v48, %v513_v49  ;;  %v16591_v56 = vcombine.high %v510_v50, %v514_v51  ;;  %v562_v40 = vld [vmem:[%s19507_s18 + $0x6a8] sm:$0xff] }
  0xe1   : > { %9765 = vmatprep.subr.bf16.mxu0 %v16533_v57  ;;  %10257 = vmatprep.subr.bf16.mxu1 %v16535_v58  ;;  %v517_v57 = vld [vmem:[%s19507_s18 + $0x540] sm:$0xff]  ;;  %v566_v48 = vld [vmem:[%s19507_s18 + $0x6c8] sm:$0xff]  ;;  %v16638_v51 = vcombine.low %v558_v39, %v562_v40 }
  0xe2   : > { %v521_v58 = vld [vmem:[%s19507_s18 + $0x560] sm:$0xff]  ;;  %v570_v49 = vld [vmem:[%s19507_s18 + $0x6e8] sm:$0xff] }
  0xe3   : > { %v16596_v7 = vcombine.low %v517_v57, %v521_v58 }
  0xe4   : > { %9766 = vmatpush1.bf16.msra.mxu0 %v16532_v1  ;;  %10258 = vmatpush1.bf16.msra.mxu1 %v16534_v2  ;;  %v16597_v1 = vcombine.high %v517_v57, %v521_v58  ;;  %v16599_v2 = vcombine.high %v518_v59, %v522_v61  ;;  %v574_v57 = vld [vmem:[%s19507_s18 + $0x708] sm:$0xff]  ;;  %v16646_v61 = vcombine.low %v566_v48, %v570_v49 }
  0xe5   : > { %9767 = vmatprep.subr.bf16.mxu0 %v16541_v3  ;;  %10259 = vmatprep.subr.bf16.mxu1 %v16543_v4  ;;  %v525_v3 = vld [vmem:[%s19507_s18 + $0x580] sm:$0xff]  ;;  %v578_v58 = vld [vmem:[%s19507_s18 + $0x728] sm:$0xff] }
  0xe6   : > { %v529_v4 = vld [vmem:[%s19507_s18 + $0x5a0] sm:$0xff] }
  0xe7   : > { %v16604_v16 = vcombine.low %v525_v3, %v529_v4 }
  0xe8   : > { %9768 = vmatpush1.bf16.msra.mxu0 %v16540_v9  ;;  %10260 = vmatpush1.bf16.msra.mxu1 %v16542_v11  ;;  %v16605_v9 = vcombine.high %v525_v3, %v529_v4  ;;  %v16607_v11 = vcombine.high %v526_v5, %v530_v6  ;;  %v582_v3 = vld [vmem:[%s19507_s18 + $0x748] sm:$0xff]  ;;  %v16654_v6 = vcombine.low %v574_v57, %v578_v58 }
  0xe9   : > { %9769 = vmatprep.subr.bf16.mxu0 %v16549_v12  ;;  %10261 = vmatprep.subr.bf16.mxu1 %v16551_v13  ;;  %v533_v12 = vld [vmem:[%s19507_s18 + $0x5c0] sm:$0xff]  ;;  %v586_v4 = vld [vmem:[%s19507_s18 + $0x768] sm:$0xff] }
  0xea   : > { %v537_v13 = vld [vmem:[%s19507_s18 + $0x5e0] sm:$0xff] }
  0xeb   : > { %v16612_v25 = vcombine.low %v533_v12, %v537_v13 }
  0xec   : > { %9770 = vmatpush1.bf16.msra.mxu0 %v16548_v18  ;;  %10262 = vmatpush1.bf16.msra.mxu1 %v16550_v19  ;;  %v16613_v18 = vcombine.high %v533_v12, %v537_v13  ;;  %v16615_v19 = vcombine.high %v534_v14, %v538_v15  ;;  %v590_v12 = vld [vmem:[%s19507_s18 + $0x788] sm:$0xff]  ;;  %v16662_v15 = vcombine.low %v582_v3, %v586_v4 }
  0xed   : > { %9780 = vmatprep.subr.bf16.mxu0 %v16557_v20  ;;  %10272 = vmatprep.subr.bf16.mxu1 %v16559_v21  ;;  %v541_v20 = vld [vmem:[%s19507_s18 + $0x600] sm:$0xff]  ;;  %v594_v13 = vld [vmem:[%s19507_s18 + $0x7a8] sm:$0xff] }
  0xee   : > { %v545_v21 = vld [vmem:[%s19507_s18 + $0x620] sm:$0xff] }
  0xef   : > { %9772 = vmatmul.mubr.bf16.vlgmr.msra.gmra.mrb[0].mxu0 %v19623_v24  ;;  %10264 = vmatmul.mubr.bf16.vlgmr.msra.gmra.mrb[0].mxu1 %v19623_v24  ;;  %v16620_v0 = vcombine.low %v541_v20, %v545_v21 }
  0xf0   : > { %9781 = vmatpush1.bf16.msra.mxu0 %v16556_v27  ;;  %10273 = vmatpush1.bf16.msra.mxu1 %v16558_v28  ;;  %v16621_v27 = vcombine.high %v541_v20, %v545_v21  ;;  %v16623_v28 = vcombine.high %v542_v22, %v546_v23  ;;  %v1888_v20 = vcombine.high %v19566_v60, %v19566_v60  ;;  %v598_v21 = vld [vmem:[%s19507_s18 + $0x7c8] sm:$0xff] }
  0xf1   : > { %9782 = vmatprep.subr.bf16.mxu0 %v16565_v29  ;;  %10274 = vmatprep.subr.bf16.mxu1 %v16567_v30  ;;  %v549_v29 = vld [vmem:[%s19507_s18 + $0x640] sm:$0xff]  ;;  %v602_v22 = vld [vmem:[%s19507_s18 + $0x7e8] sm:$0xff] }
  0xf2   : > { %9812 = vmatprep.mubr.bf16.mxu0 %v19631_v33  ;;  %10304 = vmatprep.mubr.bf16.mxu1 %v19631_v33  ;;  %v553_v30 = vld [vmem:[%s19507_s18 + $0x660] sm:$0xff]  ;;  %v606_v60 = vld [vmem:[%s19507_s18 + $0x808] sm:$0xff] }
  0xf3   : > { %v16628_v41 = vcombine.low %v549_v29, %v553_v30 }
  0xf4   : > { %9783 = vmatpush1.bf16.msra.mxu0 %v16564_v35  ;;  %10275 = vmatpush1.bf16.msra.mxu1 %v16566_v36  ;;  %v16629_v35 = vcombine.high %v549_v29, %v553_v30  ;;  %v16631_v36 = vcombine.high %v550_v31, %v554_v32  ;;  %v609_v29 = vld [vmem:[%s19507_s18 + $0x820] sm:$0xff]  ;;  %v19696_v30 = vrot.slane %v1888_v20, %v19559_v54  ;;  %v610_v31 = vld [vmem:[%s19507_s18 + $0x828] sm:$0xff] }
  0xf5   : > { %9784 = vmatprep.subr.bf16.mxu0 %v16573_v37  ;;  %10276 = vmatprep.subr.bf16.mxu1 %v16575_v38  ;;  %v557_v37 = vld [vmem:[%s19507_s18 + $0x680] sm:$0xff] }
  0xf6   : > { %v561_v38 = vld [vmem:[%s19507_s18 + $0x6a0] sm:$0xff] }
  0xf7   : > { %v16636_v50 = vcombine.low %v557_v37, %v561_v38  ;;  %v653_v20 = vld [vmem:[%s19507_s18 + $0x980] sm:$0xff] }
  0xf8   : > { %9785 = vmatpush1.bf16.msra.mxu0 %v16572_v43  ;;  %10277 = vmatpush1.bf16.msra.mxu1 %v16574_v44  ;;  %v16637_v43 = vcombine.high %v557_v37, %v561_v38  ;;  %v16639_v44 = vcombine.high %v558_v39, %v562_v40  ;;  %v617_v37 = vld [vmem:[%s19507_s18 + $0x860] sm:$0xff]  ;;  %v1904_v38 = vcombine.high %v19696_v30, %v19696_v30  ;;  %v614_v40 = vld [vmem:[%s19507_s18 + $0x848] sm:$0xff] }
  0xf9   : > { %9786 = vmatprep.subr.bf16.mxu0 %v16581_v46  ;;  %10278 = vmatprep.subr.bf16.mxu1 %v16583_v47  ;;  %v565_v46 = vld [vmem:[%s19507_s18 + $0x6c0] sm:$0xff]  ;;  %v19706_v39 = vcombine.high %v19623_v24, %v19623_v24 }
  0xfa   : > { %v569_v47 = vld [vmem:[%s19507_s18 + $0x6e0] sm:$0xff] }
  0xfb   : > { %v16644_v59 = vcombine.low %v565_v46, %v569_v47 }
  0xfc   : > { %9787 = vmatpush1.bf16.msra.mxu0 %v16580_v52  ;;  %10279 = vmatpush1.bf16.msra.mxu1 %v16582_v53  ;;  %v16645_v52 = vcombine.high %v565_v46, %v569_v47  ;;  %v16647_v53 = vcombine.high %v566_v48, %v570_v49  ;;  %v621_v47 = vld [vmem:[%s19507_s18 + $0x880] sm:$0xff]  ;;  %v19713_v49 = vrot.slane %v1904_v38, %v19559_v54 }
  0xfd   : > { %9788 = vmatprep.subr.bf16.mxu0 %v16589_v55  ;;  %10280 = vmatprep.subr.bf16.mxu1 %v16591_v56  ;;  %v573_v55 = vld [vmem:[%s19507_s18 + $0x700] sm:$0xff] }
  0xfe   : > { %v577_v56 = vld [vmem:[%s19507_s18 + $0x720] sm:$0xff] }
  0xff   : > { %v16652_v5 = vcombine.low %v573_v55, %v577_v56  ;;  %v625_v48 = vld [vmem:[%s19507_s18 + $0x8a0] sm:$0xff] }
 0x100   : > { %9789 = vmatpush1.bf16.msra.mxu0 %v16588_v62  ;;  %10281 = vmatpush1.bf16.msra.mxu1 %v16590_v63  ;;  %v16653_v62 = vcombine.high %v573_v55, %v577_v56  ;;  %v16655_v63 = vcombine.high %v574_v57, %v578_v58  ;;  %v16701_v55 = vcombine.high %v621_v47, %v625_v48  ;;  %v629_v57 = vld [vmem:[%s19507_s18 + $0x8c0] sm:$0xff] }
 0x101   : > { %9790 = vmatprep.subr.bf16.mxu0 %v16597_v1  ;;  %10282 = vmatprep.subr.bf16.mxu1 %v16599_v2  ;;  %v581_v1 = vld [vmem:[%s19507_s18 + $0x740] sm:$0xff] }
 0x102   : > { %v585_v2 = vld [vmem:[%s19507_s18 + $0x760] sm:$0xff] }
 0x103   : > { %v16660_v14 = vcombine.low %v581_v1, %v585_v2  ;;  %v633_v58 = vld [vmem:[%s19507_s18 + $0x8e0] sm:$0xff] }
 0x104   : > { %9791 = vmatpush1.bf16.msra.mxu0 %v16596_v7  ;;  %10283 = vmatpush1.bf16.msra.mxu1 %v16598_v8  ;;  %v16661_v7 = vcombine.high %v581_v1, %v585_v2  ;;  %v16663_v8 = vcombine.high %v582_v3, %v586_v4  ;;  %v16709_v1 = vcombine.high %v629_v57, %v633_v58  ;;  %v637_v3 = vld [vmem:[%s19507_s18 + $0x900] sm:$0xff] }
 0x105   : > { %9792 = vmatprep.subr.bf16.mxu0 %v16605_v9  ;;  %10284 = vmatprep.subr.bf16.mxu1 %v16607_v11  ;;  %v589_v9 = vld [vmem:[%s19507_s18 + $0x780] sm:$0xff] }
 0x106   : > { %v593_v11 = vld [vmem:[%s19507_s18 + $0x7a0] sm:$0xff] }
 0x107   : > { %v16668_v23 = vcombine.low %v589_v9, %v593_v11  ;;  %v641_v4 = vld [vmem:[%s19507_s18 + $0x920] sm:$0xff] }
 0x108   : > { %9793 = vmatpush1.bf16.msra.mxu0 %v16604_v16  ;;  %10285 = vmatpush1.bf16.msra.mxu1 %v16606_v17  ;;  %v16669_v16 = vcombine.high %v589_v9, %v593_v11  ;;  %v16671_v17 = vcombine.high %v590_v12, %v594_v13  ;;  %v16717_v9 = vcombine.high %v637_v3, %v641_v4  ;;  %v673_v38 = vld [vmem:[%s19507_s18 + $0xa20] sm:$0xff] }
 0x109   : > { %9794 = vmatprep.subr.bf16.mxu0 %v16613_v18  ;;  %10286 = vmatprep.subr.bf16.mxu1 %v16615_v19  ;;  %v597_v18 = vld [vmem:[%s19507_s18 + $0x7c0] sm:$0xff] }
 0x10a   : > { %v601_v19 = vld [vmem:[%s19507_s18 + $0x7e0] sm:$0xff] }
 0x10b   : > { %v16676_v32 = vcombine.low %v597_v18, %v601_v19 }
 0x10c   : > { %9795 = vmatpush1.bf16.msra.mxu0 %v16612_v25  ;;  %10287 = vmatpush1.bf16.msra.mxu1 %v16614_v26  ;;  %v16670_v25 = vcombine.low %v590_v12, %v594_v13  ;;  %v16677_v26 = vcombine.high %v597_v18, %v601_v19  ;;  %v645_v12 = vld [vmem:[%s19507_s18 + $0x940] sm:$0xff] }
 0x10d   : > { %9796 = vmatprep.subr.bf16.mxu0 %v16621_v27  ;;  %10288 = vmatprep.subr.bf16.mxu1 %v16623_v28  ;;  %v16679_v27 = vcombine.high %v598_v21, %v602_v22  ;;  %v605_v28 = vld [vmem:[%s19507_s18 + $0x800] sm:$0xff] }
 0x10e   : > { %v649_v13 = vld [vmem:[%s19507_s18 + $0x960] sm:$0xff] }
 0x10f   : > { %v16725_v18 = vcombine.high %v645_v12, %v649_v13 }
 0x110   : > { %9797 = vmatpush1.bf16.msra.mxu0 %v16620_v0  ;;  %10289 = vmatpush1.bf16.msra.mxu1 %v16622_v34  ;;  %v16678_v0 = vcombine.low %v598_v21, %v602_v22  ;;  %v16685_v34 = vcombine.high %v605_v28, %v609_v29  ;;  %v657_v21 = vld [vmem:[%s19507_s18 + $0x9a0] sm:$0xff]  ;;  %v654_v22 = vld [vmem:[%s19507_s18 + $0x988] sm:$0xff] }
 0x111   : > { %9798 = vmatprep.subr.bf16.mxu0 %v16629_v35  ;;  %10290 = vmatprep.subr.bf16.mxu1 %v16631_v36  ;;  %v16687_v35 = vcombine.high %v606_v60, %v610_v31  ;;  %v613_v36 = vld [vmem:[%s19507_s18 + $0x840] sm:$0xff] }
 0x114   : > { %9799 = vmatpush1.bf16.msra.mxu0 %v16628_v41  ;;  %10291 = vmatpush1.bf16.msra.mxu1 %v16630_v42  ;;  %v618_v41 = vld [vmem:[%s19507_s18 + $0x868] sm:$0xff]  ;;  %v16684_v42 = vcombine.low %v605_v28, %v609_v29  ;;  %v661_v29 = vld [vmem:[%s19507_s18 + $0x9c0] sm:$0xff] }
 0x115   : > { %9800 = vmatprep.subr.bf16.mxu0 %v16637_v43  ;;  %10292 = vmatprep.subr.bf16.mxu1 %v16639_v44  ;;  %v16686_v43 = vcombine.low %v606_v60, %v610_v31  ;;  %v16693_v44 = vcombine.high %v613_v36, %v617_v37  ;;  %v16695_v46 = vcombine.high %v614_v40, %v618_v41  ;;  %v665_v60 = vld [vmem:[%s19507_s18 + $0x9e0] sm:$0xff]  ;;  %v662_v31 = vld [vmem:[%s19507_s18 + $0x9c8] sm:$0xff] }
 0x118   : > { %9801 = vmatpush1.bf16.msra.mxu0 %v16636_v50  ;;  %10293 = vmatpush1.bf16.msra.mxu1 %v16638_v51  ;;  %v622_v50 = vld [vmem:[%s19507_s18 + $0x888] sm:$0xff] }
 0x119   : > { %9802 = vmatprep.subr.bf16.mxu0 %v16645_v52  ;;  %10294 = vmatprep.subr.bf16.mxu1 %v16647_v53  ;;  %v626_v51 = vld [vmem:[%s19507_s18 + $0x8a8] sm:$0xff]  ;;  %v16692_v52 = vcombine.low %v613_v36, %v617_v37  ;;  %v16694_v53 = vcombine.low %v614_v40, %v618_v41  ;;  %v669_v37 = vld [vmem:[%s19507_s18 + $0xa00] sm:$0xff] }
 0x11a   : > { %v16703_v56 = vcombine.high %v622_v50, %v626_v51  ;;  %v670_v40 = vld [vmem:[%s19507_s18 + $0xa08] sm:$0xff] }
 0x11b   : > { %v674_v41 = vld [vmem:[%s19507_s18 + $0xa28] sm:$0xff] }
 0x11c   : > { %9803 = vmatpush1.bf16.msra.mxu0 %v16644_v59  ;;  %10295 = vmatpush1.bf16.msra.mxu1 %v16646_v61  ;;  %v630_v59 = vld [vmem:[%s19507_s18 + $0x8c8] sm:$0xff] }
 0x11d   : > { %9804 = vmatprep.subr.bf16.mxu0 %v16653_v62  ;;  %10296 = vmatprep.subr.bf16.mxu1 %v16655_v63  ;;  %v634_v61 = vld [vmem:[%s19507_s18 + $0x8e8] sm:$0xff]  ;;  %v16700_v62 = vcombine.low %v621_v47, %v625_v48  ;;  %v16702_v63 = vcombine.low %v622_v50, %v626_v51  ;;  %v677_v47 = vld [vmem:[%s19507_s18 + $0xa40] sm:$0xff] }
 0x11e   : > { %v16711_v2 = vcombine.high %v630_v59, %v634_v61  ;;  %v681_v48 = vld [vmem:[%s19507_s18 + $0xa60] sm:$0xff]  ;;  %v678_v50 = vld [vmem:[%s19507_s18 + $0xa48] sm:$0xff] }
 0x11f   : > { %v682_v51 = vld [vmem:[%s19507_s18 + $0xa68] sm:$0xff] }
 0x120   : > { %9805 = vmatpush1.bf16.msra.mxu0 %v16652_v5  ;;  %10297 = vmatpush1.bf16.msra.mxu1 %v16654_v6  ;;  %v638_v5 = vld [vmem:[%s19507_s18 + $0x908] sm:$0xff] }
 0x121   : > { %9806 = vmatprep.subr.bf16.mxu0 %v16661_v7  ;;  %10298 = vmatprep.subr.bf16.mxu1 %v16663_v8  ;;  %v642_v6 = vld [vmem:[%s19507_s18 + $0x928] sm:$0xff]  ;;  %v16708_v7 = vcombine.low %v629_v57, %v633_v58  ;;  %v16710_v8 = vcombine.low %v630_v59, %v634_v61  ;;  %v685_v57 = vld [vmem:[%s19507_s18 + $0xa80] sm:$0xff] }
 0x122   : > { %v16719_v11 = vcombine.high %v638_v5, %v642_v6  ;;  %v689_v58 = vld [vmem:[%s19507_s18 + $0xaa0] sm:$0xff]  ;;  %v686_v59 = vld [vmem:[%s19507_s18 + $0xa88] sm:$0xff] }
 0x123   : > { %v690_v61 = vld [vmem:[%s19507_s18 + $0xaa8] sm:$0xff] }
 0x124   : > { %9807 = vmatpush1.bf16.msra.mxu0 %v16660_v14  ;;  %10299 = vmatpush1.bf16.msra.mxu1 %v16662_v15  ;;  %v646_v14 = vld [vmem:[%s19507_s18 + $0x948] sm:$0xff] }
 0x125   : > { %9808 = vmatprep.subr.bf16.mxu0 %v16669_v16  ;;  %10300 = vmatprep.subr.bf16.mxu1 %v16671_v17  ;;  %v650_v15 = vld [vmem:[%s19507_s18 + $0x968] sm:$0xff]  ;;  %v16716_v16 = vcombine.low %v637_v3, %v641_v4  ;;  %v16718_v17 = vcombine.low %v638_v5, %v642_v6  ;;  %v693_v3 = vld [vmem:[%s19507_s18 + $0xac0] sm:$0xff] }
 0x126   : > { %v16727_v19 = vcombine.high %v646_v14, %v650_v15  ;;  %v697_v4 = vld [vmem:[%s19507_s18 + $0xae0] sm:$0xff]  ;;  %v694_v5 = vld [vmem:[%s19507_s18 + $0xac8] sm:$0xff] }
 0x127   : > { %v698_v6 = vld [vmem:[%s19507_s18 + $0xae8] sm:$0xff] }
 0x128   : > { %9809 = vmatpush1.bf16.msra.mxu0 %v16668_v23  ;;  %10301 = vmatpush1.bf16.msra.mxu1 %v16670_v25  ;;  %v658_v23 = vld [vmem:[%s19507_s18 + $0x9a8] sm:$0xff]  ;;  %v16724_v25 = vcombine.low %v645_v12, %v649_v13  ;;  %v701_v12 = vld [vmem:[%s19507_s18 + $0xb00] sm:$0xff] }
 0x129   : > { %9810 = vmatprep.subr.bf16.mxu0 %v16677_v26  ;;  %10302 = vmatprep.subr.bf16.mxu1 %v16679_v27  ;;  %v16726_v26 = vcombine.low %v646_v14, %v650_v15  ;;  %v16733_v27 = vcombine.high %v653_v20, %v657_v21  ;;  %v16735_v28 = vcombine.high %v654_v22, %v658_v23  ;;  %v705_v13 = vld [vmem:[%s19507_s18 + $0xb20] sm:$0xff]  ;;  %v702_v14 = vld [vmem:[%s19507_s18 + $0xb08] sm:$0xff] }
 0x12a   : > { %v706_v15 = vld [vmem:[%s19507_s18 + $0xb28] sm:$0xff] }
 0x12c   : > { %9811 = vmatpush1.bf16.msra.mxu0 %v16676_v32  ;;  %10303 = vmatpush1.bf16.msra.mxu1 %v16678_v0  ;;  %v666_v32 = vld [vmem:[%s19507_s18 + $0x9e8] sm:$0xff]  ;;  %v16732_v0 = vcombine.low %v653_v20, %v657_v21  ;;  %v709_v20 = vld [vmem:[%s19507_s18 + $0xb40] sm:$0xff] }
 0x12d   : > { %9821 = vmatprep.subr.bf16.mxu0 %v16685_v34  ;;  %10313 = vmatprep.subr.bf16.mxu1 %v16687_v35  ;;  %v16734_v34 = vcombine.low %v654_v22, %v658_v23  ;;  %v16741_v35 = vcombine.high %v661_v29, %v665_v60  ;;  %v16743_v36 = vcombine.high %v662_v31, %v666_v32  ;;  %v713_v21 = vld [vmem:[%s19507_s18 + $0xb60] sm:$0xff]  ;;  %v710_v22 = vld [vmem:[%s19507_s18 + $0xb48] sm:$0xff] }
 0x12e   : > { %v714_v23 = vld [vmem:[%s19507_s18 + $0xb68] sm:$0xff] }
 0x12f   : > { %9813 = vmatmul.mubr.bf16.vlgmr.msra.gmra.mrb[0].mxu0 %v19706_v39  ;;  %10305 = vmatmul.mubr.bf16.vlgmr.msra.gmra.mrb[0].mxu1 %v19706_v39 }
 0x130   : > { %9822 = vmatpush1.bf16.msra.mxu0 %v16684_v42  ;;  %10314 = vmatpush1.bf16.msra.mxu1 %v16686_v43  ;;  %v16740_v42 = vcombine.low %v661_v29, %v665_v60  ;;  %v16742_v43 = vcombine.low %v662_v31, %v666_v32  ;;  %v717_v29 = vld [vmem:[%s19507_s18 + $0xb80] sm:$0xff]  ;;  %v718_v31 = vld [vmem:[%s19507_s18 + $0xb88] sm:$0xff] }
 0x131   : > { %9823 = vmatprep.subr.bf16.mxu0 %v16693_v44  ;;  %10315 = vmatprep.subr.bf16.mxu1 %v16695_v46  ;;  %v16749_v44 = vcombine.high %v669_v37, %v673_v38  ;;  %v16751_v46 = vcombine.high %v670_v40, %v674_v41  ;;  %v721_v60 = vld [vmem:[%s19507_s18 + $0xba0] sm:$0xff]  ;;  %v722_v32 = vld [vmem:[%s19507_s18 + $0xba8] sm:$0xff] }
 0x132   : > { %9853 = vmatprep.mubr.bf16.mxu0 %v19713_v49  ;;  %10345 = vmatprep.mubr.bf16.mxu1 %v19713_v49 }
 0x134   : > { %9824 = vmatpush1.bf16.msra.mxu0 %v16692_v52  ;;  %10316 = vmatpush1.bf16.msra.mxu1 %v16694_v53  ;;  %v16748_v52 = vcombine.low %v669_v37, %v673_v38  ;;  %v16750_v53 = vcombine.low %v670_v40, %v674_v41  ;;  %v725_v37 = vld [vmem:[%s19507_s18 + $0xbc0] sm:$0xff]  ;;  %v726_v40 = vld [vmem:[%s19507_s18 + $0xbc8] sm:$0xff] }
 0x135   : > { %9825 = vmatprep.subr.bf16.mxu0 %v16701_v55  ;;  %10317 = vmatprep.subr.bf16.mxu1 %v16703_v56  ;;  %v16757_v55 = vcombine.high %v677_v47, %v681_v48  ;;  %v16759_v56 = vcombine.high %v678_v50, %v682_v51  ;;  %v729_v38 = vld [vmem:[%s19507_s18 + $0xbe0] sm:$0xff]  ;;  %v730_v41 = vld [vmem:[%s19507_s18 + $0xbe8] sm:$0xff] }
 0x138   : > { %9826 = vmatpush1.bf16.msra.mxu0 %v16700_v62  ;;  %10318 = vmatpush1.bf16.msra.mxu1 %v16702_v63  ;;  %v16756_v62 = vcombine.low %v677_v47, %v681_v48  ;;  %v16758_v63 = vcombine.low %v678_v50, %v682_v51  ;;  %v733_v47 = vld [vmem:[%s19507_s18 + $0xc00] sm:$0xff]  ;;  %v734_v50 = vld [vmem:[%s19507_s18 + $0xc08] sm:$0xff] }
 0x139   : > { %9827 = vmatprep.subr.bf16.mxu0 %v16709_v1  ;;  %10319 = vmatprep.subr.bf16.mxu1 %v16711_v2  ;;  %v16765_v1 = vcombine.high %v685_v57, %v689_v58  ;;  %v16767_v2 = vcombine.high %v686_v59, %v690_v61  ;;  %v737_v48 = vld [vmem:[%s19507_s18 + $0xc20] sm:$0xff]  ;;  %v738_v51 = vld [vmem:[%s19507_s18 + $0xc28] sm:$0xff] }
 0x13c   : > { %9828 = vmatpush1.bf16.msra.mxu0 %v16708_v7  ;;  %10320 = vmatpush1.bf16.msra.mxu1 %v16710_v8  ;;  %v16764_v7 = vcombine.low %v685_v57, %v689_v58  ;;  %v16766_v8 = vcombine.low %v686_v59, %v690_v61  ;;  %v741_v57 = vld [vmem:[%s19507_s18 + $0xc40] sm:$0xff]  ;;  %v19781_v59 = vrot.slane %v19696_v30, %v19559_v54  ;;  %v742_v61 = vld [vmem:[%s19507_s18 + $0xc48] sm:$0xff] }
 0x13d   : > { %9829 = vmatprep.subr.bf16.mxu0 %v16717_v9  ;;  %10321 = vmatprep.subr.bf16.mxu1 %v16719_v11  ;;  %v16773_v9 = vcombine.high %v693_v3, %v697_v4  ;;  %v16775_v11 = vcombine.high %v694_v5, %v698_v6  ;;  %v745_v58 = vld [vmem:[%s19507_s18 + $0xc60] sm:$0xff]  ;;  %v750_v30 = vld [vmem:[%s19507_s18 + $0xc88] sm:$0xff] }
 0x140   : > { %9830 = vmatpush1.bf16.msra.mxu0 %v16716_v16  ;;  %10322 = vmatpush1.bf16.msra.mxu1 %v16718_v17  ;;  %v16772_v16 = vcombine.low %v693_v3, %v697_v4  ;;  %v16774_v17 = vcombine.low %v694_v5, %v698_v6  ;;  %v749_v4 = vld [vmem:[%s19507_s18 + $0xc80] sm:$0xff]  ;;  %v19789_v6 = vcombine.high %v19713_v49, %v19713_v49 }
 0x141   : > { %9831 = vmatprep.subr.bf16.mxu0 %v16725_v18  ;;  %10323 = vmatprep.subr.bf16.mxu1 %v16727_v19  ;;  %v16781_v18 = vcombine.high %v701_v12, %v705_v13  ;;  %v16783_v19 = vcombine.high %v702_v14, %v706_v15  ;;  %v753_v5 = vld [vmem:[%s19507_s18 + $0xca0] sm:$0xff] }
 0x144   : > { %9832 = vmatpush1.bf16.msra.mxu0 %v16724_v25  ;;  %10324 = vmatpush1.bf16.msra.mxu1 %v16726_v26  ;;  %v16780_v25 = vcombine.low %v701_v12, %v705_v13  ;;  %v16782_v26 = vcombine.low %v702_v14, %v706_v15  ;;  %v757_v13 = vld [vmem:[%s19507_s18 + $0xcc0] sm:$0xff]  ;;  %v758_v15 = vld [vmem:[%s19507_s18 + $0xcc8] sm:$0xff] }
 0x145   : > { %9833 = vmatprep.subr.bf16.mxu0 %v16733_v27  ;;  %10325 = vmatprep.subr.bf16.mxu1 %v16735_v28  ;;  %v16789_v27 = vcombine.high %v709_v20, %v713_v21  ;;  %v16791_v28 = vcombine.high %v710_v22, %v714_v23  ;;  %v761_v14 = vld [vmem:[%s19507_s18 + $0xce0] sm:$0xff] }
 0x148   : > { %9834 = vmatpush1.bf16.msra.mxu0 %v16732_v0  ;;  %10326 = vmatpush1.bf16.msra.mxu1 %v16734_v34  ;;  %v16788_v0 = vcombine.low %v709_v20, %v713_v21  ;;  %v16790_v34 = vcombine.low %v710_v22, %v714_v23  ;;  %v765_v21 = vld [vmem:[%s19507_s18 + $0xd00] sm:$0xff]  ;;  %v766_v23 = vld [vmem:[%s19507_s18 + $0xd08] sm:$0xff] }
 0x149   : > { %9835 = vmatprep.subr.bf16.mxu0 %v16741_v35  ;;  %10327 = vmatprep.subr.bf16.mxu1 %v16743_v36  ;;  %v16797_v35 = vcombine.high %v717_v29, %v721_v60  ;;  %v16799_v36 = vcombine.high %v718_v31, %v722_v32  ;;  %v769_v22 = vld [vmem:[%s19507_s18 + $0xd20] sm:$0xff] }
 0x14c   : > { %9836 = vmatpush1.bf16.msra.mxu0 %v16740_v42  ;;  %10328 = vmatpush1.bf16.msra.mxu1 %v16742_v43  ;;  %v16796_v42 = vcombine.low %v717_v29, %v721_v60  ;;  %v16798_v43 = vcombine.low %v718_v31, %v722_v32  ;;  %v773_v60 = vld [vmem:[%s19507_s18 + $0xd40] sm:$0xff]  ;;  %v774_v32 = vld [vmem:[%s19507_s18 + $0xd48] sm:$0xff] }
 0x14d   : > { %9837 = vmatprep.subr.bf16.mxu0 %v16749_v44  ;;  %10329 = vmatprep.subr.bf16.mxu1 %v16751_v46  ;;  %v16805_v44 = vcombine.high %v725_v37, %v729_v38  ;;  %v16807_v46 = vcombine.high %v726_v40, %v730_v41  ;;  %v777_v31 = vld [vmem:[%s19507_s18 + $0xd60] sm:$0xff] }
 0x150   : > { %9838 = vmatpush1.bf16.msra.mxu0 %v16748_v52  ;;  %10330 = vmatpush1.bf16.msra.mxu1 %v16750_v53  ;;  %v16804_v52 = vcombine.low %v725_v37, %v729_v38  ;;  %v16806_v53 = vcombine.low %v726_v40, %v730_v41  ;;  %v781_v38 = vld [vmem:[%s19507_s18 + $0xd80] sm:$0xff]  ;;  %v782_v41 = vld [vmem:[%s19507_s18 + $0xd88] sm:$0xff] }
 0x151   : > { %9839 = vmatprep.subr.bf16.mxu0 %v16757_v55  ;;  %10331 = vmatprep.subr.bf16.mxu1 %v16759_v56  ;;  %v16813_v55 = vcombine.high %v733_v47, %v737_v48  ;;  %v16815_v56 = vcombine.high %v734_v50, %v738_v51  ;;  %v785_v40 = vld [vmem:[%s19507_s18 + $0xda0] sm:$0xff] }
 0x154   : > { %9840 = vmatpush1.bf16.msra.mxu0 %v16756_v62  ;;  %10332 = vmatpush1.bf16.msra.mxu1 %v16758_v63  ;;  %v746_v62 = vld [vmem:[%s19507_s18 + $0xc68] sm:$0xff]  ;;  %v16812_v63 = vcombine.low %v733_v47, %v737_v48  ;;  %v789_v48 = vld [vmem:[%s19507_s18 + $0xdc0] sm:$0xff] }
 0x155   : > { %9841 = vmatprep.subr.bf16.mxu0 %v16765_v1  ;;  %10333 = vmatprep.subr.bf16.mxu1 %v16767_v2  ;;  %v16814_v1 = vcombine.low %v734_v50, %v738_v51  ;;  %v16821_v2 = vcombine.high %v741_v57, %v745_v58  ;;  %v16823_v3 = vcombine.high %v742_v61, %v746_v62  ;;  %v793_v50 = vld [vmem:[%s19507_s18 + $0xde0] sm:$0xff]  ;;  %v790_v51 = vld [vmem:[%s19507_s18 + $0xdc8] sm:$0xff] }
 0x158   : > { %9842 = vmatpush1.bf16.msra.mxu0 %v16764_v7  ;;  %10334 = vmatpush1.bf16.msra.mxu1 %v16766_v8  ;;  %v754_v7 = vld [vmem:[%s19507_s18 + $0xca8] sm:$0xff]  ;;  %v16820_v8 = vcombine.low %v741_v57, %v745_v58  ;;  %v797_v58 = vld [vmem:[%s19507_s18 + $0xe00] sm:$0xff] }
 0x159   : > { %9843 = vmatprep.subr.bf16.mxu0 %v16773_v9  ;;  %10335 = vmatprep.subr.bf16.mxu1 %v16775_v11  ;;  %v16822_v9 = vcombine.low %v742_v61, %v746_v62  ;;  %v16829_v11 = vcombine.high %v749_v4, %v753_v5  ;;  %v16831_v12 = vcombine.high %v750_v30, %v754_v7  ;;  %v801_v61 = vld [vmem:[%s19507_s18 + $0xe20] sm:$0xff]  ;;  %v798_v62 = vld [vmem:[%s19507_s18 + $0xe08] sm:$0xff] }
 0x15c   : > { %9844 = vmatpush1.bf16.msra.mxu0 %v16772_v16  ;;  %10336 = vmatpush1.bf16.msra.mxu1 %v16774_v17  ;;  %v762_v16 = vld [vmem:[%s19507_s18 + $0xce8] sm:$0xff]  ;;  %v16828_v17 = vcombine.low %v749_v4, %v753_v5  ;;  %v805_v5 = vld [vmem:[%s19507_s18 + $0xe40] sm:$0xff] }
 0x15d   : > { %9845 = vmatprep.subr.bf16.mxu0 %v16781_v18  ;;  %10337 = vmatprep.subr.bf16.mxu1 %v16783_v19  ;;  %v16830_v18 = vcombine.low %v750_v30, %v754_v7  ;;  %v16837_v19 = vcombine.high %v757_v13, %v761_v14  ;;  %v16839_v20 = vcombine.high %v758_v15, %v762_v16  ;;  %v809_v30 = vld [vmem:[%s19507_s18 + $0xe60] sm:$0xff]  ;;  %v806_v7 = vld [vmem:[%s19507_s18 + $0xe48] sm:$0xff] }
 0x160   : > { %9846 = vmatpush1.bf16.msra.mxu0 %v16780_v25  ;;  %10338 = vmatpush1.bf16.msra.mxu1 %v16782_v26  ;;  %v770_v25 = vld [vmem:[%s19507_s18 + $0xd28] sm:$0xff]  ;;  %v16836_v26 = vcombine.low %v757_v13, %v761_v14  ;;  %v813_v14 = vld [vmem:[%s19507_s18 + $0xe80] sm:$0xff] }
 0x161   : > { %9847 = vmatprep.subr.bf16.mxu0 %v16789_v27  ;;  %10339 = vmatprep.subr.bf16.mxu1 %v16791_v28  ;;  %v16838_v27 = vcombine.low %v758_v15, %v762_v16  ;;  %v16845_v28 = vcombine.high %v765_v21, %v769_v22  ;;  %v16847_v29 = vcombine.high %v766_v23, %v770_v25  ;;  %v817_v15 = vld [vmem:[%s19507_s18 + $0xea0] sm:$0xff]  ;;  %v814_v16 = vld [vmem:[%s19507_s18 + $0xe88] sm:$0xff] }
 0x164   : > { %9848 = vmatpush1.bf16.msra.mxu0 %v16788_v0  ;;  %10340 = vmatpush1.bf16.msra.mxu1 %v16790_v34  ;;  %v778_v0 = vld [vmem:[%s19507_s18 + $0xd68] sm:$0xff]  ;;  %v16844_v34 = vcombine.low %v765_v21, %v769_v22  ;;  %v821_v22 = vld [vmem:[%s19507_s18 + $0xec0] sm:$0xff] }
 0x165   : > { %9849 = vmatprep.subr.bf16.mxu0 %v16797_v35  ;;  %10341 = vmatprep.subr.bf16.mxu1 %v16799_v36  ;;  %v16846_v35 = vcombine.low %v766_v23, %v770_v25  ;;  %v16853_v36 = vcombine.high %v773_v60, %v777_v31  ;;  %v16855_v37 = vcombine.high %v774_v32, %v778_v0  ;;  %v825_v23 = vld [vmem:[%s19507_s18 + $0xee0] sm:$0xff]  ;;  %v822_v25 = vld [vmem:[%s19507_s18 + $0xec8] sm:$0xff] }
 0x168   : > { %9850 = vmatpush1.bf16.msra.mxu0 %v16796_v42  ;;  %10342 = vmatpush1.bf16.msra.mxu1 %v16798_v43  ;;  %v786_v42 = vld [vmem:[%s19507_s18 + $0xda8] sm:$0xff]  ;;  %v16852_v43 = vcombine.low %v773_v60, %v777_v31  ;;  %v829_v31 = vld [vmem:[%s19507_s18 + $0xf00] sm:$0xff] }
 0x169   : > { %9851 = vmatprep.subr.bf16.mxu0 %v16805_v44  ;;  %10343 = vmatprep.subr.bf16.mxu1 %v16807_v46  ;;  %v16854_v44 = vcombine.low %v774_v32, %v778_v0  ;;  %v16861_v46 = vcombine.high %v781_v38, %v785_v40  ;;  %v16863_v47 = vcombine.high %v782_v41, %v786_v42  ;;  %v833_v32 = vld [vmem:[%s19507_s18 + $0xf20] sm:$0xff]  ;;  %v830_v0 = vld [vmem:[%s19507_s18 + $0xf08] sm:$0xff] }
 0x16c   : > { %9852 = vmatpush1.bf16.msra.mxu0 %v16804_v52  ;;  %10344 = vmatpush1.bf16.msra.mxu1 %v16806_v53  ;;  %v794_v52 = vld [vmem:[%s19507_s18 + $0xde8] sm:$0xff]  ;;  %v16860_v53 = vcombine.low %v781_v38, %v785_v40  ;;  %v837_v40 = vld [vmem:[%s19507_s18 + $0xf40] sm:$0xff] }
 0x16d   : > { %9862 = vmatprep.subr.bf16.mxu0 %v16813_v55  ;;  %10354 = vmatprep.subr.bf16.mxu1 %v16815_v56  ;;  %v16862_v55 = vcombine.low %v782_v41, %v786_v42  ;;  %v16869_v56 = vcombine.high %v789_v48, %v793_v50  ;;  %v16871_v57 = vcombine.high %v790_v51, %v794_v52  ;;  %v841_v41 = vld [vmem:[%s19507_s18 + $0xf60] sm:$0xff]  ;;  %v838_v42 = vld [vmem:[%s19507_s18 + $0xf48] sm:$0xff] }
 0x16f   : > { %9854 = vmatmul.mubr.bf16.vlgmr.msra.gmra.mrb[0].mxu0 %v19781_v59  ;;  %10346 = vmatmul.mubr.bf16.vlgmr.msra.gmra.mrb[0].mxu1 %v19781_v59 }
 0x170   : > { %9863 = vmatpush1.bf16.msra.mxu0 %v16812_v63  ;;  %10355 = vmatpush1.bf16.msra.mxu1 %v16814_v1  ;;  %v802_v63 = vld [vmem:[%s19507_s18 + $0xe28] sm:$0xff]  ;;  %v16868_v1 = vcombine.low %v789_v48, %v793_v50  ;;  %v845_v50 = vld [vmem:[%s19507_s18 + $0xf80] sm:$0xff] }
 0x171   : > { %9864 = vmatprep.subr.bf16.mxu0 %v16821_v2  ;;  %10356 = vmatprep.subr.bf16.mxu1 %v16823_v3  ;;  %v16870_v2 = vcombine.low %v790_v51, %v794_v52  ;;  %v16877_v3 = vcombine.high %v797_v58, %v801_v61  ;;  %v16879_v4 = vcombine.high %v798_v62, %v802_v63  ;;  %v849_v51 = vld [vmem:[%s19507_s18 + $0xfa0] sm:$0xff]  ;;  %v846_v52 = vld [vmem:[%s19507_s18 + $0xf88] sm:$0xff] }
 0x172   : > { %9894 = vmatprep.mubr.bf16.mxu0 %v19789_v6  ;;  %10386 = vmatprep.mubr.bf16.mxu1 %v19789_v6 }
 0x174   : > { %9865 = vmatpush1.bf16.msra.mxu0 %v16820_v8  ;;  %10357 = vmatpush1.bf16.msra.mxu1 %v16822_v9  ;;  %v810_v8 = vld [vmem:[%s19507_s18 + $0xe68] sm:$0xff]  ;;  %v16876_v9 = vcombine.low %v797_v58, %v801_v61  ;;  %v853_v61 = vld [vmem:[%s19507_s18 + $0xfc0] sm:$0xff] }
 0x175   : > { %9866 = vmatprep.subr.bf16.mxu0 %v16829_v11  ;;  %10358 = vmatprep.subr.bf16.mxu1 %v16831_v12  ;;  %v16878_v11 = vcombine.low %v798_v62, %v802_v63  ;;  %v16885_v12 = vcombine.high %v805_v5, %v809_v30  ;;  %v16887_v13 = vcombine.high %v806_v7, %v810_v8  ;;  %v857_v62 = vld [vmem:[%s19507_s18 + $0xfe0] sm:$0xff]  ;;  %v854_v63 = vld [vmem:[%s19507_s18 + $0xfc8] sm:$0xff] }
 0x178   : > { %9867 = vmatpush1.bf16.msra.mxu0 %v16828_v17  ;;  %10359 = vmatpush1.bf16.msra.mxu1 %v16830_v18  ;;  %v818_v17 = vld [vmem:[%s19507_s18 + $0xea8] sm:$0xff]  ;;  %v16884_v18 = vcombine.low %v805_v5, %v809_v30  ;;  %v16933_v5 = vcombine.high %v853_v61, %v857_v62 }
 0x179   : > { %9868 = vmatprep.subr.bf16.mxu0 %v16837_v19  ;;  %10360 = vmatprep.subr.bf16.mxu1 %v16839_v20  ;;  %v16886_v19 = vcombine.low %v806_v7, %v810_v8  ;;  %v16893_v20 = vcombine.high %v813_v14, %v817_v15  ;;  %v16895_v21 = vcombine.high %v814_v16, %v818_v17  ;;  %v861_v7 = vld [vmem:[%s19507_s18 + $0x1000] sm:$0xff] }
 0x17a   : > { %v865_v8 = vld [vmem:[%s19507_s18 + $0x1020] sm:$0xff] }
 0x17c   : > { %9869 = vmatpush1.bf16.msra.mxu0 %v16836_v26  ;;  %10361 = vmatpush1.bf16.msra.mxu1 %v16838_v27  ;;  %v826_v26 = vld [vmem:[%s19507_s18 + $0xee8] sm:$0xff]  ;;  %v16892_v27 = vcombine.low %v813_v14, %v817_v15  ;;  %v16941_v15 = vcombine.high %v861_v7, %v865_v8 }
 0x17d   : > { %9870 = vmatprep.subr.bf16.mxu0 %v16845_v28  ;;  %10362 = vmatprep.subr.bf16.mxu1 %v16847_v29  ;;  %v16894_v28 = vcombine.low %v814_v16, %v818_v17  ;;  %v16901_v29 = vcombine.high %v821_v22, %v825_v23  ;;  %v16903_v60 = vcombine.high %v822_v25, %v826_v26  ;;  %v869_v17 = vld [vmem:[%s19507_s18 + $0x1040] sm:$0xff] }
 0x180   : > { %9871 = vmatpush1.bf16.msra.mxu0 %v16844_v34  ;;  %10363 = vmatpush1.bf16.msra.mxu1 %v16846_v35  ;;  %v834_v34 = vld [vmem:[%s19507_s18 + $0xf28] sm:$0xff]  ;;  %v16900_v35 = vcombine.low %v821_v22, %v825_v23  ;;  %v16940_v23 = vcombine.low %v861_v7, %v865_v8 }
 0x181   : > { %9872 = vmatprep.subr.bf16.mxu0 %v16853_v36  ;;  %10364 = vmatprep.subr.bf16.mxu1 %v16855_v37  ;;  %v16902_v36 = vcombine.low %v822_v25, %v826_v26  ;;  %v16909_v37 = vcombine.high %v829_v31, %v833_v32  ;;  %v16911_v38 = vcombine.high %v830_v0, %v834_v34  ;;  %v874_v22 = vld [vmem:[%s19507_s18 + $0x1068] sm:$0xff] }
 0x182   : > { %v910_v7 = vld [vmem:[%s19507_s18 + $0x1188] sm:$0xff] }
 0x183   : > { %v914_v8 = vld [vmem:[%s19507_s18 + $0x11a8] sm:$0xff] }
 0x184   : > { %9873 = vmatpush1.bf16.msra.mxu0 %v16852_v43  ;;  %10365 = vmatpush1.bf16.msra.mxu1 %v16854_v44  ;;  %v842_v43 = vld [vmem:[%s19507_s18 + $0xf68] sm:$0xff]  ;;  %v16908_v44 = vcombine.low %v829_v31, %v833_v32 }
 0x185   : > { %9874 = vmatprep.subr.bf16.mxu0 %v16861_v46  ;;  %10366 = vmatprep.subr.bf16.mxu1 %v16863_v47  ;;  %v16910_v46 = vcombine.low %v830_v0, %v834_v34  ;;  %v16917_v47 = vcombine.high %v837_v40, %v841_v41  ;;  %v16919_v48 = vcombine.high %v838_v42, %v842_v43  ;;  %v878_v31 = vld [vmem:[%s19507_s18 + $0x1088] sm:$0xff] }
 0x186   : > { %v882_v32 = vld [vmem:[%s19507_s18 + $0x10a8] sm:$0xff] }
 0x188   : > { %9875 = vmatpush1.bf16.msra.mxu0 %v16860_v53  ;;  %10367 = vmatpush1.bf16.msra.mxu1 %v16862_v55  ;;  %v850_v53 = vld [vmem:[%s19507_s18 + $0xfa8] sm:$0xff]  ;;  %v16916_v55 = vcombine.low %v837_v40, %v841_v41 }
 0x189   : > { %9876 = vmatprep.subr.bf16.mxu0 %v16869_v56  ;;  %10368 = vmatprep.subr.bf16.mxu1 %v16871_v57  ;;  %v16918_v56 = vcombine.low %v838_v42, %v842_v43  ;;  %v16925_v57 = vcombine.high %v845_v50, %v849_v51  ;;  %v16927_v58 = vcombine.high %v846_v52, %v850_v53  ;;  %v886_v40 = vld [vmem:[%s19507_s18 + $0x10c8] sm:$0xff] }
 0x18a   : > { %v890_v41 = vld [vmem:[%s19507_s18 + $0x10e8] sm:$0xff]  ;;  %v16958_v43 = vcombine.low %v878_v31, %v882_v32 }
 0x18c   : > { %9877 = vmatpush1.bf16.msra.mxu0 %v16868_v1  ;;  %10369 = vmatpush1.bf16.msra.mxu1 %v16870_v2  ;;  %v858_v1 = vld [vmem:[%s19507_s18 + $0xfe8] sm:$0xff]  ;;  %v19852_v2 = vld [vmem:[%s21951_s0 + $0x8] sm:$0xff] }
 0x18d   : > { %9878 = vmatprep.subr.bf16.mxu0 %v16877_v3  ;;  %10370 = vmatprep.subr.bf16.mxu1 %v16879_v4  ;;  %v16924_v3 = vcombine.low %v845_v50, %v849_v51  ;;  %v16926_v4 = vcombine.low %v846_v52, %v850_v53  ;;  %v16935_v30 = vcombine.high %v854_v63, %v858_v1  ;;  %v894_v50 = vld [vmem:[%s19507_s18 + $0x1108] sm:$0xff] }
 0x18e   : > { %v16934_v14 = vcombine.low %v854_v63, %v858_v1  ;;  %v898_v51 = vld [vmem:[%s19507_s18 + $0x1128] sm:$0xff]  ;;  %v16966_v53 = vcombine.low %v886_v40, %v890_v41 }
 0x18f   : > { %v16974_v1 = vcombine.low %v894_v50, %v898_v51 }
 0x190   : > { %9879 = vmatpush1.bf16.msra.mxu0 %v16876_v9  ;;  %10371 = vmatpush1.bf16.msra.mxu1 %v16878_v11  ;;  %v19858_v9 = vrot.slane %v19852_v2, %v19559_v54  ;;  %v862_v11 = vld [vmem:[%s19507_s18 + $0x1008] sm:$0xff] }
 0x191   : > { %9880 = vmatprep.subr.bf16.mxu0 %v16885_v12  ;;  %10372 = vmatprep.subr.bf16.mxu1 %v16887_v13  ;;  %v866_v12 = vld [vmem:[%s19507_s18 + $0x1028] sm:$0xff]  ;;  %v16932_v13 = vcombine.low %v853_v61, %v857_v62 }
 0x192   : > { %v16943_v16 = vcombine.high %v862_v11, %v866_v12  ;;  %v16942_v25 = vcombine.low %v862_v11, %v866_v12  ;;  %v902_v61 = vld [vmem:[%s19507_s18 + $0x1148] sm:$0xff] }
 0x193   : > { %v906_v62 = vld [vmem:[%s19507_s18 + $0x1168] sm:$0xff] }
 0x194   : > { %9881 = vmatpush1.bf16.msra.mxu0 %v16884_v18  ;;  %10373 = vmatpush1.bf16.msra.mxu1 %v16886_v19  ;;  %v873_v18 = vld [vmem:[%s19507_s18 + $0x1060] sm:$0xff]  ;;  %v1952_v19 = vcombine.high %v19858_v9, %v19858_v9  ;;  %v16982_v12 = vcombine.low %v902_v61, %v906_v62 }
 0x195   : > { %9882 = vmatprep.subr.bf16.mxu0 %v16893_v20  ;;  %10374 = vmatprep.subr.bf16.mxu1 %v16895_v21  ;;  %v19868_v20 = vcombine.high %v19781_v59, %v19781_v59  ;;  %v870_v21 = vld [vmem:[%s19507_s18 + $0x1048] sm:$0xff]  ;;  %v16949_v26 = vcombine.high %v869_v17, %v873_v18  ;;  %v16948_v0 = vcombine.low %v869_v17, %v873_v18 }
 0x196   : > { %v16950_v34 = vcombine.low %v870_v21, %v874_v22  ;;  %v918_v17 = vld [vmem:[%s19507_s18 + $0x11c8] sm:$0xff] }
 0x197   : > { %v922_v18 = vld [vmem:[%s19507_s18 + $0x11e8] sm:$0xff] }
 0x198   : > { %9883 = vmatpush1.bf16.msra.mxu0 %v16892_v27  ;;  %10375 = vmatpush1.bf16.msra.mxu1 %v16894_v28  ;;  %v16951_v27 = vcombine.high %v870_v21, %v874_v22  ;;  %v877_v28 = vld [vmem:[%s19507_s18 + $0x1080] sm:$0xff]  ;;  %v16990_v21 = vcombine.low %v910_v7, %v914_v8 }
 0x199   : > { %9884 = vmatprep.subr.bf16.mxu0 %v16901_v29  ;;  %10376 = vmatprep.subr.bf16.mxu1 %v16903_v60  ;;  %v881_v29 = vld [vmem:[%s19507_s18 + $0x10a0] sm:$0xff]  ;;  %v19875_v60 = vrot.slane %v1952_v19, %v19559_v54 }
 0x19a   : > { %v16956_v42 = vcombine.low %v877_v28, %v881_v29 }
 0x19c   : > { %9885 = vmatpush1.bf16.msra.mxu0 %v16900_v35  ;;  %10377 = vmatpush1.bf16.msra.mxu1 %v16902_v36  ;;  %v16957_v35 = vcombine.high %v877_v28, %v881_v29  ;;  %v16959_v36 = vcombine.high %v878_v31, %v882_v32  ;;  %v930_v28 = vld [vmem:[%s19507_s18 + $0x1228] sm:$0xff]  ;;  %v16998_v31 = vcombine.low %v918_v17, %v922_v18 }
 0x19d   : > { %9886 = vmatprep.subr.bf16.mxu0 %v16909_v37  ;;  %10378 = vmatprep.subr.bf16.mxu1 %v16911_v38  ;;  %v885_v37 = vld [vmem:[%s19507_s18 + $0x10c0] sm:$0xff] }
 0x19e   : > { %v889_v38 = vld [vmem:[%s19507_s18 + $0x10e0] sm:$0xff] }
 0x19f   : > { %v16964_v52 = vcombine.low %v885_v37, %v889_v38 }
 0x1a0   : > { %9887 = vmatpush1.bf16.msra.mxu0 %v16908_v44  ;;  %10379 = vmatpush1.bf16.msra.mxu1 %v16910_v46  ;;  %v16965_v44 = vcombine.high %v885_v37, %v889_v38  ;;  %v16967_v46 = vcombine.high %v886_v40, %v890_v41  ;;  %v938_v37 = vld [vmem:[%s19507_s18 + $0x1268] sm:$0xff] }
 0x1a1   : > { %9888 = vmatprep.subr.bf16.mxu0 %v16917_v47  ;;  %10380 = vmatprep.subr.bf16.mxu1 %v16919_v48  ;;  %v893_v47 = vld [vmem:[%s19507_s18 + $0x1100] sm:$0xff] }
 0x1a2   : > { %v897_v48 = vld [vmem:[%s19507_s18 + $0x1120] sm:$0xff] }
 0x1a3   : > { %v16972_v63 = vcombine.low %v893_v47, %v897_v48 }
 0x1a4   : > { %9889 = vmatpush1.bf16.msra.mxu0 %v16916_v55  ;;  %10381 = vmatpush1.bf16.msra.mxu1 %v16918_v56  ;;  %v16973_v55 = vcombine.high %v893_v47, %v897_v48  ;;  %v16975_v56 = vcombine.high %v894_v50, %v898_v51  ;;  %v946_v47 = vld [vmem:[%s19507_s18 + $0x12a8] sm:$0xff] }
 0x1a5   : > { %9890 = vmatprep.subr.bf16.mxu0 %v16925_v57  ;;  %10382 = vmatprep.subr.bf16.mxu1 %v16927_v58  ;;  %v901_v57 = vld [vmem:[%s19507_s18 + $0x1140] sm:$0xff] }
 0x1a6   : > { %v905_v58 = vld [vmem:[%s19507_s18 + $0x1160] sm:$0xff] }
 0x1a7   : > { %v16980_v11 = vcombine.low %v901_v57, %v905_v58 }
 0x1a8   : > { %9891 = vmatpush1.bf16.msra.mxu0 %v16924_v3  ;;  %10383 = vmatpush1.bf16.msra.mxu1 %v16926_v4  ;;  %v16981_v3 = vcombine.high %v901_v57, %v905_v58  ;;  %v16983_v4 = vcombine.high %v902_v61, %v906_v62  ;;  %v954_v57 = vld [vmem:[%s19507_s18 + $0x12e8] sm:$0xff] }
 0x1a9   : > { %9892 = vmatprep.subr.bf16.mxu0 %v16933_v5  ;;  %10384 = vmatprep.subr.bf16.mxu1 %v16935_v30  ;;  %v909_v5 = vld [vmem:[%s19507_s18 + $0x1180] sm:$0xff] }
 0x1aa   : > { %v913_v30 = vld [vmem:[%s19507_s18 + $0x11a0] sm:$0xff] }
 0x1ab   : > { %v16988_v19 = vcombine.low %v909_v5, %v913_v30 }
 0x1ac   : > { %9893 = vmatpush1.bf16.msra.mxu0 %v16932_v13  ;;  %10385 = vmatpush1.bf16.msra.mxu1 %v16934_v14  ;;  %v16989_v13 = vcombine.high %v909_v5, %v913_v30  ;;  %v16991_v14 = vcombine.high %v910_v7, %v914_v8  ;;  %v962_v5 = vld [vmem:[%s19507_s18 + $0x1328] sm:$0xff] }
 0x1ad   : > { %9903 = vmatprep.subr.bf16.mxu0 %v16941_v15  ;;  %10395 = vmatprep.subr.bf16.mxu1 %v16943_v16  ;;  %v917_v15 = vld [vmem:[%s19507_s18 + $0x11c0] sm:$0xff] }
 0x1ae   : > { %v921_v16 = vld [vmem:[%s19507_s18 + $0x11e0] sm:$0xff] }
 0x1af   : > { %9895 = vmatmul.mubr.bf16.vlgmr.msra.gmra.mrb[0].mxu0 %v19868_v20  ;;  %10387 = vmatmul.mubr.bf16.vlgmr.msra.gmra.mrb[0].mxu1 %v19868_v20  ;;  %v16997_v22 = vcombine.high %v917_v15, %v921_v16  ;;  %v16996_v29 = vcombine.low %v917_v15, %v921_v16  ;;  %v970_v15 = vld [vmem:[%s19507_s18 + $0x1368] sm:$0xff] }
 0x1b0   : > { %9904 = vmatpush1.bf16.msra.mxu0 %v16940_v23  ;;  %10396 = vmatpush1.bf16.msra.mxu1 %v16942_v25  ;;  %v16999_v23 = vcombine.high %v918_v17, %v922_v18  ;;  %v925_v25 = vld [vmem:[%s19507_s18 + $0x1200] sm:$0xff] }
 0x1b1   : > { %9905 = vmatprep.subr.bf16.mxu0 %v16949_v26  ;;  %10397 = vmatprep.subr.bf16.mxu1 %v16951_v27  ;;  %v929_v26 = vld [vmem:[%s19507_s18 + $0x1220] sm:$0xff]  ;;  %v926_v27 = vld [vmem:[%s19507_s18 + $0x1208] sm:$0xff] }
 0x1b2   : > { %9935 = vmatprep.mubr.bf16.mxu0 %v19875_v60  ;;  %10427 = vmatprep.mubr.bf16.mxu1 %v19875_v60  ;;  %v17005_v32 = vcombine.high %v925_v25, %v929_v26  ;;  %v17004_v38 = vcombine.low %v925_v25, %v929_v26  ;;  %v17006_v40 = vcombine.low %v926_v27, %v930_v28  ;;  %v978_v25 = vld [vmem:[%s19507_s18 + $0x13a8] sm:$0xff] }
 0x1b4   : > { %9906 = vmatpush1.bf16.msra.mxu0 %v16948_v0  ;;  %10398 = vmatpush1.bf16.msra.mxu1 %v16950_v34  ;;  %v17007_v0 = vcombine.high %v926_v27, %v930_v28  ;;  %v933_v34 = vld [vmem:[%s19507_s18 + $0x1240] sm:$0xff] }
 0x1b5   : > { %9907 = vmatprep.subr.bf16.mxu0 %v16957_v35  ;;  %10399 = vmatprep.subr.bf16.mxu1 %v16959_v36  ;;  %v937_v35 = vld [vmem:[%s19507_s18 + $0x1260] sm:$0xff]  ;;  %v934_v36 = vld [vmem:[%s19507_s18 + $0x1248] sm:$0xff] }
 0x1b6   : > { %v17013_v41 = vcombine.high %v933_v34, %v937_v35  ;;  %v17012_v48 = vcombine.low %v933_v34, %v937_v35  ;;  %v17014_v50 = vcombine.low %v934_v36, %v938_v37  ;;  %v986_v34 = vld [vmem:[%s19507_s18 + $0x13e8] sm:$0xff] }
 0x1b8   : > { %9908 = vmatpush1.bf16.msra.mxu0 %v16956_v42  ;;  %10400 = vmatpush1.bf16.msra.mxu1 %v16958_v43  ;;  %v17015_v42 = vcombine.high %v934_v36, %v938_v37  ;;  %v941_v43 = vld [vmem:[%s19507_s18 + $0x1280] sm:$0xff] }
 0x1b9   : > { %9909 = vmatprep.subr.bf16.mxu0 %v16965_v44  ;;  %10401 = vmatprep.subr.bf16.mxu1 %v16967_v46  ;;  %v945_v44 = vld [vmem:[%s19507_s18 + $0x12a0] sm:$0xff]  ;;  %v942_v46 = vld [vmem:[%s19507_s18 + $0x1288] sm:$0xff] }
 0x1ba   : > { %v17021_v51 = vcombine.high %v941_v43, %v945_v44  ;;  %v17020_v58 = vcombine.low %v941_v43, %v945_v44  ;;  %v17022_v61 = vcombine.low %v942_v46, %v946_v47  ;;  %v994_v43 = vld [vmem:[%s19507_s18 + $0x1428] sm:$0xff] }
 0x1bc   : > { %9910 = vmatpush1.bf16.msra.mxu0 %v16964_v52  ;;  %10402 = vmatpush1.bf16.msra.mxu1 %v16966_v53  ;;  %v17023_v52 = vcombine.high %v942_v46, %v946_v47  ;;  %v949_v53 = vld [vmem:[%s19507_s18 + $0x12c0] sm:$0xff] }
 0x1bd   : > { %9911 = vmatprep.subr.bf16.mxu0 %v16973_v55  ;;  %10403 = vmatprep.subr.bf16.mxu1 %v16975_v56  ;;  %v953_v55 = vld [vmem:[%s19507_s18 + $0x12e0] sm:$0xff]  ;;  %v950_v56 = vld [vmem:[%s19507_s18 + $0x12c8] sm:$0xff] }
 0x1be   : > { %v17029_v62 = vcombine.high %v949_v53, %v953_v55  ;;  %v17028_v30 = vcombine.low %v949_v53, %v953_v55  ;;  %v17030_v7 = vcombine.low %v950_v56, %v954_v57  ;;  %v998_v53 = vld [vmem:[%s19507_s18 + $0x1448] sm:$0xff] }
 0x1bf   : > { %v1002_v55 = vld [vmem:[%s19507_s18 + $0x1468] sm:$0xff] }
 0x1c0   : > { %9912 = vmatpush1.bf16.msra.mxu0 %v16972_v63  ;;  %10404 = vmatpush1.bf16.msra.mxu1 %v16974_v1  ;;  %v17031_v63 = vcombine.high %v950_v56, %v954_v57  ;;  %v957_v1 = vld [vmem:[%s19507_s18 + $0x1300] sm:$0xff] }
 0x1c1   : > { %9913 = vmatprep.subr.bf16.mxu0 %v16981_v3  ;;  %10405 = vmatprep.subr.bf16.mxu1 %v16983_v4  ;;  %v961_v3 = vld [vmem:[%s19507_s18 + $0x1320] sm:$0xff]  ;;  %v958_v4 = vld [vmem:[%s19507_s18 + $0x1308] sm:$0xff] }
 0x1c2   : > { %v17037_v8 = vcombine.high %v957_v1, %v961_v3  ;;  %v17036_v16 = vcombine.low %v957_v1, %v961_v3  ;;  %v17038_v17 = vcombine.low %v958_v4, %v962_v5  ;;  %v19951_v1 = vcombine.high %v19875_v60, %v19875_v60  ;;  %v1010_v3 = vld [vmem:[%s19507_s18 + $0x14a8] sm:$0xff] }
 0x1c4   : > { %9914 = vmatpush1.bf16.msra.mxu0 %v16980_v11  ;;  %10406 = vmatpush1.bf16.msra.mxu1 %v16982_v12  ;;  %v17039_v11 = vcombine.high %v958_v4, %v962_v5  ;;  %v965_v12 = vld [vmem:[%s19507_s18 + $0x1340] sm:$0xff]  ;;  %v17078_v5 = vcombine.low %v998_v53, %v1002_v55 }
 0x1c5   : > { %9915 = vmatprep.subr.bf16.mxu0 %v16989_v13  ;;  %10407 = vmatprep.subr.bf16.mxu1 %v16991_v14  ;;  %v969_v13 = vld [vmem:[%s19507_s18 + $0x1360] sm:$0xff]  ;;  %v966_v14 = vld [vmem:[%s19507_s18 + $0x1348] sm:$0xff] }
 0x1c6   : > { %v17045_v18 = vcombine.high %v965_v12, %v969_v13  ;;  %v17044_v26 = vcombine.low %v965_v12, %v969_v13  ;;  %v17046_v27 = vcombine.low %v966_v14, %v970_v15  ;;  %v1014_v12 = vld [vmem:[%s19507_s18 + $0x14c8] sm:$0xff] }
 0x1c7   : > { %v1018_v13 = vld [vmem:[%s19507_s18 + $0x14e8] sm:$0xff] }
 0x1c8   : > { %9916 = vmatpush1.bf16.msra.mxu0 %v16988_v19  ;;  %10408 = vmatpush1.bf16.msra.mxu1 %v16990_v21  ;;  %v17047_v19 = vcombine.high %v966_v14, %v970_v15  ;;  %v973_v21 = vld [vmem:[%s19507_s18 + $0x1380] sm:$0xff] }
 0x1c9   : > { %9917 = vmatprep.subr.bf16.mxu0 %v16997_v22  ;;  %10409 = vmatprep.subr.bf16.mxu1 %v16999_v23  ;;  %v977_v22 = vld [vmem:[%s19507_s18 + $0x13a0] sm:$0xff]  ;;  %v974_v23 = vld [vmem:[%s19507_s18 + $0x1388] sm:$0xff] }
 0x1ca   : > { %v17053_v28 = vcombine.high %v973_v21, %v977_v22  ;;  %v17052_v35 = vcombine.low %v973_v21, %v977_v22  ;;  %v17054_v36 = vcombine.low %v974_v23, %v978_v25  ;;  %v1022_v21 = vld [vmem:[%s19507_s18 + $0x1508] sm:$0xff] }
 0x1cb   : > { %v1026_v22 = vld [vmem:[%s19507_s18 + $0x1528] sm:$0xff] }
 0x1cc   : > { %9918 = vmatpush1.bf16.msra.mxu0 %v16996_v29  ;;  %10410 = vmatpush1.bf16.msra.mxu1 %v16998_v31  ;;  %v17055_v29 = vcombine.high %v974_v23, %v978_v25  ;;  %v981_v31 = vld [vmem:[%s19507_s18 + $0x13c0] sm:$0xff]  ;;  %v17094_v25 = vcombine.low %v1014_v12, %v1018_v13 }
 0x1cd   : > { %9919 = vmatprep.subr.bf16.mxu0 %v17005_v32  ;;  %10411 = vmatprep.subr.bf16.mxu1 %v17007_v0  ;;  %v985_v32 = vld [vmem:[%s19507_s18 + $0x13e0] sm:$0xff]  ;;  %v982_v0 = vld [vmem:[%s19507_s18 + $0x13c8] sm:$0xff] }
 0x1ce   : > { %v17061_v37 = vcombine.high %v981_v31, %v985_v32  ;;  %v17060_v44 = vcombine.low %v981_v31, %v985_v32  ;;  %v17062_v46 = vcombine.low %v982_v0, %v986_v34  ;;  %v1030_v31 = vld [vmem:[%s19507_s18 + $0x1548] sm:$0xff] }
 0x1cf   : > { %v1034_v32 = vld [vmem:[%s19507_s18 + $0x1568] sm:$0xff] }
 0x1d0   : > { %9920 = vmatpush1.bf16.msra.mxu0 %v17004_v38  ;;  %10412 = vmatpush1.bf16.msra.mxu1 %v17006_v40  ;;  %v17063_v38 = vcombine.high %v982_v0, %v986_v34  ;;  %v989_v40 = vld [vmem:[%s19507_s18 + $0x1400] sm:$0xff]  ;;  %v17102_v34 = vcombine.low %v1022_v21, %v1026_v22 }
 0x1d1   : > { %9921 = vmatprep.subr.bf16.mxu0 %v17013_v41  ;;  %10413 = vmatprep.subr.bf16.mxu1 %v17015_v42  ;;  %v993_v41 = vld [vmem:[%s19507_s18 + $0x1420] sm:$0xff]  ;;  %v990_v42 = vld [vmem:[%s19507_s18 + $0x1408] sm:$0xff] }
 0x1d2   : > { %v17069_v47 = vcombine.high %v989_v40, %v993_v41  ;;  %v17068_v56 = vcombine.low %v989_v40, %v993_v41  ;;  %v17070_v57 = vcombine.low %v990_v42, %v994_v43  ;;  %v1038_v40 = vld [vmem:[%s19507_s18 + $0x1588] sm:$0xff] }
 0x1d3   : > { %v1042_v41 = vld [vmem:[%s19507_s18 + $0x15a8] sm:$0xff] }
 0x1d4   : > { %9922 = vmatpush1.bf16.msra.mxu0 %v17012_v48  ;;  %10414 = vmatpush1.bf16.msra.mxu1 %v17014_v50  ;;  %v17071_v48 = vcombine.high %v990_v42, %v994_v43  ;;  %v997_v50 = vld [vmem:[%s19507_s18 + $0x1440] sm:$0xff]  ;;  %v17110_v43 = vcombine.low %v1030_v31, %v1034_v32 }
 0x1d5   : > { %9923 = vmatprep.subr.bf16.mxu0 %v17021_v51  ;;  %10415 = vmatprep.subr.bf16.mxu1 %v17023_v52  ;;  %v1001_v51 = vld [vmem:[%s19507_s18 + $0x1460] sm:$0xff]  ;;  %v19943_v52 = vrot.slane %v19858_v9, %v19559_v54  ;;  %v1006_v9 = vld [vmem:[%s19507_s18 + $0x1488] sm:$0xff] }
 0x1d6   : > { %v17076_v4 = vcombine.low %v997_v50, %v1001_v51  ;;  %v17086_v15 = vcombine.low %v1006_v9, %v1010_v3 }
 0x1d8   : > { %9924 = vmatpush1.bf16.msra.mxu0 %v17020_v58  ;;  %10416 = vmatpush1.bf16.msra.mxu1 %v17022_v61  ;;  %v17077_v58 = vcombine.high %v997_v50, %v1001_v51  ;;  %v17079_v61 = vcombine.high %v998_v53, %v1002_v55  ;;  %v1046_v50 = vld [vmem:[%s19507_s18 + $0x15c8] sm:$0xff]  ;;  %v17118_v55 = vcombine.low %v1038_v40, %v1042_v41 }
 0x1d9   : > { %9925 = vmatprep.subr.bf16.mxu0 %v17029_v62  ;;  %10417 = vmatprep.subr.bf16.mxu1 %v17031_v63  ;;  %v1005_v62 = vld [vmem:[%s19507_s18 + $0x1480] sm:$0xff]  ;;  %v1050_v51 = vld [vmem:[%s19507_s18 + $0x15e8] sm:$0xff] }
 0x1da   : > { %v1009_v63 = vld [vmem:[%s19507_s18 + $0x14a0] sm:$0xff] }
 0x1db   : > { %v17084_v14 = vcombine.low %v1005_v62, %v1009_v63 }
 0x1dc   : > { %9926 = vmatpush1.bf16.msra.mxu0 %v17028_v30  ;;  %10418 = vmatpush1.bf16.msra.mxu1 %v17030_v7  ;;  %v17085_v30 = vcombine.high %v1005_v62, %v1009_v63  ;;  %v17087_v7 = vcombine.high %v1006_v9, %v1010_v3  ;;  %v1054_v62 = vld [vmem:[%s19507_s18 + $0x1608] sm:$0xff]  ;;  %v17126_v3 = vcombine.low %v1046_v50, %v1050_v51 }
 0x1dd   : > { %9927 = vmatprep.subr.bf16.mxu0 %v17037_v8  ;;  %10419 = vmatprep.subr.bf16.mxu1 %v17039_v11  ;;  %v1013_v8 = vld [vmem:[%s19507_s18 + $0x14c0] sm:$0xff]  ;;  %v1058_v63 = vld [vmem:[%s19507_s18 + $0x1628] sm:$0xff] }
 0x1de   : > { %v1017_v11 = vld [vmem:[%s19507_s18 + $0x14e0] sm:$0xff] }
 0x1df   : > { %v17092_v23 = vcombine.low %v1013_v8, %v1017_v11 }
 0x1e0   : > { %9928 = vmatpush1.bf16.msra.mxu0 %v17036_v16  ;;  %10420 = vmatpush1.bf16.msra.mxu1 %v17038_v17  ;;  %v17093_v16 = vcombine.high %v1013_v8, %v1017_v11  ;;  %v17095_v17 = vcombine.high %v1014_v12, %v1018_v13  ;;  %v1062_v8 = vld [vmem:[%s19507_s18 + $0x1648] sm:$0xff]  ;;  %v17134_v13 = vcombine.low %v1054_v62, %v1058_v63 }
 0x1e1   : > { %9929 = vmatprep.subr.bf16.mxu0 %v17045_v18  ;;  %10421 = vmatprep.subr.bf16.mxu1 %v17047_v19  ;;  %v1021_v18 = vld [vmem:[%s19507_s18 + $0x1500] sm:$0xff]  ;;  %v1066_v11 = vld [vmem:[%s19507_s18 + $0x1668] sm:$0xff] }
 0x1e2   : > { %v1025_v19 = vld [vmem:[%s19507_s18 + $0x1520] sm:$0xff] }
 0x1e3   : > { %v17100_v0 = vcombine.low %v1021_v18, %v1025_v19 }
 0x1e4   : > { %9930 = vmatpush1.bf16.msra.mxu0 %v17044_v26  ;;  %10422 = vmatpush1.bf16.msra.mxu1 %v17046_v27  ;;  %v17101_v26 = vcombine.high %v1021_v18, %v1025_v19  ;;  %v17103_v27 = vcombine.high %v1022_v21, %v1026_v22  ;;  %v1070_v18 = vld [vmem:[%s19507_s18 + $0x1688] sm:$0xff]  ;;  %v17142_v22 = vcombine.low %v1062_v8, %v1066_v11 }
 0x1e5   : > { %9931 = vmatprep.subr.bf16.mxu0 %v17053_v28  ;;  %10423 = vmatprep.subr.bf16.mxu1 %v17055_v29  ;;  %v1029_v28 = vld [vmem:[%s19507_s18 + $0x1540] sm:$0xff]  ;;  %v1074_v19 = vld [vmem:[%s19507_s18 + $0x16a8] sm:$0xff] }
 0x1e6   : > { %v1033_v29 = vld [vmem:[%s19507_s18 + $0x1560] sm:$0xff] }
 0x1e7   : > { %v17108_v42 = vcombine.low %v1029_v28, %v1033_v29 }
 0x1e8   : > { %9932 = vmatpush1.bf16.msra.mxu0 %v17052_v35  ;;  %10424 = vmatpush1.bf16.msra.mxu1 %v17054_v36  ;;  %v17109_v35 = vcombine.high %v1029_v28, %v1033_v29  ;;  %v17111_v36 = vcombine.high %v1030_v31, %v1034_v32  ;;  %v1078_v28 = vld [vmem:[%s19507_s18 + $0x16c8] sm:$0xff]  ;;  %v17150_v32 = vcombine.low %v1070_v18, %v1074_v19 }
 0x1e9   : > { %9933 = vmatprep.subr.bf16.mxu0 %v17061_v37  ;;  %10425 = vmatprep.subr.bf16.mxu1 %v17063_v38  ;;  %v1037_v37 = vld [vmem:[%s19507_s18 + $0x1580] sm:$0xff]  ;;  %v1082_v29 = vld [vmem:[%s19507_s18 + $0x16e8] sm:$0xff] }
 0x1ea   : > { %v1041_v38 = vld [vmem:[%s19507_s18 + $0x15a0] sm:$0xff] }
 0x1eb   : > { %v17116_v53 = vcombine.low %v1037_v37, %v1041_v38 }
 0x1ec   : > { %9934 = vmatpush1.bf16.msra.mxu0 %v17060_v44  ;;  %10426 = vmatpush1.bf16.msra.mxu1 %v17062_v46  ;;  %v17117_v44 = vcombine.high %v1037_v37, %v1041_v38  ;;  %v17119_v46 = vcombine.high %v1038_v40, %v1042_v41  ;;  %v1086_v37 = vld [vmem:[%s19507_s18 + $0x1708] sm:$0xff]  ;;  %v17158_v41 = vcombine.low %v1078_v28, %v1082_v29 }
 0x1ed   : > { %9944 = vmatprep.subr.bf16.mxu0 %v17069_v47  ;;  %10436 = vmatprep.subr.bf16.mxu1 %v17071_v48  ;;  %v1045_v47 = vld [vmem:[%s19507_s18 + $0x15c0] sm:$0xff]  ;;  %v1090_v38 = vld [vmem:[%s19507_s18 + $0x1728] sm:$0xff] }
 0x1ee   : > { %v1049_v48 = vld [vmem:[%s19507_s18 + $0x15e0] sm:$0xff] }
 0x1ef   : > { %9936 = vmatmul.mubr.bf16.vlgmr.msra.gmra.mrb[0].mxu0 %v19943_v52  ;;  %10428 = vmatmul.mubr.bf16.vlgmr.msra.gmra.mrb[0].mxu1 %v19943_v52  ;;  %v17124_v9 = vcombine.low %v1045_v47, %v1049_v48 }
 0x1f0   : > { %9945 = vmatpush1.bf16.msra.mxu0 %v17068_v56  ;;  %10437 = vmatpush1.bf16.msra.mxu1 %v17070_v57  ;;  %v17125_v56 = vcombine.high %v1045_v47, %v1049_v48  ;;  %v17127_v57 = vcombine.high %v1046_v50, %v1050_v51  ;;  %v1094_v47 = vld [vmem:[%s19507_s18 + $0x1748] sm:$0xff]  ;;  %v17166_v51 = vcombine.low %v1086_v37, %v1090_v38 }
 0x1f1   : > { %9946 = vmatprep.subr.bf16.mxu0 %v17077_v58  ;;  %10438 = vmatprep.subr.bf16.mxu1 %v17079_v61  ;;  %v1053_v58 = vld [vmem:[%s19507_s18 + $0x1600] sm:$0xff]  ;;  %v1098_v48 = vld [vmem:[%s19507_s18 + $0x1768] sm:$0xff] }
 0x1f2   : > { %9976 = vmatprep.mubr.bf16.mxu0 %v19951_v1  ;;  %10468 = vmatprep.mubr.bf16.mxu1 %v19951_v1  ;;  %v1057_v61 = vld [vmem:[%s19507_s18 + $0x1620] sm:$0xff] }
 0x1f3   : > { %v17132_v12 = vcombine.low %v1053_v58, %v1057_v61 }
 0x1f4   : > { %9947 = vmatpush1.bf16.msra.mxu0 %v17076_v4  ;;  %10439 = vmatpush1.bf16.msra.mxu1 %v17078_v5  ;;  %v17133_v4 = vcombine.high %v1053_v58, %v1057_v61  ;;  %v17135_v5 = vcombine.high %v1054_v62, %v1058_v63  ;;  %v1102_v58 = vld [vmem:[%s19507_s18 + $0x1788] sm:$0xff]  ;;  %v17174_v63 = vcombine.low %v1094_v47, %v1098_v48 }
 0x1f5   : > { %9948 = vmatprep.subr.bf16.mxu0 %v17085_v30  ;;  %10440 = vmatprep.subr.bf16.mxu1 %v17087_v7  ;;  %v1061_v30 = vld [vmem:[%s19507_s18 + $0x1640] sm:$0xff]  ;;  %v1106_v61 = vld [vmem:[%s19507_s18 + $0x17a8] sm:$0xff] }
 0x1f6   : > { %v1065_v7 = vld [vmem:[%s19507_s18 + $0x1660] sm:$0xff] }
 0x1f7   : > { %v17140_v21 = vcombine.low %v1061_v30, %v1065_v7 }
 0x1f8   : > { %9949 = vmatpush1.bf16.msra.mxu0 %v17084_v14  ;;  %10441 = vmatpush1.bf16.msra.mxu1 %v17086_v15  ;;  %v17141_v14 = vcombine.high %v1061_v30, %v1065_v7  ;;  %v17143_v15 = vcombine.high %v1062_v8, %v1066_v11  ;;  %v1937_v30 = vcombine.high %v19852_v2, %v19852_v2  ;;  %v1110_v7 = vld [vmem:[%s19507_s18 + $0x17c8] sm:$0xff] }
 0x1f9   : > { %9950 = vmatprep.subr.bf16.mxu0 %v17093_v16  ;;  %10442 = vmatprep.subr.bf16.mxu1 %v17095_v17  ;;  %v1069_v16 = vld [vmem:[%s19507_s18 + $0x1680] sm:$0xff]  ;;  %v1114_v8 = vld [vmem:[%s19507_s18 + $0x17e8] sm:$0xff] }
 0x1fa   : > { %v1073_v17 = vld [vmem:[%s19507_s18 + $0x16a0] sm:$0xff]  ;;  %v1118_v2 = vld [vmem:[%s19507_s18 + $0x1808] sm:$0xff] }
 0x1fb   : > { %v17148_v31 = vcombine.low %v1069_v16, %v1073_v17 }
 0x1fc   : > { %9951 = vmatpush1.bf16.msra.mxu0 %v17092_v23  ;;  %10443 = vmatpush1.bf16.msra.mxu1 %v17094_v25  ;;  %v17149_v23 = vcombine.high %v1069_v16, %v1073_v17  ;;  %v17151_v25 = vcombine.high %v1070_v18, %v1074_v19  ;;  %v1121_v16 = vld [vmem:[%s19507_s18 + $0x1820] sm:$0xff]  ;;  %v20016_v17 = vrot.slane %v1937_v30, %v19559_v54  ;;  %v1122_v18 = vld [vmem:[%s19507_s18 + $0x1828] sm:$0xff] }
 0x1fd   : > { %9952 = vmatprep.subr.bf16.mxu0 %v17101_v26  ;;  %10444 = vmatprep.subr.bf16.mxu1 %v17103_v27  ;;  %v1077_v26 = vld [vmem:[%s19507_s18 + $0x16c0] sm:$0xff] }
 0x1fe   : > { %v1081_v27 = vld [vmem:[%s19507_s18 + $0x16e0] sm:$0xff] }
 0x1ff   : > { %v17156_v40 = vcombine.low %v1077_v26, %v1081_v27  ;;  %v1157_v30 = vld [vmem:[%s19507_s18 + $0x1940] sm:$0xff] }
 0x200   : > { %9953 = vmatpush1.bf16.msra.mxu0 %v17100_v0  ;;  %10445 = vmatpush1.bf16.msra.mxu1 %v17102_v34  ;;  %v17157_v0 = vcombine.high %v1077_v26, %v1081_v27  ;;  %v17159_v34 = vcombine.high %v1078_v28, %v1082_v29  ;;  %v1129_v26 = vld [vmem:[%s19507_s18 + $0x1860] sm:$0xff]  ;;  %v1953_v27 = vcombine.high %v20016_v17, %v20016_v17  ;;  %v1126_v29 = vld [vmem:[%s19507_s18 + $0x1848] sm:$0xff] }
 0x201   : > { %9954 = vmatprep.subr.bf16.mxu0 %v17109_v35  ;;  %10446 = vmatprep.subr.bf16.mxu1 %v17111_v36  ;;  %v1085_v35 = vld [vmem:[%s19507_s18 + $0x1700] sm:$0xff]  ;;  %v20026_v28 = vcombine.high %v19943_v52, %v19943_v52 }
 0x202   : > { %v1089_v36 = vld [vmem:[%s19507_s18 + $0x1720] sm:$0xff] }
 0x203   : > { %v17164_v50 = vcombine.low %v1085_v35, %v1089_v36 }
 0x204   : > { %9955 = vmatpush1.bf16.msra.mxu0 %v17108_v42  ;;  %10447 = vmatpush1.bf16.msra.mxu1 %v17110_v43  ;;  %v17165_v42 = vcombine.high %v1085_v35, %v1089_v36  ;;  %v17167_v43 = vcombine.high %v1086_v37, %v1090_v38  ;;  %v1133_v36 = vld [vmem:[%s19507_s18 + $0x1880] sm:$0xff]  ;;  %v20033_v38 = vrot.slane %v1953_v27, %v19559_v54 }
 0x205   : > { %9956 = vmatprep.subr.bf16.mxu0 %v17117_v44  ;;  %10448 = vmatprep.subr.bf16.mxu1 %v17119_v46  ;;  %v1093_v44 = vld [vmem:[%s19507_s18 + $0x1740] sm:$0xff] }
 0x206   : > { %v1097_v46 = vld [vmem:[%s19507_s18 + $0x1760] sm:$0xff] }
 0x207   : > { %v17172_v62 = vcombine.low %v1093_v44, %v1097_v46  ;;  %v1137_v37 = vld [vmem:[%s19507_s18 + $0x18a0] sm:$0xff] }
 0x208   : > { %9957 = vmatpush1.bf16.msra.mxu0 %v17116_v53  ;;  %10449 = vmatpush1.bf16.msra.mxu1 %v17118_v55  ;;  %v17173_v53 = vcombine.high %v1093_v44, %v1097_v46  ;;  %v17175_v55 = vcombine.high %v1094_v47, %v1098_v48  ;;  %v17213_v44 = vcombine.high %v1133_v36, %v1137_v37  ;;  %v1141_v47 = vld [vmem:[%s19507_s18 + $0x18c0] sm:$0xff] }
 0x209   : > { %9958 = vmatprep.subr.bf16.mxu0 %v17125_v56  ;;  %10450 = vmatprep.subr.bf16.mxu1 %v17127_v57  ;;  %v1101_v56 = vld [vmem:[%s19507_s18 + $0x1780] sm:$0xff] }
 0x20a   : > { %v1105_v57 = vld [vmem:[%s19507_s18 + $0x17a0] sm:$0xff] }
 0x20b   : > { %v17180_v11 = vcombine.low %v1101_v56, %v1105_v57  ;;  %v1145_v48 = vld [vmem:[%s19507_s18 + $0x18e0] sm:$0xff] }
 0x20c   : > { %9959 = vmatpush1.bf16.msra.mxu0 %v17124_v9  ;;  %10451 = vmatpush1.bf16.msra.mxu1 %v17126_v3  ;;  %v17181_v9 = vcombine.high %v1101_v56, %v1105_v57  ;;  %v17183_v3 = vcombine.high %v1102_v58, %v1106_v61  ;;  %v17221_v56 = vcombine.high %v1141_v47, %v1145_v48  ;;  %v1177_v27 = vld [vmem:[%s19507_s18 + $0x19e0] sm:$0xff] }
 0x20d   : > { %9960 = vmatprep.subr.bf16.mxu0 %v17133_v4  ;;  %10452 = vmatprep.subr.bf16.mxu1 %v17135_v5  ;;  %v1109_v4 = vld [vmem:[%s19507_s18 + $0x17c0] sm:$0xff] }
 0x20e   : > { %v1113_v5 = vld [vmem:[%s19507_s18 + $0x17e0] sm:$0xff] }
 0x20f   : > { %v17188_v19 = vcombine.low %v1109_v4, %v1113_v5 }
 0x210   : > { %9961 = vmatpush1.bf16.msra.mxu0 %v17132_v12  ;;  %10453 = vmatpush1.bf16.msra.mxu1 %v17134_v13  ;;  %v17182_v12 = vcombine.low %v1102_v58, %v1106_v61  ;;  %v17189_v13 = vcombine.high %v1109_v4, %v1113_v5  ;;  %v1149_v58 = vld [vmem:[%s19507_s18 + $0x1900] sm:$0xff] }
 0x211   : > { %9962 = vmatprep.subr.bf16.mxu0 %v17141_v14  ;;  %10454 = vmatprep.subr.bf16.mxu1 %v17143_v15  ;;  %v17191_v14 = vcombine.high %v1110_v7, %v1114_v8  ;;  %v1117_v15 = vld [vmem:[%s19507_s18 + $0x1800] sm:$0xff] }
 0x212   : > { %v1153_v61 = vld [vmem:[%s19507_s18 + $0x1920] sm:$0xff] }
 0x213   : > { %v17229_v4 = vcombine.high %v1149_v58, %v1153_v61 }
 0x214   : > { %9963 = vmatpush1.bf16.msra.mxu0 %v17140_v21  ;;  %10455 = vmatpush1.bf16.msra.mxu1 %v17142_v22  ;;  %v17190_v21 = vcombine.low %v1110_v7, %v1114_v8  ;;  %v17197_v22 = vcombine.high %v1117_v15, %v1121_v16  ;;  %v1161_v7 = vld [vmem:[%s19507_s18 + $0x1960] sm:$0xff]  ;;  %v1158_v8 = vld [vmem:[%s19507_s18 + $0x1948] sm:$0xff] }
 0x215   : > { %9964 = vmatprep.subr.bf16.mxu0 %v17149_v23  ;;  %10456 = vmatprep.subr.bf16.mxu1 %v17151_v25  ;;  %v17199_v23 = vcombine.high %v1118_v2, %v1122_v18  ;;  %v1125_v25 = vld [vmem:[%s19507_s18 + $0x1840] sm:$0xff] }
 0x218   : > { %9965 = vmatpush1.bf16.msra.mxu0 %v17148_v31  ;;  %10457 = vmatpush1.bf16.msra.mxu1 %v17150_v32  ;;  %v1130_v31 = vld [vmem:[%s19507_s18 + $0x1868] sm:$0xff]  ;;  %v17196_v32 = vcombine.low %v1117_v15, %v1121_v16  ;;  %v1165_v16 = vld [vmem:[%s19507_s18 + $0x1980] sm:$0xff] }
 0x219   : > { %9966 = vmatprep.subr.bf16.mxu0 %v17157_v0  ;;  %10458 = vmatprep.subr.bf16.mxu1 %v17159_v34  ;;  %v17198_v0 = vcombine.low %v1118_v2, %v1122_v18  ;;  %v17205_v34 = vcombine.high %v1125_v25, %v1129_v26  ;;  %v17207_v35 = vcombine.high %v1126_v29, %v1130_v31  ;;  %v1169_v2 = vld [vmem:[%s19507_s18 + $0x19a0] sm:$0xff]  ;;  %v1166_v18 = vld [vmem:[%s19507_s18 + $0x1988] sm:$0xff] }
 0x21c   : > { %9967 = vmatpush1.bf16.msra.mxu0 %v17156_v40  ;;  %10459 = vmatpush1.bf16.msra.mxu1 %v17158_v41  ;;  %v1134_v40 = vld [vmem:[%s19507_s18 + $0x1888] sm:$0xff] }
 0x21d   : > { %9968 = vmatprep.subr.bf16.mxu0 %v17165_v42  ;;  %10460 = vmatprep.subr.bf16.mxu1 %v17167_v43  ;;  %v1138_v41 = vld [vmem:[%s19507_s18 + $0x18a8] sm:$0xff]  ;;  %v17204_v42 = vcombine.low %v1125_v25, %v1129_v26  ;;  %v17206_v43 = vcombine.low %v1126_v29, %v1130_v31  ;;  %v1173_v26 = vld [vmem:[%s19507_s18 + $0x19c0] sm:$0xff] }
 0x21e   : > { %v17215_v46 = vcombine.high %v1134_v40, %v1138_v41  ;;  %v1174_v29 = vld [vmem:[%s19507_s18 + $0x19c8] sm:$0xff] }
 0x21f   : > { %v1178_v31 = vld [vmem:[%s19507_s18 + $0x19e8] sm:$0xff] }
 0x220   : > { %9969 = vmatpush1.bf16.msra.mxu0 %v17164_v50  ;;  %10461 = vmatpush1.bf16.msra.mxu1 %v17166_v51  ;;  %v1142_v50 = vld [vmem:[%s19507_s18 + $0x18c8] sm:$0xff] }
 0x221   : > { %9970 = vmatprep.subr.bf16.mxu0 %v17173_v53  ;;  %10462 = vmatprep.subr.bf16.mxu1 %v17175_v55  ;;  %v1146_v51 = vld [vmem:[%s19507_s18 + $0x18e8] sm:$0xff]  ;;  %v17212_v53 = vcombine.low %v1133_v36, %v1137_v37  ;;  %v17214_v55 = vcombine.low %v1134_v40, %v1138_v41  ;;  %v1181_v36 = vld [vmem:[%s19507_s18 + $0x1a00] sm:$0xff] }
 0x222   : > { %v17223_v57 = vcombine.high %v1142_v50, %v1146_v51  ;;  %v1185_v37 = vld [vmem:[%s19507_s18 + $0x1a20] sm:$0xff]  ;;  %v1182_v40 = vld [vmem:[%s19507_s18 + $0x1a08] sm:$0xff] }
 0x223   : > { %v1186_v41 = vld [vmem:[%s19507_s18 + $0x1a28] sm:$0xff] }
 0x224   : > { %9971 = vmatpush1.bf16.msra.mxu0 %v17172_v62  ;;  %10463 = vmatpush1.bf16.msra.mxu1 %v17174_v63  ;;  %v1150_v62 = vld [vmem:[%s19507_s18 + $0x1908] sm:$0xff] }
 0x225   : > { %9972 = vmatprep.subr.bf16.mxu0 %v17181_v9  ;;  %10464 = vmatprep.subr.bf16.mxu1 %v17183_v3  ;;  %v1154_v63 = vld [vmem:[%s19507_s18 + $0x1928] sm:$0xff]  ;;  %v17220_v9 = vcombine.low %v1141_v47, %v1145_v48  ;;  %v17222_v3 = vcombine.low %v1142_v50, %v1146_v51  ;;  %v1189_v47 = vld [vmem:[%s19507_s18 + $0x1a40] sm:$0xff] }
 0x226   : > { %v17231_v5 = vcombine.high %v1150_v62, %v1154_v63  ;;  %v1193_v48 = vld [vmem:[%s19507_s18 + $0x1a60] sm:$0xff]  ;;  %v1190_v50 = vld [vmem:[%s19507_s18 + $0x1a48] sm:$0xff] }
 0x227   : > { %v1194_v51 = vld [vmem:[%s19507_s18 + $0x1a68] sm:$0xff] }
 0x228   : > { %9973 = vmatpush1.bf16.msra.mxu0 %v17180_v11  ;;  %10465 = vmatpush1.bf16.msra.mxu1 %v17182_v12  ;;  %v1162_v11 = vld [vmem:[%s19507_s18 + $0x1968] sm:$0xff]  ;;  %v17228_v12 = vcombine.low %v1149_v58, %v1153_v61  ;;  %v1197_v58 = vld [vmem:[%s19507_s18 + $0x1a80] sm:$0xff] }
 0x229   : > { %9974 = vmatprep.subr.bf16.mxu0 %v17189_v13  ;;  %10466 = vmatprep.subr.bf16.mxu1 %v17191_v14  ;;  %v17230_v13 = vcombine.low %v1150_v62, %v1154_v63  ;;  %v17237_v14 = vcombine.high %v1157_v30, %v1161_v7  ;;  %v17239_v15 = vcombine.high %v1158_v8, %v1162_v11  ;;  %v1201_v61 = vld [vmem:[%s19507_s18 + $0x1aa0] sm:$0xff]  ;;  %v1198_v62 = vld [vmem:[%s19507_s18 + $0x1a88] sm:$0xff] }
 0x22a   : > { %v1202_v63 = vld [vmem:[%s19507_s18 + $0x1aa8] sm:$0xff] }
 0x22c   : > { %9975 = vmatpush1.bf16.msra.mxu0 %v17188_v19  ;;  %10467 = vmatpush1.bf16.msra.mxu1 %v17190_v21  ;;  %v1170_v19 = vld [vmem:[%s19507_s18 + $0x19a8] sm:$0xff]  ;;  %v17236_v21 = vcombine.low %v1157_v30, %v1161_v7  ;;  %v1205_v30 = vld [vmem:[%s19507_s18 + $0x1ac0] sm:$0xff] }
 0x22d   : > { %9985 = vmatprep.subr.bf16.mxu0 %v17197_v22  ;;  %10477 = vmatprep.subr.bf16.mxu1 %v17199_v23  ;;  %v17238_v22 = vcombine.low %v1158_v8, %v1162_v11  ;;  %v17245_v23 = vcombine.high %v1165_v16, %v1169_v2  ;;  %v17247_v25 = vcombine.high %v1166_v18, %v1170_v19  ;;  %v1209_v7 = vld [vmem:[%s19507_s18 + $0x1ae0] sm:$0xff]  ;;  %v1206_v8 = vld [vmem:[%s19507_s18 + $0x1ac8] sm:$0xff] }
 0x22e   : > { %v1210_v11 = vld [vmem:[%s19507_s18 + $0x1ae8] sm:$0xff] }
 0x22f   : > { %9977 = vmatmul.mubr.bf16.vlgmr.msra.gmra.mrb[0].mxu0 %v20026_v28  ;;  %10469 = vmatmul.mubr.bf16.vlgmr.msra.gmra.mrb[0].mxu1 %v20026_v28 }
 0x230   : > { %9986 = vmatpush1.bf16.msra.mxu0 %v17196_v32  ;;  %10478 = vmatpush1.bf16.msra.mxu1 %v17198_v0  ;;  %v17244_v32 = vcombine.low %v1165_v16, %v1169_v2  ;;  %v17246_v0 = vcombine.low %v1166_v18, %v1170_v19  ;;  %v1213_v16 = vld [vmem:[%s19507_s18 + $0x1b00] sm:$0xff]  ;;  %v1214_v18 = vld [vmem:[%s19507_s18 + $0x1b08] sm:$0xff] }
 0x231   : > { %9987 = vmatprep.subr.bf16.mxu0 %v17205_v34  ;;  %10479 = vmatprep.subr.bf16.mxu1 %v17207_v35  ;;  %v17253_v34 = vcombine.high %v1173_v26, %v1177_v27  ;;  %v17255_v35 = vcombine.high %v1174_v29, %v1178_v31  ;;  %v1217_v2 = vld [vmem:[%s19507_s18 + $0x1b20] sm:$0xff]  ;;  %v1218_v19 = vld [vmem:[%s19507_s18 + $0x1b28] sm:$0xff] }
 0x232   : > { %10017 = vmatprep.mubr.bf16.mxu0 %v20033_v38  ;;  %10509 = vmatprep.mubr.bf16.mxu1 %v20033_v38 }
 0x234   : > { %9988 = vmatpush1.bf16.msra.mxu0 %v17204_v42  ;;  %10480 = vmatpush1.bf16.msra.mxu1 %v17206_v43  ;;  %v17252_v42 = vcombine.low %v1173_v26, %v1177_v27  ;;  %v17254_v43 = vcombine.low %v1174_v29, %v1178_v31  ;;  %v1221_v26 = vld [vmem:[%s19507_s18 + $0x1b40] sm:$0xff]  ;;  %v1222_v29 = vld [vmem:[%s19507_s18 + $0x1b48] sm:$0xff] }
 0x235   : > { %9989 = vmatprep.subr.bf16.mxu0 %v17213_v44  ;;  %10481 = vmatprep.subr.bf16.mxu1 %v17215_v46  ;;  %v17261_v44 = vcombine.high %v1181_v36, %v1185_v37  ;;  %v17263_v46 = vcombine.high %v1182_v40, %v1186_v41  ;;  %v1225_v27 = vld [vmem:[%s19507_s18 + $0x1b60] sm:$0xff]  ;;  %v1226_v31 = vld [vmem:[%s19507_s18 + $0x1b68] sm:$0xff] }
 0x238   : > { %9990 = vmatpush1.bf16.msra.mxu0 %v17212_v53  ;;  %10482 = vmatpush1.bf16.msra.mxu1 %v17214_v55  ;;  %v17260_v53 = vcombine.low %v1181_v36, %v1185_v37  ;;  %v17262_v55 = vcombine.low %v1182_v40, %v1186_v41  ;;  %v1229_v36 = vld [vmem:[%s19507_s18 + $0x1b80] sm:$0xff]  ;;  %v1230_v40 = vld [vmem:[%s19507_s18 + $0x1b88] sm:$0xff] }
 0x239   : > { %9991 = vmatprep.subr.bf16.mxu0 %v17221_v56  ;;  %10483 = vmatprep.subr.bf16.mxu1 %v17223_v57  ;;  %v17269_v56 = vcombine.high %v1189_v47, %v1193_v48  ;;  %v17271_v57 = vcombine.high %v1190_v50, %v1194_v51  ;;  %v1233_v37 = vld [vmem:[%s19507_s18 + $0x1ba0] sm:$0xff]  ;;  %v1234_v41 = vld [vmem:[%s19507_s18 + $0x1ba8] sm:$0xff] }
 0x23c   : > { %9992 = vmatpush1.bf16.msra.mxu0 %v17220_v9  ;;  %10484 = vmatpush1.bf16.msra.mxu1 %v17222_v3  ;;  %v17268_v9 = vcombine.low %v1189_v47, %v1193_v48  ;;  %v17270_v3 = vcombine.low %v1190_v50, %v1194_v51  ;;  %v1237_v47 = vld [vmem:[%s19507_s18 + $0x1bc0] sm:$0xff]  ;;  %v1238_v50 = vld [vmem:[%s19507_s18 + $0x1bc8] sm:$0xff] }
 0x23d   : > { %9993 = vmatprep.subr.bf16.mxu0 %v17229_v4  ;;  %10485 = vmatprep.subr.bf16.mxu1 %v17231_v5  ;;  %v17277_v4 = vcombine.high %v1197_v58, %v1201_v61  ;;  %v17279_v5 = vcombine.high %v1198_v62, %v1202_v63  ;;  %v1241_v48 = vld [vmem:[%s19507_s18 + $0x1be0] sm:$0xff]  ;;  %v1242_v51 = vld [vmem:[%s19507_s18 + $0x1be8] sm:$0xff] }
 0x240   : > { %9994 = vmatpush1.bf16.msra.mxu0 %v17228_v12  ;;  %10486 = vmatpush1.bf16.msra.mxu1 %v17230_v13  ;;  %v17276_v12 = vcombine.low %v1197_v58, %v1201_v61  ;;  %v17278_v13 = vcombine.low %v1198_v62, %v1202_v63  ;;  %v1245_v58 = vld [vmem:[%s19507_s18 + $0x1c00] sm:$0xff]  ;;  %v1246_v62 = vld [vmem:[%s19507_s18 + $0x1c08] sm:$0xff] }
 0x241   : > { %9995 = vmatprep.subr.bf16.mxu0 %v17237_v14  ;;  %10487 = vmatprep.subr.bf16.mxu1 %v17239_v15  ;;  %v17285_v14 = vcombine.high %v1205_v30, %v1209_v7  ;;  %v17287_v15 = vcombine.high %v1206_v8, %v1210_v11  ;;  %v1249_v61 = vld [vmem:[%s19507_s18 + $0x1c20] sm:$0xff]  ;;  %v1250_v63 = vld [vmem:[%s19507_s18 + $0x1c28] sm:$0xff] }
 0x244   : > { %9996 = vmatpush1.bf16.msra.mxu0 %v17236_v21  ;;  %10488 = vmatpush1.bf16.msra.mxu1 %v17238_v22  ;;  %v17284_v21 = vcombine.low %v1205_v30, %v1209_v7  ;;  %v17286_v22 = vcombine.low %v1206_v8, %v1210_v11  ;;  %v1253_v30 = vld [vmem:[%s19507_s18 + $0x1c40] sm:$0xff]  ;;  %v20101_v8 = vrot.slane %v20016_v17, %v19559_v54  ;;  %v1254_v11 = vld [vmem:[%s19507_s18 + $0x1c48] sm:$0xff] }
 0x245   : > { %9997 = vmatprep.subr.bf16.mxu0 %v17245_v23  ;;  %10489 = vmatprep.subr.bf16.mxu1 %v17247_v25  ;;  %v17293_v23 = vcombine.high %v1213_v16, %v1217_v2  ;;  %v17295_v25 = vcombine.high %v1214_v18, %v1218_v19  ;;  %v1257_v7 = vld [vmem:[%s19507_s18 + $0x1c60] sm:$0xff]  ;;  %v1262_v17 = vld [vmem:[%s19507_s18 + $0x1c88] sm:$0xff] }
 0x248   : > { %9998 = vmatpush1.bf16.msra.mxu0 %v17244_v32  ;;  %10490 = vmatpush1.bf16.msra.mxu1 %v17246_v0  ;;  %v17292_v32 = vcombine.low %v1213_v16, %v1217_v2  ;;  %v17294_v0 = vcombine.low %v1214_v18, %v1218_v19  ;;  %v1261_v2 = vld [vmem:[%s19507_s18 + $0x1c80] sm:$0xff]  ;;  %v20109_v19 = vcombine.high %v20033_v38, %v20033_v38 }
 0x249   : > { %9999 = vmatprep.subr.bf16.mxu0 %v17253_v34  ;;  %10491 = vmatprep.subr.bf16.mxu1 %v17255_v35  ;;  %v17301_v34 = vcombine.high %v1221_v26, %v1225_v27  ;;  %v17303_v35 = vcombine.high %v1222_v29, %v1226_v31  ;;  %v1265_v18 = vld [vmem:[%s19507_s18 + $0x1ca0] sm:$0xff] }
 0x24c   : > { %10000 = vmatpush1.bf16.msra.mxu0 %v17252_v42  ;;  %10492 = vmatpush1.bf16.msra.mxu1 %v17254_v43  ;;  %v17300_v42 = vcombine.low %v1221_v26, %v1225_v27  ;;  %v17302_v43 = vcombine.low %v1222_v29, %v1226_v31  ;;  %v1269_v27 = vld [vmem:[%s19507_s18 + $0x1cc0] sm:$0xff]  ;;  %v1270_v31 = vld [vmem:[%s19507_s18 + $0x1cc8] sm:$0xff] }
 0x24d   : > { %10001 = vmatprep.subr.bf16.mxu0 %v17261_v44  ;;  %10493 = vmatprep.subr.bf16.mxu1 %v17263_v46  ;;  %v17309_v44 = vcombine.high %v1229_v36, %v1233_v37  ;;  %v17311_v46 = vcombine.high %v1230_v40, %v1234_v41  ;;  %v1273_v29 = vld [vmem:[%s19507_s18 + $0x1ce0] sm:$0xff] }
 0x250   : > { %10002 = vmatpush1.bf16.msra.mxu0 %v17260_v53  ;;  %10494 = vmatpush1.bf16.msra.mxu1 %v17262_v55  ;;  %v17308_v53 = vcombine.low %v1229_v36, %v1233_v37  ;;  %v17310_v55 = vcombine.low %v1230_v40, %v1234_v41  ;;  %v1277_v37 = vld [vmem:[%s19507_s18 + $0x1d00] sm:$0xff]  ;;  %v1278_v41 = vld [vmem:[%s19507_s18 + $0x1d08] sm:$0xff] }
 0x251   : > { %10003 = vmatprep.subr.bf16.mxu0 %v17269_v56  ;;  %10495 = vmatprep.subr.bf16.mxu1 %v17271_v57  ;;  %v17317_v56 = vcombine.high %v1237_v47, %v1241_v48  ;;  %v17319_v57 = vcombine.high %v1238_v50, %v1242_v51  ;;  %v1281_v40 = vld [vmem:[%s19507_s18 + $0x1d20] sm:$0xff] }
 0x254   : > { %10004 = vmatpush1.bf16.msra.mxu0 %v17268_v9  ;;  %10496 = vmatpush1.bf16.msra.mxu1 %v17270_v3  ;;  %v17316_v9 = vcombine.low %v1237_v47, %v1241_v48  ;;  %v17318_v3 = vcombine.low %v1238_v50, %v1242_v51  ;;  %v1285_v48 = vld [vmem:[%s19507_s18 + $0x1d40] sm:$0xff]  ;;  %v1286_v51 = vld [vmem:[%s19507_s18 + $0x1d48] sm:$0xff] }
 0x255   : > { %10005 = vmatprep.subr.bf16.mxu0 %v17277_v4  ;;  %10497 = vmatprep.subr.bf16.mxu1 %v17279_v5  ;;  %v17325_v4 = vcombine.high %v1245_v58, %v1249_v61  ;;  %v17327_v5 = vcombine.high %v1246_v62, %v1250_v63  ;;  %v1289_v50 = vld [vmem:[%s19507_s18 + $0x1d60] sm:$0xff] }
 0x258   : > { %10006 = vmatpush1.bf16.msra.mxu0 %v17276_v12  ;;  %10498 = vmatpush1.bf16.msra.mxu1 %v17278_v13  ;;  %v1258_v12 = vld [vmem:[%s19507_s18 + $0x1c68] sm:$0xff]  ;;  %v17324_v13 = vcombine.low %v1245_v58, %v1249_v61  ;;  %v1293_v61 = vld [vmem:[%s19507_s18 + $0x1d80] sm:$0xff] }
 0x259   : > { %10007 = vmatprep.subr.bf16.mxu0 %v17285_v14  ;;  %10499 = vmatprep.subr.bf16.mxu1 %v17287_v15  ;;  %v17326_v14 = vcombine.low %v1246_v62, %v1250_v63  ;;  %v17333_v15 = vcombine.high %v1253_v30, %v1257_v7  ;;  %v17335_v16 = vcombine.high %v1254_v11, %v1258_v12  ;;  %v1297_v62 = vld [vmem:[%s19507_s18 + $0x1da0] sm:$0xff]  ;;  %v1294_v63 = vld [vmem:[%s19507_s18 + $0x1d88] sm:$0xff] }
 0x25c   : > { %10008 = vmatpush1.bf16.msra.mxu0 %v17284_v21  ;;  %10500 = vmatpush1.bf16.msra.mxu1 %v17286_v22  ;;  %v1266_v21 = vld [vmem:[%s19507_s18 + $0x1ca8] sm:$0xff]  ;;  %v17332_v22 = vcombine.low %v1253_v30, %v1257_v7  ;;  %v1301_v7 = vld [vmem:[%s19507_s18 + $0x1dc0] sm:$0xff] }
 0x25d   : > { %10009 = vmatprep.subr.bf16.mxu0 %v17293_v23  ;;  %10501 = vmatprep.subr.bf16.mxu1 %v17295_v25  ;;  %v17334_v23 = vcombine.low %v1254_v11, %v1258_v12  ;;  %v17341_v25 = vcombine.high %v1261_v2, %v1265_v18  ;;  %v17343_v26 = vcombine.high %v1262_v17, %v1266_v21  ;;  %v1305_v11 = vld [vmem:[%s19507_s18 + $0x1de0] sm:$0xff]  ;;  %v1302_v12 = vld [vmem:[%s19507_s18 + $0x1dc8] sm:$0xff] }
 0x260   : > { %10010 = vmatpush1.bf16.msra.mxu0 %v17292_v32  ;;  %10502 = vmatpush1.bf16.msra.mxu1 %v17294_v0  ;;  %v1274_v32 = vld [vmem:[%s19507_s18 + $0x1ce8] sm:$0xff]  ;;  %v17340_v0 = vcombine.low %v1261_v2, %v1265_v18  ;;  %v1309_v18 = vld [vmem:[%s19507_s18 + $0x1e00] sm:$0xff] }
 0x261   : > { %10011 = vmatprep.subr.bf16.mxu0 %v17301_v34  ;;  %10503 = vmatprep.subr.bf16.mxu1 %v17303_v35  ;;  %v17342_v34 = vcombine.low %v1262_v17, %v1266_v21  ;;  %v17349_v35 = vcombine.high %v1269_v27, %v1273_v29  ;;  %v17351_v36 = vcombine.high %v1270_v31, %v1274_v32  ;;  %v1313_v17 = vld [vmem:[%s19507_s18 + $0x1e20] sm:$0xff]  ;;  %v1310_v21 = vld [vmem:[%s19507_s18 + $0x1e08] sm:$0xff] }
 0x264   : > { %10012 = vmatpush1.bf16.msra.mxu0 %v17300_v42  ;;  %10504 = vmatpush1.bf16.msra.mxu1 %v17302_v43  ;;  %v1282_v42 = vld [vmem:[%s19507_s18 + $0x1d28] sm:$0xff]  ;;  %v17348_v43 = vcombine.low %v1269_v27, %v1273_v29  ;;  %v1317_v29 = vld [vmem:[%s19507_s18 + $0x1e40] sm:$0xff] }
 0x265   : > { %10013 = vmatprep.subr.bf16.mxu0 %v17309_v44  ;;  %10505 = vmatprep.subr.bf16.mxu1 %v17311_v46  ;;  %v17350_v44 = vcombine.low %v1270_v31, %v1274_v32  ;;  %v17357_v46 = vcombine.high %v1277_v37, %v1281_v40  ;;  %v17359_v47 = vcombine.high %v1278_v41, %v1282_v42  ;;  %v1321_v31 = vld [vmem:[%s19507_s18 + $0x1e60] sm:$0xff]  ;;  %v1318_v32 = vld [vmem:[%s19507_s18 + $0x1e48] sm:$0xff] }
 0x268   : > { %10014 = vmatpush1.bf16.msra.mxu0 %v17308_v53  ;;  %10506 = vmatpush1.bf16.msra.mxu1 %v17310_v55  ;;  %v1290_v53 = vld [vmem:[%s19507_s18 + $0x1d68] sm:$0xff]  ;;  %v17356_v55 = vcombine.low %v1277_v37, %v1281_v40  ;;  %v1325_v40 = vld [vmem:[%s19507_s18 + $0x1e80] sm:$0xff] }
 0x269   : > { %10015 = vmatprep.subr.bf16.mxu0 %v17317_v56  ;;  %10507 = vmatprep.subr.bf16.mxu1 %v17319_v57  ;;  %v17358_v56 = vcombine.low %v1278_v41, %v1282_v42  ;;  %v17365_v57 = vcombine.high %v1285_v48, %v1289_v50  ;;  %v17367_v58 = vcombine.high %v1286_v51, %v1290_v53  ;;  %v1329_v41 = vld [vmem:[%s19507_s18 + $0x1ea0] sm:$0xff]  ;;  %v1326_v42 = vld [vmem:[%s19507_s18 + $0x1e88] sm:$0xff] }
 0x26c   : > { %10016 = vmatpush1.bf16.msra.mxu0 %v17316_v9  ;;  %10508 = vmatpush1.bf16.msra.mxu1 %v17318_v3  ;;  %v1298_v9 = vld [vmem:[%s19507_s18 + $0x1da8] sm:$0xff]  ;;  %v17364_v3 = vcombine.low %v1285_v48, %v1289_v50  ;;  %v1333_v50 = vld [vmem:[%s19507_s18 + $0x1ec0] sm:$0xff] }
 0x26d   : > { %10026 = vmatprep.subr.bf16.mxu0 %v17325_v4  ;;  %10518 = vmatprep.subr.bf16.mxu1 %v17327_v5  ;;  %v17366_v4 = vcombine.low %v1286_v51, %v1290_v53  ;;  %v17373_v5 = vcombine.high %v1293_v61, %v1297_v62  ;;  %v17375_v30 = vcombine.high %v1294_v63, %v1298_v9  ;;  %v1337_v51 = vld [vmem:[%s19507_s18 + $0x1ee0] sm:$0xff]  ;;  %v1334_v53 = vld [vmem:[%s19507_s18 + $0x1ec8] sm:$0xff] }
 0x26f   : > { %10018 = vmatmul.mubr.bf16.vlgmr.msra.gmra.mrb[0].mxu0 %v20101_v8  ;;  %10510 = vmatmul.mubr.bf16.vlgmr.msra.gmra.mrb[0].mxu1 %v20101_v8 }
 0x270   : > { %10027 = vmatpush1.bf16.msra.mxu0 %v17324_v13  ;;  %10519 = vmatpush1.bf16.msra.mxu1 %v17326_v14  ;;  %v1306_v13 = vld [vmem:[%s19507_s18 + $0x1de8] sm:$0xff]  ;;  %v17372_v14 = vcombine.low %v1293_v61, %v1297_v62  ;;  %v1341_v62 = vld [vmem:[%s19507_s18 + $0x1f00] sm:$0xff] }
 0x271   : > { %10028 = vmatprep.subr.bf16.mxu0 %v17333_v15  ;;  %10520 = vmatprep.subr.bf16.mxu1 %v17335_v16  ;;  %v17374_v15 = vcombine.low %v1294_v63, %v1298_v9  ;;  %v17381_v16 = vcombine.high %v1301_v7, %v1305_v11  ;;  %v17383_v2 = vcombine.high %v1302_v12, %v1306_v13  ;;  %v1345_v63 = vld [vmem:[%s19507_s18 + $0x1f20] sm:$0xff]  ;;  %v1342_v9 = vld [vmem:[%s19507_s18 + $0x1f08] sm:$0xff] }
 0x272   : > { %10058 = vmatprep.mubr.bf16.mxu0 %v20109_v19  ;;  %10550 = vmatprep.mubr.bf16.mxu1 %v20109_v19 }
 0x274   : > { %10029 = vmatpush1.bf16.msra.mxu0 %v17332_v22  ;;  %10521 = vmatpush1.bf16.msra.mxu1 %v17334_v23  ;;  %v1314_v22 = vld [vmem:[%s19507_s18 + $0x1e28] sm:$0xff]  ;;  %v17380_v23 = vcombine.low %v1301_v7, %v1305_v11  ;;  %v1349_v11 = vld [vmem:[%s19507_s18 + $0x1f40] sm:$0xff] }
 0x275   : > { %10030 = vmatprep.subr.bf16.mxu0 %v17341_v25  ;;  %10522 = vmatprep.subr.bf16.mxu1 %v17343_v26  ;;  %v17382_v25 = vcombine.low %v1302_v12, %v1306_v13  ;;  %v17389_v26 = vcombine.high %v1309_v18, %v1313_v17  ;;  %v17391_v27 = vcombine.high %v1310_v21, %v1314_v22  ;;  %v1353_v12 = vld [vmem:[%s19507_s18 + $0x1f60] sm:$0xff]  ;;  %v1350_v13 = vld [vmem:[%s19507_s18 + $0x1f48] sm:$0xff] }
 0x278   : > { %10031 = vmatpush1.bf16.msra.mxu0 %v17340_v0  ;;  %10523 = vmatpush1.bf16.msra.mxu1 %v17342_v34  ;;  %v1322_v0 = vld [vmem:[%s19507_s18 + $0x1e68] sm:$0xff]  ;;  %v17388_v34 = vcombine.low %v1309_v18, %v1313_v17  ;;  %v1357_v17 = vld [vmem:[%s19507_s18 + $0x1f80] sm:$0xff] }
 0x279   : > { %10032 = vmatprep.subr.bf16.mxu0 %v17349_v35  ;;  %10524 = vmatprep.subr.bf16.mxu1 %v17351_v36  ;;  %v17390_v35 = vcombine.low %v1310_v21, %v1314_v22  ;;  %v17397_v36 = vcombine.high %v1317_v29, %v1321_v31  ;;  %v17399_v37 = vcombine.high %v1318_v32, %v1322_v0  ;;  %v1361_v21 = vld [vmem:[%s19507_s18 + $0x1fa0] sm:$0xff]  ;;  %v1358_v22 = vld [vmem:[%s19507_s18 + $0x1f88] sm:$0xff] }
 0x27c   : > { %10033 = vmatpush1.bf16.msra.mxu0 %v17348_v43  ;;  %10525 = vmatpush1.bf16.msra.mxu1 %v17350_v44  ;;  %v1330_v43 = vld [vmem:[%s19507_s18 + $0x1ea8] sm:$0xff]  ;;  %v17396_v44 = vcombine.low %v1317_v29, %v1321_v31  ;;  %v1365_v31 = vld [vmem:[%s19507_s18 + $0x1fc0] sm:$0xff] }
 0x27d   : > { %10034 = vmatprep.subr.bf16.mxu0 %v17357_v46  ;;  %10526 = vmatprep.subr.bf16.mxu1 %v17359_v47  ;;  %v17398_v46 = vcombine.low %v1318_v32, %v1322_v0  ;;  %v17405_v47 = vcombine.high %v1325_v40, %v1329_v41  ;;  %v17407_v48 = vcombine.high %v1326_v42, %v1330_v43  ;;  %v1369_v32 = vld [vmem:[%s19507_s18 + $0x1fe0] sm:$0xff]  ;;  %v1366_v0 = vld [vmem:[%s19507_s18 + $0x1fc8] sm:$0xff] }
 0x280   : > { %10035 = vmatpush1.bf16.msra.mxu0 %v17356_v55  ;;  %10527 = vmatpush1.bf16.msra.mxu1 %v17358_v56  ;;  %v1338_v55 = vld [vmem:[%s19507_s18 + $0x1ee8] sm:$0xff]  ;;  %v17404_v56 = vcombine.low %v1325_v40, %v1329_v41  ;;  %v17445_v40 = vcombine.high %v1365_v31, %v1369_v32 }
 0x281   : > { %10036 = vmatprep.subr.bf16.mxu0 %v17365_v57  ;;  %10528 = vmatprep.subr.bf16.mxu1 %v17367_v58  ;;  %v17406_v57 = vcombine.low %v1326_v42, %v1330_v43  ;;  %v17413_v58 = vcombine.high %v1333_v50, %v1337_v51  ;;  %v17415_v61 = vcombine.high %v1334_v53, %v1338_v55  ;;  %v1373_v42 = vld [vmem:[%s19507_s18 + $0x2000] sm:$0xff] }
 0x282   : > { %v1377_v43 = vld [vmem:[%s19507_s18 + $0x2020] sm:$0xff] }
 0x284   : > { %10037 = vmatpush1.bf16.msra.mxu0 %v17364_v3  ;;  %10529 = vmatpush1.bf16.msra.mxu1 %v17366_v4  ;;  %v1346_v3 = vld [vmem:[%s19507_s18 + $0x1f28] sm:$0xff]  ;;  %v17412_v4 = vcombine.low %v1333_v50, %v1337_v51  ;;  %v17453_v51 = vcombine.high %v1373_v42, %v1377_v43 }
 0x285   : > { %10038 = vmatprep.subr.bf16.mxu0 %v17373_v5  ;;  %10530 = vmatprep.subr.bf16.mxu1 %v17375_v30  ;;  %v17414_v5 = vcombine.low %v1334_v53, %v1338_v55  ;;  %v17421_v30 = vcombine.high %v1341_v62, %v1345_v63  ;;  %v17423_v7 = vcombine.high %v1342_v9, %v1346_v3  ;;  %v1381_v55 = vld [vmem:[%s19507_s18 + $0x2040] sm:$0xff] }
 0x288   : > { %10039 = vmatpush1.bf16.msra.mxu0 %v17372_v14  ;;  %10531 = vmatpush1.bf16.msra.mxu1 %v17374_v15  ;;  %v1354_v14 = vld [vmem:[%s19507_s18 + $0x1f68] sm:$0xff]  ;;  %v17420_v15 = vcombine.low %v1341_v62, %v1345_v63  ;;  %v17452_v63 = vcombine.low %v1373_v42, %v1377_v43 }
 0x289   : > { %10040 = vmatprep.subr.bf16.mxu0 %v17381_v16  ;;  %10532 = vmatprep.subr.bf16.mxu1 %v17383_v2  ;;  %v17422_v16 = vcombine.low %v1342_v9, %v1346_v3  ;;  %v17429_v2 = vcombine.high %v1349_v11, %v1353_v12  ;;  %v17431_v18 = vcombine.high %v1350_v13, %v1354_v14  ;;  %v1386_v62 = vld [vmem:[%s19507_s18 + $0x2068] sm:$0xff] }
 0x28a   : > { %v1414_v42 = vld [vmem:[%s19507_s18 + $0x2148] sm:$0xff] }
 0x28b   : > { %v1418_v43 = vld [vmem:[%s19507_s18 + $0x2168] sm:$0xff] }
 0x28c   : > { %10041 = vmatpush1.bf16.msra.mxu0 %v17380_v23  ;;  %10533 = vmatpush1.bf16.msra.mxu1 %v17382_v25  ;;  %v1362_v23 = vld [vmem:[%s19507_s18 + $0x1fa8] sm:$0xff]  ;;  %v17428_v25 = vcombine.low %v1349_v11, %v1353_v12 }
 0x28d   : > { %10042 = vmatprep.subr.bf16.mxu0 %v17389_v26  ;;  %10534 = vmatprep.subr.bf16.mxu1 %v17391_v27  ;;  %v17430_v26 = vcombine.low %v1350_v13, %v1354_v14  ;;  %v17437_v27 = vcombine.high %v1357_v17, %v1361_v21  ;;  %v17439_v29 = vcombine.high %v1358_v22, %v1362_v23  ;;  %v1390_v11 = vld [vmem:[%s19507_s18 + $0x2088] sm:$0xff] }
 0x28e   : > { %v1394_v12 = vld [vmem:[%s19507_s18 + $0x20a8] sm:$0xff] }
 0x290   : > { %10043 = vmatpush1.bf16.msra.mxu0 %v17388_v34  ;;  %10535 = vmatpush1.bf16.msra.mxu1 %v17390_v35  ;;  %v1370_v34 = vld [vmem:[%s19507_s18 + $0x1fe8] sm:$0xff]  ;;  %v20172_v35 = vld [vmem:[%s21951_s0 + $0x10] sm:$0xff] }
 0x291   : > { %10044 = vmatprep.subr.bf16.mxu0 %v17397_v36  ;;  %10536 = vmatprep.subr.bf16.mxu1 %v17399_v37  ;;  %v17436_v36 = vcombine.low %v1357_v17, %v1361_v21  ;;  %v17438_v37 = vcombine.low %v1358_v22, %v1362_v23  ;;  %v17447_v41 = vcombine.high %v1366_v0, %v1370_v34  ;;  %v1398_v17 = vld [vmem:[%s19507_s18 + $0x20c8] sm:$0xff] }
 0x292   : > { %v17446_v50 = vcombine.low %v1366_v0, %v1370_v34  ;;  %v1402_v21 = vld [vmem:[%s19507_s18 + $0x20e8] sm:$0xff]  ;;  %v17470_v23 = vcombine.low %v1390_v11, %v1394_v12 }
 0x293   : > { %v17478_v34 = vcombine.low %v1398_v17, %v1402_v21 }
 0x294   : > { %10045 = vmatpush1.bf16.msra.mxu0 %v17396_v44  ;;  %10537 = vmatpush1.bf16.msra.mxu1 %v17398_v46  ;;  %v20178_v44 = vrot.slane %v20172_v35, %v19559_v54  ;;  %v1374_v46 = vld [vmem:[%s19507_s18 + $0x2008] sm:$0xff] }
 0x295   : > { %10046 = vmatprep.subr.bf16.mxu0 %v17405_v47  ;;  %10538 = vmatprep.subr.bf16.mxu1 %v17407_v48  ;;  %v1378_v47 = vld [vmem:[%s19507_s18 + $0x2028] sm:$0xff]  ;;  %v17444_v48 = vcombine.low %v1365_v31, %v1369_v32 }
 0x296   : > { %v17455_v53 = vcombine.high %v1374_v46, %v1378_v47  ;;  %v17454_v9 = vcombine.low %v1374_v46, %v1378_v47  ;;  %v1406_v31 = vld [vmem:[%s19507_s18 + $0x2108] sm:$0xff] }
 0x297   : > { %v1410_v32 = vld [vmem:[%s19507_s18 + $0x2128] sm:$0xff] }
 0x298   : > { %10047 = vmatpush1.bf16.msra.mxu0 %v17404_v56  ;;  %10539 = vmatpush1.bf16.msra.mxu1 %v17406_v57  ;;  %v1385_v56 = vld [vmem:[%s19507_s18 + $0x2060] sm:$0xff]  ;;  %v2001_v57 = vcombine.high %v20178_v44, %v20178_v44  ;;  %v17486_v47 = vcombine.low %v1406_v31, %v1410_v32 }
 0x299   : > { %10048 = vmatprep.subr.bf16.mxu0 %v17413_v58  ;;  %10540 = vmatprep.subr.bf16.mxu1 %v17415_v61  ;;  %v20188_v58 = vcombine.high %v20101_v8, %v20101_v8  ;;  %v1382_v61 = vld [vmem:[%s19507_s18 + $0x2048] sm:$0xff]  ;;  %v17461_v3 = vcombine.high %v1381_v55, %v1385_v56  ;;  %v17460_v13 = vcombine.low %v1381_v55, %v1385_v56 }
 0x29a   : > { %v17462_v14 = vcombine.low %v1382_v61, %v1386_v62  ;;  %v1422_v55 = vld [vmem:[%s19507_s18 + $0x2188] sm:$0xff] }
 0x29b   : > { %v1426_v56 = vld [vmem:[%s19507_s18 + $0x21a8] sm:$0xff] }
 0x29c   : > { %10049 = vmatpush1.bf16.msra.mxu0 %v17412_v4  ;;  %10541 = vmatpush1.bf16.msra.mxu1 %v17414_v5  ;;  %v17463_v4 = vcombine.high %v1382_v61, %v1386_v62  ;;  %v1389_v5 = vld [vmem:[%s19507_s18 + $0x2080] sm:$0xff]  ;;  %v17494_v61 = vcombine.low %v1414_v42, %v1418_v43 }
 0x29d   : > { %10050 = vmatprep.subr.bf16.mxu0 %v17421_v30  ;;  %10542 = vmatprep.subr.bf16.mxu1 %v17423_v7  ;;  %v1393_v30 = vld [vmem:[%s19507_s18 + $0x20a0] sm:$0xff]  ;;  %v20195_v7 = vrot.slane %v2001_v57, %v19559_v54 }
 0x29e   : > { %v17468_v22 = vcombine.low %v1389_v5, %v1393_v30 }
 0x2a0   : > { %10051 = vmatpush1.bf16.msra.mxu0 %v17420_v15  ;;  %10543 = vmatpush1.bf16.msra.mxu1 %v17422_v16  ;;  %v17469_v15 = vcombine.high %v1389_v5, %v1393_v30  ;;  %v17471_v16 = vcombine.high %v1390_v11, %v1394_v12  ;;  %v1434_v5 = vld [vmem:[%s19507_s18 + $0x21e8] sm:$0xff]  ;;  %v17502_v11 = vcombine.low %v1422_v55, %v1426_v56 }
 0x2a1   : > { %10052 = vmatprep.subr.bf16.mxu0 %v17429_v2  ;;  %10544 = vmatprep.subr.bf16.mxu1 %v17431_v18  ;;  %v1397_v2 = vld [vmem:[%s19507_s18 + $0x20c0] sm:$0xff] }
 0x2a2   : > { %v1401_v18 = vld [vmem:[%s19507_s18 + $0x20e0] sm:$0xff] }
 0x2a3   : > { %v17476_v0 = vcombine.low %v1397_v2, %v1401_v18 }
 0x2a4   : > { %10053 = vmatpush1.bf16.msra.mxu0 %v17428_v25  ;;  %10545 = vmatpush1.bf16.msra.mxu1 %v17430_v26  ;;  %v17477_v25 = vcombine.high %v1397_v2, %v1401_v18  ;;  %v17479_v26 = vcombine.high %v1398_v17, %v1402_v21  ;;  %v1442_v2 = vld [vmem:[%s19507_s18 + $0x2228] sm:$0xff] }
 0x2a5   : > { %10054 = vmatprep.subr.bf16.mxu0 %v17437_v27  ;;  %10546 = vmatprep.subr.bf16.mxu1 %v17439_v29  ;;  %v1405_v27 = vld [vmem:[%s19507_s18 + $0x2100] sm:$0xff] }
 0x2a6   : > { %v1409_v29 = vld [vmem:[%s19507_s18 + $0x2120] sm:$0xff] }
 0x2a7   : > { %v17484_v46 = vcombine.low %v1405_v27, %v1409_v29 }
 0x2a8   : > { %10055 = vmatpush1.bf16.msra.mxu0 %v17436_v36  ;;  %10547 = vmatpush1.bf16.msra.mxu1 %v17438_v37  ;;  %v17485_v36 = vcombine.high %v1405_v27, %v1409_v29  ;;  %v17487_v37 = vcombine.high %v1406_v31, %v1410_v32  ;;  %v1450_v27 = vld [vmem:[%s19507_s18 + $0x2268] sm:$0xff] }
 0x2a9   : > { %10056 = vmatprep.subr.bf16.mxu0 %v17445_v40  ;;  %10548 = vmatprep.subr.bf16.mxu1 %v17447_v41  ;;  %v1413_v40 = vld [vmem:[%s19507_s18 + $0x2140] sm:$0xff] }
 0x2aa   : > { %v1417_v41 = vld [vmem:[%s19507_s18 + $0x2160] sm:$0xff] }
 0x2ab   : > { %v17492_v57 = vcombine.low %v1413_v40, %v1417_v41 }
 0x2ac   : > { %10057 = vmatpush1.bf16.msra.mxu0 %v17444_v48  ;;  %10549 = vmatpush1.bf16.msra.mxu1 %v17446_v50  ;;  %v17493_v48 = vcombine.high %v1413_v40, %v1417_v41  ;;  %v17495_v50 = vcombine.high %v1414_v42, %v1418_v43  ;;  %v1458_v40 = vld [vmem:[%s19507_s18 + $0x22a8] sm:$0xff] }
 0x2ad   : > { %10067 = vmatprep.subr.bf16.mxu0 %v17453_v51  ;;  %10559 = vmatprep.subr.bf16.mxu1 %v17455_v53  ;;  %v1421_v51 = vld [vmem:[%s19507_s18 + $0x2180] sm:$0xff] }
 0x2ae   : > { %v1425_v53 = vld [vmem:[%s19507_s18 + $0x21a0] sm:$0xff] }
 0x2af   : > { %10059 = vmatmul.mubr.bf16.vlgmr.msra.gmra.mrb[0].mxu0 %v20188_v58  ;;  %10551 = vmatmul.mubr.bf16.vlgmr.msra.gmra.mrb[0].mxu1 %v20188_v58  ;;  %v17501_v62 = vcombine.high %v1421_v51, %v1425_v53  ;;  %v17500_v30 = vcombine.low %v1421_v51, %v1425_v53  ;;  %v1466_v51 = vld [vmem:[%s19507_s18 + $0x22e8] sm:$0xff] }
 0x2b0   : > { %10068 = vmatpush1.bf16.msra.mxu0 %v17452_v63  ;;  %10560 = vmatpush1.bf16.msra.mxu1 %v17454_v9  ;;  %v17503_v63 = vcombine.high %v1422_v55, %v1426_v56  ;;  %v1429_v9 = vld [vmem:[%s19507_s18 + $0x21c0] sm:$0xff] }
 0x2b1   : > { %10069 = vmatprep.subr.bf16.mxu0 %v17461_v3  ;;  %10561 = vmatprep.subr.bf16.mxu1 %v17463_v4  ;;  %v1433_v3 = vld [vmem:[%s19507_s18 + $0x21e0] sm:$0xff]  ;;  %v1430_v4 = vld [vmem:[%s19507_s18 + $0x21c8] sm:$0xff] }
 0x2b2   : > { %10099 = vmatprep.mubr.bf16.mxu0 %v20195_v7  ;;  %10591 = vmatprep.mubr.bf16.mxu1 %v20195_v7  ;;  %v17509_v12 = vcombine.high %v1429_v9, %v1433_v3  ;;  %v17508_v18 = vcombine.low %v1429_v9, %v1433_v3  ;;  %v17510_v17 = vcombine.low %v1430_v4, %v1434_v5  ;;  %v1474_v9 = vld [vmem:[%s19507_s18 + $0x2328] sm:$0xff] }
 0x2b4   : > { %10070 = vmatpush1.bf16.msra.mxu0 %v17460_v13  ;;  %10562 = vmatpush1.bf16.msra.mxu1 %v17462_v14  ;;  %v17511_v13 = vcombine.high %v1430_v4, %v1434_v5  ;;  %v1437_v14 = vld [vmem:[%s19507_s18 + $0x2200] sm:$0xff] }
 0x2b5   : > { %10071 = vmatprep.subr.bf16.mxu0 %v17469_v15  ;;  %10563 = vmatprep.subr.bf16.mxu1 %v17471_v16  ;;  %v1441_v15 = vld [vmem:[%s19507_s18 + $0x2220] sm:$0xff]  ;;  %v1438_v16 = vld [vmem:[%s19507_s18 + $0x2208] sm:$0xff] }
 0x2b6   : > { %v17517_v21 = vcombine.high %v1437_v14, %v1441_v15  ;;  %v17516_v29 = vcombine.low %v1437_v14, %v1441_v15  ;;  %v17518_v31 = vcombine.low %v1438_v16, %v1442_v2  ;;  %v1482_v14 = vld [vmem:[%s19507_s18 + $0x2368] sm:$0xff] }
 0x2b8   : > { %10072 = vmatpush1.bf16.msra.mxu0 %v17468_v22  ;;  %10564 = vmatpush1.bf16.msra.mxu1 %v17470_v23  ;;  %v17519_v22 = vcombine.high %v1438_v16, %v1442_v2  ;;  %v1445_v23 = vld [vmem:[%s19507_s18 + $0x2240] sm:$0xff] }
 0x2b9   : > { %10073 = vmatprep.subr.bf16.mxu0 %v17477_v25  ;;  %10565 = vmatprep.subr.bf16.mxu1 %v17479_v26  ;;  %v1449_v25 = vld [vmem:[%s19507_s18 + $0x2260] sm:$0xff]  ;;  %v1446_v26 = vld [vmem:[%s19507_s18 + $0x2248] sm:$0xff] }
 0x2ba   : > { %v17525_v32 = vcombine.high %v1445_v23, %v1449_v25  ;;  %v17524_v41 = vcombine.low %v1445_v23, %v1449_v25  ;;  %v17526_v42 = vcombine.low %v1446_v26, %v1450_v27  ;;  %v1490_v23 = vld [vmem:[%s19507_s18 + $0x23a8] sm:$0xff] }
 0x2bc   : > { %10074 = vmatpush1.bf16.msra.mxu0 %v17476_v0  ;;  %10566 = vmatpush1.bf16.msra.mxu1 %v17478_v34  ;;  %v17527_v0 = vcombine.high %v1446_v26, %v1450_v27  ;;  %v1453_v34 = vld [vmem:[%s19507_s18 + $0x2280] sm:$0xff] }
 0x2bd   : > { %10075 = vmatprep.subr.bf16.mxu0 %v17485_v36  ;;  %10567 = vmatprep.subr.bf16.mxu1 %v17487_v37  ;;  %v1457_v36 = vld [vmem:[%s19507_s18 + $0x22a0] sm:$0xff]  ;;  %v1454_v37 = vld [vmem:[%s19507_s18 + $0x2288] sm:$0xff] }
 0x2be   : > { %v17533_v43 = vcombine.high %v1453_v34, %v1457_v36  ;;  %v17532_v53 = vcombine.low %v1453_v34, %v1457_v36  ;;  %v17534_v55 = vcombine.low %v1454_v37, %v1458_v40  ;;  %v1498_v34 = vld [vmem:[%s19507_s18 + $0x23e8] sm:$0xff] }
 0x2c0   : > { %10076 = vmatpush1.bf16.msra.mxu0 %v17484_v46  ;;  %10568 = vmatpush1.bf16.msra.mxu1 %v17486_v47  ;;  %v17535_v46 = vcombine.high %v1454_v37, %v1458_v40  ;;  %v1461_v47 = vld [vmem:[%s19507_s18 + $0x22c0] sm:$0xff] }
 0x2c1   : > { %10077 = vmatprep.subr.bf16.mxu0 %v17493_v48  ;;  %10569 = vmatprep.subr.bf16.mxu1 %v17495_v50  ;;  %v1465_v48 = vld [vmem:[%s19507_s18 + $0x22e0] sm:$0xff]  ;;  %v1462_v50 = vld [vmem:[%s19507_s18 + $0x22c8] sm:$0xff] }
 0x2c2   : > { %v17541_v56 = vcombine.high %v1461_v47, %v1465_v48  ;;  %v17540_v3 = vcombine.low %v1461_v47, %v1465_v48  ;;  %v17542_v4 = vcombine.low %v1462_v50, %v1466_v51  ;;  %v1506_v47 = vld [vmem:[%s19507_s18 + $0x2428] sm:$0xff] }
 0x2c4   : > { %10078 = vmatpush1.bf16.msra.mxu0 %v17492_v57  ;;  %10570 = vmatpush1.bf16.msra.mxu1 %v17494_v61  ;;  %v17543_v57 = vcombine.high %v1462_v50, %v1466_v51  ;;  %v1469_v61 = vld [vmem:[%s19507_s18 + $0x2300] sm:$0xff] }
 0x2c5   : > { %10079 = vmatprep.subr.bf16.mxu0 %v17501_v62  ;;  %10571 = vmatprep.subr.bf16.mxu1 %v17503_v63  ;;  %v1473_v62 = vld [vmem:[%s19507_s18 + $0x2320] sm:$0xff]  ;;  %v1470_v63 = vld [vmem:[%s19507_s18 + $0x2308] sm:$0xff] }
 0x2c6   : > { %v17549_v5 = vcombine.high %v1469_v61, %v1473_v62  ;;  %v17548_v15 = vcombine.low %v1469_v61, %v1473_v62  ;;  %v17550_v16 = vcombine.low %v1470_v63, %v1474_v9  ;;  %v1510_v61 = vld [vmem:[%s19507_s18 + $0x2448] sm:$0xff] }
 0x2c7   : > { %v1514_v62 = vld [vmem:[%s19507_s18 + $0x2468] sm:$0xff] }
 0x2c8   : > { %10080 = vmatpush1.bf16.msra.mxu0 %v17500_v30  ;;  %10572 = vmatpush1.bf16.msra.mxu1 %v17502_v11  ;;  %v17551_v30 = vcombine.high %v1470_v63, %v1474_v9  ;;  %v1477_v11 = vld [vmem:[%s19507_s18 + $0x2340] sm:$0xff] }
 0x2c9   : > { %10081 = vmatprep.subr.bf16.mxu0 %v17509_v12  ;;  %10573 = vmatprep.subr.bf16.mxu1 %v17511_v13  ;;  %v1481_v12 = vld [vmem:[%s19507_s18 + $0x2360] sm:$0xff]  ;;  %v1478_v13 = vld [vmem:[%s19507_s18 + $0x2348] sm:$0xff] }
 0x2ca   : > { %v17557_v2 = vcombine.high %v1477_v11, %v1481_v12  ;;  %v17556_v25 = vcombine.low %v1477_v11, %v1481_v12  ;;  %v17558_v26 = vcombine.low %v1478_v13, %v1482_v14  ;;  %v20271_v11 = vcombine.high %v20195_v7, %v20195_v7  ;;  %v1522_v12 = vld [vmem:[%s19507_s18 + $0x24a8] sm:$0xff] }
 0x2cc   : > { %10082 = vmatpush1.bf16.msra.mxu0 %v17508_v18  ;;  %10574 = vmatpush1.bf16.msra.mxu1 %v17510_v17  ;;  %v17559_v18 = vcombine.high %v1478_v13, %v1482_v14  ;;  %v1485_v17 = vld [vmem:[%s19507_s18 + $0x2380] sm:$0xff]  ;;  %v17590_v14 = vcombine.low %v1510_v61, %v1514_v62 }
 0x2cd   : > { %10083 = vmatprep.subr.bf16.mxu0 %v17517_v21  ;;  %10575 = vmatprep.subr.bf16.mxu1 %v17519_v22  ;;  %v1489_v21 = vld [vmem:[%s19507_s18 + $0x23a0] sm:$0xff]  ;;  %v1486_v22 = vld [vmem:[%s19507_s18 + $0x2388] sm:$0xff] }
 0x2ce   : > { %v17565_v27 = vcombine.high %v1485_v17, %v1489_v21  ;;  %v17564_v36 = vcombine.low %v1485_v17, %v1489_v21  ;;  %v17566_v37 = vcombine.low %v1486_v22, %v1490_v23  ;;  %v1526_v17 = vld [vmem:[%s19507_s18 + $0x24c8] sm:$0xff] }
 0x2cf   : > { %v1530_v21 = vld [vmem:[%s19507_s18 + $0x24e8] sm:$0xff] }
 0x2d0   : > { %10084 = vmatpush1.bf16.msra.mxu0 %v17516_v29  ;;  %10576 = vmatpush1.bf16.msra.mxu1 %v17518_v31  ;;  %v17567_v29 = vcombine.high %v1486_v22, %v1490_v23  ;;  %v1493_v31 = vld [vmem:[%s19507_s18 + $0x23c0] sm:$0xff] }
 0x2d1   : > { %10085 = vmatprep.subr.bf16.mxu0 %v17525_v32  ;;  %10577 = vmatprep.subr.bf16.mxu1 %v17527_v0  ;;  %v1497_v32 = vld [vmem:[%s19507_s18 + $0x23e0] sm:$0xff]  ;;  %v1494_v0 = vld [vmem:[%s19507_s18 + $0x23c8] sm:$0xff] }
 0x2d2   : > { %v17573_v40 = vcombine.high %v1493_v31, %v1497_v32  ;;  %v17572_v48 = vcombine.low %v1493_v31, %v1497_v32  ;;  %v17574_v50 = vcombine.low %v1494_v0, %v1498_v34  ;;  %v1534_v31 = vld [vmem:[%s19507_s18 + $0x2508] sm:$0xff] }
 0x2d3   : > { %v1538_v32 = vld [vmem:[%s19507_s18 + $0x2528] sm:$0xff] }
 0x2d4   : > { %10086 = vmatpush1.bf16.msra.mxu0 %v17524_v41  ;;  %10578 = vmatpush1.bf16.msra.mxu1 %v17526_v42  ;;  %v17575_v41 = vcombine.high %v1494_v0, %v1498_v34  ;;  %v1501_v42 = vld [vmem:[%s19507_s18 + $0x2400] sm:$0xff]  ;;  %v17606_v34 = vcombine.low %v1526_v17, %v1530_v21 }
 0x2d5   : > { %10087 = vmatprep.subr.bf16.mxu0 %v17533_v43  ;;  %10579 = vmatprep.subr.bf16.mxu1 %v17535_v46  ;;  %v1505_v43 = vld [vmem:[%s19507_s18 + $0x2420] sm:$0xff]  ;;  %v1502_v46 = vld [vmem:[%s19507_s18 + $0x2408] sm:$0xff] }
 0x2d6   : > { %v17581_v51 = vcombine.high %v1501_v42, %v1505_v43  ;;  %v17580_v63 = vcombine.low %v1501_v42, %v1505_v43  ;;  %v17582_v9 = vcombine.low %v1502_v46, %v1506_v47  ;;  %v1542_v42 = vld [vmem:[%s19507_s18 + $0x2548] sm:$0xff] }
 0x2d7   : > { %v1546_v43 = vld [vmem:[%s19507_s18 + $0x2568] sm:$0xff] }
 0x2d8   : > { %10088 = vmatpush1.bf16.msra.mxu0 %v17532_v53  ;;  %10580 = vmatpush1.bf16.msra.mxu1 %v17534_v55  ;;  %v17583_v53 = vcombine.high %v1502_v46, %v1506_v47  ;;  %v1509_v55 = vld [vmem:[%s19507_s18 + $0x2440] sm:$0xff]  ;;  %v17614_v47 = vcombine.low %v1534_v31, %v1538_v32 }
 0x2d9   : > { %10089 = vmatprep.subr.bf16.mxu0 %v17541_v56  ;;  %10581 = vmatprep.subr.bf16.mxu1 %v17543_v57  ;;  %v1513_v56 = vld [vmem:[%s19507_s18 + $0x2460] sm:$0xff]  ;;  %v20263_v57 = vrot.slane %v20178_v44, %v19559_v54  ;;  %v1518_v44 = vld [vmem:[%s19507_s18 + $0x2488] sm:$0xff] }
 0x2da   : > { %v17588_v13 = vcombine.low %v1509_v55, %v1513_v56  ;;  %v17598_v23 = vcombine.low %v1518_v44, %v1522_v12 }
 0x2dc   : > { %10090 = vmatpush1.bf16.msra.mxu0 %v17540_v3  ;;  %10582 = vmatpush1.bf16.msra.mxu1 %v17542_v4  ;;  %v17589_v3 = vcombine.high %v1509_v55, %v1513_v56  ;;  %v17591_v4 = vcombine.high %v1510_v61, %v1514_v62  ;;  %v1550_v55 = vld [vmem:[%s19507_s18 + $0x2588] sm:$0xff]  ;;  %v17622_v62 = vcombine.low %v1542_v42, %v1546_v43 }
 0x2dd   : > { %10091 = vmatprep.subr.bf16.mxu0 %v17549_v5  ;;  %10583 = vmatprep.subr.bf16.mxu1 %v17551_v30  ;;  %v1517_v5 = vld [vmem:[%s19507_s18 + $0x2480] sm:$0xff]  ;;  %v1554_v56 = vld [vmem:[%s19507_s18 + $0x25a8] sm:$0xff] }
 0x2de   : > { %v1521_v30 = vld [vmem:[%s19507_s18 + $0x24a0] sm:$0xff] }
 0x2df   : > { %v17596_v22 = vcombine.low %v1517_v5, %v1521_v30 }
 0x2e0   : > { %10092 = vmatpush1.bf16.msra.mxu0 %v17548_v15  ;;  %10584 = vmatpush1.bf16.msra.mxu1 %v17550_v16  ;;  %v17597_v15 = vcombine.high %v1517_v5, %v1521_v30  ;;  %v17599_v16 = vcombine.high %v1518_v44, %v1522_v12  ;;  %v1558_v5 = vld [vmem:[%s19507_s18 + $0x25c8] sm:$0xff]  ;;  %v17630_v12 = vcombine.low %v1550_v55, %v1554_v56 }
 0x2e1   : > { %10093 = vmatprep.subr.bf16.mxu0 %v17557_v2  ;;  %10585 = vmatprep.subr.bf16.mxu1 %v17559_v18  ;;  %v1525_v2 = vld [vmem:[%s19507_s18 + $0x24c0] sm:$0xff]  ;;  %v1562_v30 = vld [vmem:[%s19507_s18 + $0x25e8] sm:$0xff] }
 0x2e2   : > { %v1529_v18 = vld [vmem:[%s19507_s18 + $0x24e0] sm:$0xff] }
 0x2e3   : > { %v17604_v0 = vcombine.low %v1525_v2, %v1529_v18 }
 0x2e4   : > { %10094 = vmatpush1.bf16.msra.mxu0 %v17556_v25  ;;  %10586 = vmatpush1.bf16.msra.mxu1 %v17558_v26  ;;  %v17605_v25 = vcombine.high %v1525_v2, %v1529_v18  ;;  %v17607_v26 = vcombine.high %v1526_v17, %v1530_v21  ;;  %v1566_v2 = vld [vmem:[%s19507_s18 + $0x2608] sm:$0xff]  ;;  %v17638_v21 = vcombine.low %v1558_v5, %v1562_v30 }
 0x2e5   : > { %10095 = vmatprep.subr.bf16.mxu0 %v17565_v27  ;;  %10587 = vmatprep.subr.bf16.mxu1 %v17567_v29  ;;  %v1533_v27 = vld [vmem:[%s19507_s18 + $0x2500] sm:$0xff]  ;;  %v1570_v18 = vld [vmem:[%s19507_s18 + $0x2628] sm:$0xff] }
 0x2e6   : > { %v1537_v29 = vld [vmem:[%s19507_s18 + $0x2520] sm:$0xff] }
 0x2e7   : > { %v17612_v46 = vcombine.low %v1533_v27, %v1537_v29 }
 0x2e8   : > { %10096 = vmatpush1.bf16.msra.mxu0 %v17564_v36  ;;  %10588 = vmatpush1.bf16.msra.mxu1 %v17566_v37  ;;  %v17613_v36 = vcombine.high %v1533_v27, %v1537_v29  ;;  %v17615_v37 = vcombine.high %v1534_v31, %v1538_v32  ;;  %v1574_v27 = vld [vmem:[%s19507_s18 + $0x2648] sm:$0xff]  ;;  %v17646_v32 = vcombine.low %v1566_v2, %v1570_v18 }
 0x2e9   : > { %10097 = vmatprep.subr.bf16.mxu0 %v17573_v40  ;;  %10589 = vmatprep.subr.bf16.mxu1 %v17575_v41  ;;  %v1541_v40 = vld [vmem:[%s19507_s18 + $0x2540] sm:$0xff]  ;;  %v1578_v29 = vld [vmem:[%s19507_s18 + $0x2668] sm:$0xff] }
 0x2ea   : > { %v1545_v41 = vld [vmem:[%s19507_s18 + $0x2560] sm:$0xff] }
 0x2eb   : > { %v17620_v61 = vcombine.low %v1541_v40, %v1545_v41 }
 0x2ec   : > { %10098 = vmatpush1.bf16.msra.mxu0 %v17572_v48  ;;  %10590 = vmatpush1.bf16.msra.mxu1 %v17574_v50  ;;  %v17621_v48 = vcombine.high %v1541_v40, %v1545_v41  ;;  %v17623_v50 = vcombine.high %v1542_v42, %v1546_v43  ;;  %v1582_v40 = vld [vmem:[%s19507_s18 + $0x2688] sm:$0xff]  ;;  %v17654_v43 = vcombine.low %v1574_v27, %v1578_v29 }
 0x2ed   : > { %10108 = vmatprep.subr.bf16.mxu0 %v17581_v51  ;;  %10600 = vmatprep.subr.bf16.mxu1 %v17583_v53  ;;  %v1549_v51 = vld [vmem:[%s19507_s18 + $0x2580] sm:$0xff]  ;;  %v1586_v41 = vld [vmem:[%s19507_s18 + $0x26a8] sm:$0xff] }
 0x2ee   : > { %v1553_v53 = vld [vmem:[%s19507_s18 + $0x25a0] sm:$0xff] }
 0x2ef   : > { %10100 = vmatmul.mubr.bf16.vlgmr.msra.gmra.mrb[0].mxu0 %v20263_v57  ;;  %10592 = vmatmul.mubr.bf16.vlgmr.msra.gmra.mrb[0].mxu1 %v20263_v57  ;;  %v17628_v44 = vcombine.low %v1549_v51, %v1553_v53 }
 0x2f0   : > { %10109 = vmatpush1.bf16.msra.mxu0 %v17580_v63  ;;  %10601 = vmatpush1.bf16.msra.mxu1 %v17582_v9  ;;  %v17629_v63 = vcombine.high %v1549_v51, %v1553_v53  ;;  %v17631_v9 = vcombine.high %v1550_v55, %v1554_v56  ;;  %v1590_v51 = vld [vmem:[%s19507_s18 + $0x26c8] sm:$0xff]  ;;  %v17662_v56 = vcombine.low %v1582_v40, %v1586_v41 }
 0x2f1   : > { %10110 = vmatprep.subr.bf16.mxu0 %v17589_v3  ;;  %10602 = vmatprep.subr.bf16.mxu1 %v17591_v4  ;;  %v1557_v3 = vld [vmem:[%s19507_s18 + $0x25c0] sm:$0xff]  ;;  %v1594_v53 = vld [vmem:[%s19507_s18 + $0x26e8] sm:$0xff] }
 0x2f2   : > { %10140 = vmatprep.mubr.bf16.mxu0 %v20271_v11  ;;  %10632 = vmatprep.mubr.bf16.mxu1 %v20271_v11  ;;  %v1561_v4 = vld [vmem:[%s19507_s18 + $0x25e0] sm:$0xff] }
 0x2f3   : > { %v17636_v17 = vcombine.low %v1557_v3, %v1561_v4 }
 0x2f4   : > { %10111 = vmatpush1.bf16.msra.mxu0 %v17588_v13  ;;  %10603 = vmatpush1.bf16.msra.mxu1 %v17590_v14  ;;  %v17637_v13 = vcombine.high %v1557_v3, %v1561_v4  ;;  %v17639_v14 = vcombine.high %v1558_v5, %v1562_v30  ;;  %v1598_v3 = vld [vmem:[%s19507_s18 + $0x2708] sm:$0xff]  ;;  %v17670_v30 = vcombine.low %v1590_v51, %v1594_v53 }
 0x2f5   : > { %10112 = vmatprep.subr.bf16.mxu0 %v17597_v15  ;;  %10604 = vmatprep.subr.bf16.mxu1 %v17599_v16  ;;  %v1565_v15 = vld [vmem:[%s19507_s18 + $0x2600] sm:$0xff]  ;;  %v1602_v4 = vld [vmem:[%s19507_s18 + $0x2728] sm:$0xff] }
 0x2f6   : > { %v1569_v16 = vld [vmem:[%s19507_s18 + $0x2620] sm:$0xff] }
 0x2f7   : > { %v17644_v31 = vcombine.low %v1565_v15, %v1569_v16 }
 0x2f8   : > { %10113 = vmatpush1.bf16.msra.mxu0 %v17596_v22  ;;  %10605 = vmatpush1.bf16.msra.mxu1 %v17598_v23  ;;  %v17645_v22 = vcombine.high %v1565_v15, %v1569_v16  ;;  %v17647_v23 = vcombine.high %v1566_v2, %v1570_v18  ;;  %v1606_v15 = vld [vmem:[%s19507_s18 + $0x2748] sm:$0xff]  ;;  %v17678_v18 = vcombine.low %v1598_v3, %v1602_v4 }
 0x2f9   : > { %10114 = vmatprep.subr.bf16.mxu0 %v17605_v25  ;;  %10606 = vmatprep.subr.bf16.mxu1 %v17607_v26  ;;  %v1573_v25 = vld [vmem:[%s19507_s18 + $0x2640] sm:$0xff]  ;;  %v1610_v16 = vld [vmem:[%s19507_s18 + $0x2768] sm:$0xff] }
 0x2fa   : > { %v1577_v26 = vld [vmem:[%s19507_s18 + $0x2660] sm:$0xff] }
 0x2fb   : > { %v17652_v42 = vcombine.low %v1573_v25, %v1577_v26 }
 0x2fc   : > { %10115 = vmatpush1.bf16.msra.mxu0 %v17604_v0  ;;  %10607 = vmatpush1.bf16.msra.mxu1 %v17606_v34  ;;  %v17653_v0 = vcombine.high %v1573_v25, %v1577_v26  ;;  %v17655_v34 = vcombine.high %v1574_v27, %v1578_v29  ;;  %v1614_v25 = vld [vmem:[%s19507_s18 + $0x2788] sm:$0xff]  ;;  %v17686_v29 = vcombine.low %v1606_v15, %v1610_v16 }
 0x2fd   : > { %10116 = vmatprep.subr.bf16.mxu0 %v17613_v36  ;;  %10608 = vmatprep.subr.bf16.mxu1 %v17615_v37  ;;  %v1581_v36 = vld [vmem:[%s19507_s18 + $0x2680] sm:$0xff]  ;;  %v1618_v26 = vld [vmem:[%s19507_s18 + $0x27a8] sm:$0xff] }
 0x2fe   : > { %v1585_v37 = vld [vmem:[%s19507_s18 + $0x26a0] sm:$0xff] }
 0x2ff   : > { %v17660_v55 = vcombine.low %v1581_v36, %v1585_v37 }
 0x300   : > { %10117 = vmatpush1.bf16.msra.mxu0 %v17612_v46  ;;  %10609 = vmatpush1.bf16.msra.mxu1 %v17614_v47  ;;  %v17661_v46 = vcombine.high %v1581_v36, %v1585_v37  ;;  %v17663_v47 = vcombine.high %v1582_v40, %v1586_v41  ;;  %v1986_v36 = vcombine.high %v20172_v35, %v20172_v35  ;;  %v1622_v37 = vld [vmem:[%s19507_s18 + $0x27c8] sm:$0xff] }
 0x301   : > { %10118 = vmatprep.subr.bf16.mxu0 %v17621_v48  ;;  %10610 = vmatprep.subr.bf16.mxu1 %v17623_v50  ;;  %v1589_v48 = vld [vmem:[%s19507_s18 + $0x26c0] sm:$0xff]  ;;  %v1626_v40 = vld [vmem:[%s19507_s18 + $0x27e8] sm:$0xff] }
 0x302   : > { %v1593_v50 = vld [vmem:[%s19507_s18 + $0x26e0] sm:$0xff]  ;;  %v1630_v35 = vld [vmem:[%s19507_s18 + $0x2808] sm:$0xff] }
 0x303   : > { %v17668_v5 = vcombine.low %v1589_v48, %v1593_v50 }
 0x304   : > { %10119 = vmatpush1.bf16.msra.mxu0 %v17620_v61  ;;  %10611 = vmatpush1.bf16.msra.mxu1 %v17622_v62  ;;  %v17669_v61 = vcombine.high %v1589_v48, %v1593_v50  ;;  %v17671_v62 = vcombine.high %v1590_v51, %v1594_v53  ;;  %v1633_v48 = vld [vmem:[%s19507_s18 + $0x2820] sm:$0xff]  ;;  %v20336_v50 = vrot.slane %v1986_v36, %v19559_v54  ;;  %v1634_v51 = vld [vmem:[%s19507_s18 + $0x2828] sm:$0xff] }
 0x305   : > { %10120 = vmatprep.subr.bf16.mxu0 %v17629_v63  ;;  %10612 = vmatprep.subr.bf16.mxu1 %v17631_v9  ;;  %v1597_v63 = vld [vmem:[%s19507_s18 + $0x2700] sm:$0xff] }
 0x306   : > { %v1601_v9 = vld [vmem:[%s19507_s18 + $0x2720] sm:$0xff] }
 0x307   : > { %v17676_v2 = vcombine.low %v1597_v63, %v1601_v9  ;;  %v1661_v36 = vld [vmem:[%s19507_s18 + $0x2900] sm:$0xff] }
 0x308   : > { %10121 = vmatpush1.bf16.msra.mxu0 %v17628_v44  ;;  %10613 = vmatpush1.bf16.msra.mxu1 %v17630_v12  ;;  %v17677_v44 = vcombine.high %v1597_v63, %v1601_v9  ;;  %v17679_v12 = vcombine.high %v1598_v3, %v1602_v4  ;;  %v1641_v63 = vld [vmem:[%s19507_s18 + $0x2860] sm:$0xff]  ;;  %v2002_v9 = vcombine.high %v20336_v50, %v20336_v50  ;;  %v1638_v4 = vld [vmem:[%s19507_s18 + $0x2848] sm:$0xff] }
 0x309   : > { %10122 = vmatprep.subr.bf16.mxu0 %v17637_v13  ;;  %10614 = vmatprep.subr.bf16.mxu1 %v17639_v14  ;;  %v1605_v13 = vld [vmem:[%s19507_s18 + $0x2740] sm:$0xff]  ;;  %v20346_v3 = vcombine.high %v20263_v57, %v20263_v57 }
 0x30a   : > { %v1609_v14 = vld [vmem:[%s19507_s18 + $0x2760] sm:$0xff] }
 0x30b   : > { %v17684_v27 = vcombine.low %v1605_v13, %v1609_v14 }
 0x30c   : > { %10123 = vmatpush1.bf16.msra.mxu0 %v17636_v17  ;;  %10615 = vmatpush1.bf16.msra.mxu1 %v17638_v21  ;;  %v17685_v17 = vcombine.high %v1605_v13, %v1609_v14  ;;  %v17687_v21 = vcombine.high %v1606_v15, %v1610_v16  ;;  %v1645_v14 = vld [vmem:[%s19507_s18 + $0x2880] sm:$0xff]  ;;  %v20353_v16 = vrot.slane %v2002_v9, %v19559_v54 }
 0x30d   : > { %10124 = vmatprep.subr.bf16.mxu0 %v17645_v22  ;;  %10616 = vmatprep.subr.bf16.mxu1 %v17647_v23  ;;  %v1613_v22 = vld [vmem:[%s19507_s18 + $0x2780] sm:$0xff] }
 0x30e   : > { %v1617_v23 = vld [vmem:[%s19507_s18 + $0x27a0] sm:$0xff] }
 0x30f   : > { %v17692_v41 = vcombine.low %v1613_v22, %v1617_v23  ;;  %v1649_v15 = vld [vmem:[%s19507_s18 + $0x28a0] sm:$0xff] }
 0x310   : > { %10125 = vmatpush1.bf16.msra.mxu0 %v17644_v31  ;;  %10617 = vmatpush1.bf16.msra.mxu1 %v17646_v32  ;;  %v17693_v31 = vcombine.high %v1613_v22, %v1617_v23  ;;  %v17695_v32 = vcombine.high %v1614_v25, %v1618_v26  ;;  %v17725_v22 = vcombine.high %v1645_v14, %v1649_v15  ;;  %v1681_v9 = vld [vmem:[%s19507_s18 + $0x29a0] sm:$0xff] }
 0x311   : > { %10126 = vmatprep.subr.bf16.mxu0 %v17653_v0  ;;  %10618 = vmatprep.subr.bf16.mxu1 %v17655_v34  ;;  %v1621_v0 = vld [vmem:[%s19507_s18 + $0x27c0] sm:$0xff] }
 0x312   : > { %v1625_v34 = vld [vmem:[%s19507_s18 + $0x27e0] sm:$0xff] }
 0x313   : > { %v17700_v53 = vcombine.low %v1621_v0, %v1625_v34 }
 0x314   : > { %10127 = vmatpush1.bf16.msra.mxu0 %v17652_v42  ;;  %10619 = vmatpush1.bf16.msra.mxu1 %v17654_v43  ;;  %v17694_v42 = vcombine.low %v1614_v25, %v1618_v26  ;;  %v17701_v43 = vcombine.high %v1621_v0, %v1625_v34  ;;  %v1653_v25 = vld [vmem:[%s19507_s18 + $0x28c0] sm:$0xff] }
 0x315   : > { %10128 = vmatprep.subr.bf16.mxu0 %v17661_v46  ;;  %10620 = vmatprep.subr.bf16.mxu1 %v17663_v47  ;;  %v17703_v46 = vcombine.high %v1622_v37, %v1626_v40  ;;  %v1629_v47 = vld [vmem:[%s19507_s18 + $0x2800] sm:$0xff] }
 0x316   : > { %v1657_v26 = vld [vmem:[%s19507_s18 + $0x28e0] sm:$0xff] }
 0x317   : > { %v17733_v0 = vcombine.high %v1653_v25, %v1657_v26 }
 0x318   : > { %10129 = vmatpush1.bf16.msra.mxu0 %v17660_v55  ;;  %10621 = vmatpush1.bf16.msra.mxu1 %v17662_v56  ;;  %v17702_v55 = vcombine.low %v1622_v37, %v1626_v40  ;;  %v17709_v56 = vcombine.high %v1629_v47, %v1633_v48  ;;  %v1665_v37 = vld [vmem:[%s19507_s18 + $0x2920] sm:$0xff]  ;;  %v1662_v40 = vld [vmem:[%s19507_s18 + $0x2908] sm:$0xff] }
 0x319   : > { %10130 = vmatprep.subr.bf16.mxu0 %v17669_v61  ;;  %10622 = vmatprep.subr.bf16.mxu1 %v17671_v62  ;;  %v17711_v61 = vcombine.high %v1630_v35, %v1634_v51  ;;  %v1637_v62 = vld [vmem:[%s19507_s18 + $0x2840] sm:$0xff] }
 0x31c   : > { %10131 = vmatpush1.bf16.msra.mxu0 %v17668_v5  ;;  %10623 = vmatpush1.bf16.msra.mxu1 %v17670_v30  ;;  %v1642_v5 = vld [vmem:[%s19507_s18 + $0x2868] sm:$0xff]  ;;  %v17708_v30 = vcombine.low %v1629_v47, %v1633_v48  ;;  %v1669_v48 = vld [vmem:[%s19507_s18 + $0x2940] sm:$0xff] }
 0x31d   : > { %10132 = vmatprep.subr.bf16.mxu0 %v17677_v44  ;;  %10624 = vmatprep.subr.bf16.mxu1 %v17679_v12  ;;  %v17710_v44 = vcombine.low %v1630_v35, %v1634_v51  ;;  %v17717_v12 = vcombine.high %v1637_v62, %v1641_v63  ;;  %v17719_v13 = vcombine.high %v1638_v4, %v1642_v5  ;;  %v1673_v35 = vld [vmem:[%s19507_s18 + $0x2960] sm:$0xff]  ;;  %v1670_v51 = vld [vmem:[%s19507_s18 + $0x2948] sm:$0xff] }
 0x320   : > { %10133 = vmatpush1.bf16.msra.mxu0 %v17676_v2  ;;  %10625 = vmatpush1.bf16.msra.mxu1 %v17678_v18  ;;  %v1646_v2 = vld [vmem:[%s19507_s18 + $0x2888] sm:$0xff] }
 0x321   : > { %10134 = vmatprep.subr.bf16.mxu0 %v17685_v17  ;;  %10626 = vmatprep.subr.bf16.mxu1 %v17687_v21  ;;  %v1650_v18 = vld [vmem:[%s19507_s18 + $0x28a8] sm:$0xff]  ;;  %v17716_v17 = vcombine.low %v1637_v62, %v1641_v63  ;;  %v17718_v21 = vcombine.low %v1638_v4, %v1642_v5  ;;  %v1677_v63 = vld [vmem:[%s19507_s18 + $0x2980] sm:$0xff] }
 0x322   : > { %v17727_v23 = vcombine.high %v1646_v2, %v1650_v18  ;;  %v1678_v4 = vld [vmem:[%s19507_s18 + $0x2988] sm:$0xff] }
 0x323   : > { %v1682_v5 = vld [vmem:[%s19507_s18 + $0x29a8] sm:$0xff] }
 0x324   : > { %10135 = vmatpush1.bf16.msra.mxu0 %v17684_v27  ;;  %10627 = vmatpush1.bf16.msra.mxu1 %v17686_v29  ;;  %v1654_v27 = vld [vmem:[%s19507_s18 + $0x28c8] sm:$0xff] }
 0x325   : > { %10136 = vmatprep.subr.bf16.mxu0 %v17693_v31  ;;  %10628 = vmatprep.subr.bf16.mxu1 %v17695_v32  ;;  %v1658_v29 = vld [vmem:[%s19507_s18 + $0x28e8] sm:$0xff]  ;;  %v17724_v31 = vcombine.low %v1645_v14, %v1649_v15  ;;  %v17726_v32 = vcombine.low %v1646_v2, %v1650_v18  ;;  %v1685_v14 = vld [vmem:[%s19507_s18 + $0x29c0] sm:$0xff] }
 0x326   : > { %v17735_v34 = vcombine.high %v1654_v27, %v1658_v29  ;;  %v1689_v15 = vld [vmem:[%s19507_s18 + $0x29e0] sm:$0xff]  ;;  %v1686_v2 = vld [vmem:[%s19507_s18 + $0x29c8] sm:$0xff] }
 0x327   : > { %v1690_v18 = vld [vmem:[%s19507_s18 + $0x29e8] sm:$0xff] }
 0x328   : > { %10137 = vmatpush1.bf16.msra.mxu0 %v17692_v41  ;;  %10629 = vmatpush1.bf16.msra.mxu1 %v17694_v42  ;;  %v1666_v41 = vld [vmem:[%s19507_s18 + $0x2928] sm:$0xff]  ;;  %v17732_v42 = vcombine.low %v1653_v25, %v1657_v26  ;;  %v1693_v25 = vld [vmem:[%s19507_s18 + $0x2a00] sm:$0xff] }
 0x329   : > { %10138 = vmatprep.subr.bf16.mxu0 %v17701_v43  ;;  %10630 = vmatprep.subr.bf16.mxu1 %v17703_v46  ;;  %v17734_v43 = vcombine.low %v1654_v27, %v1658_v29  ;;  %v17741_v46 = vcombine.high %v1661_v36, %v1665_v37  ;;  %v17743_v47 = vcombine.high %v1662_v40, %v1666_v41  ;;  %v1697_v26 = vld [vmem:[%s19507_s18 + $0x2a20] sm:$0xff]  ;;  %v1694_v27 = vld [vmem:[%s19507_s18 + $0x2a08] sm:$0xff] }
 0x32a   : > { %v1698_v29 = vld [vmem:[%s19507_s18 + $0x2a28] sm:$0xff] }
 0x32c   : > { %10139 = vmatpush1.bf16.msra.mxu0 %v17700_v53  ;;  %10631 = vmatpush1.bf16.msra.mxu1 %v17702_v55  ;;  %v1674_v53 = vld [vmem:[%s19507_s18 + $0x2968] sm:$0xff]  ;;  %v17740_v55 = vcombine.low %v1661_v36, %v1665_v37  ;;  %v1701_v36 = vld [vmem:[%s19507_s18 + $0x2a40] sm:$0xff] }
 0x32d   : > { %10149 = vmatprep.subr.bf16.mxu0 %v17709_v56  ;;  %10641 = vmatprep.subr.bf16.mxu1 %v17711_v61  ;;  %v17742_v56 = vcombine.low %v1662_v40, %v1666_v41  ;;  %v17749_v61 = vcombine.high %v1669_v48, %v1673_v35  ;;  %v17751_v62 = vcombine.high %v1670_v51, %v1674_v53  ;;  %v1705_v37 = vld [vmem:[%s19507_s18 + $0x2a60] sm:$0xff]  ;;  %v1702_v40 = vld [vmem:[%s19507_s18 + $0x2a48] sm:$0xff] }
 0x32e   : > { %v1706_v41 = vld [vmem:[%s19507_s18 + $0x2a68] sm:$0xff] }
 0x32f   : > { %10141 = vmatmul.mubr.bf16.vlgmr.msra.gmra.mrb[0].mxu0 %v20346_v3  ;;  %10633 = vmatmul.mubr.bf16.vlgmr.msra.gmra.mrb[0].mxu1 %v20346_v3 }
 0x330   : > { %10150 = vmatpush1.bf16.msra.mxu0 %v17708_v30  ;;  %10642 = vmatpush1.bf16.msra.mxu1 %v17710_v44  ;;  %v17748_v30 = vcombine.low %v1669_v48, %v1673_v35  ;;  %v17750_v44 = vcombine.low %v1670_v51, %v1674_v53  ;;  %v1709_v48 = vld [vmem:[%s19507_s18 + $0x2a80] sm:$0xff]  ;;  %v1710_v51 = vld [vmem:[%s19507_s18 + $0x2a88] sm:$0xff] }
 0x331   : > { %10151 = vmatprep.subr.bf16.mxu0 %v17717_v12  ;;  %10643 = vmatprep.subr.bf16.mxu1 %v17719_v13  ;;  %v17757_v12 = vcombine.high %v1677_v63, %v1681_v9  ;;  %v17759_v13 = vcombine.high %v1678_v4, %v1682_v5  ;;  %v1713_v35 = vld [vmem:[%s19507_s18 + $0x2aa0] sm:$0xff]  ;;  %v1714_v53 = vld [vmem:[%s19507_s18 + $0x2aa8] sm:$0xff] }
 0x332   : > { %10181 = vmatprep.mubr.bf16.mxu0 %v20353_v16  ;;  %10673 = vmatprep.mubr.bf16.mxu1 %v20353_v16 }
 0x334   : > { %10152 = vmatpush1.bf16.msra.mxu0 %v17716_v17  ;;  %10644 = vmatpush1.bf16.msra.mxu1 %v17718_v21  ;;  %v17756_v17 = vcombine.low %v1677_v63, %v1681_v9  ;;  %v17758_v21 = vcombine.low %v1678_v4, %v1682_v5  ;;  %v1717_v63 = vld [vmem:[%s19507_s18 + $0x2ac0] sm:$0xff]  ;;  %v1718_v4 = vld [vmem:[%s19507_s18 + $0x2ac8] sm:$0xff] }
 0x335   : > { %10153 = vmatprep.subr.bf16.mxu0 %v17725_v22  ;;  %10645 = vmatprep.subr.bf16.mxu1 %v17727_v23  ;;  %v17765_v22 = vcombine.high %v1685_v14, %v1689_v15  ;;  %v17767_v23 = vcombine.high %v1686_v2, %v1690_v18  ;;  %v1721_v9 = vld [vmem:[%s19507_s18 + $0x2ae0] sm:$0xff]  ;;  %v1722_v5 = vld [vmem:[%s19507_s18 + $0x2ae8] sm:$0xff] }
 0x338   : > { %10154 = vmatpush1.bf16.msra.mxu0 %v17724_v31  ;;  %10646 = vmatpush1.bf16.msra.mxu1 %v17726_v32  ;;  %v17764_v31 = vcombine.low %v1685_v14, %v1689_v15  ;;  %v17766_v32 = vcombine.low %v1686_v2, %v1690_v18  ;;  %v1725_v14 = vld [vmem:[%s19507_s18 + $0x2b00] sm:$0xff]  ;;  %v1726_v2 = vld [vmem:[%s19507_s18 + $0x2b08] sm:$0xff] }
 0x339   : > { %10155 = vmatprep.subr.bf16.mxu0 %v17733_v0  ;;  %10647 = vmatprep.subr.bf16.mxu1 %v17735_v34  ;;  %v17773_v0 = vcombine.high %v1693_v25, %v1697_v26  ;;  %v17775_v34 = vcombine.high %v1694_v27, %v1698_v29  ;;  %v1729_v15 = vld [vmem:[%s19507_s18 + $0x2b20] sm:$0xff]  ;;  %v1730_v18 = vld [vmem:[%s19507_s18 + $0x2b28] sm:$0xff] }
 0x33c   : > { %10156 = vmatpush1.bf16.msra.mxu0 %v17732_v42  ;;  %10648 = vmatpush1.bf16.msra.mxu1 %v17734_v43  ;;  %v17772_v42 = vcombine.low %v1693_v25, %v1697_v26  ;;  %v17774_v43 = vcombine.low %v1694_v27, %v1698_v29  ;;  %v1733_v25 = vld [vmem:[%s19507_s18 + $0x2b40] sm:$0xff]  ;;  %v1734_v27 = vld [vmem:[%s19507_s18 + $0x2b48] sm:$0xff] }
 0x33d   : > { %10157 = vmatprep.subr.bf16.mxu0 %v17741_v46  ;;  %10649 = vmatprep.subr.bf16.mxu1 %v17743_v47  ;;  %v17781_v46 = vcombine.high %v1701_v36, %v1705_v37  ;;  %v17783_v47 = vcombine.high %v1702_v40, %v1706_v41  ;;  %v1737_v26 = vld [vmem:[%s19507_s18 + $0x2b60] sm:$0xff]  ;;  %v1738_v29 = vld [vmem:[%s19507_s18 + $0x2b68] sm:$0xff] }
 0x340   : > { %10158 = vmatpush1.bf16.msra.mxu0 %v17740_v55  ;;  %10650 = vmatpush1.bf16.msra.mxu1 %v17742_v56  ;;  %v17780_v55 = vcombine.low %v1701_v36, %v1705_v37  ;;  %v17782_v56 = vcombine.low %v1702_v40, %v1706_v41  ;;  %v1741_v36 = vld [vmem:[%s19507_s18 + $0x2b80] sm:$0xff]  ;;  %v1742_v40 = vld [vmem:[%s19507_s18 + $0x2b88] sm:$0xff] }
 0x341   : > { %10159 = vmatprep.subr.bf16.mxu0 %v17749_v61  ;;  %10651 = vmatprep.subr.bf16.mxu1 %v17751_v62  ;;  %v17789_v61 = vcombine.high %v1709_v48, %v1713_v35  ;;  %v17791_v62 = vcombine.high %v1710_v51, %v1714_v53  ;;  %v1745_v37 = vld [vmem:[%s19507_s18 + $0x2ba0] sm:$0xff]  ;;  %v1746_v41 = vld [vmem:[%s19507_s18 + $0x2ba8] sm:$0xff] }
 0x344   : > { %10160 = vmatpush1.bf16.msra.mxu0 %v17748_v30  ;;  %10652 = vmatpush1.bf16.msra.mxu1 %v17750_v44  ;;  %v17788_v30 = vcombine.low %v1709_v48, %v1713_v35  ;;  %v17790_v44 = vcombine.low %v1710_v51, %v1714_v53  ;;  %v1749_v48 = vld [vmem:[%s19507_s18 + $0x2bc0] sm:$0xff]  ;;  %v1750_v51 = vld [vmem:[%s19507_s18 + $0x2bc8] sm:$0xff] }
 0x345   : > { %10161 = vmatprep.subr.bf16.mxu0 %v17757_v12  ;;  %10653 = vmatprep.subr.bf16.mxu1 %v17759_v13  ;;  %v17797_v12 = vcombine.high %v1717_v63, %v1721_v9  ;;  %v17799_v13 = vcombine.high %v1718_v4, %v1722_v5  ;;  %v1753_v35 = vld [vmem:[%s19507_s18 + $0x2be0] sm:$0xff]  ;;  %v1754_v53 = vld [vmem:[%s19507_s18 + $0x2be8] sm:$0xff] }
 0x348   : > { %10162 = vmatpush1.bf16.msra.mxu0 %v17756_v17  ;;  %10654 = vmatpush1.bf16.msra.mxu1 %v17758_v21  ;;  %v17796_v17 = vcombine.low %v1717_v63, %v1721_v9  ;;  %v17798_v21 = vcombine.low %v1718_v4, %v1722_v5  ;;  %v1757_v63 = vld [vmem:[%s19507_s18 + $0x2c00] sm:$0xff]  ;;  %v1758_v4 = vld [vmem:[%s19507_s18 + $0x2c08] sm:$0xff] }
 0x349   : > { %10163 = vmatprep.subr.bf16.mxu0 %v17765_v22  ;;  %10655 = vmatprep.subr.bf16.mxu1 %v17767_v23  ;;  %v17805_v22 = vcombine.high %v1725_v14, %v1729_v15  ;;  %v17807_v23 = vcombine.high %v1726_v2, %v1730_v18  ;;  %v1761_v9 = vld [vmem:[%s19507_s18 + $0x2c20] sm:$0xff]  ;;  %v1762_v5 = vld [vmem:[%s19507_s18 + $0x2c28] sm:$0xff] }
 0x34c   : > { %10164 = vmatpush1.bf16.msra.mxu0 %v17764_v31  ;;  %10656 = vmatpush1.bf16.msra.mxu1 %v17766_v32  ;;  %v17804_v31 = vcombine.low %v1725_v14, %v1729_v15  ;;  %v17806_v32 = vcombine.low %v1726_v2, %v1730_v18  ;;  %v1765_v14 = vld [vmem:[%s19507_s18 + $0x2c40] sm:$0xff]  ;;  %v20421_v2 = vrot.slane %v20336_v50, %v19559_v54  ;;  %v1766_v18 = vld [vmem:[%s19507_s18 + $0x2c48] sm:$0xff] }
 0x34d   : > { %10165 = vmatprep.subr.bf16.mxu0 %v17773_v0  ;;  %10657 = vmatprep.subr.bf16.mxu1 %v17775_v34  ;;  %v17813_v0 = vcombine.high %v1733_v25, %v1737_v26  ;;  %v17815_v34 = vcombine.high %v1734_v27, %v1738_v29  ;;  %v1769_v15 = vld [vmem:[%s19507_s18 + $0x2c60] sm:$0xff]  ;;  %v1774_v54 = vld [vmem:[%s19507_s18 + $0x2c88] sm:$0xff] }
 0x34e   : > { %v1778_v50 = vld [vmem:[%s19507_s18 + $0x2ca8] sm:$0xff] }
 0x350   : > { %10166 = vmatpush1.bf16.msra.mxu0 %v17772_v42  ;;  %10658 = vmatpush1.bf16.msra.mxu1 %v17774_v43  ;;  %v17812_v42 = vcombine.low %v1733_v25, %v1737_v26  ;;  %v17814_v43 = vcombine.low %v1734_v27, %v1738_v29  ;;  %v1773_v26 = vld [vmem:[%s19507_s18 + $0x2c80] sm:$0xff]  ;;  %v20429_v29 = vcombine.high %v20353_v16, %v20353_v16 }
 0x351   : > { %10167 = vmatprep.subr.bf16.mxu0 %v17781_v46  ;;  %10659 = vmatprep.subr.bf16.mxu1 %v17783_v47  ;;  %v17821_v46 = vcombine.high %v1741_v36, %v1745_v37  ;;  %v17823_v47 = vcombine.high %v1742_v40, %v1746_v41  ;;  %v1777_v27 = vld [vmem:[%s19507_s18 + $0x2ca0] sm:$0xff] }
 0x354   : > { %10168 = vmatpush1.bf16.msra.mxu0 %v17780_v55  ;;  %10660 = vmatpush1.bf16.msra.mxu1 %v17782_v56  ;;  %v17820_v55 = vcombine.low %v1741_v36, %v1745_v37  ;;  %v17822_v56 = vcombine.low %v1742_v40, %v1746_v41  ;;  %v1781_v36 = vld [vmem:[%s19507_s18 + $0x2cc0] sm:$0xff]  ;;  %v1782_v40 = vld [vmem:[%s19507_s18 + $0x2cc8] sm:$0xff] }
 0x355   : > { %10169 = vmatprep.subr.bf16.mxu0 %v17789_v61  ;;  %10661 = vmatprep.subr.bf16.mxu1 %v17791_v62  ;;  %v17829_v61 = vcombine.high %v1749_v48, %v1753_v35  ;;  %v17831_v62 = vcombine.high %v1750_v51, %v1754_v53  ;;  %v1785_v37 = vld [vmem:[%s19507_s18 + $0x2ce0] sm:$0xff]  ;;  %v1786_v41 = vld [vmem:[%s19507_s18 + $0x2ce8] sm:$0xff] }
 0x358   : > { %10170 = vmatpush1.bf16.msra.mxu0 %v17788_v30  ;;  %10662 = vmatpush1.bf16.msra.mxu1 %v17790_v44  ;;  %v17828_v30 = vcombine.low %v1749_v48, %v1753_v35  ;;  %v17830_v44 = vcombine.low %v1750_v51, %v1754_v53  ;;  %v1789_v48 = vld [vmem:[%s19507_s18 + $0x2d00] sm:$0xff]  ;;  %v1790_v51 = vld [vmem:[%s19507_s18 + $0x2d08] sm:$0xff] }
 0x359   : > { %10171 = vmatprep.subr.bf16.mxu0 %v17797_v12  ;;  %10663 = vmatprep.subr.bf16.mxu1 %v17799_v13  ;;  %v17837_v12 = vcombine.high %v1757_v63, %v1761_v9  ;;  %v17839_v13 = vcombine.high %v1758_v4, %v1762_v5  ;;  %v1793_v35 = vld [vmem:[%s19507_s18 + $0x2d20] sm:$0xff]  ;;  %v1794_v53 = vld [vmem:[%s19507_s18 + $0x2d28] sm:$0xff] }
 0x35c   : > { %10172 = vmatpush1.bf16.msra.mxu0 %v17796_v17  ;;  %10664 = vmatpush1.bf16.msra.mxu1 %v17798_v21  ;;  %v1770_v17 = vld [vmem:[%s19507_s18 + $0x2c68] sm:$0xff]  ;;  %v17836_v21 = vcombine.low %v1757_v63, %v1761_v9  ;;  %v1797_v63 = vld [vmem:[%s19507_s18 + $0x2d40] sm:$0xff] }
 0x35d   : > { %10173 = vmatprep.subr.bf16.mxu0 %v17805_v22  ;;  %10665 = vmatprep.subr.bf16.mxu1 %v17807_v23  ;;  %v17838_v22 = vcombine.low %v1758_v4, %v1762_v5  ;;  %v17845_v23 = vcombine.high %v1765_v14, %v1769_v15  ;;  %v17847_v25 = vcombine.high %v1766_v18, %v1770_v17  ;;  %v1801_v9 = vld [vmem:[%s19507_s18 + $0x2d60] sm:$0xff]  ;;  %v1798_v4 = vld [vmem:[%s19507_s18 + $0x2d48] sm:$0xff] }
 0x35e   : > { %v1802_v5 = vld [vmem:[%s19507_s18 + $0x2d68] sm:$0xff] }
 0x360   : > { %10174 = vmatpush1.bf16.msra.mxu0 %v17804_v31  ;;  %10666 = vmatpush1.bf16.msra.mxu1 %v17806_v32  ;;  %v17844_v31 = vcombine.low %v1765_v14, %v1769_v15  ;;  %v17846_v32 = vcombine.low %v1766_v18, %v1770_v17  ;;  %v1805_v14 = vld [vmem:[%s19507_s18 + $0x2d80] sm:$0xff]  ;;  %v1806_v18 = vld [vmem:[%s19507_s18 + $0x2d88] sm:$0xff] }
 0x361   : > { %10175 = vmatprep.subr.bf16.mxu0 %v17813_v0  ;;  %10667 = vmatprep.subr.bf16.mxu1 %v17815_v34  ;;  %v17853_v0 = vcombine.high %v1773_v26, %v1777_v27  ;;  %v17855_v34 = vcombine.high %v1774_v54, %v1778_v50  ;;  %v1809_v15 = vld [vmem:[%s19507_s18 + $0x2da0] sm:$0xff]  ;;  %v1810_v17 = vld [vmem:[%s19507_s18 + $0x2da8] sm:$0xff] }
 0x364   : > { %10176 = vmatpush1.bf16.msra.mxu0 %v17812_v42  ;;  %10668 = vmatpush1.bf16.msra.mxu1 %v17814_v43  ;;  %v17852_v42 = vcombine.low %v1773_v26, %v1777_v27  ;;  %v17854_v43 = vcombine.low %v1774_v54, %v1778_v50  ;;  %v1813_v26 = vld [vmem:[%s19507_s18 + $0x2dc0] sm:$0xff]  ;;  %v1814_v54 = vld [vmem:[%s19507_s18 + $0x2dc8] sm:$0xff] }
 0x365   : > { %10177 = vmatprep.subr.bf16.mxu0 %v17821_v46  ;;  %10669 = vmatprep.subr.bf16.mxu1 %v17823_v47  ;;  %v17861_v46 = vcombine.high %v1781_v36, %v1785_v37  ;;  %v17863_v47 = vcombine.high %v1782_v40, %v1786_v41  ;;  %v1817_v27 = vld [vmem:[%s19507_s18 + $0x2de0] sm:$0xff]  ;;  %v1818_v50 = vld [vmem:[%s19507_s18 + $0x2de8] sm:$0xff] }
 0x368   : > { %10178 = vmatpush1.bf16.msra.mxu0 %v17820_v55  ;;  %10670 = vmatpush1.bf16.msra.mxu1 %v17822_v56  ;;  %v17860_v55 = vcombine.low %v1781_v36, %v1785_v37  ;;  %v17862_v56 = vcombine.low %v1782_v40, %v1786_v41  ;;  %v1821_v36 = vld [vmem:[%s19507_s18 + $0x2e00] sm:$0xff]  ;;  %v1822_v40 = vld [vmem:[%s19507_s18 + $0x2e08] sm:$0xff] }
 0x369   : > { %10179 = vmatprep.subr.bf16.mxu0 %v17829_v61  ;;  %10671 = vmatprep.subr.bf16.mxu1 %v17831_v62  ;;  %v17869_v61 = vcombine.high %v1789_v48, %v1793_v35  ;;  %v17871_v62 = vcombine.high %v1790_v51, %v1794_v53  ;;  %v1825_v37 = vld [vmem:[%s19507_s18 + $0x2e20] sm:$0xff]  ;;  %v1826_v41 = vld [vmem:[%s19507_s18 + $0x2e28] sm:$0xff] }
 0x36c   : > { %10180 = vmatpush1.bf16.msra.mxu0 %v17828_v30  ;;  %10672 = vmatpush1.bf16.msra.mxu1 %v17830_v44  ;;  %v17868_v30 = vcombine.low %v1789_v48, %v1793_v35  ;;  %v17870_v44 = vcombine.low %v1790_v51, %v1794_v53  ;;  %v1829_v48 = vld [vmem:[%s19507_s18 + $0x2e40] sm:$0xff]  ;;  %v1830_v51 = vld [vmem:[%s19507_s18 + $0x2e48] sm:$0xff] }
 0x36d   : > { %10190 = vmatprep.subr.bf16.mxu0 %v17837_v12  ;;  %10682 = vmatprep.subr.bf16.mxu1 %v17839_v13  ;;  %v17877_v12 = vcombine.high %v1797_v63, %v1801_v9  ;;  %v17879_v13 = vcombine.high %v1798_v4, %v1802_v5  ;;  %v1833_v35 = vld [vmem:[%s19507_s18 + $0x2e60] sm:$0xff]  ;;  %v1834_v53 = vld [vmem:[%s19507_s18 + $0x2e68] sm:$0xff] }
 0x36f   : > { %10182 = vmatmul.mubr.bf16.vlgmr.msra.gmra.mrb[0].mxu0 %v20421_v2  ;;  %10674 = vmatmul.mubr.bf16.vlgmr.msra.gmra.mrb[0].mxu1 %v20421_v2 }
 0x370   : > { %10191 = vmatpush1.bf16.msra.mxu0 %v17836_v21  ;;  %10683 = vmatpush1.bf16.msra.mxu1 %v17838_v22  ;;  %v17876_v21 = vcombine.low %v1797_v63, %v1801_v9  ;;  %v17878_v22 = vcombine.low %v1798_v4, %v1802_v5  ;;  %v1837_v63 = vld [vmem:[%s19507_s18 + $0x2e80] sm:$0xff]  ;;  %v1838_v4 = vld [vmem:[%s19507_s18 + $0x2e88] sm:$0xff] }
 0x371   : > { %10192 = vmatprep.subr.bf16.mxu0 %v17845_v23  ;;  %10684 = vmatprep.subr.bf16.mxu1 %v17847_v25  ;;  %v17885_v23 = vcombine.high %v1805_v14, %v1809_v15  ;;  %v17887_v25 = vcombine.high %v1806_v18, %v1810_v17  ;;  %v1841_v9 = vld [vmem:[%s19507_s18 + $0x2ea0] sm:$0xff]  ;;  %v1842_v5 = vld [vmem:[%s19507_s18 + $0x2ea8] sm:$0xff] }
 0x372   : > { %10222 = vmatprep.mubr.bf16.mxu0 %v20429_v29  ;;  %10714 = vmatprep.mubr.bf16.mxu1 %v20429_v29 }
 0x374   : > { %10193 = vmatpush1.bf16.msra.mxu0 %v17844_v31  ;;  %10685 = vmatpush1.bf16.msra.mxu1 %v17846_v32  ;;  %v17884_v31 = vcombine.low %v1805_v14, %v1809_v15  ;;  %v17886_v32 = vcombine.low %v1806_v18, %v1810_v17  ;;  %v1845_v14 = vld [vmem:[%s19507_s18 + $0x2ec0] sm:$0xff]  ;;  %v1846_v18 = vld [vmem:[%s19507_s18 + $0x2ec8] sm:$0xff] }
 0x375   : > { %10194 = vmatprep.subr.bf16.mxu0 %v17853_v0  ;;  %10686 = vmatprep.subr.bf16.mxu1 %v17855_v34  ;;  %v17893_v0 = vcombine.high %v1813_v26, %v1817_v27  ;;  %v17895_v34 = vcombine.high %v1814_v54, %v1818_v50  ;;  %v1849_v15 = vld [vmem:[%s19507_s18 + $0x2ee0] sm:$0xff]  ;;  %v1850_v17 = vld [vmem:[%s19507_s18 + $0x2ee8] sm:$0xff] }
 0x378   : > { %10195 = vmatpush1.bf16.msra.mxu0 %v17852_v42  ;;  %10687 = vmatpush1.bf16.msra.mxu1 %v17854_v43  ;;  %v17892_v42 = vcombine.low %v1813_v26, %v1817_v27  ;;  %v17894_v43 = vcombine.low %v1814_v54, %v1818_v50  ;;  %v1853_v26 = vld [vmem:[%s19507_s18 + $0x2f00] sm:$0xff]  ;;  %v1854_v54 = vld [vmem:[%s19507_s18 + $0x2f08] sm:$0xff] }
 0x379   : > { %10196 = vmatprep.subr.bf16.mxu0 %v17861_v46  ;;  %10688 = vmatprep.subr.bf16.mxu1 %v17863_v47  ;;  %v17901_v46 = vcombine.high %v1821_v36, %v1825_v37  ;;  %v17903_v47 = vcombine.high %v1822_v40, %v1826_v41  ;;  %v1857_v27 = vld [vmem:[%s19507_s18 + $0x2f20] sm:$0xff]  ;;  %v1858_v50 = vld [vmem:[%s19507_s18 + $0x2f28] sm:$0xff] }
 0x37c   : > { %10197 = vmatpush1.bf16.msra.mxu0 %v17860_v55  ;;  %10689 = vmatpush1.bf16.msra.mxu1 %v17862_v56  ;;  %v17900_v55 = vcombine.low %v1821_v36, %v1825_v37  ;;  %v17902_v56 = vcombine.low %v1822_v40, %v1826_v41  ;;  %v1861_v36 = vld [vmem:[%s19507_s18 + $0x2f40] sm:$0xff]  ;;  %v1862_v40 = vld [vmem:[%s19507_s18 + $0x2f48] sm:$0xff] }
 0x37d   : > { %10198 = vmatprep.subr.bf16.mxu0 %v17869_v61  ;;  %10690 = vmatprep.subr.bf16.mxu1 %v17871_v62  ;;  %v17909_v61 = vcombine.high %v1829_v48, %v1833_v35  ;;  %v17911_v62 = vcombine.high %v1830_v51, %v1834_v53  ;;  %v1865_v37 = vld [vmem:[%s19507_s18 + $0x2f60] sm:$0xff]  ;;  %v1866_v41 = vld [vmem:[%s19507_s18 + $0x2f68] sm:$0xff] }
 0x380   : > { %10199 = vmatpush1.bf16.msra.mxu0 %v17868_v30  ;;  %10691 = vmatpush1.bf16.msra.mxu1 %v17870_v44  ;;  %v17908_v30 = vcombine.low %v1829_v48, %v1833_v35  ;;  %v17910_v44 = vcombine.low %v1830_v51, %v1834_v53  ;;  %v1869_v48 = vld [vmem:[%s19507_s18 + $0x2f80] sm:$0xff]  ;;  %v1870_v51 = vld [vmem:[%s19507_s18 + $0x2f88] sm:$0xff] }
 0x381   : > { %10200 = vmatprep.subr.bf16.mxu0 %v17877_v12  ;;  %10692 = vmatprep.subr.bf16.mxu1 %v17879_v13  ;;  %v17917_v12 = vcombine.high %v1837_v63, %v1841_v9  ;;  %v17919_v13 = vcombine.high %v1838_v4, %v1842_v5  ;;  %v1873_v35 = vld [vmem:[%s19507_s18 + $0x2fa0] sm:$0xff]  ;;  %v1874_v53 = vld [vmem:[%s19507_s18 + $0x2fa8] sm:$0xff] }
 0x384   : > { %10201 = vmatpush1.bf16.msra.mxu0 %v17876_v21  ;;  %10693 = vmatpush1.bf16.msra.mxu1 %v17878_v22  ;;  %v17916_v21 = vcombine.low %v1837_v63, %v1841_v9  ;;  %v17918_v22 = vcombine.low %v1838_v4, %v1842_v5  ;;  %v1877_v63 = vld [vmem:[%s19507_s18 + $0x2fc0] sm:$0xff]  ;;  %v1878_v4 = vld [vmem:[%s19507_s18 + $0x2fc8] sm:$0xff] }
 0x385   : > { %10202 = vmatprep.subr.bf16.mxu0 %v17885_v23  ;;  %10694 = vmatprep.subr.bf16.mxu1 %v17887_v25  ;;  %v17925_v23 = vcombine.high %v1845_v14, %v1849_v15  ;;  %v17927_v25 = vcombine.high %v1846_v18, %v1850_v17  ;;  %v1881_v9 = vld [vmem:[%s19507_s18 + $0x2fe0] sm:$0xff]  ;;  %v1882_v5 = vld [vmem:[%s19507_s18 + $0x2fe8] sm:$0xff] }
 0x388   : > { %10203 = vmatpush1.bf16.msra.mxu0 %v17884_v31  ;;  %10695 = vmatpush1.bf16.msra.mxu1 %v17886_v32  ;;  %v17924_v31 = vcombine.low %v1845_v14, %v1849_v15  ;;  %v17926_v32 = vcombine.low %v1846_v18, %v1850_v17  ;;  %v351_v14 = vld [vmem:[%s19507_s18 + $0x10] sm:$0xff]  ;;  %v352_v18 = vld [vmem:[%s19507_s18 + $0x18] sm:$0xff] }
 0x389   : > { %10204 = vmatprep.subr.bf16.mxu0 %v17893_v0  ;;  %10696 = vmatprep.subr.bf16.mxu1 %v17895_v34  ;;  %v17933_v0 = vcombine.high %v1853_v26, %v1857_v27  ;;  %v17935_v34 = vcombine.high %v1854_v54, %v1858_v50  ;;  %v355_v15 = vld [vmem:[%s19507_s18 + $0x30] sm:$0xff]  ;;  %v356_v17 = vld [vmem:[%s19507_s18 + $0x38] sm:$0xff] }
 0x38c   : > { %10205 = vmatpush1.bf16.msra.mxu0 %v17892_v42  ;;  %10697 = vmatpush1.bf16.msra.mxu1 %v17894_v43  ;;  %v17932_v42 = vcombine.low %v1853_v26, %v1857_v27  ;;  %v17934_v43 = vcombine.low %v1854_v54, %v1858_v50  ;;  %v359_v26 = vld [vmem:[%s19507_s18 + $0x50] sm:$0xff]  ;;  %v20497_v54 = vcombine.high %v20421_v2, %v20421_v2  ;;  %v360_v50 = vld [vmem:[%s19507_s18 + $0x58] sm:$0xff] }
 0x38d   : > { %10206 = vmatprep.subr.bf16.mxu0 %v17901_v46  ;;  %10698 = vmatprep.subr.bf16.mxu1 %v17903_v47  ;;  %v17941_v46 = vcombine.high %v1861_v36, %v1865_v37  ;;  %v17943_v47 = vcombine.high %v1862_v40, %v1866_v41  ;;  %v363_v27 = vld [vmem:[%s19507_s18 + $0x70] sm:$0xff] }
 0x390   : > { %10207 = vmatpush1.bf16.msra.mxu0 %v17900_v55  ;;  %10699 = vmatpush1.bf16.msra.mxu1 %v17902_v56  ;;  %v17940_v55 = vcombine.low %v1861_v36, %v1865_v37  ;;  %v17942_v56 = vcombine.low %v1862_v40, %v1866_v41  ;;  %v367_v37 = vld [vmem:[%s19507_s18 + $0x90] sm:$0xff]  ;;  %v368_v41 = vld [vmem:[%s19507_s18 + $0x98] sm:$0xff] }
 0x391   : > { %10208 = vmatprep.subr.bf16.mxu0 %v17909_v61  ;;  %10700 = vmatprep.subr.bf16.mxu1 %v17911_v62  ;;  %v17949_v61 = vcombine.high %v1869_v48, %v1873_v35  ;;  %v17951_v62 = vcombine.high %v1870_v51, %v1874_v53  ;;  %v371_v40 = vld [vmem:[%s19507_s18 + $0xb0] sm:$0xff] }
 0x394   : > { %10209 = vmatpush1.bf16.msra.mxu0 %v17908_v30  ;;  %10701 = vmatpush1.bf16.msra.mxu1 %v17910_v44  ;;  %v17948_v30 = vcombine.low %v1869_v48, %v1873_v35  ;;  %v17950_v44 = vcombine.low %v1870_v51, %v1874_v53  ;;  %v375_v35 = vld [vmem:[%s19507_s18 + $0xd0] sm:$0xff]  ;;  %v376_v53 = vld [vmem:[%s19507_s18 + $0xd8] sm:$0xff] }
 0x395   : > { %10210 = vmatprep.subr.bf16.mxu0 %v17917_v12  ;;  %10702 = vmatprep.subr.bf16.mxu1 %v17919_v13  ;;  %v17957_v12 = vcombine.high %v1877_v63, %v1881_v9  ;;  %v17959_v13 = vcombine.high %v1878_v4, %v1882_v5  ;;  %v379_v51 = vld [vmem:[%s19507_s18 + $0xf0] sm:$0xff] }
 0x398   : > { %10211 = vmatpush1.bf16.msra.mxu0 %v17916_v21  ;;  %10703 = vmatpush1.bf16.msra.mxu1 %v17918_v22  ;;  %v17956_v21 = vcombine.low %v1877_v63, %v1881_v9  ;;  %v17958_v22 = vcombine.low %v1878_v4, %v1882_v5  ;;  %v383_v9 = vld [vmem:[%s19507_s18 + $0x110] sm:$0xff]  ;;  %v384_v5 = vld [vmem:[%s19507_s18 + $0x118] sm:$0xff] }
 0x399   : > { %10212 = vmatprep.subr.bf16.mxu0 %v17925_v23  ;;  %10704 = vmatprep.subr.bf16.mxu1 %v17927_v25  ;;  %v16433_v23 = vcombine.high %v351_v14, %v355_v15  ;;  %v16435_v25 = vcombine.high %v352_v18, %v356_v17  ;;  %v387_v4 = vld [vmem:[%s19507_s18 + $0x130] sm:$0xff] }
 0x39c   : > { %10213 = vmatpush1.bf16.msra.mxu0 %v17924_v31  ;;  %10705 = vmatpush1.bf16.msra.mxu1 %v17926_v32  ;;  %v364_v31 = vld [vmem:[%s19507_s18 + $0x78] sm:$0xff]  ;;  %v16432_v32 = vcombine.low %v351_v14, %v355_v15  ;;  %v391_v14 = vld [vmem:[%s19507_s18 + $0x150] sm:$0xff] }
 0x39d   : > { %10214 = vmatprep.subr.bf16.mxu0 %v17933_v0  ;;  %10706 = vmatprep.subr.bf16.mxu1 %v17935_v34  ;;  %v16434_v0 = vcombine.low %v352_v18, %v356_v17  ;;  %v16441_v34 = vcombine.high %v359_v26, %v363_v27  ;;  %v16443_v36 = vcombine.high %v360_v50, %v364_v31  ;;  %v395_v15 = vld [vmem:[%s19507_s18 + $0x170] sm:$0xff]  ;;  %v392_v18 = vld [vmem:[%s19507_s18 + $0x158] sm:$0xff] }
 0x39e   : > { %v396_v17 = vld [vmem:[%s19507_s18 + $0x178] sm:$0xff] }
 0x3a0   : > { %10215 = vmatpush1.bf16.msra.mxu0 %v17932_v42  ;;  %10707 = vmatpush1.bf16.msra.mxu1 %v17934_v43  ;;  %v372_v42 = vld [vmem:[%s19507_s18 + $0xb8] sm:$0xff]  ;;  %v16440_v43 = vcombine.low %v359_v26, %v363_v27  ;;  %v399_v26 = vld [vmem:[%s19507_s18 + $0x190] sm:$0xff] }
 0x3a1   : > { %10216 = vmatprep.subr.bf16.mxu0 %v17941_v46  ;;  %10708 = vmatprep.subr.bf16.mxu1 %v17943_v47  ;;  %v16442_v46 = vcombine.low %v360_v50, %v364_v31  ;;  %v16449_v47 = vcombine.high %v367_v37, %v371_v40  ;;  %v16451_v48 = vcombine.high %v368_v41, %v372_v42  ;;  %v403_v27 = vld [vmem:[%s19507_s18 + $0x1b0] sm:$0xff]  ;;  %v400_v50 = vld [vmem:[%s19507_s18 + $0x198] sm:$0xff] }
 0x3a2   : > { %v404_v31 = vld [vmem:[%s19507_s18 + $0x1b8] sm:$0xff] }
 0x3a4   : > { %10217 = vmatpush1.bf16.msra.mxu0 %v17940_v55  ;;  %10709 = vmatpush1.bf16.msra.mxu1 %v17942_v56  ;;  %v380_v55 = vld [vmem:[%s19507_s18 + $0xf8] sm:$0xff]  ;;  %v16448_v56 = vcombine.low %v367_v37, %v371_v40  ;;  %v407_v37 = vld [vmem:[%s19507_s18 + $0x1d0] sm:$0xff] }
 0x3a5   : > { %10218 = vmatprep.subr.bf16.mxu0 %v17949_v61  ;;  %10710 = vmatprep.subr.bf16.mxu1 %v17951_v62  ;;  %v16450_v61 = vcombine.low %v368_v41, %v372_v42  ;;  %v16457_v62 = vcombine.high %v375_v35, %v379_v51  ;;  %v16459_v63 = vcombine.high %v376_v53, %v380_v55  ;;  %v411_v40 = vld [vmem:[%s19507_s18 + $0x1f0] sm:$0xff]  ;;  %v408_v41 = vld [vmem:[%s19507_s18 + $0x1d8] sm:$0xff] }
 0x3a6   : > { %v412_v42 = vld [vmem:[%s19507_s18 + $0x1f8] sm:$0xff] }
 0x3a8   : > { %10219 = vmatpush1.bf16.msra.mxu0 %v17948_v30  ;;  %10711 = vmatpush1.bf16.msra.mxu1 %v17950_v44  ;;  %v388_v30 = vld [vmem:[%s19507_s18 + $0x138] sm:$0xff]  ;;  %v16456_v44 = vcombine.low %v375_v35, %v379_v51  ;;  %v415_v35 = vld [vmem:[%s19507_s18 + $0x210] sm:$0xff] }
 0x3a9   : > { %10220 = vmatprep.subr.bf16.mxu0 %v17957_v12  ;;  %10712 = vmatprep.subr.bf16.mxu1 %v17959_v13  ;;  %v16465_v12 = vcombine.high %v383_v9, %v387_v4  ;;  %v16467_v13 = vcombine.high %v384_v5, %v388_v30  ;;  %v419_v51 = vld [vmem:[%s19507_s18 + $0x230] sm:$0xff] }
 0x3ac   : > { %10221 = vmatpush1.bf16.msra.mxu0 %v17956_v21  ;;  %10713 = vmatpush1.bf16.msra.mxu1 %v17958_v22  ;;  %v16464_v21 = vcombine.low %v383_v9, %v387_v4  ;;  %v16466_v22 = vcombine.low %v384_v5, %v388_v30  ;;  %v423_v9 = vld [vmem:[%s19507_s18 + $0x250] sm:$0xff]  ;;  %v424_v5 = vld [vmem:[%s19507_s18 + $0x258] sm:$0xff] }
 0x3ad   : > { %10723 = vmatprep.subr.bf16.mxu0 %v16433_v23  ;;  %11215 = vmatprep.subr.bf16.mxu1 %v16435_v25  ;;  %v16473_v23 = vcombine.high %v391_v14, %v395_v15  ;;  %v16475_v25 = vcombine.high %v392_v18, %v396_v17  ;;  %v427_v4 = vld [vmem:[%s19507_s18 + $0x270] sm:$0xff]  ;;  %v428_v30 = vld [vmem:[%s19507_s18 + $0x278] sm:$0xff] }
 0x3af   : > { %10223 = vmatmul.mubr.bf16.vlgmr.msra.gmra.mrb[0].mxu0 %v20497_v54  ;;  %10715 = vmatmul.mubr.bf16.vlgmr.msra.gmra.mrb[0].mxu1 %v20497_v54 }
 0x3b0   : > { %10724 = vmatpush1.bf16.msra.mxu0 %v16432_v32  ;;  %11216 = vmatpush1.bf16.msra.mxu1 %v16434_v0  ;;  %v16472_v32 = vcombine.low %v391_v14, %v395_v15  ;;  %v16474_v0 = vcombine.low %v392_v18, %v396_v17  ;;  %v431_v14 = vld [vmem:[%s19507_s18 + $0x290] sm:$0xff]  ;;  %v432_v18 = vld [vmem:[%s19507_s18 + $0x298] sm:$0xff] }
 0x3b1   : > { %10725 = vmatprep.subr.bf16.mxu0 %v16441_v34  ;;  %11217 = vmatprep.subr.bf16.mxu1 %v16443_v36  ;;  %v16481_v34 = vcombine.high %v399_v26, %v403_v27  ;;  %v16483_v36 = vcombine.high %v400_v50, %v404_v31  ;;  %v435_v15 = vld [vmem:[%s19507_s18 + $0x2b0] sm:$0xff]  ;;  %v436_v17 = vld [vmem:[%s19507_s18 + $0x2b8] sm:$0xff] }
 0x3b2   : > { %10755 = vmatprep.mubr.bf16.mxu0 %v19581_v10  ;;  %11247 = vmatprep.mubr.bf16.mxu1 %v19581_v10  ;;  %v16458_v10 = vcombine.low %v376_v53, %v380_v55  ;;  %v416_v53 = vld [vmem:[%s19507_s18 + $0x218] sm:$0xff] }
 0x3b3   : > { %v420_v55 = vld [vmem:[%s19507_s18 + $0x238] sm:$0xff] }
 0x3b4   : > { %10726 = vmatpush1.bf16.msra.mxu0 %v16440_v43  ;;  %11218 = vmatpush1.bf16.msra.mxu1 %v16442_v46  ;;  %v16480_v43 = vcombine.low %v399_v26, %v403_v27  ;;  %v16482_v46 = vcombine.low %v400_v50, %v404_v31  ;;  %v439_v26 = vld [vmem:[%s19507_s18 + $0x2d0] sm:$0xff]  ;;  %v440_v50 = vld [vmem:[%s19507_s18 + $0x2d8] sm:$0xff] }
 0x3b5   : > { %10727 = vmatprep.subr.bf16.mxu0 %v16449_v47  ;;  %11219 = vmatprep.subr.bf16.mxu1 %v16451_v48  ;;  %v16489_v47 = vcombine.high %v407_v37, %v411_v40  ;;  %v16491_v48 = vcombine.high %v408_v41, %v412_v42  ;;  %v443_v27 = vld [vmem:[%s19507_s18 + $0x2f0] sm:$0xff]  ;;  %v444_v31 = vld [vmem:[%s19507_s18 + $0x2f8] sm:$0xff] }
 0x3b8   : > { %10728 = vmatpush1.bf16.msra.mxu0 %v16448_v56  ;;  %11220 = vmatpush1.bf16.msra.mxu1 %v16450_v61  ;;  %v16488_v56 = vcombine.low %v407_v37, %v411_v40  ;;  %v16490_v61 = vcombine.low %v408_v41, %v412_v42  ;;  %v447_v37 = vld [vmem:[%s19507_s18 + $0x310] sm:$0xff]  ;;  %v448_v41 = vld [vmem:[%s19507_s18 + $0x318] sm:$0xff] }
 0x3b9   : > { %10729 = vmatprep.subr.bf16.mxu0 %v16457_v62  ;;  %11221 = vmatprep.subr.bf16.mxu1 %v16459_v63  ;;  %v16497_v62 = vcombine.high %v415_v35, %v419_v51  ;;  %v16499_v63 = vcombine.high %v416_v53, %v420_v55  ;;  %v451_v40 = vld [vmem:[%s19507_s18 + $0x330] sm:$0xff]  ;;  %v452_v42 = vld [vmem:[%s19507_s18 + $0x338] sm:$0xff] }
 0x3bc   : > { %10730 = vmatpush1.bf16.msra.mxu0 %v16456_v44  ;;  %11222 = vmatpush1.bf16.msra.mxu1 %v16458_v10  ;;  %v16496_v44 = vcombine.low %v415_v35, %v419_v51  ;;  %v16498_v10 = vcombine.low %v416_v53, %v420_v55  ;;  %v455_v35 = vld [vmem:[%s19507_s18 + $0x350] sm:$0xff]  ;;  %v456_v53 = vld [vmem:[%s19507_s18 + $0x358] sm:$0xff] }
 0x3bd   : > { %10731 = vmatprep.subr.bf16.mxu0 %v16465_v12  ;;  %11223 = vmatprep.subr.bf16.mxu1 %v16467_v13  ;;  %v16505_v12 = vcombine.high %v423_v9, %v427_v4  ;;  %v16507_v13 = vcombine.high %v424_v5, %v428_v30  ;;  %v459_v51 = vld [vmem:[%s19507_s18 + $0x370] sm:$0xff]  ;;  %v460_v55 = vld [vmem:[%s19507_s18 + $0x378] sm:$0xff] }
 0x3c0   : > { %10732 = vmatpush1.bf16.msra.mxu0 %v16464_v21  ;;  %11224 = vmatpush1.bf16.msra.mxu1 %v16466_v22  ;;  %v16504_v21 = vcombine.low %v423_v9, %v427_v4  ;;  %v16506_v22 = vcombine.low %v424_v5, %v428_v30  ;;  %v463_v9 = vld [vmem:[%s19507_s18 + $0x390] sm:$0xff]  ;;  %v464_v5 = vld [vmem:[%s19507_s18 + $0x398] sm:$0xff] }
 0x3c1   : > { %10733 = vmatprep.subr.bf16.mxu0 %v16473_v23  ;;  %11225 = vmatprep.subr.bf16.mxu1 %v16475_v25  ;;  %v16513_v23 = vcombine.high %v431_v14, %v435_v15  ;;  %v16515_v25 = vcombine.high %v432_v18, %v436_v17  ;;  %v467_v4 = vld [vmem:[%s19507_s18 + $0x3b0] sm:$0xff]  ;;  %v468_v30 = vld [vmem:[%s19507_s18 + $0x3b8] sm:$0xff] }
 0x3c4   : > { %10734 = vmatpush1.bf16.msra.mxu0 %v16472_v32  ;;  %11226 = vmatpush1.bf16.msra.mxu1 %v16474_v0  ;;  %v16512_v32 = vcombine.low %v431_v14, %v435_v15  ;;  %v16514_v0 = vcombine.low %v432_v18, %v436_v17  ;;  %v471_v14 = vld [vmem:[%s19507_s18 + $0x3d0] sm:$0xff]  ;;  %v472_v18 = vld [vmem:[%s19507_s18 + $0x3d8] sm:$0xff] }
 0x3c5   : > { %10735 = vmatprep.subr.bf16.mxu0 %v16481_v34  ;;  %11227 = vmatprep.subr.bf16.mxu1 %v16483_v36  ;;  %v16521_v34 = vcombine.high %v439_v26, %v443_v27  ;;  %v16523_v36 = vcombine.high %v440_v50, %v444_v31  ;;  %v475_v15 = vld [vmem:[%s19507_s18 + $0x3f0] sm:$0xff]  ;;  %v476_v17 = vld [vmem:[%s19507_s18 + $0x3f8] sm:$0xff] }
 0x3c8   : > { %10736 = vmatpush1.bf16.msra.mxu0 %v16480_v43  ;;  %11228 = vmatpush1.bf16.msra.mxu1 %v16482_v46  ;;  %v16520_v43 = vcombine.low %v439_v26, %v443_v27  ;;  %v16522_v46 = vcombine.low %v440_v50, %v444_v31  ;;  %v479_v26 = vld [vmem:[%s19507_s18 + $0x410] sm:$0xff]  ;;  %v480_v50 = vld [vmem:[%s19507_s18 + $0x418] sm:$0xff] }
 0x3c9   : > { %10737 = vmatprep.subr.bf16.mxu0 %v16489_v47  ;;  %11229 = vmatprep.subr.bf16.mxu1 %v16491_v48  ;;  %v16529_v47 = vcombine.high %v447_v37, %v451_v40  ;;  %v16531_v48 = vcombine.high %v448_v41, %v452_v42  ;;  %v483_v27 = vld [vmem:[%s19507_s18 + $0x430] sm:$0xff]  ;;  %v484_v31 = vld [vmem:[%s19507_s18 + $0x438] sm:$0xff] }
 0x3cc   : > { %10738 = vmatpush1.bf16.msra.mxu0 %v16488_v56  ;;  %11230 = vmatpush1.bf16.msra.mxu1 %v16490_v61  ;;  %v16528_v56 = vcombine.low %v447_v37, %v451_v40  ;;  %v16530_v61 = vcombine.low %v448_v41, %v452_v42  ;;  %v487_v37 = vld [vmem:[%s19507_s18 + $0x450] sm:$0xff]  ;;  %v488_v41 = vld [vmem:[%s19507_s18 + $0x458] sm:$0xff] }
 0x3cd   : > { %10739 = vmatprep.subr.bf16.mxu0 %v16497_v62  ;;  %11231 = vmatprep.subr.bf16.mxu1 %v16499_v63  ;;  %v16537_v62 = vcombine.high %v455_v35, %v459_v51  ;;  %v16539_v63 = vcombine.high %v456_v53, %v460_v55  ;;  %v491_v40 = vld [vmem:[%s19507_s18 + $0x470] sm:$0xff]  ;;  %v492_v42 = vld [vmem:[%s19507_s18 + $0x478] sm:$0xff] }
 0x3d0   : > { %10740 = vmatpush1.bf16.msra.mxu0 %v16496_v44  ;;  %11232 = vmatpush1.bf16.msra.mxu1 %v16498_v10  ;;  %v16536_v44 = vcombine.low %v455_v35, %v459_v51  ;;  %v16538_v10 = vcombine.low %v456_v53, %v460_v55  ;;  %v495_v35 = vld [vmem:[%s19507_s18 + $0x490] sm:$0xff]  ;;  %v496_v53 = vld [vmem:[%s19507_s18 + $0x498] sm:$0xff] }
 0x3d1   : > { %10741 = vmatprep.subr.bf16.mxu0 %v16505_v12  ;;  %11233 = vmatprep.subr.bf16.mxu1 %v16507_v13  ;;  %v16545_v12 = vcombine.high %v463_v9, %v467_v4  ;;  %v16547_v13 = vcombine.high %v464_v5, %v468_v30  ;;  %v499_v51 = vld [vmem:[%s19507_s18 + $0x4b0] sm:$0xff]  ;;  %v500_v55 = vld [vmem:[%s19507_s18 + $0x4b8] sm:$0xff] }
 0x3d4   : > { %10742 = vmatpush1.bf16.msra.mxu0 %v16504_v21  ;;  %11234 = vmatpush1.bf16.msra.mxu1 %v16506_v22  ;;  %v16544_v21 = vcombine.low %v463_v9, %v467_v4  ;;  %v16546_v22 = vcombine.low %v464_v5, %v468_v30  ;;  %v503_v9 = vld [vmem:[%s19507_s18 + $0x4d0] sm:$0xff]  ;;  %v504_v5 = vld [vmem:[%s19507_s18 + $0x4d8] sm:$0xff] }
 0x3d5   : > { %10743 = vmatprep.subr.bf16.mxu0 %v16513_v23  ;;  %11235 = vmatprep.subr.bf16.mxu1 %v16515_v25  ;;  %v16553_v23 = vcombine.high %v471_v14, %v475_v15  ;;  %v16555_v25 = vcombine.high %v472_v18, %v476_v17  ;;  %v507_v4 = vld [vmem:[%s19507_s18 + $0x4f0] sm:$0xff]  ;;  %v508_v30 = vld [vmem:[%s19507_s18 + $0x4f8] sm:$0xff] }
 0x3d8   : > { %10744 = vmatpush1.bf16.msra.mxu0 %v16512_v32  ;;  %11236 = vmatpush1.bf16.msra.mxu1 %v16514_v0  ;;  %v16552_v32 = vcombine.low %v471_v14, %v475_v15  ;;  %v16554_v0 = vcombine.low %v472_v18, %v476_v17  ;;  %v515_v14 = vld [vmem:[%s19507_s18 + $0x530] sm:$0xff]  ;;  %v512_v15 = vld [vmem:[%s19507_s18 + $0x518] sm:$0xff]  ;;  %v16584_v17 = vcombine.low %v503_v9, %v507_v4 }
 0x3d9   : > { %10745 = vmatprep.subr.bf16.mxu0 %v16521_v34  ;;  %11237 = vmatprep.subr.bf16.mxu1 %v16523_v36  ;;  %v16561_v34 = vcombine.high %v479_v26, %v483_v27  ;;  %v16563_v36 = vcombine.high %v480_v50, %v484_v31  ;;  %v516_v18 = vld [vmem:[%s19507_s18 + $0x538] sm:$0xff] }
 0x3dc   : > { %10746 = vmatpush1.bf16.msra.mxu0 %v16520_v43  ;;  %11238 = vmatpush1.bf16.msra.mxu1 %v16522_v46  ;;  %v16560_v43 = vcombine.low %v479_v26, %v483_v27  ;;  %v16562_v46 = vcombine.low %v480_v50, %v484_v31  ;;  %v520_v26 = vld [vmem:[%s19507_s18 + $0x558] sm:$0xff]  ;;  %v16594_v31 = vcombine.low %v512_v15, %v516_v18 }
 0x3dd   : > { %10747 = vmatprep.subr.bf16.mxu0 %v16529_v47  ;;  %11239 = vmatprep.subr.bf16.mxu1 %v16531_v48  ;;  %v16569_v47 = vcombine.high %v487_v37, %v491_v40  ;;  %v16571_v48 = vcombine.high %v488_v41, %v492_v42  ;;  %v524_v27 = vld [vmem:[%s19507_s18 + $0x578] sm:$0xff] }
 0x3e0   : > { %10748 = vmatpush1.bf16.msra.mxu0 %v16528_v56  ;;  %11240 = vmatpush1.bf16.msra.mxu1 %v16530_v61  ;;  %v16568_v56 = vcombine.low %v487_v37, %v491_v40  ;;  %v16570_v61 = vcombine.low %v488_v41, %v492_v42  ;;  %v528_v37 = vld [vmem:[%s19507_s18 + $0x598] sm:$0xff]  ;;  %v16602_v42 = vcombine.low %v520_v26, %v524_v27 }
 0x3e1   : > { %10749 = vmatprep.subr.bf16.mxu0 %v16537_v62  ;;  %11241 = vmatprep.subr.bf16.mxu1 %v16539_v63  ;;  %v16577_v62 = vcombine.high %v495_v35, %v499_v51  ;;  %v16579_v63 = vcombine.high %v496_v53, %v500_v55  ;;  %v532_v40 = vld [vmem:[%s19507_s18 + $0x5b8] sm:$0xff] }
 0x3e4   : > { %10750 = vmatpush1.bf16.msra.mxu0 %v16536_v44  ;;  %11242 = vmatpush1.bf16.msra.mxu1 %v16538_v10  ;;  %v16578_v44 = vcombine.low %v496_v53, %v500_v55  ;;  %v16585_v10 = vcombine.high %v503_v9, %v507_v4  ;;  %v16610_v55 = vcombine.low %v528_v37, %v532_v40  ;;  %v544_v9 = vld [vmem:[%s19507_s18 + $0x618] sm:$0xff] }
 0x3e5   : > { %10751 = vmatprep.subr.bf16.mxu0 %v16545_v12  ;;  %11243 = vmatprep.subr.bf16.mxu1 %v16547_v13  ;;  %v16587_v12 = vcombine.high %v504_v5, %v508_v30  ;;  %v511_v13 = vld [vmem:[%s19507_s18 + $0x510] sm:$0xff]  ;;  %v548_v4 = vld [vmem:[%s19507_s18 + $0x638] sm:$0xff] }
 0x3e6   : > { %v16592_v50 = vcombine.low %v511_v13, %v515_v14 }
 0x3e8   : > { %10752 = vmatpush1.bf16.msra.mxu0 %v16544_v21  ;;  %11244 = vmatpush1.bf16.msra.mxu1 %v16546_v22  ;;  %v16593_v21 = vcombine.high %v511_v13, %v515_v14  ;;  %v16595_v22 = vcombine.high %v512_v15, %v516_v18  ;;  %v552_v13 = vld [vmem:[%s19507_s18 + $0x658] sm:$0xff]  ;;  %v16626_v18 = vcombine.low %v544_v9, %v548_v4 }
 0x3e9   : > { %10753 = vmatprep.subr.bf16.mxu0 %v16553_v23  ;;  %11245 = vmatprep.subr.bf16.mxu1 %v16555_v25  ;;  %v519_v23 = vld [vmem:[%s19507_s18 + $0x550] sm:$0xff]  ;;  %v556_v14 = vld [vmem:[%s19507_s18 + $0x678] sm:$0xff] }
 0x3ea   : > { %v523_v25 = vld [vmem:[%s19507_s18 + $0x570] sm:$0xff] }
 0x3eb   : > { %v16600_v41 = vcombine.low %v519_v23, %v523_v25 }
 0x3ec   : > { %10754 = vmatpush1.bf16.msra.mxu0 %v16552_v32  ;;  %11246 = vmatpush1.bf16.msra.mxu1 %v16554_v0  ;;  %v16601_v32 = vcombine.high %v519_v23, %v523_v25  ;;  %v16603_v0 = vcombine.high %v520_v26, %v524_v27  ;;  %v560_v23 = vld [vmem:[%s19507_s18 + $0x698] sm:$0xff]  ;;  %v16634_v27 = vcombine.low %v552_v13, %v556_v14 }
 0x3ed   : > { %10764 = vmatprep.subr.bf16.mxu0 %v16561_v34  ;;  %11256 = vmatprep.subr.bf16.mxu1 %v16563_v36  ;;  %v527_v34 = vld [vmem:[%s19507_s18 + $0x590] sm:$0xff]  ;;  %v564_v25 = vld [vmem:[%s19507_s18 + $0x6b8] sm:$0xff] }
 0x3ee   : > { %v531_v36 = vld [vmem:[%s19507_s18 + $0x5b0] sm:$0xff] }
 0x3ef   : > { %10756 = vmatmul.mubr.bf16.vlgmr.msra.gmra.mrb[4].mxu0 %v19623_v24  ;;  %11248 = vmatmul.mubr.bf16.vlgmr.msra.gmra.mrb[4].mxu1 %v19623_v24  ;;  %v16576_v24 = vcombine.low %v495_v35, %v499_v51  ;;  %v536_v35 = vld [vmem:[%s19507_s18 + $0x5d8] sm:$0xff]  ;;  %v16608_v53 = vcombine.low %v527_v34, %v531_v36 }
 0x3f0   : > { %10765 = vmatpush1.bf16.msra.mxu0 %v16560_v43  ;;  %11257 = vmatpush1.bf16.msra.mxu1 %v16562_v46  ;;  %v16609_v43 = vcombine.high %v527_v34, %v531_v36  ;;  %v16611_v46 = vcombine.high %v528_v37, %v532_v40  ;;  %v540_v51 = vld [vmem:[%s19507_s18 + $0x5f8] sm:$0xff]  ;;  %v16642_v40 = vcombine.low %v560_v23, %v564_v25 }
 0x3f1   : > { %10766 = vmatprep.subr.bf16.mxu0 %v16569_v47  ;;  %11258 = vmatprep.subr.bf16.mxu1 %v16571_v48  ;;  %v535_v47 = vld [vmem:[%s19507_s18 + $0x5d0] sm:$0xff]  ;;  %v568_v34 = vld [vmem:[%s19507_s18 + $0x6d8] sm:$0xff] }
 0x3f2   : > { %10796 = vmatprep.mubr.bf16.mxu0 %v19631_v33  ;;  %11288 = vmatprep.mubr.bf16.mxu1 %v19631_v33  ;;  %v16586_v33 = vcombine.low %v504_v5, %v508_v30  ;;  %v539_v48 = vld [vmem:[%s19507_s18 + $0x5f0] sm:$0xff]  ;;  %v16618_v30 = vcombine.low %v536_v35, %v540_v51  ;;  %v572_v36 = vld [vmem:[%s19507_s18 + $0x6f8] sm:$0xff] }
 0x3f3   : > { %v16616_v5 = vcombine.low %v535_v47, %v539_v48 }
 0x3f4   : > { %10767 = vmatpush1.bf16.msra.mxu0 %v16568_v56  ;;  %11259 = vmatpush1.bf16.msra.mxu1 %v16570_v61  ;;  %v16617_v56 = vcombine.high %v535_v47, %v539_v48  ;;  %v16619_v61 = vcombine.high %v536_v35, %v540_v51  ;;  %v576_v47 = vld [vmem:[%s19507_s18 + $0x718] sm:$0xff]  ;;  %v16650_v51 = vcombine.low %v568_v34, %v572_v36 }
 0x3f5   : > { %10768 = vmatprep.subr.bf16.mxu0 %v16577_v62  ;;  %11260 = vmatprep.subr.bf16.mxu1 %v16579_v63  ;;  %v543_v62 = vld [vmem:[%s19507_s18 + $0x610] sm:$0xff]  ;;  %v580_v48 = vld [vmem:[%s19507_s18 + $0x738] sm:$0xff] }
 0x3f6   : > { %v547_v63 = vld [vmem:[%s19507_s18 + $0x630] sm:$0xff] }
 0x3f7   : > { %v16624_v15 = vcombine.low %v543_v62, %v547_v63 }
 0x3f8   : > { %10769 = vmatpush1.bf16.msra.mxu0 %v16576_v24  ;;  %11261 = vmatpush1.bf16.msra.mxu1 %v16578_v44  ;;  %v16625_v24 = vcombine.high %v543_v62, %v547_v63  ;;  %v16627_v44 = vcombine.high %v544_v9, %v548_v4  ;;  %v584_v62 = vld [vmem:[%s19507_s18 + $0x758] sm:$0xff]  ;;  %v16658_v4 = vcombine.low %v576_v47, %v580_v48 }
 0x3f9   : > { %10770 = vmatprep.subr.bf16.mxu0 %v16585_v10  ;;  %11262 = vmatprep.subr.bf16.mxu1 %v16587_v12  ;;  %v551_v10 = vld [vmem:[%s19507_s18 + $0x650] sm:$0xff]  ;;  %v588_v63 = vld [vmem:[%s19507_s18 + $0x778] sm:$0xff] }
 0x3fa   : > { %v555_v12 = vld [vmem:[%s19507_s18 + $0x670] sm:$0xff] }
 0x3fb   : > { %v16632_v26 = vcombine.low %v551_v10, %v555_v12 }
 0x3fc   : > { %10771 = vmatpush1.bf16.msra.mxu0 %v16584_v17  ;;  %11263 = vmatpush1.bf16.msra.mxu1 %v16586_v33  ;;  %v16633_v17 = vcombine.high %v551_v10, %v555_v12  ;;  %v16635_v33 = vcombine.high %v552_v13, %v556_v14  ;;  %v592_v10 = vld [vmem:[%s19507_s18 + $0x798] sm:$0xff]  ;;  %v16666_v14 = vcombine.low %v584_v62, %v588_v63 }
 0x3fd   : > { %10772 = vmatprep.subr.bf16.mxu0 %v16593_v21  ;;  %11264 = vmatprep.subr.bf16.mxu1 %v16595_v22  ;;  %v559_v21 = vld [vmem:[%s19507_s18 + $0x690] sm:$0xff]  ;;  %v596_v12 = vld [vmem:[%s19507_s18 + $0x7b8] sm:$0xff] }
 0x3fe   : > { %v563_v22 = vld [vmem:[%s19507_s18 + $0x6b0] sm:$0xff] }
 0x3ff   : > { %v16640_v37 = vcombine.low %v559_v21, %v563_v22 }
 0x400   : > { %10773 = vmatpush1.bf16.msra.mxu0 %v16592_v50  ;;  %11265 = vmatpush1.bf16.msra.mxu1 %v16594_v31  ;;  %v16641_v50 = vcombine.high %v559_v21, %v563_v22  ;;  %v16643_v31 = vcombine.high %v560_v23, %v564_v25  ;;  %v600_v21 = vld [vmem:[%s19507_s18 + $0x7d8] sm:$0xff]  ;;  %v16674_v25 = vcombine.low %v592_v10, %v596_v12 }
 0x401   : > { %10774 = vmatprep.subr.bf16.mxu0 %v16601_v32  ;;  %11266 = vmatprep.subr.bf16.mxu1 %v16603_v0  ;;  %v567_v32 = vld [vmem:[%s19507_s18 + $0x6d0] sm:$0xff]  ;;  %v604_v22 = vld [vmem:[%s19507_s18 + $0x7f8] sm:$0xff] }
 0x402   : > { %v571_v0 = vld [vmem:[%s19507_s18 + $0x6f0] sm:$0xff] }
 0x403   : > { %v16648_v35 = vcombine.low %v567_v32, %v571_v0 }
 0x404   : > { %10775 = vmatpush1.bf16.msra.mxu0 %v16600_v41  ;;  %11267 = vmatpush1.bf16.msra.mxu1 %v16602_v42  ;;  %v16649_v41 = vcombine.high %v567_v32, %v571_v0  ;;  %v16651_v42 = vcombine.high %v568_v34, %v572_v36  ;;  %v608_v32 = vld [vmem:[%s19507_s18 + $0x818] sm:$0xff]  ;;  %v16682_v36 = vcombine.low %v600_v21, %v604_v22 }
 0x405   : > { %10776 = vmatprep.subr.bf16.mxu0 %v16609_v43  ;;  %11268 = vmatprep.subr.bf16.mxu1 %v16611_v46  ;;  %v575_v43 = vld [vmem:[%s19507_s18 + $0x710] sm:$0xff]  ;;  %v612_v0 = vld [vmem:[%s19507_s18 + $0x838] sm:$0xff] }
 0x406   : > { %v579_v46 = vld [vmem:[%s19507_s18 + $0x730] sm:$0xff] }
 0x407   : > { %v16656_v9 = vcombine.low %v575_v43, %v579_v46 }
 0x408   : > { %10777 = vmatpush1.bf16.msra.mxu0 %v16608_v53  ;;  %11269 = vmatpush1.bf16.msra.mxu1 %v16610_v55  ;;  %v16657_v53 = vcombine.high %v575_v43, %v579_v46  ;;  %v16659_v55 = vcombine.high %v576_v47, %v580_v48  ;;  %v616_v43 = vld [vmem:[%s19507_s18 + $0x858] sm:$0xff]  ;;  %v16690_v48 = vcombine.low %v608_v32, %v612_v0 }
 0x409   : > { %10778 = vmatprep.subr.bf16.mxu0 %v16617_v56  ;;  %11270 = vmatprep.subr.bf16.mxu1 %v16619_v61  ;;  %v583_v56 = vld [vmem:[%s19507_s18 + $0x750] sm:$0xff]  ;;  %v620_v46 = vld [vmem:[%s19507_s18 + $0x878] sm:$0xff] }
 0x40a   : > { %v587_v61 = vld [vmem:[%s19507_s18 + $0x770] sm:$0xff] }
 0x40b   : > { %v16664_v13 = vcombine.low %v583_v56, %v587_v61 }
 0x40c   : > { %10779 = vmatpush1.bf16.msra.mxu0 %v16616_v5  ;;  %11271 = vmatpush1.bf16.msra.mxu1 %v16618_v30  ;;  %v16665_v5 = vcombine.high %v583_v56, %v587_v61  ;;  %v16667_v30 = vcombine.high %v584_v62, %v588_v63  ;;  %v624_v56 = vld [vmem:[%s19507_s18 + $0x898] sm:$0xff]  ;;  %v16698_v63 = vcombine.low %v616_v43, %v620_v46 }
 0x40d   : > { %10780 = vmatprep.subr.bf16.mxu0 %v16625_v24  ;;  %11272 = vmatprep.subr.bf16.mxu1 %v16627_v44  ;;  %v591_v24 = vld [vmem:[%s19507_s18 + $0x790] sm:$0xff]  ;;  %v628_v61 = vld [vmem:[%s19507_s18 + $0x8b8] sm:$0xff] }
 0x40e   : > { %v595_v44 = vld [vmem:[%s19507_s18 + $0x7b0] sm:$0xff] }
 0x40f   : > { %v16672_v23 = vcombine.low %v591_v24, %v595_v44 }
 0x410   : > { %10781 = vmatpush1.bf16.msra.mxu0 %v16624_v15  ;;  %11273 = vmatpush1.bf16.msra.mxu1 %v16626_v18  ;;  %v16673_v15 = vcombine.high %v591_v24, %v595_v44  ;;  %v16675_v18 = vcombine.high %v592_v10, %v596_v12  ;;  %v632_v24 = vld [vmem:[%s19507_s18 + $0x8d8] sm:$0xff]  ;;  %v16706_v10 = vcombine.low %v624_v56, %v628_v61 }
 0x411   : > { %10782 = vmatprep.subr.bf16.mxu0 %v16633_v17  ;;  %11274 = vmatprep.subr.bf16.mxu1 %v16635_v33  ;;  %v599_v17 = vld [vmem:[%s19507_s18 + $0x7d0] sm:$0xff]  ;;  %v636_v44 = vld [vmem:[%s19507_s18 + $0x8f8] sm:$0xff] }
 0x412   : > { %v603_v33 = vld [vmem:[%s19507_s18 + $0x7f0] sm:$0xff] }
 0x413   : > { %v16680_v34 = vcombine.low %v599_v17, %v603_v33 }
 0x414   : > { %10783 = vmatpush1.bf16.msra.mxu0 %v16632_v26  ;;  %11275 = vmatpush1.bf16.msra.mxu1 %v16634_v27  ;;  %v16681_v26 = vcombine.high %v599_v17, %v603_v33  ;;  %v16683_v27 = vcombine.high %v600_v21, %v604_v22  ;;  %v644_v17 = vld [vmem:[%s19507_s18 + $0x938] sm:$0xff] }
 0x415   : > { %10784 = vmatprep.subr.bf16.mxu0 %v16641_v50  ;;  %11276 = vmatprep.subr.bf16.mxu1 %v16643_v31  ;;  %v607_v50 = vld [vmem:[%s19507_s18 + $0x810] sm:$0xff] }
 0x416   : > { %v611_v31 = vld [vmem:[%s19507_s18 + $0x830] sm:$0xff] }
 0x417   : > { %v16688_v47 = vcombine.low %v607_v50, %v611_v31 }
 0x418   : > { %10785 = vmatpush1.bf16.msra.mxu0 %v16640_v37  ;;  %11277 = vmatpush1.bf16.msra.mxu1 %v16642_v40  ;;  %v16689_v37 = vcombine.high %v607_v50, %v611_v31  ;;  %v16691_v40 = vcombine.high %v608_v32, %v612_v0 }
 0x419   : > { %10786 = vmatprep.subr.bf16.mxu0 %v16649_v41  ;;  %11278 = vmatprep.subr.bf16.mxu1 %v16651_v42  ;;  %v615_v41 = vld [vmem:[%s19507_s18 + $0x850] sm:$0xff] }
 0x41a   : > { %v619_v42 = vld [vmem:[%s19507_s18 + $0x870] sm:$0xff] }
 0x41b   : > { %v16696_v62 = vcombine.low %v615_v41, %v619_v42 }
 0x41c   : > { %10787 = vmatpush1.bf16.msra.mxu0 %v16648_v35  ;;  %11279 = vmatpush1.bf16.msra.mxu1 %v16650_v51  ;;  %v16697_v35 = vcombine.high %v615_v41, %v619_v42  ;;  %v16699_v51 = vcombine.high %v616_v43, %v620_v46 }
 0x41d   : > { %10788 = vmatprep.subr.bf16.mxu0 %v16657_v53  ;;  %11280 = vmatprep.subr.bf16.mxu1 %v16659_v55  ;;  %v623_v53 = vld [vmem:[%s19507_s18 + $0x890] sm:$0xff] }
 0x41e   : > { %v627_v55 = vld [vmem:[%s19507_s18 + $0x8b0] sm:$0xff] }
 0x420   : > { %10789 = vmatpush1.bf16.msra.mxu0 %v16656_v9  ;;  %11281 = vmatpush1.bf16.msra.mxu1 %v16658_v4  ;;  %v16705_v9 = vcombine.high %v623_v53, %v627_v55  ;;  %v16707_v4 = vcombine.high %v624_v56, %v628_v61 }
 0x421   : > { %10790 = vmatprep.subr.bf16.mxu0 %v16665_v5  ;;  %11282 = vmatprep.subr.bf16.mxu1 %v16667_v30  ;;  %v631_v5 = vld [vmem:[%s19507_s18 + $0x8d0] sm:$0xff] }
 0x422   : > { %v635_v30 = vld [vmem:[%s19507_s18 + $0x8f0] sm:$0xff] }
 0x423   : > { %v16713_v12 = vcombine.high %v631_v5, %v635_v30  ;;  %v16712_v33 = vcombine.low %v631_v5, %v635_v30 }
 0x424   : > { %10791 = vmatpush1.bf16.msra.mxu0 %v16664_v13  ;;  %11283 = vmatpush1.bf16.msra.mxu1 %v16666_v14  ;;  %v16715_v13 = vcombine.high %v632_v24, %v636_v44  ;;  %v639_v14 = vld [vmem:[%s19507_s18 + $0x910] sm:$0xff] }
 0x425   : > { %10792 = vmatprep.subr.bf16.mxu0 %v16673_v15  ;;  %11284 = vmatprep.subr.bf16.mxu1 %v16675_v18  ;;  %v643_v15 = vld [vmem:[%s19507_s18 + $0x930] sm:$0xff]  ;;  %v640_v18 = vld [vmem:[%s19507_s18 + $0x918] sm:$0xff] }
 0x426   : > { %v16721_v21 = vcombine.high %v639_v14, %v643_v15  ;;  %v16723_v22 = vcombine.high %v640_v18, %v644_v17  ;;  %v16720_v50 = vcombine.low %v639_v14, %v643_v15  ;;  %v16722_v31 = vcombine.low %v640_v18, %v644_v17 }
 0x428   : > { %10793 = vmatpush1.bf16.msra.mxu0 %v16672_v23  ;;  %11285 = vmatpush1.bf16.msra.mxu1 %v16674_v25  ;;  %v647_v23 = vld [vmem:[%s19507_s18 + $0x950] sm:$0xff] }
 0x429   : > { %10794 = vmatprep.subr.bf16.mxu0 %v16681_v26  ;;  %11286 = vmatprep.subr.bf16.mxu1 %v16683_v27  ;;  %v651_v25 = vld [vmem:[%s19507_s18 + $0x970] sm:$0xff]  ;;  %v648_v26 = vld [vmem:[%s19507_s18 + $0x958] sm:$0xff] }
 0x42a   : > { %v652_v27 = vld [vmem:[%s19507_s18 + $0x978] sm:$0xff]  ;;  %v16729_v32 = vcombine.high %v647_v23, %v651_v25  ;;  %v16728_v41 = vcombine.low %v647_v23, %v651_v25 }
 0x42b   : > { %v16731_v0 = vcombine.high %v648_v26, %v652_v27  ;;  %v16730_v42 = vcombine.low %v648_v26, %v652_v27 }
 0x42c   : > { %10795 = vmatpush1.bf16.msra.mxu0 %v16680_v34  ;;  %11287 = vmatpush1.bf16.msra.mxu1 %v16682_v36  ;;  %v655_v34 = vld [vmem:[%s19507_s18 + $0x990] sm:$0xff] }
 0x42d   : > { %10805 = vmatprep.subr.bf16.mxu0 %v16689_v37  ;;  %11297 = vmatprep.subr.bf16.mxu1 %v16691_v40  ;;  %v659_v36 = vld [vmem:[%s19507_s18 + $0x9b0] sm:$0xff]  ;;  %v656_v37 = vld [vmem:[%s19507_s18 + $0x998] sm:$0xff] }
 0x42e   : > { %v660_v40 = vld [vmem:[%s19507_s18 + $0x9b8] sm:$0xff]  ;;  %v16737_v43 = vcombine.high %v655_v34, %v659_v36 }
 0x42f   : > { %10797 = vmatmul.mubr.bf16.vlgmr.msra.gmra.mrb[4].mxu0 %v19706_v39  ;;  %11289 = vmatmul.mubr.bf16.vlgmr.msra.gmra.mrb[4].mxu1 %v19706_v39  ;;  %v16704_v39 = vcombine.low %v623_v53, %v627_v55  ;;  %v16739_v46 = vcombine.high %v656_v37, %v660_v40  ;;  %v16736_v53 = vcombine.low %v655_v34, %v659_v36 }
 0x430   : > { %10806 = vmatpush1.bf16.msra.mxu0 %v16688_v47  ;;  %11298 = vmatpush1.bf16.msra.mxu1 %v16690_v48  ;;  %v663_v47 = vld [vmem:[%s19507_s18 + $0x9d0] sm:$0xff]  ;;  %v16738_v55 = vcombine.low %v656_v37, %v660_v40 }
 0x431   : > { %10807 = vmatprep.subr.bf16.mxu0 %v16697_v35  ;;  %11299 = vmatprep.subr.bf16.mxu1 %v16699_v51  ;;  %v667_v48 = vld [vmem:[%s19507_s18 + $0x9f0] sm:$0xff]  ;;  %v664_v35 = vld [vmem:[%s19507_s18 + $0x9d8] sm:$0xff] }
 0x432   : > { %10837 = vmatprep.mubr.bf16.mxu0 %v19713_v49  ;;  %11329 = vmatprep.mubr.bf16.mxu1 %v19713_v49  ;;  %v16714_v49 = vcombine.low %v632_v24, %v636_v44  ;;  %v668_v51 = vld [vmem:[%s19507_s18 + $0x9f8] sm:$0xff]  ;;  %v16745_v56 = vcombine.high %v663_v47, %v667_v48  ;;  %v16744_v5 = vcombine.low %v663_v47, %v667_v48 }
 0x433   : > { %v16747_v61 = vcombine.high %v664_v35, %v668_v51  ;;  %v16746_v30 = vcombine.low %v664_v35, %v668_v51 }
 0x434   : > { %10808 = vmatpush1.bf16.msra.mxu0 %v16696_v62  ;;  %11300 = vmatpush1.bf16.msra.mxu1 %v16698_v63  ;;  %v671_v62 = vld [vmem:[%s19507_s18 + $0xa10] sm:$0xff] }
 0x435   : > { %10809 = vmatprep.subr.bf16.mxu0 %v16705_v9  ;;  %11301 = vmatprep.subr.bf16.mxu1 %v16707_v4  ;;  %v675_v63 = vld [vmem:[%s19507_s18 + $0xa30] sm:$0xff]  ;;  %v672_v9 = vld [vmem:[%s19507_s18 + $0xa18] sm:$0xff] }
 0x436   : > { %v676_v4 = vld [vmem:[%s19507_s18 + $0xa38] sm:$0xff]  ;;  %v16753_v24 = vcombine.high %v671_v62, %v675_v63  ;;  %v16752_v14 = vcombine.low %v671_v62, %v675_v63 }
 0x437   : > { %v16755_v44 = vcombine.high %v672_v9, %v676_v4  ;;  %v16754_v15 = vcombine.low %v672_v9, %v676_v4 }
 0x438   : > { %10810 = vmatpush1.bf16.msra.mxu0 %v16704_v39  ;;  %11302 = vmatpush1.bf16.msra.mxu1 %v16706_v10  ;;  %v679_v39 = vld [vmem:[%s19507_s18 + $0xa50] sm:$0xff] }
 0x439   : > { %10811 = vmatprep.subr.bf16.mxu0 %v16713_v12  ;;  %11303 = vmatprep.subr.bf16.mxu1 %v16715_v13  ;;  %v683_v10 = vld [vmem:[%s19507_s18 + $0xa70] sm:$0xff]  ;;  %v680_v12 = vld [vmem:[%s19507_s18 + $0xa58] sm:$0xff] }
 0x43a   : > { %v684_v13 = vld [vmem:[%s19507_s18 + $0xa78] sm:$0xff]  ;;  %v16761_v18 = vcombine.high %v679_v39, %v683_v10  ;;  %v16760_v23 = vcombine.low %v679_v39, %v683_v10 }
 0x43b   : > { %v16763_v17 = vcombine.high %v680_v12, %v684_v13  ;;  %v16762_v25 = vcombine.low %v680_v12, %v684_v13 }
 0x43c   : > { %10812 = vmatpush1.bf16.msra.mxu0 %v16712_v33  ;;  %11304 = vmatpush1.bf16.msra.mxu1 %v16714_v49  ;;  %v687_v33 = vld [vmem:[%s19507_s18 + $0xa90] sm:$0xff] }
 0x43d   : > { %10813 = vmatprep.subr.bf16.mxu0 %v16721_v21  ;;  %11305 = vmatprep.subr.bf16.mxu1 %v16723_v22  ;;  %v691_v49 = vld [vmem:[%s19507_s18 + $0xab0] sm:$0xff]  ;;  %v688_v21 = vld [vmem:[%s19507_s18 + $0xa98] sm:$0xff] }
 0x43e   : > { %v692_v22 = vld [vmem:[%s19507_s18 + $0xab8] sm:$0xff]  ;;  %v16769_v26 = vcombine.high %v687_v33, %v691_v49  ;;  %v16768_v34 = vcombine.low %v687_v33, %v691_v49 }
 0x43f   : > { %v16771_v27 = vcombine.high %v688_v21, %v692_v22  ;;  %v16770_v36 = vcombine.low %v688_v21, %v692_v22 }
 0x440   : > { %10814 = vmatpush1.bf16.msra.mxu0 %v16720_v50  ;;  %11306 = vmatpush1.bf16.msra.mxu1 %v16722_v31  ;;  %v695_v50 = vld [vmem:[%s19507_s18 + $0xad0] sm:$0xff] }
 0x441   : > { %10815 = vmatprep.subr.bf16.mxu0 %v16729_v32  ;;  %11307 = vmatprep.subr.bf16.mxu1 %v16731_v0  ;;  %v699_v31 = vld [vmem:[%s19507_s18 + $0xaf0] sm:$0xff]  ;;  %v696_v32 = vld [vmem:[%s19507_s18 + $0xad8] sm:$0xff] }
 0x442   : > { %v700_v0 = vld [vmem:[%s19507_s18 + $0xaf8] sm:$0xff]  ;;  %v16777_v37 = vcombine.high %v695_v50, %v699_v31  ;;  %v16776_v47 = vcombine.low %v695_v50, %v699_v31 }
 0x443   : > { %v16779_v40 = vcombine.high %v696_v32, %v700_v0  ;;  %v16778_v48 = vcombine.low %v696_v32, %v700_v0 }
 0x444   : > { %10816 = vmatpush1.bf16.msra.mxu0 %v16728_v41  ;;  %11308 = vmatpush1.bf16.msra.mxu1 %v16730_v42  ;;  %v703_v41 = vld [vmem:[%s19507_s18 + $0xb10] sm:$0xff] }
 0x445   : > { %10817 = vmatprep.subr.bf16.mxu0 %v16737_v43  ;;  %11309 = vmatprep.subr.bf16.mxu1 %v16739_v46  ;;  %v707_v42 = vld [vmem:[%s19507_s18 + $0xb30] sm:$0xff]  ;;  %v704_v43 = vld [vmem:[%s19507_s18 + $0xb18] sm:$0xff] }
 0x446   : > { %v708_v46 = vld [vmem:[%s19507_s18 + $0xb38] sm:$0xff]  ;;  %v16785_v35 = vcombine.high %v703_v41, %v707_v42  ;;  %v16784_v62 = vcombine.low %v703_v41, %v707_v42 }
 0x447   : > { %v16787_v51 = vcombine.high %v704_v43, %v708_v46  ;;  %v16786_v63 = vcombine.low %v704_v43, %v708_v46 }
 0x448   : > { %10818 = vmatpush1.bf16.msra.mxu0 %v16736_v53  ;;  %11310 = vmatpush1.bf16.msra.mxu1 %v16738_v55  ;;  %v711_v53 = vld [vmem:[%s19507_s18 + $0xb50] sm:$0xff] }
 0x449   : > { %10819 = vmatprep.subr.bf16.mxu0 %v16745_v56  ;;  %11311 = vmatprep.subr.bf16.mxu1 %v16747_v61  ;;  %v715_v55 = vld [vmem:[%s19507_s18 + $0xb70] sm:$0xff]  ;;  %v712_v56 = vld [vmem:[%s19507_s18 + $0xb58] sm:$0xff] }
 0x44a   : > { %v716_v61 = vld [vmem:[%s19507_s18 + $0xb78] sm:$0xff]  ;;  %v16793_v9 = vcombine.high %v711_v53, %v715_v55  ;;  %v16792_v39 = vcombine.low %v711_v53, %v715_v55 }
 0x44b   : > { %v16795_v4 = vcombine.high %v712_v56, %v716_v61  ;;  %v16794_v10 = vcombine.low %v712_v56, %v716_v61 }
 0x44c   : > { %10820 = vmatpush1.bf16.msra.mxu0 %v16744_v5  ;;  %11312 = vmatpush1.bf16.msra.mxu1 %v16746_v30  ;;  %v719_v5 = vld [vmem:[%s19507_s18 + $0xb90] sm:$0xff] }
 0x44d   : > { %10821 = vmatprep.subr.bf16.mxu0 %v16753_v24  ;;  %11313 = vmatprep.subr.bf16.mxu1 %v16755_v44  ;;  %v723_v30 = vld [vmem:[%s19507_s18 + $0xbb0] sm:$0xff]  ;;  %v720_v24 = vld [vmem:[%s19507_s18 + $0xb98] sm:$0xff] }
 0x44e   : > { %v724_v44 = vld [vmem:[%s19507_s18 + $0xbb8] sm:$0xff]  ;;  %v16801_v12 = vcombine.high %v719_v5, %v723_v30  ;;  %v16800_v33 = vcombine.low %v719_v5, %v723_v30 }
 0x44f   : > { %v16803_v13 = vcombine.high %v720_v24, %v724_v44  ;;  %v16802_v49 = vcombine.low %v720_v24, %v724_v44  ;;  %v767_v44 = vld [vmem:[%s19507_s18 + $0xd10] sm:$0xff] }
 0x450   : > { %10822 = vmatpush1.bf16.msra.mxu0 %v16752_v14  ;;  %11314 = vmatpush1.bf16.msra.mxu1 %v16754_v15  ;;  %v727_v14 = vld [vmem:[%s19507_s18 + $0xbd0] sm:$0xff] }
 0x451   : > { %10823 = vmatprep.subr.bf16.mxu0 %v16761_v18  ;;  %11315 = vmatprep.subr.bf16.mxu1 %v16763_v17  ;;  %v731_v15 = vld [vmem:[%s19507_s18 + $0xbf0] sm:$0xff]  ;;  %v728_v18 = vld [vmem:[%s19507_s18 + $0xbd8] sm:$0xff] }
 0x452   : > { %v732_v17 = vld [vmem:[%s19507_s18 + $0xbf8] sm:$0xff]  ;;  %v16809_v21 = vcombine.high %v727_v14, %v731_v15  ;;  %v16808_v50 = vcombine.low %v727_v14, %v731_v15 }
 0x453   : > { %v16811_v22 = vcombine.high %v728_v18, %v732_v17  ;;  %v16810_v31 = vcombine.low %v728_v18, %v732_v17  ;;  %v775_v18 = vld [vmem:[%s19507_s18 + $0xd50] sm:$0xff] }
 0x454   : > { %10824 = vmatpush1.bf16.msra.mxu0 %v16760_v23  ;;  %11316 = vmatpush1.bf16.msra.mxu1 %v16762_v25  ;;  %v735_v23 = vld [vmem:[%s19507_s18 + $0xc10] sm:$0xff] }
 0x455   : > { %10825 = vmatprep.subr.bf16.mxu0 %v16769_v26  ;;  %11317 = vmatprep.subr.bf16.mxu1 %v16771_v27  ;;  %v739_v25 = vld [vmem:[%s19507_s18 + $0xc30] sm:$0xff]  ;;  %v736_v26 = vld [vmem:[%s19507_s18 + $0xc18] sm:$0xff] }
 0x456   : > { %v740_v27 = vld [vmem:[%s19507_s18 + $0xc38] sm:$0xff]  ;;  %v16817_v32 = vcombine.high %v735_v23, %v739_v25  ;;  %v16816_v41 = vcombine.low %v735_v23, %v739_v25  ;;  %v779_v17 = vld [vmem:[%s19507_s18 + $0xd70] sm:$0xff] }
 0x457   : > { %v16819_v0 = vcombine.high %v736_v26, %v740_v27  ;;  %v16818_v42 = vcombine.low %v736_v26, %v740_v27  ;;  %v16857_v23 = vcombine.high %v775_v18, %v779_v17  ;;  %v783_v26 = vld [vmem:[%s19507_s18 + $0xd90] sm:$0xff] }
 0x458   : > { %10826 = vmatpush1.bf16.msra.mxu0 %v16768_v34  ;;  %11318 = vmatpush1.bf16.msra.mxu1 %v16770_v36  ;;  %v743_v34 = vld [vmem:[%s19507_s18 + $0xc50] sm:$0xff] }
 0x459   : > { %10827 = vmatprep.subr.bf16.mxu0 %v16777_v37  ;;  %11319 = vmatprep.subr.bf16.mxu1 %v16779_v40  ;;  %v747_v36 = vld [vmem:[%s19507_s18 + $0xc70] sm:$0xff]  ;;  %v744_v37 = vld [vmem:[%s19507_s18 + $0xc58] sm:$0xff] }
 0x45a   : > { %v748_v40 = vld [vmem:[%s19507_s18 + $0xc78] sm:$0xff]  ;;  %v16825_v43 = vcombine.high %v743_v34, %v747_v36  ;;  %v16824_v53 = vcombine.low %v743_v34, %v747_v36  ;;  %v787_v27 = vld [vmem:[%s19507_s18 + $0xdb0] sm:$0xff] }
 0x45b   : > { %v16827_v46 = vcombine.high %v744_v37, %v748_v40  ;;  %v16826_v55 = vcombine.low %v744_v37, %v748_v40  ;;  %v16865_v34 = vcombine.high %v783_v26, %v787_v27  ;;  %v791_v40 = vld [vmem:[%s19507_s18 + $0xdd0] sm:$0xff] }
 0x45c   : > { %10828 = vmatpush1.bf16.msra.mxu0 %v16776_v47  ;;  %11320 = vmatpush1.bf16.msra.mxu1 %v16778_v48  ;;  %v751_v47 = vld [vmem:[%s19507_s18 + $0xc90] sm:$0xff] }
 0x45d   : > { %10829 = vmatprep.subr.bf16.mxu0 %v16785_v35  ;;  %11321 = vmatprep.subr.bf16.mxu1 %v16787_v51  ;;  %v755_v48 = vld [vmem:[%s19507_s18 + $0xcb0] sm:$0xff]  ;;  %v752_v35 = vld [vmem:[%s19507_s18 + $0xc98] sm:$0xff] }
 0x45e   : > { %v756_v51 = vld [vmem:[%s19507_s18 + $0xcb8] sm:$0xff]  ;;  %v16833_v56 = vcombine.high %v751_v47, %v755_v48 }
 0x45f   : > { %v16835_v61 = vcombine.high %v752_v35, %v756_v51  ;;  %v16834_v5 = vcombine.low %v752_v35, %v756_v51  ;;  %v16864_v51 = vcombine.low %v783_v26, %v787_v27 }
 0x460   : > { %10830 = vmatpush1.bf16.msra.mxu0 %v16784_v62  ;;  %11322 = vmatpush1.bf16.msra.mxu1 %v16786_v63  ;;  %v759_v62 = vld [vmem:[%s19507_s18 + $0xcd0] sm:$0xff] }
 0x461   : > { %10831 = vmatprep.subr.bf16.mxu0 %v16793_v9  ;;  %11323 = vmatprep.subr.bf16.mxu1 %v16795_v4  ;;  %v763_v63 = vld [vmem:[%s19507_s18 + $0xcf0] sm:$0xff]  ;;  %v760_v9 = vld [vmem:[%s19507_s18 + $0xcd8] sm:$0xff] }
 0x462   : > { %v764_v4 = vld [vmem:[%s19507_s18 + $0xcf8] sm:$0xff]  ;;  %v16841_v30 = vcombine.high %v759_v62, %v763_v63 }
 0x463   : > { %v16843_v24 = vcombine.high %v760_v9, %v764_v4 }
 0x464   : > { %10832 = vmatpush1.bf16.msra.mxu0 %v16792_v39  ;;  %11324 = vmatpush1.bf16.msra.mxu1 %v16794_v10  ;;  %v771_v39 = vld [vmem:[%s19507_s18 + $0xd30] sm:$0xff]  ;;  %v768_v10 = vld [vmem:[%s19507_s18 + $0xd18] sm:$0xff] }
 0x465   : > { %10833 = vmatprep.subr.bf16.mxu0 %v16801_v12  ;;  %11325 = vmatprep.subr.bf16.mxu1 %v16803_v13  ;;  %v772_v12 = vld [vmem:[%s19507_s18 + $0xd38] sm:$0xff]  ;;  %v16840_v13 = vcombine.low %v759_v62, %v763_v63  ;;  %v16849_v14 = vcombine.high %v767_v44, %v771_v39 }
 0x466   : > { %v16851_v15 = vcombine.high %v768_v10, %v772_v12 }
 0x468   : > { %10834 = vmatpush1.bf16.msra.mxu0 %v16800_v33  ;;  %11326 = vmatpush1.bf16.msra.mxu1 %v16802_v49  ;;  %v776_v33 = vld [vmem:[%s19507_s18 + $0xd58] sm:$0xff] }
 0x469   : > { %10835 = vmatprep.subr.bf16.mxu0 %v16809_v21  ;;  %11327 = vmatprep.subr.bf16.mxu1 %v16811_v22  ;;  %v780_v49 = vld [vmem:[%s19507_s18 + $0xd78] sm:$0xff]  ;;  %v16848_v21 = vcombine.low %v767_v44, %v771_v39  ;;  %v16850_v22 = vcombine.low %v768_v10, %v772_v12  ;;  %v807_v10 = vld [vmem:[%s19507_s18 + $0xe50] sm:$0xff] }
 0x46a   : > { %v16859_v25 = vcombine.high %v776_v33, %v780_v49  ;;  %v811_v12 = vld [vmem:[%s19507_s18 + $0xe70] sm:$0xff] }
 0x46c   : > { %10836 = vmatpush1.bf16.msra.mxu0 %v16808_v50  ;;  %11328 = vmatpush1.bf16.msra.mxu1 %v16810_v31  ;;  %v784_v50 = vld [vmem:[%s19507_s18 + $0xd98] sm:$0xff] }
 0x46d   : > { %10846 = vmatprep.subr.bf16.mxu0 %v16817_v32  ;;  %11338 = vmatprep.subr.bf16.mxu1 %v16819_v0  ;;  %v788_v31 = vld [vmem:[%s19507_s18 + $0xdb8] sm:$0xff]  ;;  %v16856_v32 = vcombine.low %v775_v18, %v779_v17  ;;  %v16858_v0 = vcombine.low %v776_v33, %v780_v49  ;;  %v16889_v18 = vcombine.high %v807_v10, %v811_v12  ;;  %v815_v33 = vld [vmem:[%s19507_s18 + $0xe90] sm:$0xff] }
 0x46e   : > { %v16867_v37 = vcombine.high %v784_v50, %v788_v31  ;;  %v819_v49 = vld [vmem:[%s19507_s18 + $0xeb0] sm:$0xff] }
 0x46f   : > { %10838 = vmatmul.mubr.bf16.vlgmr.msra.gmra.mrb[4].mxu0 %v19781_v59  ;;  %11330 = vmatmul.mubr.bf16.vlgmr.msra.gmra.mrb[4].mxu1 %v19781_v59  ;;  %v16832_v59 = vcombine.low %v751_v47, %v755_v48  ;;  %v796_v47 = vld [vmem:[%s19507_s18 + $0xdf8] sm:$0xff]  ;;  %v16897_v26 = vcombine.high %v815_v33, %v819_v49 }
 0x470   : > { %10847 = vmatpush1.bf16.msra.mxu0 %v16816_v41  ;;  %11339 = vmatpush1.bf16.msra.mxu1 %v16818_v42  ;;  %v795_v41 = vld [vmem:[%s19507_s18 + $0xdf0] sm:$0xff] }
 0x471   : > { %10848 = vmatprep.subr.bf16.mxu0 %v16825_v43  ;;  %11340 = vmatprep.subr.bf16.mxu1 %v16827_v46  ;;  %v792_v46 = vld [vmem:[%s19507_s18 + $0xdd8] sm:$0xff] }
 0x472   : > { %10878 = vmatprep.mubr.bf16.mxu0 %v19789_v6  ;;  %11370 = vmatprep.mubr.bf16.mxu1 %v19789_v6  ;;  %v16842_v6 = vcombine.low %v760_v9, %v764_v4  ;;  %v16875_v63 = vcombine.high %v792_v46, %v796_v47  ;;  %v799_v9 = vld [vmem:[%s19507_s18 + $0xe10] sm:$0xff] }
 0x473   : > { %v803_v4 = vld [vmem:[%s19507_s18 + $0xe30] sm:$0xff] }
 0x474   : > { %10849 = vmatpush1.bf16.msra.mxu0 %v16824_v53  ;;  %11341 = vmatpush1.bf16.msra.mxu1 %v16826_v55  ;;  %v16881_v44 = vcombine.high %v799_v9, %v803_v4 }
 0x475   : > { %10850 = vmatprep.subr.bf16.mxu0 %v16833_v56  ;;  %11342 = vmatprep.subr.bf16.mxu1 %v16835_v61  ;;  %v16866_v56 = vcombine.low %v784_v50, %v788_v31  ;;  %v16873_v61 = vcombine.high %v791_v40, %v795_v41  ;;  %v823_v50 = vld [vmem:[%s19507_s18 + $0xed0] sm:$0xff] }
 0x476   : > { %v827_v31 = vld [vmem:[%s19507_s18 + $0xef0] sm:$0xff] }
 0x478   : > { %10851 = vmatpush1.bf16.msra.mxu0 %v16832_v59  ;;  %11343 = vmatpush1.bf16.msra.mxu1 %v16834_v5  ;;  %v800_v59 = vld [vmem:[%s19507_s18 + $0xe18] sm:$0xff] }
 0x479   : > { %10852 = vmatprep.subr.bf16.mxu0 %v16841_v30  ;;  %11344 = vmatprep.subr.bf16.mxu1 %v16843_v24  ;;  %v804_v5 = vld [vmem:[%s19507_s18 + $0xe38] sm:$0xff]  ;;  %v16872_v30 = vcombine.low %v791_v40, %v795_v41  ;;  %v16874_v24 = vcombine.low %v792_v46, %v796_v47  ;;  %v16905_v40 = vcombine.high %v823_v50, %v827_v31  ;;  %v831_v46 = vld [vmem:[%s19507_s18 + $0xf10] sm:$0xff] }
 0x47a   : > { %v16883_v39 = vcombine.high %v800_v59, %v804_v5  ;;  %v835_v47 = vld [vmem:[%s19507_s18 + $0xf30] sm:$0xff] }
 0x47c   : > { %10853 = vmatpush1.bf16.msra.mxu0 %v16840_v13  ;;  %11345 = vmatpush1.bf16.msra.mxu1 %v16842_v6  ;;  %v808_v13 = vld [vmem:[%s19507_s18 + $0xe58] sm:$0xff] }
 0x47d   : > { %10854 = vmatprep.subr.bf16.mxu0 %v16849_v14  ;;  %11346 = vmatprep.subr.bf16.mxu1 %v16851_v15  ;;  %v812_v6 = vld [vmem:[%s19507_s18 + $0xe78] sm:$0xff]  ;;  %v16880_v14 = vcombine.low %v799_v9, %v803_v4  ;;  %v16882_v15 = vcombine.low %v800_v59, %v804_v5  ;;  %v16912_v59 = vcombine.low %v831_v46, %v835_v47 }
 0x47e   : > { %v16891_v17 = vcombine.high %v808_v13, %v812_v6  ;;  %v840_v9 = vld [vmem:[%s19507_s18 + $0xf58] sm:$0xff] }
 0x47f   : > { %v844_v4 = vld [vmem:[%s19507_s18 + $0xf78] sm:$0xff] }
 0x480   : > { %10855 = vmatpush1.bf16.msra.mxu0 %v16848_v21  ;;  %11347 = vmatpush1.bf16.msra.mxu1 %v16850_v22  ;;  %v816_v21 = vld [vmem:[%s19507_s18 + $0xe98] sm:$0xff] }
 0x481   : > { %10856 = vmatprep.subr.bf16.mxu0 %v16857_v23  ;;  %11348 = vmatprep.subr.bf16.mxu1 %v16859_v25  ;;  %v820_v22 = vld [vmem:[%s19507_s18 + $0xeb8] sm:$0xff]  ;;  %v16888_v23 = vcombine.low %v807_v10, %v811_v12  ;;  %v16890_v25 = vcombine.low %v808_v13, %v812_v6  ;;  %v16922_v6 = vcombine.low %v840_v9, %v844_v4 }
 0x482   : > { %v20729_v36 = vpop.f32.mrb[0].mxu0  ;;  %v20733_v42 = vpop.f32.mrb[0].mxu1  ;;  %v16899_v27 = vcombine.high %v816_v21, %v820_v22  ;;  %v848_v10 = vld [vmem:[%s19507_s18 + $0xf98] sm:$0xff] }
 0x483   : > { %v20735_v43 = vpop.f32.mrb[1].mxu0  ;;  %v20739_v48 = vpop.f32.mrb[1].mxu1  ;;  %v852_v12 = vld [vmem:[%s19507_s18 + $0xfb8] sm:$0xff] }
 0x484   : > { %v10228_v35 = vpop.f32.mrb[2].mxu0  ;;  %10857 = vmatpush1.bf16.msra.mxu0 %v16856_v32  ;;  %v10720_v53 = vpop.f32.mrb[2].mxu1  ;;  %11349 = vmatpush1.bf16.msra.mxu1 %v16858_v0  ;;  %v824_v32 = vld [vmem:[%s19507_s18 + $0xed8] sm:$0xff] }
 0x485   : > { %v10229_v55 = vpop.f32.mrb[3].mxu0  ;;  %10858 = vmatprep.subr.bf16.mxu0 %v16865_v34  ;;  %v10721_v62 = vpop.f32.mrb[3].mxu1  ;;  %11350 = vmatprep.subr.bf16.mxu1 %v16867_v37  ;;  %v828_v0 = vld [vmem:[%s19507_s18 + $0xef8] sm:$0xff]  ;;  %v16896_v34 = vcombine.low %v815_v33, %v819_v49  ;;  %v16898_v37 = vcombine.low %v816_v21, %v820_v22  ;;  %v16904_v53 = vcombine.low %v823_v50, %v827_v31 }
 0x486   : > { %v16907_v41 = vcombine.high %v824_v32, %v828_v0  ;;  %v832_v35 = vld [vmem:[%s19507_s18 + $0xf18] sm:$0xff]  ;;  %v16906_v55 = vcombine.low %v824_v32, %v828_v0  ;;  %v839_v62 = vld [vmem:[%s19507_s18 + $0xf50] sm:$0xff]  ;;  %v16930_v22 = vcombine.low %v848_v10, %v852_v12 }
 0x487   : > { %v856_v33 = vld [vmem:[%s19507_s18 + $0xfd8] sm:$0xff] }
 0x488   : > { %10859 = vmatpush1.bf16.msra.mxu0 %v16864_v51  ;;  %11351 = vmatpush1.bf16.msra.mxu1 %v16866_v56  ;;  %v836_v51 = vld [vmem:[%s19507_s18 + $0xf38] sm:$0xff]  ;;  %v16913_v56 = vcombine.high %v831_v46, %v835_v47 }
 0x489   : > { %10860 = vmatprep.subr.bf16.mxu0 %v16873_v61  ;;  %11352 = vmatprep.subr.bf16.mxu1 %v16875_v63  ;;  %v16915_v61 = vcombine.high %v832_v35, %v836_v51  ;;  %v843_v63 = vld [vmem:[%s19507_s18 + $0xf70] sm:$0xff]  ;;  %v16914_v5 = vcombine.low %v832_v35, %v836_v51  ;;  %v860_v49 = vld [vmem:[%s19507_s18 + $0xff8] sm:$0xff] }
 0x48a   : > { %v16920_v13 = vcombine.low %v839_v62, %v843_v63  ;;  %v864_v50 = vld [vmem:[%s19507_s18 + $0x1018] sm:$0xff]  ;;  %v16938_v0 = vcombine.low %v856_v33, %v860_v49 }
 0x48b   : > { %v868_v31 = vld [vmem:[%s19507_s18 + $0x1038] sm:$0xff] }
 0x48c   : > { %10861 = vmatpush1.bf16.msra.mxu0 %v16872_v30  ;;  %11353 = vmatpush1.bf16.msra.mxu1 %v16874_v24  ;;  %v16921_v30 = vcombine.high %v839_v62, %v843_v63  ;;  %v16923_v24 = vcombine.high %v840_v9, %v844_v4  ;;  %v872_v46 = vld [vmem:[%s19507_s18 + $0x1058] sm:$0xff]  ;;  %v16946_v51 = vcombine.low %v864_v50, %v868_v31 }
 0x48d   : > { %10862 = vmatprep.subr.bf16.mxu0 %v16881_v44  ;;  %11354 = vmatprep.subr.bf16.mxu1 %v16883_v39  ;;  %v847_v44 = vld [vmem:[%s19507_s18 + $0xf90] sm:$0xff]  ;;  %v876_v47 = vld [vmem:[%s19507_s18 + $0x1078] sm:$0xff] }
 0x48e   : > { %v851_v39 = vld [vmem:[%s19507_s18 + $0xfb0] sm:$0xff]  ;;  %v880_v62 = vld [vmem:[%s19507_s18 + $0x1098] sm:$0xff]  ;;  %v16954_v4 = vcombine.low %v872_v46, %v876_v47 }
 0x48f   : > { %v16928_v21 = vcombine.low %v847_v44, %v851_v39  ;;  %v884_v63 = vld [vmem:[%s19507_s18 + $0x10b8] sm:$0xff] }
 0x490   : > { %10863 = vmatpush1.bf16.msra.mxu0 %v16880_v14  ;;  %11355 = vmatpush1.bf16.msra.mxu1 %v16882_v15  ;;  %v16929_v14 = vcombine.high %v847_v44, %v851_v39  ;;  %v16931_v15 = vcombine.high %v848_v10, %v852_v12  ;;  %v888_v44 = vld [vmem:[%s19507_s18 + $0x10d8] sm:$0xff]  ;;  %v16962_v10 = vcombine.low %v880_v62, %v884_v63 }
 0x491   : > { %10864 = vmatprep.subr.bf16.mxu0 %v16889_v18  ;;  %11356 = vmatprep.subr.bf16.mxu1 %v16891_v17  ;;  %v855_v18 = vld [vmem:[%s19507_s18 + $0xfd0] sm:$0xff]  ;;  %v892_v39 = vld [vmem:[%s19507_s18 + $0x10f8] sm:$0xff] }
 0x492   : > { %v859_v17 = vld [vmem:[%s19507_s18 + $0xff0] sm:$0xff] }
 0x493   : > { %v16936_v32 = vcombine.low %v855_v18, %v859_v17 }
 0x494   : > { %10865 = vmatpush1.bf16.msra.mxu0 %v16888_v23  ;;  %11357 = vmatpush1.bf16.msra.mxu1 %v16890_v25  ;;  %v16937_v23 = vcombine.high %v855_v18, %v859_v17  ;;  %v16939_v25 = vcombine.high %v856_v33, %v860_v49  ;;  %v900_v18 = vld [vmem:[%s19507_s18 + $0x1138] sm:$0xff] }
 0x495   : > { %10866 = vmatprep.subr.bf16.mxu0 %v16897_v26  ;;  %11358 = vmatprep.subr.bf16.mxu1 %v16899_v27  ;;  %v863_v26 = vld [vmem:[%s19507_s18 + $0x1010] sm:$0xff] }
 0x496   : > { %v867_v27 = vld [vmem:[%s19507_s18 + $0x1030] sm:$0xff] }
 0x497   : > { %v16944_v35 = vcombine.low %v863_v26, %v867_v27 }
 0x498   : > { %10867 = vmatpush1.bf16.msra.mxu0 %v16896_v34  ;;  %11359 = vmatpush1.bf16.msra.mxu1 %v16898_v37  ;;  %v16945_v34 = vcombine.high %v863_v26, %v867_v27  ;;  %v16947_v37 = vcombine.high %v864_v50, %v868_v31 }
 0x499   : > { %10868 = vmatprep.subr.bf16.mxu0 %v16905_v40  ;;  %11360 = vmatprep.subr.bf16.mxu1 %v16907_v41  ;;  %v871_v40 = vld [vmem:[%s19507_s18 + $0x1050] sm:$0xff] }
 0x49a   : > { %v875_v41 = vld [vmem:[%s19507_s18 + $0x1070] sm:$0xff] }
 0x49b   : > { %v16952_v9 = vcombine.low %v871_v40, %v875_v41 }
 0x49c   : > { %10869 = vmatpush1.bf16.msra.mxu0 %v16904_v53  ;;  %11361 = vmatpush1.bf16.msra.mxu1 %v16906_v55  ;;  %v16953_v53 = vcombine.high %v871_v40, %v875_v41  ;;  %v16955_v55 = vcombine.high %v872_v46, %v876_v47 }
 0x49d   : > { %10870 = vmatprep.subr.bf16.mxu0 %v16913_v56  ;;  %11362 = vmatprep.subr.bf16.mxu1 %v16915_v61  ;;  %v879_v56 = vld [vmem:[%s19507_s18 + $0x1090] sm:$0xff] }
 0x49e   : > { %v883_v61 = vld [vmem:[%s19507_s18 + $0x10b0] sm:$0xff] }
 0x4a0   : > { %10871 = vmatpush1.bf16.msra.mxu0 %v16912_v59  ;;  %11363 = vmatpush1.bf16.msra.mxu1 %v16914_v5  ;;  %v16961_v59 = vcombine.high %v879_v56, %v883_v61  ;;  %v16963_v5 = vcombine.high %v880_v62, %v884_v63 }
 0x4a1   : > { %10872 = vmatprep.subr.bf16.mxu0 %v16921_v30  ;;  %11364 = vmatprep.subr.bf16.mxu1 %v16923_v24  ;;  %v887_v30 = vld [vmem:[%s19507_s18 + $0x10d0] sm:$0xff] }
 0x4a2   : > { %v891_v24 = vld [vmem:[%s19507_s18 + $0x10f0] sm:$0xff] }
 0x4a3   : > { %v16969_v12 = vcombine.high %v887_v30, %v891_v24  ;;  %v16968_v17 = vcombine.low %v887_v30, %v891_v24 }
 0x4a4   : > { %10873 = vmatpush1.bf16.msra.mxu0 %v16920_v13  ;;  %11365 = vmatpush1.bf16.msra.mxu1 %v16922_v6  ;;  %v16971_v13 = vcombine.high %v888_v44, %v892_v39  ;;  %v895_v6 = vld [vmem:[%s19507_s18 + $0x1110] sm:$0xff] }
 0x4a5   : > { %10874 = vmatprep.subr.bf16.mxu0 %v16929_v14  ;;  %11366 = vmatprep.subr.bf16.mxu1 %v16931_v15  ;;  %v899_v14 = vld [vmem:[%s19507_s18 + $0x1130] sm:$0xff]  ;;  %v896_v15 = vld [vmem:[%s19507_s18 + $0x1118] sm:$0xff] }
 0x4a6   : > { %v16977_v33 = vcombine.high %v895_v6, %v899_v14  ;;  %v16979_v49 = vcombine.high %v896_v15, %v900_v18  ;;  %v16976_v26 = vcombine.low %v895_v6, %v899_v14  ;;  %v16978_v27 = vcombine.low %v896_v15, %v900_v18 }
 0x4a8   : > { %10875 = vmatpush1.bf16.msra.mxu0 %v16928_v21  ;;  %11367 = vmatpush1.bf16.msra.mxu1 %v16930_v22  ;;  %v903_v21 = vld [vmem:[%s19507_s18 + $0x1150] sm:$0xff] }
 0x4a9   : > { %10876 = vmatprep.subr.bf16.mxu0 %v16937_v23  ;;  %11368 = vmatprep.subr.bf16.mxu1 %v16939_v25  ;;  %v907_v22 = vld [vmem:[%s19507_s18 + $0x1170] sm:$0xff]  ;;  %v904_v23 = vld [vmem:[%s19507_s18 + $0x1158] sm:$0xff] }
 0x4aa   : > { %v908_v25 = vld [vmem:[%s19507_s18 + $0x1178] sm:$0xff]  ;;  %v16985_v50 = vcombine.high %v903_v21, %v907_v22  ;;  %v16984_v40 = vcombine.low %v903_v21, %v907_v22 }
 0x4ab   : > { %v16987_v31 = vcombine.high %v904_v23, %v908_v25  ;;  %v16986_v41 = vcombine.low %v904_v23, %v908_v25 }
 0x4ac   : > { %10877 = vmatpush1.bf16.msra.mxu0 %v16936_v32  ;;  %11369 = vmatpush1.bf16.msra.mxu1 %v16938_v0  ;;  %v911_v32 = vld [vmem:[%s19507_s18 + $0x1190] sm:$0xff] }
 0x4ad   : > { %10887 = vmatprep.subr.bf16.mxu0 %v16945_v34  ;;  %11379 = vmatprep.subr.bf16.mxu1 %v16947_v37  ;;  %v915_v0 = vld [vmem:[%s19507_s18 + $0x11b0] sm:$0xff]  ;;  %v912_v34 = vld [vmem:[%s19507_s18 + $0x1198] sm:$0xff] }
 0x4ae   : > { %v916_v37 = vld [vmem:[%s19507_s18 + $0x11b8] sm:$0xff]  ;;  %v16993_v46 = vcombine.high %v911_v32, %v915_v0 }
 0x4af   : > { %10879 = vmatmul.mubr.bf16.vlgmr.msra.gmra.mrb[4].mxu0 %v19868_v20  ;;  %11371 = vmatmul.mubr.bf16.vlgmr.msra.gmra.mrb[4].mxu1 %v19868_v20  ;;  %v16960_v20 = vcombine.low %v879_v56, %v883_v61  ;;  %v16995_v47 = vcombine.high %v912_v34, %v916_v37  ;;  %v16992_v56 = vcombine.low %v911_v32, %v915_v0 }
 0x4b0   : > { %10888 = vmatpush1.bf16.msra.mxu0 %v16944_v35  ;;  %11380 = vmatpush1.bf16.msra.mxu1 %v16946_v51  ;;  %v919_v35 = vld [vmem:[%s19507_s18 + $0x11d0] sm:$0xff]  ;;  %v16994_v61 = vcombine.low %v912_v34, %v916_v37 }
 0x4b1   : > { %10889 = vmatprep.subr.bf16.mxu0 %v16953_v53  ;;  %11381 = vmatprep.subr.bf16.mxu1 %v16955_v55  ;;  %v923_v51 = vld [vmem:[%s19507_s18 + $0x11f0] sm:$0xff]  ;;  %v920_v53 = vld [vmem:[%s19507_s18 + $0x11d8] sm:$0xff] }
 0x4b2   : > { %10919 = vmatprep.mubr.bf16.mxu0 %v19875_v60  ;;  %11411 = vmatprep.mubr.bf16.mxu1 %v19875_v60  ;;  %v16970_v60 = vcombine.low %v888_v44, %v892_v39  ;;  %v924_v55 = vld [vmem:[%s19507_s18 + $0x11f8] sm:$0xff]  ;;  %v17001_v62 = vcombine.high %v919_v35, %v923_v51  ;;  %v17000_v30 = vcombine.low %v919_v35, %v923_v51 }
 0x4b3   : > { %v17003_v63 = vcombine.high %v920_v53, %v924_v55  ;;  %v17002_v24 = vcombine.low %v920_v53, %v924_v55 }
 0x4b4   : > { %10890 = vmatpush1.bf16.msra.mxu0 %v16952_v9  ;;  %11382 = vmatpush1.bf16.msra.mxu1 %v16954_v4  ;;  %v927_v9 = vld [vmem:[%s19507_s18 + $0x1210] sm:$0xff] }
 0x4b5   : > { %10891 = vmatprep.subr.bf16.mxu0 %v16961_v59  ;;  %11383 = vmatprep.subr.bf16.mxu1 %v16963_v5  ;;  %v931_v4 = vld [vmem:[%s19507_s18 + $0x1230] sm:$0xff]  ;;  %v928_v59 = vld [vmem:[%s19507_s18 + $0x1218] sm:$0xff] }
 0x4b6   : > { %v932_v5 = vld [vmem:[%s19507_s18 + $0x1238] sm:$0xff]  ;;  %v17009_v44 = vcombine.high %v927_v9, %v931_v4  ;;  %v17008_v6 = vcombine.low %v927_v9, %v931_v4 }
 0x4b7   : > { %v17011_v39 = vcombine.high %v928_v59, %v932_v5  ;;  %v17010_v14 = vcombine.low %v928_v59, %v932_v5 }
 0x4b8   : > { %10892 = vmatpush1.bf16.msra.mxu0 %v16960_v20  ;;  %11384 = vmatpush1.bf16.msra.mxu1 %v16962_v10  ;;  %v935_v20 = vld [vmem:[%s19507_s18 + $0x1250] sm:$0xff] }
 0x4b9   : > { %10893 = vmatprep.subr.bf16.mxu0 %v16969_v12  ;;  %11385 = vmatprep.subr.bf16.mxu1 %v16971_v13  ;;  %v939_v10 = vld [vmem:[%s19507_s18 + $0x1270] sm:$0xff]  ;;  %v936_v12 = vld [vmem:[%s19507_s18 + $0x1258] sm:$0xff] }
 0x4ba   : > { %v940_v13 = vld [vmem:[%s19507_s18 + $0x1278] sm:$0xff]  ;;  %v17017_v15 = vcombine.high %v935_v20, %v939_v10  ;;  %v17016_v21 = vcombine.low %v935_v20, %v939_v10 }
 0x4bb   : > { %v17019_v18 = vcombine.high %v936_v12, %v940_v13  ;;  %v17018_v22 = vcombine.low %v936_v12, %v940_v13 }
 0x4bc   : > { %10894 = vmatpush1.bf16.msra.mxu0 %v16968_v17  ;;  %11386 = vmatpush1.bf16.msra.mxu1 %v16970_v60  ;;  %v943_v17 = vld [vmem:[%s19507_s18 + $0x1290] sm:$0xff] }
 0x4bd   : > { %10895 = vmatprep.subr.bf16.mxu0 %v16977_v33  ;;  %11387 = vmatprep.subr.bf16.mxu1 %v16979_v49  ;;  %v947_v60 = vld [vmem:[%s19507_s18 + $0x12b0] sm:$0xff]  ;;  %v944_v33 = vld [vmem:[%s19507_s18 + $0x1298] sm:$0xff] }
 0x4be   : > { %v948_v49 = vld [vmem:[%s19507_s18 + $0x12b8] sm:$0xff]  ;;  %v17025_v23 = vcombine.high %v943_v17, %v947_v60  ;;  %v17024_v32 = vcombine.low %v943_v17, %v947_v60 }
 0x4bf   : > { %v17027_v25 = vcombine.high %v944_v33, %v948_v49  ;;  %v17026_v0 = vcombine.low %v944_v33, %v948_v49 }
 0x4c0   : > { %10896 = vmatpush1.bf16.msra.mxu0 %v16976_v26  ;;  %11388 = vmatpush1.bf16.msra.mxu1 %v16978_v27  ;;  %v951_v26 = vld [vmem:[%s19507_s18 + $0x12d0] sm:$0xff] }
 0x4c1   : > { %10897 = vmatprep.subr.bf16.mxu0 %v16985_v50  ;;  %11389 = vmatprep.subr.bf16.mxu1 %v16987_v31  ;;  %v955_v27 = vld [vmem:[%s19507_s18 + $0x12f0] sm:$0xff]  ;;  %v952_v50 = vld [vmem:[%s19507_s18 + $0x12d8] sm:$0xff] }
 0x4c2   : > { %v956_v31 = vld [vmem:[%s19507_s18 + $0x12f8] sm:$0xff]  ;;  %v17033_v34 = vcombine.high %v951_v26, %v955_v27  ;;  %v17032_v35 = vcombine.low %v951_v26, %v955_v27 }
 0x4c3   : > { %v17035_v37 = vcombine.high %v952_v50, %v956_v31  ;;  %v17034_v51 = vcombine.low %v952_v50, %v956_v31 }
 0x4c4   : > { %10898 = vmatpush1.bf16.msra.mxu0 %v16984_v40  ;;  %11390 = vmatpush1.bf16.msra.mxu1 %v16986_v41  ;;  %v959_v40 = vld [vmem:[%s19507_s18 + $0x1310] sm:$0xff] }
 0x4c5   : > { %10899 = vmatprep.subr.bf16.mxu0 %v16993_v46  ;;  %11391 = vmatprep.subr.bf16.mxu1 %v16995_v47  ;;  %v963_v41 = vld [vmem:[%s19507_s18 + $0x1330] sm:$0xff]  ;;  %v960_v46 = vld [vmem:[%s19507_s18 + $0x1318] sm:$0xff] }
 0x4c6   : > { %v964_v47 = vld [vmem:[%s19507_s18 + $0x1338] sm:$0xff]  ;;  %v17041_v53 = vcombine.high %v959_v40, %v963_v41  ;;  %v17040_v9 = vcombine.low %v959_v40, %v963_v41 }
 0x4c7   : > { %v17043_v55 = vcombine.high %v960_v46, %v964_v47  ;;  %v17042_v4 = vcombine.low %v960_v46, %v964_v47 }
 0x4c8   : > { %10900 = vmatpush1.bf16.msra.mxu0 %v16992_v56  ;;  %11392 = vmatpush1.bf16.msra.mxu1 %v16994_v61  ;;  %v967_v56 = vld [vmem:[%s19507_s18 + $0x1350] sm:$0xff] }
 0x4c9   : > { %10901 = vmatprep.subr.bf16.mxu0 %v17001_v62  ;;  %11393 = vmatprep.subr.bf16.mxu1 %v17003_v63  ;;  %v971_v61 = vld [vmem:[%s19507_s18 + $0x1370] sm:$0xff]  ;;  %v968_v62 = vld [vmem:[%s19507_s18 + $0x1358] sm:$0xff] }
 0x4ca   : > { %v972_v63 = vld [vmem:[%s19507_s18 + $0x1378] sm:$0xff]  ;;  %v17049_v59 = vcombine.high %v967_v56, %v971_v61  ;;  %v17048_v20 = vcombine.low %v967_v56, %v971_v61 }
 0x4cb   : > { %v17051_v5 = vcombine.high %v968_v62, %v972_v63  ;;  %v17050_v10 = vcombine.low %v968_v62, %v972_v63 }
 0x4cc   : > { %10902 = vmatpush1.bf16.msra.mxu0 %v17000_v30  ;;  %11394 = vmatpush1.bf16.msra.mxu1 %v17002_v24  ;;  %v975_v30 = vld [vmem:[%s19507_s18 + $0x1390] sm:$0xff] }
 0x4cd   : > { %10903 = vmatprep.subr.bf16.mxu0 %v17009_v44  ;;  %11395 = vmatprep.subr.bf16.mxu1 %v17011_v39  ;;  %v979_v24 = vld [vmem:[%s19507_s18 + $0x13b0] sm:$0xff]  ;;  %v976_v44 = vld [vmem:[%s19507_s18 + $0x1398] sm:$0xff] }
 0x4ce   : > { %v980_v39 = vld [vmem:[%s19507_s18 + $0x13b8] sm:$0xff]  ;;  %v17057_v12 = vcombine.high %v975_v30, %v979_v24  ;;  %v17056_v17 = vcombine.low %v975_v30, %v979_v24 }
 0x4cf   : > { %v17059_v13 = vcombine.high %v976_v44, %v980_v39  ;;  %v17058_v60 = vcombine.low %v976_v44, %v980_v39  ;;  %v1023_v39 = vld [vmem:[%s19507_s18 + $0x1510] sm:$0xff] }
 0x4d0   : > { %10904 = vmatpush1.bf16.msra.mxu0 %v17008_v6  ;;  %11396 = vmatpush1.bf16.msra.mxu1 %v17010_v14  ;;  %v983_v6 = vld [vmem:[%s19507_s18 + $0x13d0] sm:$0xff] }
 0x4d1   : > { %10905 = vmatprep.subr.bf16.mxu0 %v17017_v15  ;;  %11397 = vmatprep.subr.bf16.mxu1 %v17019_v18  ;;  %v987_v14 = vld [vmem:[%s19507_s18 + $0x13f0] sm:$0xff]  ;;  %v984_v15 = vld [vmem:[%s19507_s18 + $0x13d8] sm:$0xff] }
 0x4d2   : > { %v988_v18 = vld [vmem:[%s19507_s18 + $0x13f8] sm:$0xff]  ;;  %v17065_v33 = vcombine.high %v983_v6, %v987_v14  ;;  %v17064_v26 = vcombine.low %v983_v6, %v987_v14 }
 0x4d3   : > { %v17067_v49 = vcombine.high %v984_v15, %v988_v18  ;;  %v17066_v27 = vcombine.low %v984_v15, %v988_v18  ;;  %v1031_v15 = vld [vmem:[%s19507_s18 + $0x1550] sm:$0xff] }
 0x4d4   : > { %10906 = vmatpush1.bf16.msra.mxu0 %v17016_v21  ;;  %11398 = vmatpush1.bf16.msra.mxu1 %v17018_v22  ;;  %v991_v21 = vld [vmem:[%s19507_s18 + $0x1410] sm:$0xff] }
 0x4d5   : > { %10907 = vmatprep.subr.bf16.mxu0 %v17025_v23  ;;  %11399 = vmatprep.subr.bf16.mxu1 %v17027_v25  ;;  %v995_v22 = vld [vmem:[%s19507_s18 + $0x1430] sm:$0xff]  ;;  %v992_v23 = vld [vmem:[%s19507_s18 + $0x1418] sm:$0xff] }
 0x4d6   : > { %v996_v25 = vld [vmem:[%s19507_s18 + $0x1438] sm:$0xff]  ;;  %v17073_v50 = vcombine.high %v991_v21, %v995_v22  ;;  %v17072_v40 = vcombine.low %v991_v21, %v995_v22  ;;  %v1035_v18 = vld [vmem:[%s19507_s18 + $0x1570] sm:$0xff] }
 0x4d7   : > { %v17075_v31 = vcombine.high %v992_v23, %v996_v25  ;;  %v17074_v41 = vcombine.low %v992_v23, %v996_v25  ;;  %v17113_v21 = vcombine.high %v1031_v15, %v1035_v18  ;;  %v1039_v23 = vld [vmem:[%s19507_s18 + $0x1590] sm:$0xff] }
 0x4d8   : > { %10908 = vmatpush1.bf16.msra.mxu0 %v17024_v32  ;;  %11400 = vmatpush1.bf16.msra.mxu1 %v17026_v0  ;;  %v999_v32 = vld [vmem:[%s19507_s18 + $0x1450] sm:$0xff] }
 0x4d9   : > { %10909 = vmatprep.subr.bf16.mxu0 %v17033_v34  ;;  %11401 = vmatprep.subr.bf16.mxu1 %v17035_v37  ;;  %v1003_v0 = vld [vmem:[%s19507_s18 + $0x1470] sm:$0xff]  ;;  %v1000_v34 = vld [vmem:[%s19507_s18 + $0x1458] sm:$0xff] }
 0x4da   : > { %v1004_v37 = vld [vmem:[%s19507_s18 + $0x1478] sm:$0xff]  ;;  %v17081_v46 = vcombine.high %v999_v32, %v1003_v0  ;;  %v17080_v56 = vcombine.low %v999_v32, %v1003_v0  ;;  %v1043_v25 = vld [vmem:[%s19507_s18 + $0x15b0] sm:$0xff] }
 0x4db   : > { %v17083_v47 = vcombine.high %v1000_v34, %v1004_v37  ;;  %v17082_v61 = vcombine.low %v1000_v34, %v1004_v37  ;;  %v17121_v32 = vcombine.high %v1039_v23, %v1043_v25  ;;  %v1047_v34 = vld [vmem:[%s19507_s18 + $0x15d0] sm:$0xff] }
 0x4dc   : > { %10910 = vmatpush1.bf16.msra.mxu0 %v17032_v35  ;;  %11402 = vmatpush1.bf16.msra.mxu1 %v17034_v51  ;;  %v1007_v35 = vld [vmem:[%s19507_s18 + $0x1490] sm:$0xff] }
 0x4dd   : > { %10911 = vmatprep.subr.bf16.mxu0 %v17041_v53  ;;  %11403 = vmatprep.subr.bf16.mxu1 %v17043_v55  ;;  %v1011_v51 = vld [vmem:[%s19507_s18 + $0x14b0] sm:$0xff]  ;;  %v1008_v53 = vld [vmem:[%s19507_s18 + $0x1498] sm:$0xff] }
 0x4de   : > { %v1012_v55 = vld [vmem:[%s19507_s18 + $0x14b8] sm:$0xff]  ;;  %v17089_v62 = vcombine.high %v1007_v35, %v1011_v51  ;;  %v1051_v37 = vld [vmem:[%s19507_s18 + $0x15f0] sm:$0xff] }
 0x4df   : > { %v17091_v63 = vcombine.high %v1008_v53, %v1012_v55  ;;  %v17090_v30 = vcombine.low %v1008_v53, %v1012_v55  ;;  %v1055_v53 = vld [vmem:[%s19507_s18 + $0x1610] sm:$0xff] }
 0x4e0   : > { %10912 = vmatpush1.bf16.msra.mxu0 %v17040_v9  ;;  %11404 = vmatpush1.bf16.msra.mxu1 %v17042_v4  ;;  %v1015_v9 = vld [vmem:[%s19507_s18 + $0x14d0] sm:$0xff] }
 0x4e1   : > { %10913 = vmatprep.subr.bf16.mxu0 %v17049_v59  ;;  %11405 = vmatprep.subr.bf16.mxu1 %v17051_v5  ;;  %v1019_v4 = vld [vmem:[%s19507_s18 + $0x14f0] sm:$0xff]  ;;  %v1016_v59 = vld [vmem:[%s19507_s18 + $0x14d8] sm:$0xff] }
 0x4e2   : > { %v1020_v5 = vld [vmem:[%s19507_s18 + $0x14f8] sm:$0xff]  ;;  %v17097_v24 = vcombine.high %v1015_v9, %v1019_v4  ;;  %v1059_v55 = vld [vmem:[%s19507_s18 + $0x1630] sm:$0xff] }
 0x4e3   : > { %v17099_v44 = vcombine.high %v1016_v59, %v1020_v5 }
 0x4e4   : > { %10914 = vmatpush1.bf16.msra.mxu0 %v17048_v20  ;;  %11406 = vmatpush1.bf16.msra.mxu1 %v17050_v10  ;;  %v1027_v20 = vld [vmem:[%s19507_s18 + $0x1530] sm:$0xff]  ;;  %v1024_v10 = vld [vmem:[%s19507_s18 + $0x1518] sm:$0xff] }
 0x4e5   : > { %10915 = vmatprep.subr.bf16.mxu0 %v17057_v12  ;;  %11407 = vmatprep.subr.bf16.mxu1 %v17059_v13  ;;  %v1028_v12 = vld [vmem:[%s19507_s18 + $0x1538] sm:$0xff]  ;;  %v17096_v13 = vcombine.low %v1015_v9, %v1019_v4  ;;  %v17105_v6 = vcombine.high %v1023_v39, %v1027_v20  ;;  %v17137_v9 = vcombine.high %v1055_v53, %v1059_v55 }
 0x4e6   : > { %v17107_v14 = vcombine.high %v1024_v10, %v1028_v12 }
 0x4e8   : > { %10916 = vmatpush1.bf16.msra.mxu0 %v17056_v17  ;;  %11408 = vmatpush1.bf16.msra.mxu1 %v17058_v60  ;;  %v1032_v17 = vld [vmem:[%s19507_s18 + $0x1558] sm:$0xff] }
 0x4e9   : > { %10917 = vmatprep.subr.bf16.mxu0 %v17065_v33  ;;  %11409 = vmatprep.subr.bf16.mxu1 %v17067_v49  ;;  %v1036_v60 = vld [vmem:[%s19507_s18 + $0x1578] sm:$0xff]  ;;  %v17104_v33 = vcombine.low %v1023_v39, %v1027_v20  ;;  %v17106_v49 = vcombine.low %v1024_v10, %v1028_v12  ;;  %v1071_v10 = vld [vmem:[%s19507_s18 + $0x1690] sm:$0xff] }
 0x4ea   : > { %v17115_v22 = vcombine.high %v1032_v17, %v1036_v60  ;;  %v1075_v12 = vld [vmem:[%s19507_s18 + $0x16b0] sm:$0xff] }
 0x4ec   : > { %10918 = vmatpush1.bf16.msra.mxu0 %v17064_v26  ;;  %11410 = vmatpush1.bf16.msra.mxu1 %v17066_v27  ;;  %v1040_v26 = vld [vmem:[%s19507_s18 + $0x1598] sm:$0xff] }
 0x4ed   : > { %10928 = vmatprep.subr.bf16.mxu0 %v17073_v50  ;;  %11420 = vmatprep.subr.bf16.mxu1 %v17075_v31  ;;  %v1044_v27 = vld [vmem:[%s19507_s18 + $0x15b8] sm:$0xff]  ;;  %v17112_v50 = vcombine.low %v1031_v15, %v1035_v18  ;;  %v17114_v31 = vcombine.low %v1032_v17, %v1036_v60  ;;  %v17153_v15 = vcombine.high %v1071_v10, %v1075_v12  ;;  %v1079_v17 = vld [vmem:[%s19507_s18 + $0x16d0] sm:$0xff] }
 0x4ee   : > { %v17123_v0 = vcombine.high %v1040_v26, %v1044_v27  ;;  %v1083_v60 = vld [vmem:[%s19507_s18 + $0x16f0] sm:$0xff] }
 0x4ef   : > { %10920 = vmatmul.mubr.bf16.vlgmr.msra.gmra.mrb[4].mxu0 %v19943_v52  ;;  %11412 = vmatmul.mubr.bf16.vlgmr.msra.gmra.mrb[4].mxu1 %v19943_v52  ;;  %v17088_v52 = vcombine.low %v1007_v35, %v1011_v51  ;;  %v17129_v35 = vcombine.high %v1047_v34, %v1051_v37 }
 0x4f0   : > { %10929 = vmatpush1.bf16.msra.mxu0 %v17072_v40  ;;  %11421 = vmatpush1.bf16.msra.mxu1 %v17074_v41  ;;  %v1048_v40 = vld [vmem:[%s19507_s18 + $0x15d8] sm:$0xff] }
 0x4f1   : > { %10930 = vmatprep.subr.bf16.mxu0 %v17081_v46  ;;  %11422 = vmatprep.subr.bf16.mxu1 %v17083_v47  ;;  %v1052_v41 = vld [vmem:[%s19507_s18 + $0x15f8] sm:$0xff]  ;;  %v17120_v46 = vcombine.low %v1039_v23, %v1043_v25  ;;  %v17122_v47 = vcombine.low %v1040_v26, %v1044_v27  ;;  %v17161_v23 = vcombine.high %v1079_v17, %v1083_v60  ;;  %v1087_v26 = vld [vmem:[%s19507_s18 + $0x1710] sm:$0xff] }
 0x4f2   : > { %10960 = vmatprep.mubr.bf16.mxu0 %v19951_v1  ;;  %11452 = vmatprep.mubr.bf16.mxu1 %v19951_v1  ;;  %v17098_v1 = vcombine.low %v1016_v59, %v1020_v5  ;;  %v17131_v51 = vcombine.high %v1048_v40, %v1052_v41  ;;  %v1063_v59 = vld [vmem:[%s19507_s18 + $0x1650] sm:$0xff] }
 0x4f3   : > { %v1067_v5 = vld [vmem:[%s19507_s18 + $0x1670] sm:$0xff] }
 0x4f4   : > { %10931 = vmatpush1.bf16.msra.mxu0 %v17080_v56  ;;  %11423 = vmatpush1.bf16.msra.mxu1 %v17082_v61  ;;  %v1056_v56 = vld [vmem:[%s19507_s18 + $0x1618] sm:$0xff]  ;;  %v17145_v39 = vcombine.high %v1063_v59, %v1067_v5  ;;  %v1091_v27 = vld [vmem:[%s19507_s18 + $0x1730] sm:$0xff] }
 0x4f5   : > { %10932 = vmatprep.subr.bf16.mxu0 %v17089_v62  ;;  %11424 = vmatprep.subr.bf16.mxu1 %v17091_v63  ;;  %v1060_v61 = vld [vmem:[%s19507_s18 + $0x1638] sm:$0xff]  ;;  %v17128_v62 = vcombine.low %v1047_v34, %v1051_v37  ;;  %v17130_v63 = vcombine.low %v1048_v40, %v1052_v41  ;;  %v17169_v34 = vcombine.high %v1087_v26, %v1091_v27  ;;  %v1095_v40 = vld [vmem:[%s19507_s18 + $0x1750] sm:$0xff] }
 0x4f6   : > { %v17139_v4 = vcombine.high %v1056_v56, %v1060_v61  ;;  %v1099_v41 = vld [vmem:[%s19507_s18 + $0x1770] sm:$0xff] }
 0x4f8   : > { %10933 = vmatpush1.bf16.msra.mxu0 %v17088_v52  ;;  %11425 = vmatpush1.bf16.msra.mxu1 %v17090_v30  ;;  %v1064_v52 = vld [vmem:[%s19507_s18 + $0x1658] sm:$0xff] }
 0x4f9   : > { %10934 = vmatprep.subr.bf16.mxu0 %v17097_v24  ;;  %11426 = vmatprep.subr.bf16.mxu1 %v17099_v44  ;;  %v1068_v30 = vld [vmem:[%s19507_s18 + $0x1678] sm:$0xff]  ;;  %v17136_v24 = vcombine.low %v1055_v53, %v1059_v55  ;;  %v17138_v44 = vcombine.low %v1056_v56, %v1060_v61  ;;  %v17177_v53 = vcombine.high %v1095_v40, %v1099_v41  ;;  %v1103_v56 = vld [vmem:[%s19507_s18 + $0x1790] sm:$0xff] }
 0x4fa   : > { %v17147_v20 = vcombine.high %v1064_v52, %v1068_v30  ;;  %v1107_v61 = vld [vmem:[%s19507_s18 + $0x17b0] sm:$0xff] }
 0x4fc   : > { %10935 = vmatpush1.bf16.msra.mxu0 %v17096_v13  ;;  %11427 = vmatpush1.bf16.msra.mxu1 %v17098_v1  ;;  %v1072_v13 = vld [vmem:[%s19507_s18 + $0x1698] sm:$0xff] }
 0x4fd   : > { %10936 = vmatprep.subr.bf16.mxu0 %v17105_v6  ;;  %11428 = vmatprep.subr.bf16.mxu1 %v17107_v14  ;;  %v1076_v1 = vld [vmem:[%s19507_s18 + $0x16b8] sm:$0xff]  ;;  %v17144_v6 = vcombine.low %v1063_v59, %v1067_v5  ;;  %v17146_v14 = vcombine.low %v1064_v52, %v1068_v30  ;;  %v17185_v59 = vcombine.high %v1103_v56, %v1107_v61  ;;  %v1111_v52 = vld [vmem:[%s19507_s18 + $0x17d0] sm:$0xff] }
 0x4fe   : > { %v17155_v18 = vcombine.high %v1072_v13, %v1076_v1  ;;  %v1115_v30 = vld [vmem:[%s19507_s18 + $0x17f0] sm:$0xff] }
 0x500   : > { %10937 = vmatpush1.bf16.msra.mxu0 %v17104_v33  ;;  %11429 = vmatpush1.bf16.msra.mxu1 %v17106_v49  ;;  %v1080_v33 = vld [vmem:[%s19507_s18 + $0x16d8] sm:$0xff] }
 0x501   : > { %10938 = vmatprep.subr.bf16.mxu0 %v17113_v21  ;;  %11430 = vmatprep.subr.bf16.mxu1 %v17115_v22  ;;  %v1084_v49 = vld [vmem:[%s19507_s18 + $0x16f8] sm:$0xff]  ;;  %v17152_v21 = vcombine.low %v1071_v10, %v1075_v12  ;;  %v17154_v22 = vcombine.low %v1072_v13, %v1076_v1  ;;  %v17193_v10 = vcombine.high %v1111_v52, %v1115_v30  ;;  %v1119_v13 = vld [vmem:[%s19507_s18 + $0x1810] sm:$0xff] }
 0x502   : > { %v17163_v25 = vcombine.high %v1080_v33, %v1084_v49  ;;  %v1123_v1 = vld [vmem:[%s19507_s18 + $0x1830] sm:$0xff] }
 0x504   : > { %10939 = vmatpush1.bf16.msra.mxu0 %v17112_v50  ;;  %11431 = vmatpush1.bf16.msra.mxu1 %v17114_v31  ;;  %v1088_v50 = vld [vmem:[%s19507_s18 + $0x1718] sm:$0xff] }
 0x505   : > { %10940 = vmatprep.subr.bf16.mxu0 %v17121_v32  ;;  %11432 = vmatprep.subr.bf16.mxu1 %v17123_v0  ;;  %v1092_v31 = vld [vmem:[%s19507_s18 + $0x1738] sm:$0xff]  ;;  %v17160_v32 = vcombine.low %v1079_v17, %v1083_v60  ;;  %v17162_v0 = vcombine.low %v1080_v33, %v1084_v49  ;;  %v17201_v17 = vcombine.high %v1119_v13, %v1123_v1  ;;  %v1127_v33 = vld [vmem:[%s19507_s18 + $0x1850] sm:$0xff] }
 0x506   : > { %v17171_v37 = vcombine.high %v1088_v50, %v1092_v31  ;;  %v1131_v49 = vld [vmem:[%s19507_s18 + $0x1870] sm:$0xff] }
 0x508   : > { %10941 = vmatpush1.bf16.msra.mxu0 %v17120_v46  ;;  %11433 = vmatpush1.bf16.msra.mxu1 %v17122_v47  ;;  %v1096_v46 = vld [vmem:[%s19507_s18 + $0x1758] sm:$0xff] }
 0x509   : > { %10942 = vmatprep.subr.bf16.mxu0 %v17129_v35  ;;  %11434 = vmatprep.subr.bf16.mxu1 %v17131_v51  ;;  %v1100_v47 = vld [vmem:[%s19507_s18 + $0x1778] sm:$0xff]  ;;  %v17168_v35 = vcombine.low %v1087_v26, %v1091_v27  ;;  %v17170_v51 = vcombine.low %v1088_v50, %v1092_v31  ;;  %v17209_v26 = vcombine.high %v1127_v33, %v1131_v49  ;;  %v1135_v50 = vld [vmem:[%s19507_s18 + $0x1890] sm:$0xff] }
 0x50a   : > { %v17179_v55 = vcombine.high %v1096_v46, %v1100_v47  ;;  %v1139_v31 = vld [vmem:[%s19507_s18 + $0x18b0] sm:$0xff] }
 0x50c   : > { %10943 = vmatpush1.bf16.msra.mxu0 %v17128_v62  ;;  %11435 = vmatpush1.bf16.msra.mxu1 %v17130_v63  ;;  %v1104_v62 = vld [vmem:[%s19507_s18 + $0x1798] sm:$0xff] }
 0x50d   : > { %10944 = vmatprep.subr.bf16.mxu0 %v17137_v9  ;;  %11436 = vmatprep.subr.bf16.mxu1 %v17139_v4  ;;  %v1108_v63 = vld [vmem:[%s19507_s18 + $0x17b8] sm:$0xff]  ;;  %v17176_v9 = vcombine.low %v1095_v40, %v1099_v41  ;;  %v17178_v4 = vcombine.low %v1096_v46, %v1100_v47  ;;  %v17217_v40 = vcombine.high %v1135_v50, %v1139_v31  ;;  %v1143_v46 = vld [vmem:[%s19507_s18 + $0x18d0] sm:$0xff] }
 0x50e   : > { %v17187_v5 = vcombine.high %v1104_v62, %v1108_v63  ;;  %v1147_v47 = vld [vmem:[%s19507_s18 + $0x18f0] sm:$0xff] }
 0x510   : > { %10945 = vmatpush1.bf16.msra.mxu0 %v17136_v24  ;;  %11437 = vmatpush1.bf16.msra.mxu1 %v17138_v44  ;;  %v1112_v24 = vld [vmem:[%s19507_s18 + $0x17d8] sm:$0xff] }
 0x511   : > { %10946 = vmatprep.subr.bf16.mxu0 %v17145_v39  ;;  %11438 = vmatprep.subr.bf16.mxu1 %v17147_v20  ;;  %v1116_v44 = vld [vmem:[%s19507_s18 + $0x17f8] sm:$0xff]  ;;  %v17184_v39 = vcombine.low %v1103_v56, %v1107_v61  ;;  %v17186_v20 = vcombine.low %v1104_v62, %v1108_v63  ;;  %v1151_v61 = vld [vmem:[%s19507_s18 + $0x1910] sm:$0xff] }
 0x512   : > { %v17195_v12 = vcombine.high %v1112_v24, %v1116_v44  ;;  %v1155_v62 = vld [vmem:[%s19507_s18 + $0x1930] sm:$0xff]  ;;  %v1152_v63 = vld [vmem:[%s19507_s18 + $0x1918] sm:$0xff] }
 0x514   : > { %10947 = vmatpush1.bf16.msra.mxu0 %v17144_v6  ;;  %11439 = vmatpush1.bf16.msra.mxu1 %v17146_v14  ;;  %v1120_v6 = vld [vmem:[%s19507_s18 + $0x1818] sm:$0xff] }
 0x515   : > { %10948 = vmatprep.subr.bf16.mxu0 %v17153_v15  ;;  %11440 = vmatprep.subr.bf16.mxu1 %v17155_v18  ;;  %v1124_v14 = vld [vmem:[%s19507_s18 + $0x1838] sm:$0xff]  ;;  %v17192_v15 = vcombine.low %v1111_v52, %v1115_v30  ;;  %v17194_v18 = vcombine.low %v1112_v24, %v1116_v44  ;;  %v1159_v52 = vld [vmem:[%s19507_s18 + $0x1950] sm:$0xff] }
 0x516   : > { %v17203_v60 = vcombine.high %v1120_v6, %v1124_v14  ;;  %v1163_v30 = vld [vmem:[%s19507_s18 + $0x1970] sm:$0xff]  ;;  %v1160_v24 = vld [vmem:[%s19507_s18 + $0x1958] sm:$0xff] }
 0x517   : > { %v1164_v44 = vld [vmem:[%s19507_s18 + $0x1978] sm:$0xff] }
 0x518   : > { %10949 = vmatpush1.bf16.msra.mxu0 %v17152_v21  ;;  %11441 = vmatpush1.bf16.msra.mxu1 %v17154_v22  ;;  %v1128_v21 = vld [vmem:[%s19507_s18 + $0x1858] sm:$0xff] }
 0x519   : > { %10950 = vmatprep.subr.bf16.mxu0 %v17161_v23  ;;  %11442 = vmatprep.subr.bf16.mxu1 %v17163_v25  ;;  %v1132_v22 = vld [vmem:[%s19507_s18 + $0x1878] sm:$0xff]  ;;  %v17200_v23 = vcombine.low %v1119_v13, %v1123_v1  ;;  %v17202_v25 = vcombine.low %v1120_v6, %v1124_v14  ;;  %v1167_v13 = vld [vmem:[%s19507_s18 + $0x1990] sm:$0xff] }
 0x51a   : > { %v17211_v27 = vcombine.high %v1128_v21, %v1132_v22  ;;  %v1171_v1 = vld [vmem:[%s19507_s18 + $0x19b0] sm:$0xff]  ;;  %v1168_v6 = vld [vmem:[%s19507_s18 + $0x1998] sm:$0xff] }
 0x51b   : > { %v1172_v14 = vld [vmem:[%s19507_s18 + $0x19b8] sm:$0xff] }
 0x51c   : > { %10951 = vmatpush1.bf16.msra.mxu0 %v17160_v32  ;;  %11443 = vmatpush1.bf16.msra.mxu1 %v17162_v0  ;;  %v1136_v32 = vld [vmem:[%s19507_s18 + $0x1898] sm:$0xff] }
 0x51d   : > { %10952 = vmatprep.subr.bf16.mxu0 %v17169_v34  ;;  %11444 = vmatprep.subr.bf16.mxu1 %v17171_v37  ;;  %v1140_v0 = vld [vmem:[%s19507_s18 + $0x18b8] sm:$0xff]  ;;  %v17208_v34 = vcombine.low %v1127_v33, %v1131_v49  ;;  %v17210_v37 = vcombine.low %v1128_v21, %v1132_v22  ;;  %v1175_v33 = vld [vmem:[%s19507_s18 + $0x19d0] sm:$0xff] }
 0x51e   : > { %v17219_v41 = vcombine.high %v1136_v32, %v1140_v0  ;;  %v1179_v49 = vld [vmem:[%s19507_s18 + $0x19f0] sm:$0xff]  ;;  %v1176_v21 = vld [vmem:[%s19507_s18 + $0x19d8] sm:$0xff] }
 0x51f   : > { %v1180_v22 = vld [vmem:[%s19507_s18 + $0x19f8] sm:$0xff] }
 0x520   : > { %10953 = vmatpush1.bf16.msra.mxu0 %v17168_v35  ;;  %11445 = vmatpush1.bf16.msra.mxu1 %v17170_v51  ;;  %v1144_v35 = vld [vmem:[%s19507_s18 + $0x18d8] sm:$0xff] }
 0x521   : > { %10954 = vmatprep.subr.bf16.mxu0 %v17177_v53  ;;  %11446 = vmatprep.subr.bf16.mxu1 %v17179_v55  ;;  %v1148_v51 = vld [vmem:[%s19507_s18 + $0x18f8] sm:$0xff]  ;;  %v17218_v53 = vcombine.low %v1136_v32, %v1140_v0  ;;  %v17225_v55 = vcombine.high %v1143_v46, %v1147_v47 }
 0x522   : > { %v17227_v56 = vcombine.high %v1144_v35, %v1148_v51  ;;  %v1184_v32 = vld [vmem:[%s19507_s18 + $0x1a18] sm:$0xff] }
 0x523   : > { %v1188_v0 = vld [vmem:[%s19507_s18 + $0x1a38] sm:$0xff] }
 0x524   : > { %10955 = vmatpush1.bf16.msra.mxu0 %v17176_v9  ;;  %11447 = vmatpush1.bf16.msra.mxu1 %v17178_v4  ;;  %v1156_v9 = vld [vmem:[%s19507_s18 + $0x1938] sm:$0xff]  ;;  %v17224_v4 = vcombine.low %v1143_v46, %v1147_v47  ;;  %v1191_v46 = vld [vmem:[%s19507_s18 + $0x1a50] sm:$0xff] }
 0x525   : > { %10956 = vmatprep.subr.bf16.mxu0 %v17185_v59  ;;  %11448 = vmatprep.subr.bf16.mxu1 %v17187_v5  ;;  %v17233_v59 = vcombine.high %v1151_v61, %v1155_v62  ;;  %v17235_v5 = vcombine.high %v1152_v63, %v1156_v9  ;;  %v1195_v47 = vld [vmem:[%s19507_s18 + $0x1a70] sm:$0xff] }
 0x528   : > { %10957 = vmatpush1.bf16.msra.mxu0 %v17184_v39  ;;  %11449 = vmatpush1.bf16.msra.mxu1 %v17186_v20  ;;  %v17232_v39 = vcombine.low %v1151_v61, %v1155_v62  ;;  %v17234_v20 = vcombine.low %v1152_v63, %v1156_v9  ;;  %v1199_v61 = vld [vmem:[%s19507_s18 + $0x1a90] sm:$0xff]  ;;  %v1200_v63 = vld [vmem:[%s19507_s18 + $0x1a98] sm:$0xff] }
 0x529   : > { %10958 = vmatprep.subr.bf16.mxu0 %v17193_v10  ;;  %11450 = vmatprep.subr.bf16.mxu1 %v17195_v12  ;;  %v17241_v10 = vcombine.high %v1159_v52, %v1163_v30  ;;  %v17243_v12 = vcombine.high %v1160_v24, %v1164_v44  ;;  %v1203_v62 = vld [vmem:[%s19507_s18 + $0x1ab0] sm:$0xff]  ;;  %v1204_v9 = vld [vmem:[%s19507_s18 + $0x1ab8] sm:$0xff] }
 0x52c   : > { %10959 = vmatpush1.bf16.msra.mxu0 %v17192_v15  ;;  %11451 = vmatpush1.bf16.msra.mxu1 %v17194_v18  ;;  %v17240_v15 = vcombine.low %v1159_v52, %v1163_v30  ;;  %v17242_v18 = vcombine.low %v1160_v24, %v1164_v44  ;;  %v1207_v52 = vld [vmem:[%s19507_s18 + $0x1ad0] sm:$0xff]  ;;  %v1208_v24 = vld [vmem:[%s19507_s18 + $0x1ad8] sm:$0xff] }
 0x52d   : > { %10969 = vmatprep.subr.bf16.mxu0 %v17201_v17  ;;  %11461 = vmatprep.subr.bf16.mxu1 %v17203_v60  ;;  %v17249_v17 = vcombine.high %v1167_v13, %v1171_v1  ;;  %v17251_v60 = vcombine.high %v1168_v6, %v1172_v14  ;;  %v1211_v30 = vld [vmem:[%s19507_s18 + $0x1af0] sm:$0xff]  ;;  %v1212_v44 = vld [vmem:[%s19507_s18 + $0x1af8] sm:$0xff] }
 0x52f   : > { %10961 = vmatmul.mubr.bf16.vlgmr.msra.gmra.mrb[4].mxu0 %v20026_v28  ;;  %11453 = vmatmul.mubr.bf16.vlgmr.msra.gmra.mrb[4].mxu1 %v20026_v28  ;;  %v17216_v28 = vcombine.low %v1135_v50, %v1139_v31  ;;  %v1183_v50 = vld [vmem:[%s19507_s18 + $0x1a10] sm:$0xff] }
 0x530   : > { %10970 = vmatpush1.bf16.msra.mxu0 %v17200_v23  ;;  %11462 = vmatpush1.bf16.msra.mxu1 %v17202_v25  ;;  %v17248_v23 = vcombine.low %v1167_v13, %v1171_v1  ;;  %v17250_v25 = vcombine.low %v1168_v6, %v1172_v14  ;;  %v1187_v31 = vld [vmem:[%s19507_s18 + $0x1a30] sm:$0xff]  ;;  %v1216_v6 = vld [vmem:[%s19507_s18 + $0x1b18] sm:$0xff] }
 0x531   : > { %10971 = vmatprep.subr.bf16.mxu0 %v17209_v26  ;;  %11463 = vmatprep.subr.bf16.mxu1 %v17211_v27  ;;  %v17257_v26 = vcombine.high %v1175_v33, %v1179_v49  ;;  %v17259_v27 = vcombine.high %v1176_v21, %v1180_v22  ;;  %v1215_v13 = vld [vmem:[%s19507_s18 + $0x1b10] sm:$0xff]  ;;  %v1220_v14 = vld [vmem:[%s19507_s18 + $0x1b38] sm:$0xff] }
 0x532   : > { %11001 = vmatprep.mubr.bf16.mxu0 %v20033_v38  ;;  %11493 = vmatprep.mubr.bf16.mxu1 %v20033_v38  ;;  %v17226_v38 = vcombine.low %v1144_v35, %v1148_v51  ;;  %v1192_v35 = vld [vmem:[%s19507_s18 + $0x1a58] sm:$0xff]  ;;  %v1219_v1 = vld [vmem:[%s19507_s18 + $0x1b30] sm:$0xff] }
 0x533   : > { %v1196_v51 = vld [vmem:[%s19507_s18 + $0x1a78] sm:$0xff] }
 0x534   : > { %10972 = vmatpush1.bf16.msra.mxu0 %v17208_v34  ;;  %11464 = vmatpush1.bf16.msra.mxu1 %v17210_v37  ;;  %v17256_v34 = vcombine.low %v1175_v33, %v1179_v49  ;;  %v17258_v37 = vcombine.low %v1176_v21, %v1180_v22  ;;  %v1223_v33 = vld [vmem:[%s19507_s18 + $0x1b50] sm:$0xff]  ;;  %v1224_v21 = vld [vmem:[%s19507_s18 + $0x1b58] sm:$0xff] }
 0x535   : > { %10973 = vmatprep.subr.bf16.mxu0 %v17217_v40  ;;  %11465 = vmatprep.subr.bf16.mxu1 %v17219_v41  ;;  %v17265_v40 = vcombine.high %v1183_v50, %v1187_v31  ;;  %v17267_v41 = vcombine.high %v1184_v32, %v1188_v0  ;;  %v1227_v49 = vld [vmem:[%s19507_s18 + $0x1b70] sm:$0xff]  ;;  %v1228_v22 = vld [vmem:[%s19507_s18 + $0x1b78] sm:$0xff] }
 0x538   : > { %10974 = vmatpush1.bf16.msra.mxu0 %v17216_v28  ;;  %11466 = vmatpush1.bf16.msra.mxu1 %v17218_v53  ;;  %v17264_v28 = vcombine.low %v1183_v50, %v1187_v31  ;;  %v17266_v53 = vcombine.low %v1184_v32, %v1188_v0  ;;  %v1231_v50 = vld [vmem:[%s19507_s18 + $0x1b90] sm:$0xff]  ;;  %v1232_v32 = vld [vmem:[%s19507_s18 + $0x1b98] sm:$0xff] }
 0x539   : > { %10975 = vmatprep.subr.bf16.mxu0 %v17225_v55  ;;  %11467 = vmatprep.subr.bf16.mxu1 %v17227_v56  ;;  %v17273_v55 = vcombine.high %v1191_v46, %v1195_v47  ;;  %v17275_v56 = vcombine.high %v1192_v35, %v1196_v51  ;;  %v1235_v31 = vld [vmem:[%s19507_s18 + $0x1bb0] sm:$0xff]  ;;  %v1236_v0 = vld [vmem:[%s19507_s18 + $0x1bb8] sm:$0xff] }
 0x53c   : > { %10976 = vmatpush1.bf16.msra.mxu0 %v17224_v4  ;;  %11468 = vmatpush1.bf16.msra.mxu1 %v17226_v38  ;;  %v17272_v4 = vcombine.low %v1191_v46, %v1195_v47  ;;  %v17274_v38 = vcombine.low %v1192_v35, %v1196_v51  ;;  %v1239_v46 = vld [vmem:[%s19507_s18 + $0x1bd0] sm:$0xff]  ;;  %v1240_v35 = vld [vmem:[%s19507_s18 + $0x1bd8] sm:$0xff] }
 0x53d   : > { %10977 = vmatprep.subr.bf16.mxu0 %v17233_v59  ;;  %11469 = vmatprep.subr.bf16.mxu1 %v17235_v5  ;;  %v17281_v59 = vcombine.high %v1199_v61, %v1203_v62  ;;  %v17283_v5 = vcombine.high %v1200_v63, %v1204_v9  ;;  %v1243_v47 = vld [vmem:[%s19507_s18 + $0x1bf0] sm:$0xff]  ;;  %v1244_v51 = vld [vmem:[%s19507_s18 + $0x1bf8] sm:$0xff] }
 0x540   : > { %10978 = vmatpush1.bf16.msra.mxu0 %v17232_v39  ;;  %11470 = vmatpush1.bf16.msra.mxu1 %v17234_v20  ;;  %v17280_v39 = vcombine.low %v1199_v61, %v1203_v62  ;;  %v17282_v20 = vcombine.low %v1200_v63, %v1204_v9  ;;  %v1247_v61 = vld [vmem:[%s19507_s18 + $0x1c10] sm:$0xff]  ;;  %v1248_v63 = vld [vmem:[%s19507_s18 + $0x1c18] sm:$0xff] }
 0x541   : > { %10979 = vmatprep.subr.bf16.mxu0 %v17241_v10  ;;  %11471 = vmatprep.subr.bf16.mxu1 %v17243_v12  ;;  %v17289_v10 = vcombine.high %v1207_v52, %v1211_v30  ;;  %v17291_v12 = vcombine.high %v1208_v24, %v1212_v44  ;;  %v1251_v62 = vld [vmem:[%s19507_s18 + $0x1c30] sm:$0xff]  ;;  %v1252_v9 = vld [vmem:[%s19507_s18 + $0x1c38] sm:$0xff] }
 0x544   : > { %10980 = vmatpush1.bf16.msra.mxu0 %v17240_v15  ;;  %11472 = vmatpush1.bf16.msra.mxu1 %v17242_v18  ;;  %v17288_v15 = vcombine.low %v1207_v52, %v1211_v30  ;;  %v17290_v18 = vcombine.low %v1208_v24, %v1212_v44  ;;  %v1255_v52 = vld [vmem:[%s19507_s18 + $0x1c50] sm:$0xff]  ;;  %v1256_v24 = vld [vmem:[%s19507_s18 + $0x1c58] sm:$0xff] }
 0x545   : > { %10981 = vmatprep.subr.bf16.mxu0 %v17249_v17  ;;  %11473 = vmatprep.subr.bf16.mxu1 %v17251_v60  ;;  %v17297_v17 = vcombine.high %v1215_v13, %v1219_v1  ;;  %v17299_v60 = vcombine.high %v1216_v6, %v1220_v14  ;;  %v1259_v30 = vld [vmem:[%s19507_s18 + $0x1c70] sm:$0xff]  ;;  %v1260_v44 = vld [vmem:[%s19507_s18 + $0x1c78] sm:$0xff] }
 0x548   : > { %10982 = vmatpush1.bf16.msra.mxu0 %v17248_v23  ;;  %11474 = vmatpush1.bf16.msra.mxu1 %v17250_v25  ;;  %v17296_v23 = vcombine.low %v1215_v13, %v1219_v1  ;;  %v17298_v25 = vcombine.low %v1216_v6, %v1220_v14  ;;  %v1263_v13 = vld [vmem:[%s19507_s18 + $0x1c90] sm:$0xff]  ;;  %v1264_v6 = vld [vmem:[%s19507_s18 + $0x1c98] sm:$0xff] }
 0x549   : > { %10983 = vmatprep.subr.bf16.mxu0 %v17257_v26  ;;  %11475 = vmatprep.subr.bf16.mxu1 %v17259_v27  ;;  %v17305_v26 = vcombine.high %v1223_v33, %v1227_v49  ;;  %v17307_v27 = vcombine.high %v1224_v21, %v1228_v22  ;;  %v1267_v1 = vld [vmem:[%s19507_s18 + $0x1cb0] sm:$0xff]  ;;  %v1268_v14 = vld [vmem:[%s19507_s18 + $0x1cb8] sm:$0xff] }
 0x54c   : > { %10984 = vmatpush1.bf16.msra.mxu0 %v17256_v34  ;;  %11476 = vmatpush1.bf16.msra.mxu1 %v17258_v37  ;;  %v17304_v34 = vcombine.low %v1223_v33, %v1227_v49  ;;  %v17306_v37 = vcombine.low %v1224_v21, %v1228_v22  ;;  %v1271_v33 = vld [vmem:[%s19507_s18 + $0x1cd0] sm:$0xff]  ;;  %v1272_v21 = vld [vmem:[%s19507_s18 + $0x1cd8] sm:$0xff] }
 0x54d   : > { %10985 = vmatprep.subr.bf16.mxu0 %v17265_v40  ;;  %11477 = vmatprep.subr.bf16.mxu1 %v17267_v41  ;;  %v17313_v40 = vcombine.high %v1231_v50, %v1235_v31  ;;  %v17315_v41 = vcombine.high %v1232_v32, %v1236_v0  ;;  %v1275_v49 = vld [vmem:[%s19507_s18 + $0x1cf0] sm:$0xff]  ;;  %v1276_v22 = vld [vmem:[%s19507_s18 + $0x1cf8] sm:$0xff] }
 0x550   : > { %10986 = vmatpush1.bf16.msra.mxu0 %v17264_v28  ;;  %11478 = vmatpush1.bf16.msra.mxu1 %v17266_v53  ;;  %v17312_v28 = vcombine.low %v1231_v50, %v1235_v31  ;;  %v17314_v53 = vcombine.low %v1232_v32, %v1236_v0  ;;  %v1283_v50 = vld [vmem:[%s19507_s18 + $0x1d30] sm:$0xff]  ;;  %v1280_v31 = vld [vmem:[%s19507_s18 + $0x1d18] sm:$0xff]  ;;  %v17352_v0 = vcombine.low %v1271_v33, %v1275_v49 }
 0x551   : > { %10987 = vmatprep.subr.bf16.mxu0 %v17273_v55  ;;  %11479 = vmatprep.subr.bf16.mxu1 %v17275_v56  ;;  %v17321_v55 = vcombine.high %v1239_v46, %v1243_v47  ;;  %v17323_v56 = vcombine.high %v1240_v35, %v1244_v51  ;;  %v1284_v32 = vld [vmem:[%s19507_s18 + $0x1d38] sm:$0xff] }
 0x554   : > { %10988 = vmatpush1.bf16.msra.mxu0 %v17272_v4  ;;  %11480 = vmatpush1.bf16.msra.mxu1 %v17274_v38  ;;  %v17320_v4 = vcombine.low %v1239_v46, %v1243_v47  ;;  %v17322_v38 = vcombine.low %v1240_v35, %v1244_v51  ;;  %v1288_v46 = vld [vmem:[%s19507_s18 + $0x1d58] sm:$0xff]  ;;  %v17362_v51 = vcombine.low %v1280_v31, %v1284_v32 }
 0x555   : > { %10989 = vmatprep.subr.bf16.mxu0 %v17281_v59  ;;  %11481 = vmatprep.subr.bf16.mxu1 %v17283_v5  ;;  %v17329_v59 = vcombine.high %v1247_v61, %v1251_v62  ;;  %v17331_v5 = vcombine.high %v1248_v63, %v1252_v9  ;;  %v1292_v47 = vld [vmem:[%s19507_s18 + $0x1d78] sm:$0xff] }
 0x558   : > { %10990 = vmatpush1.bf16.msra.mxu0 %v17280_v39  ;;  %11482 = vmatpush1.bf16.msra.mxu1 %v17282_v20  ;;  %v17328_v39 = vcombine.low %v1247_v61, %v1251_v62  ;;  %v17330_v20 = vcombine.low %v1248_v63, %v1252_v9  ;;  %v1296_v61 = vld [vmem:[%s19507_s18 + $0x1d98] sm:$0xff]  ;;  %v17370_v9 = vcombine.low %v1288_v46, %v1292_v47 }
 0x559   : > { %10991 = vmatprep.subr.bf16.mxu0 %v17289_v10  ;;  %11483 = vmatprep.subr.bf16.mxu1 %v17291_v12  ;;  %v17337_v10 = vcombine.high %v1255_v52, %v1259_v30  ;;  %v17339_v12 = vcombine.high %v1256_v24, %v1260_v44  ;;  %v1300_v62 = vld [vmem:[%s19507_s18 + $0x1db8] sm:$0xff] }
 0x55c   : > { %10992 = vmatpush1.bf16.msra.mxu0 %v17288_v15  ;;  %11484 = vmatpush1.bf16.msra.mxu1 %v17290_v18  ;;  %v17336_v15 = vcombine.low %v1255_v52, %v1259_v30  ;;  %v17338_v18 = vcombine.low %v1256_v24, %v1260_v44  ;;  %v1304_v52 = vld [vmem:[%s19507_s18 + $0x1dd8] sm:$0xff]  ;;  %v17378_v44 = vcombine.low %v1296_v61, %v1300_v62 }
 0x55d   : > { %10993 = vmatprep.subr.bf16.mxu0 %v17297_v17  ;;  %11485 = vmatprep.subr.bf16.mxu1 %v17299_v60  ;;  %v17345_v17 = vcombine.high %v1263_v13, %v1267_v1  ;;  %v17347_v60 = vcombine.high %v1264_v6, %v1268_v14  ;;  %v1308_v30 = vld [vmem:[%s19507_s18 + $0x1df8] sm:$0xff] }
 0x560   : > { %10994 = vmatpush1.bf16.msra.mxu0 %v17296_v23  ;;  %11486 = vmatpush1.bf16.msra.mxu1 %v17298_v25  ;;  %v17346_v23 = vcombine.low %v1264_v6, %v1268_v14  ;;  %v17353_v25 = vcombine.high %v1271_v33, %v1275_v49  ;;  %v17386_v14 = vcombine.low %v1304_v52, %v1308_v30  ;;  %v1320_v33 = vld [vmem:[%s19507_s18 + $0x1e58] sm:$0xff] }
 0x561   : > { %10995 = vmatprep.subr.bf16.mxu0 %v17305_v26  ;;  %11487 = vmatprep.subr.bf16.mxu1 %v17307_v27  ;;  %v17355_v26 = vcombine.high %v1272_v21, %v1276_v22  ;;  %v1279_v27 = vld [vmem:[%s19507_s18 + $0x1d10] sm:$0xff]  ;;  %v1324_v49 = vld [vmem:[%s19507_s18 + $0x1e78] sm:$0xff] }
 0x562   : > { %v17360_v35 = vcombine.low %v1279_v27, %v1283_v50 }
 0x564   : > { %10996 = vmatpush1.bf16.msra.mxu0 %v17304_v34  ;;  %11488 = vmatpush1.bf16.msra.mxu1 %v17306_v37  ;;  %v17361_v34 = vcombine.high %v1279_v27, %v1283_v50  ;;  %v17363_v37 = vcombine.high %v1280_v31, %v1284_v32  ;;  %v1328_v27 = vld [vmem:[%s19507_s18 + $0x1e98] sm:$0xff]  ;;  %v17402_v32 = vcombine.low %v1320_v33, %v1324_v49 }
 0x565   : > { %10997 = vmatprep.subr.bf16.mxu0 %v17313_v40  ;;  %11489 = vmatprep.subr.bf16.mxu1 %v17315_v41  ;;  %v1287_v40 = vld [vmem:[%s19507_s18 + $0x1d50] sm:$0xff]  ;;  %v1332_v50 = vld [vmem:[%s19507_s18 + $0x1eb8] sm:$0xff] }
 0x566   : > { %v1291_v41 = vld [vmem:[%s19507_s18 + $0x1d70] sm:$0xff] }
 0x567   : > { %v17368_v63 = vcombine.low %v1287_v40, %v1291_v41 }
 0x568   : > { %10998 = vmatpush1.bf16.msra.mxu0 %v17312_v28  ;;  %11490 = vmatpush1.bf16.msra.mxu1 %v17314_v53  ;;  %v17369_v28 = vcombine.high %v1287_v40, %v1291_v41  ;;  %v17371_v53 = vcombine.high %v1288_v46, %v1292_v47  ;;  %v1336_v40 = vld [vmem:[%s19507_s18 + $0x1ed8] sm:$0xff]  ;;  %v17410_v47 = vcombine.low %v1328_v27, %v1332_v50 }
 0x569   : > { %10999 = vmatprep.subr.bf16.mxu0 %v17321_v55  ;;  %11491 = vmatprep.subr.bf16.mxu1 %v17323_v56  ;;  %v1295_v55 = vld [vmem:[%s19507_s18 + $0x1d90] sm:$0xff]  ;;  %v1340_v41 = vld [vmem:[%s19507_s18 + $0x1ef8] sm:$0xff] }
 0x56a   : > { %v1299_v56 = vld [vmem:[%s19507_s18 + $0x1db0] sm:$0xff] }
 0x56b   : > { %v17376_v24 = vcombine.low %v1295_v55, %v1299_v56 }
 0x56c   : > { %11000 = vmatpush1.bf16.msra.mxu0 %v17320_v4  ;;  %11492 = vmatpush1.bf16.msra.mxu1 %v17322_v38  ;;  %v17377_v4 = vcombine.high %v1295_v55, %v1299_v56  ;;  %v17379_v38 = vcombine.high %v1296_v61, %v1300_v62  ;;  %v1344_v55 = vld [vmem:[%s19507_s18 + $0x1f18] sm:$0xff]  ;;  %v17418_v62 = vcombine.low %v1336_v40, %v1340_v41 }
 0x56d   : > { %11010 = vmatprep.subr.bf16.mxu0 %v17329_v59  ;;  %11502 = vmatprep.subr.bf16.mxu1 %v17331_v5  ;;  %v1303_v59 = vld [vmem:[%s19507_s18 + $0x1dd0] sm:$0xff]  ;;  %v1348_v56 = vld [vmem:[%s19507_s18 + $0x1f38] sm:$0xff] }
 0x56e   : > { %v1307_v5 = vld [vmem:[%s19507_s18 + $0x1df0] sm:$0xff] }
 0x56f   : > { %11002 = vmatmul.mubr.bf16.vlgmr.msra.gmra.mrb[4].mxu0 %v20101_v8  ;;  %11494 = vmatmul.mubr.bf16.vlgmr.msra.gmra.mrb[4].mxu1 %v20101_v8  ;;  %v17344_v8 = vcombine.low %v1263_v13, %v1267_v1  ;;  %v1312_v13 = vld [vmem:[%s19507_s18 + $0x1e18] sm:$0xff]  ;;  %v17384_v6 = vcombine.low %v1303_v59, %v1307_v5 }
 0x570   : > { %11011 = vmatpush1.bf16.msra.mxu0 %v17328_v39  ;;  %11503 = vmatpush1.bf16.msra.mxu1 %v17330_v20  ;;  %v17385_v39 = vcombine.high %v1303_v59, %v1307_v5  ;;  %v17387_v20 = vcombine.high %v1304_v52, %v1308_v30  ;;  %v1316_v1 = vld [vmem:[%s19507_s18 + $0x1e38] sm:$0xff]  ;;  %v17426_v30 = vcombine.low %v1344_v55, %v1348_v56 }
 0x571   : > { %11012 = vmatprep.subr.bf16.mxu0 %v17337_v10  ;;  %11504 = vmatprep.subr.bf16.mxu1 %v17339_v12  ;;  %v1311_v10 = vld [vmem:[%s19507_s18 + $0x1e10] sm:$0xff]  ;;  %v1352_v59 = vld [vmem:[%s19507_s18 + $0x1f58] sm:$0xff] }
 0x572   : > { %11042 = vmatprep.mubr.bf16.mxu0 %v20109_v19  ;;  %11534 = vmatprep.mubr.bf16.mxu1 %v20109_v19  ;;  %v17354_v19 = vcombine.low %v1272_v21, %v1276_v22  ;;  %v1315_v12 = vld [vmem:[%s19507_s18 + $0x1e30] sm:$0xff]  ;;  %v17394_v22 = vcombine.low %v1312_v13, %v1316_v1  ;;  %v1356_v5 = vld [vmem:[%s19507_s18 + $0x1f78] sm:$0xff] }
 0x573   : > { %v17392_v21 = vcombine.low %v1311_v10, %v1315_v12 }
 0x574   : > { %11013 = vmatpush1.bf16.msra.mxu0 %v17336_v15  ;;  %11505 = vmatpush1.bf16.msra.mxu1 %v17338_v18  ;;  %v17393_v15 = vcombine.high %v1311_v10, %v1315_v12  ;;  %v17395_v18 = vcombine.high %v1312_v13, %v1316_v1  ;;  %v1360_v10 = vld [vmem:[%s19507_s18 + $0x1f98] sm:$0xff]  ;;  %v17434_v1 = vcombine.low %v1352_v59, %v1356_v5 }
 0x575   : > { %11014 = vmatprep.subr.bf16.mxu0 %v17345_v17  ;;  %11506 = vmatprep.subr.bf16.mxu1 %v17347_v60  ;;  %v1319_v17 = vld [vmem:[%s19507_s18 + $0x1e50] sm:$0xff]  ;;  %v1364_v12 = vld [vmem:[%s19507_s18 + $0x1fb8] sm:$0xff] }
 0x576   : > { %v1323_v60 = vld [vmem:[%s19507_s18 + $0x1e70] sm:$0xff] }
 0x577   : > { %v17400_v31 = vcombine.low %v1319_v17, %v1323_v60 }
 0x578   : > { %11015 = vmatpush1.bf16.msra.mxu0 %v17344_v8  ;;  %11507 = vmatpush1.bf16.msra.mxu1 %v17346_v23  ;;  %v17401_v8 = vcombine.high %v1319_v17, %v1323_v60  ;;  %v17403_v23 = vcombine.high %v1320_v33, %v1324_v49  ;;  %v1368_v17 = vld [vmem:[%s19507_s18 + $0x1fd8] sm:$0xff]  ;;  %v17442_v49 = vcombine.low %v1360_v10, %v1364_v12 }
 0x579   : > { %11016 = vmatprep.subr.bf16.mxu0 %v17353_v25  ;;  %11508 = vmatprep.subr.bf16.mxu1 %v17355_v26  ;;  %v1327_v25 = vld [vmem:[%s19507_s18 + $0x1e90] sm:$0xff]  ;;  %v1372_v60 = vld [vmem:[%s19507_s18 + $0x1ff8] sm:$0xff] }
 0x57a   : > { %v1331_v26 = vld [vmem:[%s19507_s18 + $0x1eb0] sm:$0xff] }
 0x57b   : > { %v17408_v46 = vcombine.low %v1327_v25, %v1331_v26 }
 0x57c   : > { %11017 = vmatpush1.bf16.msra.mxu0 %v17352_v0  ;;  %11509 = vmatpush1.bf16.msra.mxu1 %v17354_v19  ;;  %v17409_v0 = vcombine.high %v1327_v25, %v1331_v26  ;;  %v17411_v19 = vcombine.high %v1328_v27, %v1332_v50  ;;  %v1376_v25 = vld [vmem:[%s19507_s18 + $0x2018] sm:$0xff]  ;;  %v17450_v50 = vcombine.low %v1368_v17, %v1372_v60 }
 0x57d   : > { %11018 = vmatprep.subr.bf16.mxu0 %v17361_v34  ;;  %11510 = vmatprep.subr.bf16.mxu1 %v17363_v37  ;;  %v1335_v34 = vld [vmem:[%s19507_s18 + $0x1ed0] sm:$0xff]  ;;  %v1380_v26 = vld [vmem:[%s19507_s18 + $0x2038] sm:$0xff] }
 0x57e   : > { %v1339_v37 = vld [vmem:[%s19507_s18 + $0x1ef0] sm:$0xff] }
 0x57f   : > { %v17416_v61 = vcombine.low %v1335_v34, %v1339_v37 }
 0x580   : > { %11019 = vmatpush1.bf16.msra.mxu0 %v17360_v35  ;;  %11511 = vmatpush1.bf16.msra.mxu1 %v17362_v51  ;;  %v17417_v35 = vcombine.high %v1335_v34, %v1339_v37  ;;  %v17419_v51 = vcombine.high %v1336_v40, %v1340_v41  ;;  %v1384_v34 = vld [vmem:[%s19507_s18 + $0x2058] sm:$0xff]  ;;  %v17458_v41 = vcombine.low %v1376_v25, %v1380_v26 }
 0x581   : > { %11020 = vmatprep.subr.bf16.mxu0 %v17369_v28  ;;  %11512 = vmatprep.subr.bf16.mxu1 %v17371_v53  ;;  %v1343_v28 = vld [vmem:[%s19507_s18 + $0x1f10] sm:$0xff]  ;;  %v1388_v37 = vld [vmem:[%s19507_s18 + $0x2078] sm:$0xff] }
 0x582   : > { %v1347_v53 = vld [vmem:[%s19507_s18 + $0x1f30] sm:$0xff] }
 0x583   : > { %v17424_v52 = vcombine.low %v1343_v28, %v1347_v53 }
 0x584   : > { %11021 = vmatpush1.bf16.msra.mxu0 %v17368_v63  ;;  %11513 = vmatpush1.bf16.msra.mxu1 %v17370_v9  ;;  %v17425_v63 = vcombine.high %v1343_v28, %v1347_v53  ;;  %v17427_v9 = vcombine.high %v1344_v55, %v1348_v56  ;;  %v1392_v28 = vld [vmem:[%s19507_s18 + $0x2098] sm:$0xff]  ;;  %v17466_v56 = vcombine.low %v1384_v34, %v1388_v37 }
 0x585   : > { %11022 = vmatprep.subr.bf16.mxu0 %v17377_v4  ;;  %11514 = vmatprep.subr.bf16.mxu1 %v17379_v38  ;;  %v1351_v4 = vld [vmem:[%s19507_s18 + $0x1f50] sm:$0xff]  ;;  %v1396_v53 = vld [vmem:[%s19507_s18 + $0x20b8] sm:$0xff] }
 0x586   : > { %v1355_v38 = vld [vmem:[%s19507_s18 + $0x1f70] sm:$0xff] }
 0x587   : > { %v17432_v13 = vcombine.low %v1351_v4, %v1355_v38 }
 0x588   : > { %11023 = vmatpush1.bf16.msra.mxu0 %v17376_v24  ;;  %11515 = vmatpush1.bf16.msra.mxu1 %v17378_v44  ;;  %v17433_v24 = vcombine.high %v1351_v4, %v1355_v38  ;;  %v17435_v44 = vcombine.high %v1352_v59, %v1356_v5  ;;  %v1400_v4 = vld [vmem:[%s19507_s18 + $0x20d8] sm:$0xff]  ;;  %v17474_v59 = vcombine.low %v1392_v28, %v1396_v53 }
 0x589   : > { %11024 = vmatprep.subr.bf16.mxu0 %v17385_v39  ;;  %11516 = vmatprep.subr.bf16.mxu1 %v17387_v20  ;;  %v1359_v39 = vld [vmem:[%s19507_s18 + $0x1f90] sm:$0xff]  ;;  %v1404_v38 = vld [vmem:[%s19507_s18 + $0x20f8] sm:$0xff] }
 0x58a   : > { %v1363_v20 = vld [vmem:[%s19507_s18 + $0x1fb0] sm:$0xff] }
 0x58b   : > { %v17440_v33 = vcombine.low %v1359_v39, %v1363_v20 }
 0x58c   : > { %11025 = vmatpush1.bf16.msra.mxu0 %v17384_v6  ;;  %11517 = vmatpush1.bf16.msra.mxu1 %v17386_v14  ;;  %v17441_v6 = vcombine.high %v1359_v39, %v1363_v20  ;;  %v17443_v14 = vcombine.high %v1360_v10, %v1364_v12  ;;  %v1412_v39 = vld [vmem:[%s19507_s18 + $0x2138] sm:$0xff] }
 0x58d   : > { %11026 = vmatprep.subr.bf16.mxu0 %v17393_v15  ;;  %11518 = vmatprep.subr.bf16.mxu1 %v17395_v18  ;;  %v1367_v15 = vld [vmem:[%s19507_s18 + $0x1fd0] sm:$0xff] }
 0x58e   : > { %v1371_v18 = vld [vmem:[%s19507_s18 + $0x1ff0] sm:$0xff] }
 0x58f   : > { %v17448_v27 = vcombine.low %v1367_v15, %v1371_v18 }
 0x590   : > { %11027 = vmatpush1.bf16.msra.mxu0 %v17392_v21  ;;  %11519 = vmatpush1.bf16.msra.mxu1 %v17394_v22  ;;  %v17449_v21 = vcombine.high %v1367_v15, %v1371_v18  ;;  %v17451_v22 = vcombine.high %v1368_v17, %v1372_v60 }
 0x591   : > { %11028 = vmatprep.subr.bf16.mxu0 %v17401_v8  ;;  %11520 = vmatprep.subr.bf16.mxu1 %v17403_v23  ;;  %v1375_v8 = vld [vmem:[%s19507_s18 + $0x2010] sm:$0xff] }
 0x592   : > { %v1379_v23 = vld [vmem:[%s19507_s18 + $0x2030] sm:$0xff] }
 0x593   : > { %v17456_v40 = vcombine.low %v1375_v8, %v1379_v23 }
 0x594   : > { %11029 = vmatpush1.bf16.msra.mxu0 %v17400_v31  ;;  %11521 = vmatpush1.bf16.msra.mxu1 %v17402_v32  ;;  %v17457_v31 = vcombine.high %v1375_v8, %v1379_v23  ;;  %v17459_v32 = vcombine.high %v1376_v25, %v1380_v26 }
 0x595   : > { %11030 = vmatprep.subr.bf16.mxu0 %v17409_v0  ;;  %11522 = vmatprep.subr.bf16.mxu1 %v17411_v19  ;;  %v1383_v0 = vld [vmem:[%s19507_s18 + $0x2050] sm:$0xff] }
 0x596   : > { %v1387_v19 = vld [vmem:[%s19507_s18 + $0x2070] sm:$0xff] }
 0x597   : > { %v17464_v55 = vcombine.low %v1383_v0, %v1387_v19 }
 0x598   : > { %11031 = vmatpush1.bf16.msra.mxu0 %v17408_v46  ;;  %11523 = vmatpush1.bf16.msra.mxu1 %v17410_v47  ;;  %v17465_v46 = vcombine.high %v1383_v0, %v1387_v19  ;;  %v17467_v47 = vcombine.high %v1384_v34, %v1388_v37 }
 0x599   : > { %11032 = vmatprep.subr.bf16.mxu0 %v17417_v35  ;;  %11524 = vmatprep.subr.bf16.mxu1 %v17419_v51  ;;  %v1391_v35 = vld [vmem:[%s19507_s18 + $0x2090] sm:$0xff] }
 0x59a   : > { %v1395_v51 = vld [vmem:[%s19507_s18 + $0x20b0] sm:$0xff] }
 0x59c   : > { %11033 = vmatpush1.bf16.msra.mxu0 %v17416_v61  ;;  %11525 = vmatpush1.bf16.msra.mxu1 %v17418_v62  ;;  %v17473_v61 = vcombine.high %v1391_v35, %v1395_v51  ;;  %v17475_v62 = vcombine.high %v1392_v28, %v1396_v53 }
 0x59d   : > { %11034 = vmatprep.subr.bf16.mxu0 %v17425_v63  ;;  %11526 = vmatprep.subr.bf16.mxu1 %v17427_v9  ;;  %v1399_v63 = vld [vmem:[%s19507_s18 + $0x20d0] sm:$0xff] }
 0x59e   : > { %v1403_v9 = vld [vmem:[%s19507_s18 + $0x20f0] sm:$0xff] }
 0x59f   : > { %v17481_v5 = vcombine.high %v1399_v63, %v1403_v9  ;;  %v17480_v20 = vcombine.low %v1399_v63, %v1403_v9 }
 0x5a0   : > { %11035 = vmatpush1.bf16.msra.mxu0 %v17424_v52  ;;  %11527 = vmatpush1.bf16.msra.mxu1 %v17426_v30  ;;  %v17483_v52 = vcombine.high %v1400_v4, %v1404_v38  ;;  %v1407_v30 = vld [vmem:[%s19507_s18 + $0x2110] sm:$0xff] }
 0x5a1   : > { %11036 = vmatprep.subr.bf16.mxu0 %v17433_v24  ;;  %11528 = vmatprep.subr.bf16.mxu1 %v17435_v44  ;;  %v1411_v24 = vld [vmem:[%s19507_s18 + $0x2130] sm:$0xff]  ;;  %v1408_v44 = vld [vmem:[%s19507_s18 + $0x2118] sm:$0xff] }
 0x5a2   : > { %v17489_v10 = vcombine.high %v1407_v30, %v1411_v24  ;;  %v17491_v12 = vcombine.high %v1408_v44, %v1412_v39  ;;  %v17488_v15 = vcombine.low %v1407_v30, %v1411_v24  ;;  %v17490_v18 = vcombine.low %v1408_v44, %v1412_v39 }
 0x5a4   : > { %11037 = vmatpush1.bf16.msra.mxu0 %v17432_v13  ;;  %11529 = vmatpush1.bf16.msra.mxu1 %v17434_v1  ;;  %v1415_v13 = vld [vmem:[%s19507_s18 + $0x2150] sm:$0xff] }
 0x5a5   : > { %11038 = vmatprep.subr.bf16.mxu0 %v17441_v6  ;;  %11530 = vmatprep.subr.bf16.mxu1 %v17443_v14  ;;  %v1419_v1 = vld [vmem:[%s19507_s18 + $0x2170] sm:$0xff]  ;;  %v1416_v6 = vld [vmem:[%s19507_s18 + $0x2158] sm:$0xff] }
 0x5a6   : > { %v1420_v14 = vld [vmem:[%s19507_s18 + $0x2178] sm:$0xff]  ;;  %v17497_v17 = vcombine.high %v1415_v13, %v1419_v1  ;;  %v17496_v8 = vcombine.low %v1415_v13, %v1419_v1 }
 0x5a7   : > { %v17499_v60 = vcombine.high %v1416_v6, %v1420_v14  ;;  %v17498_v23 = vcombine.low %v1416_v6, %v1420_v14 }
 0x5a8   : > { %11039 = vmatpush1.bf16.msra.mxu0 %v17440_v33  ;;  %11531 = vmatpush1.bf16.msra.mxu1 %v17442_v49  ;;  %v1423_v33 = vld [vmem:[%s19507_s18 + $0x2190] sm:$0xff] }
 0x5a9   : > { %11040 = vmatprep.subr.bf16.mxu0 %v17449_v21  ;;  %11532 = vmatprep.subr.bf16.mxu1 %v17451_v22  ;;  %v1427_v49 = vld [vmem:[%s19507_s18 + $0x21b0] sm:$0xff]  ;;  %v1424_v21 = vld [vmem:[%s19507_s18 + $0x2198] sm:$0xff] }
 0x5aa   : > { %v1428_v22 = vld [vmem:[%s19507_s18 + $0x21b8] sm:$0xff]  ;;  %v17505_v25 = vcombine.high %v1423_v33, %v1427_v49  ;;  %v17504_v0 = vcombine.low %v1423_v33, %v1427_v49 }
 0x5ab   : > { %v17507_v26 = vcombine.high %v1424_v21, %v1428_v22  ;;  %v17506_v19 = vcombine.low %v1424_v21, %v1428_v22 }
 0x5ac   : > { %11041 = vmatpush1.bf16.msra.mxu0 %v17448_v27  ;;  %11533 = vmatpush1.bf16.msra.mxu1 %v17450_v50  ;;  %v1431_v27 = vld [vmem:[%s19507_s18 + $0x21d0] sm:$0xff] }
 0x5ad   : > { %11051 = vmatprep.subr.bf16.mxu0 %v17457_v31  ;;  %11543 = vmatprep.subr.bf16.mxu1 %v17459_v32  ;;  %v1435_v50 = vld [vmem:[%s19507_s18 + $0x21f0] sm:$0xff]  ;;  %v1432_v31 = vld [vmem:[%s19507_s18 + $0x21d8] sm:$0xff] }
 0x5ae   : > { %v1436_v32 = vld [vmem:[%s19507_s18 + $0x21f8] sm:$0xff]  ;;  %v17513_v34 = vcombine.high %v1431_v27, %v1435_v50 }
 0x5af   : > { %11043 = vmatmul.mubr.bf16.vlgmr.msra.gmra.mrb[4].mxu0 %v20188_v58  ;;  %11535 = vmatmul.mubr.bf16.vlgmr.msra.gmra.mrb[4].mxu1 %v20188_v58  ;;  %v17472_v58 = vcombine.low %v1391_v35, %v1395_v51  ;;  %v17515_v37 = vcombine.high %v1432_v31, %v1436_v32  ;;  %v17512_v35 = vcombine.low %v1431_v27, %v1435_v50 }
 0x5b0   : > { %11052 = vmatpush1.bf16.msra.mxu0 %v17456_v40  ;;  %11544 = vmatpush1.bf16.msra.mxu1 %v17458_v41  ;;  %v1439_v40 = vld [vmem:[%s19507_s18 + $0x2210] sm:$0xff]  ;;  %v17514_v51 = vcombine.low %v1432_v31, %v1436_v32 }
 0x5b1   : > { %11053 = vmatprep.subr.bf16.mxu0 %v17465_v46  ;;  %11545 = vmatprep.subr.bf16.mxu1 %v17467_v47  ;;  %v1443_v41 = vld [vmem:[%s19507_s18 + $0x2230] sm:$0xff]  ;;  %v1440_v46 = vld [vmem:[%s19507_s18 + $0x2218] sm:$0xff] }
 0x5b2   : > { %11083 = vmatprep.mubr.bf16.mxu0 %v20195_v7  ;;  %11575 = vmatprep.mubr.bf16.mxu1 %v20195_v7  ;;  %v17482_v7 = vcombine.low %v1400_v4, %v1404_v38  ;;  %v1444_v47 = vld [vmem:[%s19507_s18 + $0x2238] sm:$0xff]  ;;  %v17521_v28 = vcombine.high %v1439_v40, %v1443_v41  ;;  %v17520_v63 = vcombine.low %v1439_v40, %v1443_v41 }
 0x5b3   : > { %v17523_v53 = vcombine.high %v1440_v46, %v1444_v47  ;;  %v17522_v9 = vcombine.low %v1440_v46, %v1444_v47 }
 0x5b4   : > { %11054 = vmatpush1.bf16.msra.mxu0 %v17464_v55  ;;  %11546 = vmatpush1.bf16.msra.mxu1 %v17466_v56  ;;  %v1447_v55 = vld [vmem:[%s19507_s18 + $0x2250] sm:$0xff] }
 0x5b5   : > { %11055 = vmatprep.subr.bf16.mxu0 %v17473_v61  ;;  %11547 = vmatprep.subr.bf16.mxu1 %v17475_v62  ;;  %v1451_v56 = vld [vmem:[%s19507_s18 + $0x2270] sm:$0xff]  ;;  %v1448_v61 = vld [vmem:[%s19507_s18 + $0x2258] sm:$0xff] }
 0x5b6   : > { %v1452_v62 = vld [vmem:[%s19507_s18 + $0x2278] sm:$0xff]  ;;  %v17529_v4 = vcombine.high %v1447_v55, %v1451_v56  ;;  %v17528_v30 = vcombine.low %v1447_v55, %v1451_v56 }
 0x5b7   : > { %v17531_v38 = vcombine.high %v1448_v61, %v1452_v62  ;;  %v17530_v24 = vcombine.low %v1448_v61, %v1452_v62 }
 0x5b8   : > { %11056 = vmatpush1.bf16.msra.mxu0 %v17472_v58  ;;  %11548 = vmatpush1.bf16.msra.mxu1 %v17474_v59  ;;  %v1455_v58 = vld [vmem:[%s19507_s18 + $0x2290] sm:$0xff] }
 0x5b9   : > { %11057 = vmatprep.subr.bf16.mxu0 %v17481_v5  ;;  %11549 = vmatprep.subr.bf16.mxu1 %v17483_v52  ;;  %v1459_v59 = vld [vmem:[%s19507_s18 + $0x22b0] sm:$0xff]  ;;  %v1456_v5 = vld [vmem:[%s19507_s18 + $0x2298] sm:$0xff] }
 0x5ba   : > { %v1460_v52 = vld [vmem:[%s19507_s18 + $0x22b8] sm:$0xff]  ;;  %v17537_v44 = vcombine.high %v1455_v58, %v1459_v59  ;;  %v17536_v13 = vcombine.low %v1455_v58, %v1459_v59 }
 0x5bb   : > { %v17539_v39 = vcombine.high %v1456_v5, %v1460_v52  ;;  %v17538_v1 = vcombine.low %v1456_v5, %v1460_v52 }
 0x5bc   : > { %11058 = vmatpush1.bf16.msra.mxu0 %v17480_v20  ;;  %11550 = vmatpush1.bf16.msra.mxu1 %v17482_v7  ;;  %v1463_v20 = vld [vmem:[%s19507_s18 + $0x22d0] sm:$0xff] }
 0x5bd   : > { %11059 = vmatprep.subr.bf16.mxu0 %v17489_v10  ;;  %11551 = vmatprep.subr.bf16.mxu1 %v17491_v12  ;;  %v1467_v7 = vld [vmem:[%s19507_s18 + $0x22f0] sm:$0xff]  ;;  %v1464_v10 = vld [vmem:[%s19507_s18 + $0x22d8] sm:$0xff] }
 0x5be   : > { %v1468_v12 = vld [vmem:[%s19507_s18 + $0x22f8] sm:$0xff]  ;;  %v17545_v6 = vcombine.high %v1463_v20, %v1467_v7  ;;  %v17544_v33 = vcombine.low %v1463_v20, %v1467_v7 }
 0x5bf   : > { %v17547_v14 = vcombine.high %v1464_v10, %v1468_v12  ;;  %v17546_v49 = vcombine.low %v1464_v10, %v1468_v12 }
 0x5c0   : > { %11060 = vmatpush1.bf16.msra.mxu0 %v17488_v15  ;;  %11552 = vmatpush1.bf16.msra.mxu1 %v17490_v18  ;;  %v1471_v15 = vld [vmem:[%s19507_s18 + $0x2310] sm:$0xff] }
 0x5c1   : > { %11061 = vmatprep.subr.bf16.mxu0 %v17497_v17  ;;  %11553 = vmatprep.subr.bf16.mxu1 %v17499_v60  ;;  %v1475_v18 = vld [vmem:[%s19507_s18 + $0x2330] sm:$0xff]  ;;  %v1472_v17 = vld [vmem:[%s19507_s18 + $0x2318] sm:$0xff] }
 0x5c2   : > { %v1476_v60 = vld [vmem:[%s19507_s18 + $0x2338] sm:$0xff]  ;;  %v17553_v21 = vcombine.high %v1471_v15, %v1475_v18  ;;  %v17552_v27 = vcombine.low %v1471_v15, %v1475_v18 }
 0x5c3   : > { %v17555_v22 = vcombine.high %v1472_v17, %v1476_v60  ;;  %v17554_v50 = vcombine.low %v1472_v17, %v1476_v60 }
 0x5c4   : > { %11062 = vmatpush1.bf16.msra.mxu0 %v17496_v8  ;;  %11554 = vmatpush1.bf16.msra.mxu1 %v17498_v23  ;;  %v1479_v8 = vld [vmem:[%s19507_s18 + $0x2350] sm:$0xff] }
 0x5c5   : > { %11063 = vmatprep.subr.bf16.mxu0 %v17505_v25  ;;  %11555 = vmatprep.subr.bf16.mxu1 %v17507_v26  ;;  %v1483_v23 = vld [vmem:[%s19507_s18 + $0x2370] sm:$0xff]  ;;  %v1480_v25 = vld [vmem:[%s19507_s18 + $0x2358] sm:$0xff] }
 0x5c6   : > { %v1484_v26 = vld [vmem:[%s19507_s18 + $0x2378] sm:$0xff]  ;;  %v17561_v31 = vcombine.high %v1479_v8, %v1483_v23  ;;  %v17560_v40 = vcombine.low %v1479_v8, %v1483_v23 }
 0x5c7   : > { %v17563_v32 = vcombine.high %v1480_v25, %v1484_v26  ;;  %v17562_v41 = vcombine.low %v1480_v25, %v1484_v26  ;;  %v1535_v26 = vld [vmem:[%s19507_s18 + $0x2510] sm:$0xff] }
 0x5c8   : > { %11064 = vmatpush1.bf16.msra.mxu0 %v17504_v0  ;;  %11556 = vmatpush1.bf16.msra.mxu1 %v17506_v19  ;;  %v1487_v0 = vld [vmem:[%s19507_s18 + $0x2390] sm:$0xff] }
 0x5c9   : > { %11065 = vmatprep.subr.bf16.mxu0 %v17513_v34  ;;  %11557 = vmatprep.subr.bf16.mxu1 %v17515_v37  ;;  %v1491_v19 = vld [vmem:[%s19507_s18 + $0x23b0] sm:$0xff]  ;;  %v1488_v34 = vld [vmem:[%s19507_s18 + $0x2398] sm:$0xff] }
 0x5ca   : > { %v1492_v37 = vld [vmem:[%s19507_s18 + $0x23b8] sm:$0xff]  ;;  %v17569_v46 = vcombine.high %v1487_v0, %v1491_v19  ;;  %v17568_v55 = vcombine.low %v1487_v0, %v1491_v19 }
 0x5cb   : > { %v17571_v47 = vcombine.high %v1488_v34, %v1492_v37  ;;  %v17570_v56 = vcombine.low %v1488_v34, %v1492_v37  ;;  %v1543_v34 = vld [vmem:[%s19507_s18 + $0x2550] sm:$0xff] }
 0x5cc   : > { %11066 = vmatpush1.bf16.msra.mxu0 %v17512_v35  ;;  %11558 = vmatpush1.bf16.msra.mxu1 %v17514_v51  ;;  %v1495_v35 = vld [vmem:[%s19507_s18 + $0x23d0] sm:$0xff] }
 0x5cd   : > { %11067 = vmatprep.subr.bf16.mxu0 %v17521_v28  ;;  %11559 = vmatprep.subr.bf16.mxu1 %v17523_v53  ;;  %v1499_v51 = vld [vmem:[%s19507_s18 + $0x23f0] sm:$0xff]  ;;  %v1496_v28 = vld [vmem:[%s19507_s18 + $0x23d8] sm:$0xff] }
 0x5ce   : > { %v1500_v53 = vld [vmem:[%s19507_s18 + $0x23f8] sm:$0xff]  ;;  %v17577_v61 = vcombine.high %v1495_v35, %v1499_v51  ;;  %v17576_v58 = vcombine.low %v1495_v35, %v1499_v51  ;;  %v1547_v37 = vld [vmem:[%s19507_s18 + $0x2570] sm:$0xff] }
 0x5cf   : > { %v17579_v62 = vcombine.high %v1496_v28, %v1500_v53  ;;  %v17578_v59 = vcombine.low %v1496_v28, %v1500_v53  ;;  %v17625_v35 = vcombine.high %v1543_v34, %v1547_v37  ;;  %v1551_v28 = vld [vmem:[%s19507_s18 + $0x2590] sm:$0xff] }
 0x5d0   : > { %11068 = vmatpush1.bf16.msra.mxu0 %v17520_v63  ;;  %11560 = vmatpush1.bf16.msra.mxu1 %v17522_v9  ;;  %v1503_v63 = vld [vmem:[%s19507_s18 + $0x2410] sm:$0xff] }
 0x5d1   : > { %11069 = vmatprep.subr.bf16.mxu0 %v17529_v4  ;;  %11561 = vmatprep.subr.bf16.mxu1 %v17531_v38  ;;  %v1507_v9 = vld [vmem:[%s19507_s18 + $0x2430] sm:$0xff]  ;;  %v1504_v4 = vld [vmem:[%s19507_s18 + $0x2418] sm:$0xff] }
 0x5d2   : > { %v1508_v38 = vld [vmem:[%s19507_s18 + $0x2438] sm:$0xff]  ;;  %v17585_v5 = vcombine.high %v1503_v63, %v1507_v9  ;;  %v17584_v20 = vcombine.low %v1503_v63, %v1507_v9  ;;  %v1555_v53 = vld [vmem:[%s19507_s18 + $0x25b0] sm:$0xff] }
 0x5d3   : > { %v17587_v52 = vcombine.high %v1504_v4, %v1508_v38  ;;  %v17586_v7 = vcombine.low %v1504_v4, %v1508_v38  ;;  %v17633_v63 = vcombine.high %v1551_v28, %v1555_v53  ;;  %v1559_v4 = vld [vmem:[%s19507_s18 + $0x25d0] sm:$0xff] }
 0x5d4   : > { %11070 = vmatpush1.bf16.msra.mxu0 %v17528_v30  ;;  %11562 = vmatpush1.bf16.msra.mxu1 %v17530_v24  ;;  %v1511_v30 = vld [vmem:[%s19507_s18 + $0x2450] sm:$0xff] }
 0x5d5   : > { %11071 = vmatprep.subr.bf16.mxu0 %v17537_v44  ;;  %11563 = vmatprep.subr.bf16.mxu1 %v17539_v39  ;;  %v1515_v24 = vld [vmem:[%s19507_s18 + $0x2470] sm:$0xff]  ;;  %v1512_v44 = vld [vmem:[%s19507_s18 + $0x2458] sm:$0xff] }
 0x5d6   : > { %v1516_v39 = vld [vmem:[%s19507_s18 + $0x2478] sm:$0xff]  ;;  %v17593_v10 = vcombine.high %v1511_v30, %v1515_v24  ;;  %v17592_v15 = vcombine.low %v1511_v30, %v1515_v24  ;;  %v1563_v38 = vld [vmem:[%s19507_s18 + $0x25f0] sm:$0xff] }
 0x5d7   : > { %v17595_v12 = vcombine.high %v1512_v44, %v1516_v39  ;;  %v17594_v18 = vcombine.low %v1512_v44, %v1516_v39  ;;  %v17641_v30 = vcombine.high %v1559_v4, %v1563_v38  ;;  %v1567_v44 = vld [vmem:[%s19507_s18 + $0x2610] sm:$0xff] }
 0x5d8   : > { %11072 = vmatpush1.bf16.msra.mxu0 %v17536_v13  ;;  %11564 = vmatpush1.bf16.msra.mxu1 %v17538_v1  ;;  %v1519_v13 = vld [vmem:[%s19507_s18 + $0x2490] sm:$0xff] }
 0x5d9   : > { %11073 = vmatprep.subr.bf16.mxu0 %v17545_v6  ;;  %11565 = vmatprep.subr.bf16.mxu1 %v17547_v14  ;;  %v1523_v1 = vld [vmem:[%s19507_s18 + $0x24b0] sm:$0xff]  ;;  %v1520_v6 = vld [vmem:[%s19507_s18 + $0x2498] sm:$0xff] }
 0x5da   : > { %v1524_v14 = vld [vmem:[%s19507_s18 + $0x24b8] sm:$0xff]  ;;  %v17601_v17 = vcombine.high %v1519_v13, %v1523_v1  ;;  %v1571_v39 = vld [vmem:[%s19507_s18 + $0x2630] sm:$0xff] }
 0x5db   : > { %v17603_v60 = vcombine.high %v1520_v6, %v1524_v14  ;;  %v17602_v8 = vcombine.low %v1520_v6, %v1524_v14  ;;  %v1575_v6 = vld [vmem:[%s19507_s18 + $0x2650] sm:$0xff] }
 0x5dc   : > { %11074 = vmatpush1.bf16.msra.mxu0 %v17544_v33  ;;  %11566 = vmatpush1.bf16.msra.mxu1 %v17546_v49  ;;  %v1527_v33 = vld [vmem:[%s19507_s18 + $0x24d0] sm:$0xff] }
 0x5dd   : > { %11075 = vmatprep.subr.bf16.mxu0 %v17553_v21  ;;  %11567 = vmatprep.subr.bf16.mxu1 %v17555_v22  ;;  %v1531_v49 = vld [vmem:[%s19507_s18 + $0x24f0] sm:$0xff]  ;;  %v1528_v21 = vld [vmem:[%s19507_s18 + $0x24d8] sm:$0xff] }
 0x5de   : > { %v1532_v22 = vld [vmem:[%s19507_s18 + $0x24f8] sm:$0xff]  ;;  %v17609_v23 = vcombine.high %v1527_v33, %v1531_v49  ;;  %v1579_v14 = vld [vmem:[%s19507_s18 + $0x2670] sm:$0xff] }
 0x5df   : > { %v17611_v25 = vcombine.high %v1528_v21, %v1532_v22 }
 0x5e0   : > { %11076 = vmatpush1.bf16.msra.mxu0 %v17552_v27  ;;  %11568 = vmatpush1.bf16.msra.mxu1 %v17554_v50  ;;  %v1539_v27 = vld [vmem:[%s19507_s18 + $0x2530] sm:$0xff]  ;;  %v1536_v50 = vld [vmem:[%s19507_s18 + $0x2518] sm:$0xff] }
 0x5e1   : > { %11077 = vmatprep.subr.bf16.mxu0 %v17561_v31  ;;  %11569 = vmatprep.subr.bf16.mxu1 %v17563_v32  ;;  %v1540_v31 = vld [vmem:[%s19507_s18 + $0x2538] sm:$0xff]  ;;  %v17608_v32 = vcombine.low %v1527_v33, %v1531_v49  ;;  %v17617_v0 = vcombine.high %v1535_v26, %v1539_v27  ;;  %v17657_v33 = vcombine.high %v1575_v6, %v1579_v14 }
 0x5e2   : > { %v17619_v19 = vcombine.high %v1536_v50, %v1540_v31 }
 0x5e4   : > { %11078 = vmatpush1.bf16.msra.mxu0 %v17560_v40  ;;  %11570 = vmatpush1.bf16.msra.mxu1 %v17562_v41  ;;  %v1544_v40 = vld [vmem:[%s19507_s18 + $0x2558] sm:$0xff] }
 0x5e5   : > { %11079 = vmatprep.subr.bf16.mxu0 %v17569_v46  ;;  %11571 = vmatprep.subr.bf16.mxu1 %v17571_v47  ;;  %v1548_v41 = vld [vmem:[%s19507_s18 + $0x2578] sm:$0xff]  ;;  %v17616_v46 = vcombine.low %v1535_v26, %v1539_v27  ;;  %v17618_v47 = vcombine.low %v1536_v50, %v1540_v31  ;;  %v1591_v50 = vld [vmem:[%s19507_s18 + $0x26d0] sm:$0xff] }
 0x5e6   : > { %v17627_v51 = vcombine.high %v1544_v40, %v1548_v41  ;;  %v1595_v31 = vld [vmem:[%s19507_s18 + $0x26f0] sm:$0xff] }
 0x5e8   : > { %11080 = vmatpush1.bf16.msra.mxu0 %v17568_v55  ;;  %11572 = vmatpush1.bf16.msra.mxu1 %v17570_v56  ;;  %v1552_v55 = vld [vmem:[%s19507_s18 + $0x2598] sm:$0xff] }
 0x5e9   : > { %11081 = vmatprep.subr.bf16.mxu0 %v17577_v61  ;;  %11573 = vmatprep.subr.bf16.mxu1 %v17579_v62  ;;  %v1556_v56 = vld [vmem:[%s19507_s18 + $0x25b8] sm:$0xff]  ;;  %v17624_v61 = vcombine.low %v1543_v34, %v1547_v37  ;;  %v17626_v62 = vcombine.low %v1544_v40, %v1548_v41  ;;  %v17673_v34 = vcombine.high %v1591_v50, %v1595_v31  ;;  %v1599_v40 = vld [vmem:[%s19507_s18 + $0x2710] sm:$0xff] }
 0x5ea   : > { %v17635_v9 = vcombine.high %v1552_v55, %v1556_v56  ;;  %v1603_v41 = vld [vmem:[%s19507_s18 + $0x2730] sm:$0xff] }
 0x5ec   : > { %11082 = vmatpush1.bf16.msra.mxu0 %v17576_v58  ;;  %11574 = vmatpush1.bf16.msra.mxu1 %v17578_v59  ;;  %v1560_v58 = vld [vmem:[%s19507_s18 + $0x25d8] sm:$0xff] }
 0x5ed   : > { %11092 = vmatprep.subr.bf16.mxu0 %v17585_v5  ;;  %11584 = vmatprep.subr.bf16.mxu1 %v17587_v52  ;;  %v1564_v59 = vld [vmem:[%s19507_s18 + $0x25f8] sm:$0xff]  ;;  %v17632_v5 = vcombine.low %v1551_v28, %v1555_v53  ;;  %v17634_v52 = vcombine.low %v1552_v55, %v1556_v56  ;;  %v17681_v28 = vcombine.high %v1599_v40, %v1603_v41  ;;  %v1607_v55 = vld [vmem:[%s19507_s18 + $0x2750] sm:$0xff] }
 0x5ee   : > { %v17643_v24 = vcombine.high %v1560_v58, %v1564_v59  ;;  %v1611_v56 = vld [vmem:[%s19507_s18 + $0x2770] sm:$0xff] }
 0x5ef   : > { %11084 = vmatmul.mubr.bf16.vlgmr.msra.gmra.mrb[4].mxu0 %v20263_v57  ;;  %11576 = vmatmul.mubr.bf16.vlgmr.msra.gmra.mrb[4].mxu1 %v20263_v57  ;;  %v17600_v57 = vcombine.low %v1519_v13, %v1523_v1  ;;  %v17649_v13 = vcombine.high %v1567_v44, %v1571_v39 }
 0x5f0   : > { %11093 = vmatpush1.bf16.msra.mxu0 %v17584_v20  ;;  %11585 = vmatpush1.bf16.msra.mxu1 %v17586_v7  ;;  %v1568_v20 = vld [vmem:[%s19507_s18 + $0x2618] sm:$0xff] }
 0x5f1   : > { %11094 = vmatprep.subr.bf16.mxu0 %v17593_v10  ;;  %11586 = vmatprep.subr.bf16.mxu1 %v17595_v12  ;;  %v1572_v7 = vld [vmem:[%s19507_s18 + $0x2638] sm:$0xff]  ;;  %v17640_v10 = vcombine.low %v1559_v4, %v1563_v38  ;;  %v17642_v12 = vcombine.low %v1560_v58, %v1564_v59  ;;  %v17689_v4 = vcombine.high %v1607_v55, %v1611_v56  ;;  %v1615_v58 = vld [vmem:[%s19507_s18 + $0x2790] sm:$0xff] }
 0x5f2   : > { %11124 = vmatprep.mubr.bf16.mxu0 %v20271_v11  ;;  %11616 = vmatprep.mubr.bf16.mxu1 %v20271_v11  ;;  %v17610_v11 = vcombine.low %v1528_v21, %v1532_v22  ;;  %v17651_v1 = vcombine.high %v1568_v20, %v1572_v7  ;;  %v1583_v21 = vld [vmem:[%s19507_s18 + $0x2690] sm:$0xff] }
 0x5f3   : > { %v1587_v22 = vld [vmem:[%s19507_s18 + $0x26b0] sm:$0xff] }
 0x5f4   : > { %11095 = vmatpush1.bf16.msra.mxu0 %v17592_v15  ;;  %11587 = vmatpush1.bf16.msra.mxu1 %v17594_v18  ;;  %v1576_v15 = vld [vmem:[%s19507_s18 + $0x2658] sm:$0xff]  ;;  %v17665_v26 = vcombine.high %v1583_v21, %v1587_v22  ;;  %v1619_v59 = vld [vmem:[%s19507_s18 + $0x27b0] sm:$0xff] }
 0x5f5   : > { %11096 = vmatprep.subr.bf16.mxu0 %v17601_v17  ;;  %11588 = vmatprep.subr.bf16.mxu1 %v17603_v60  ;;  %v1580_v18 = vld [vmem:[%s19507_s18 + $0x2678] sm:$0xff]  ;;  %v17648_v17 = vcombine.low %v1567_v44, %v1571_v39  ;;  %v17650_v60 = vcombine.low %v1568_v20, %v1572_v7  ;;  %v17697_v44 = vcombine.high %v1615_v58, %v1619_v59  ;;  %v1623_v20 = vld [vmem:[%s19507_s18 + $0x27d0] sm:$0xff] }
 0x5f6   : > { %v17659_v49 = vcombine.high %v1576_v15, %v1580_v18  ;;  %v1627_v7 = vld [vmem:[%s19507_s18 + $0x27f0] sm:$0xff] }
 0x5f8   : > { %11097 = vmatpush1.bf16.msra.mxu0 %v17600_v57  ;;  %11589 = vmatpush1.bf16.msra.mxu1 %v17602_v8  ;;  %v1584_v57 = vld [vmem:[%s19507_s18 + $0x2698] sm:$0xff] }
 0x5f9   : > { %11098 = vmatprep.subr.bf16.mxu0 %v17609_v23  ;;  %11590 = vmatprep.subr.bf16.mxu1 %v17611_v25  ;;  %v1588_v8 = vld [vmem:[%s19507_s18 + $0x26b8] sm:$0xff]  ;;  %v17656_v23 = vcombine.low %v1575_v6, %v1579_v14  ;;  %v17658_v25 = vcombine.low %v1576_v15, %v1580_v18  ;;  %v17705_v6 = vcombine.high %v1623_v20, %v1627_v7  ;;  %v1631_v15 = vld [vmem:[%s19507_s18 + $0x2810] sm:$0xff] }
 0x5fa   : > { %v17667_v27 = vcombine.high %v1584_v57, %v1588_v8  ;;  %v1635_v18 = vld [vmem:[%s19507_s18 + $0x2830] sm:$0xff] }
 0x5fc   : > { %11099 = vmatpush1.bf16.msra.mxu0 %v17608_v32  ;;  %11591 = vmatpush1.bf16.msra.mxu1 %v17610_v11  ;;  %v1592_v32 = vld [vmem:[%s19507_s18 + $0x26d8] sm:$0xff] }
 0x5fd   : > { %11100 = vmatprep.subr.bf16.mxu0 %v17617_v0  ;;  %11592 = vmatprep.subr.bf16.mxu1 %v17619_v19  ;;  %v1596_v11 = vld [vmem:[%s19507_s18 + $0x26f8] sm:$0xff]  ;;  %v17664_v0 = vcombine.low %v1583_v21, %v1587_v22  ;;  %v17666_v19 = vcombine.low %v1584_v57, %v1588_v8  ;;  %v17713_v21 = vcombine.high %v1631_v15, %v1635_v18  ;;  %v1639_v57 = vld [vmem:[%s19507_s18 + $0x2850] sm:$0xff] }
 0x5fe   : > { %v17675_v37 = vcombine.high %v1592_v32, %v1596_v11  ;;  %v1643_v8 = vld [vmem:[%s19507_s18 + $0x2870] sm:$0xff] }
 0x600   : > { %11101 = vmatpush1.bf16.msra.mxu0 %v17616_v46  ;;  %11593 = vmatpush1.bf16.msra.mxu1 %v17618_v47  ;;  %v1600_v46 = vld [vmem:[%s19507_s18 + $0x2718] sm:$0xff] }
 0x601   : > { %11102 = vmatprep.subr.bf16.mxu0 %v17625_v35  ;;  %11594 = vmatprep.subr.bf16.mxu1 %v17627_v51  ;;  %v1604_v47 = vld [vmem:[%s19507_s18 + $0x2738] sm:$0xff]  ;;  %v17672_v35 = vcombine.low %v1591_v50, %v1595_v31  ;;  %v17674_v51 = vcombine.low %v1592_v32, %v1596_v11  ;;  %v17721_v50 = vcombine.high %v1639_v57, %v1643_v8  ;;  %v1647_v32 = vld [vmem:[%s19507_s18 + $0x2890] sm:$0xff] }
 0x602   : > { %v17683_v53 = vcombine.high %v1600_v46, %v1604_v47  ;;  %v1651_v11 = vld [vmem:[%s19507_s18 + $0x28b0] sm:$0xff] }
 0x604   : > { %11103 = vmatpush1.bf16.msra.mxu0 %v17624_v61  ;;  %11595 = vmatpush1.bf16.msra.mxu1 %v17626_v62  ;;  %v1608_v61 = vld [vmem:[%s19507_s18 + $0x2758] sm:$0xff] }
 0x605   : > { %11104 = vmatprep.subr.bf16.mxu0 %v17633_v63  ;;  %11596 = vmatprep.subr.bf16.mxu1 %v17635_v9  ;;  %v1612_v62 = vld [vmem:[%s19507_s18 + $0x2778] sm:$0xff]  ;;  %v17680_v63 = vcombine.low %v1599_v40, %v1603_v41  ;;  %v17682_v9 = vcombine.low %v1600_v46, %v1604_v47  ;;  %v17729_v40 = vcombine.high %v1647_v32, %v1651_v11  ;;  %v1655_v46 = vld [vmem:[%s19507_s18 + $0x28d0] sm:$0xff] }
 0x606   : > { %v17691_v38 = vcombine.high %v1608_v61, %v1612_v62  ;;  %v1659_v47 = vld [vmem:[%s19507_s18 + $0x28f0] sm:$0xff] }
 0x608   : > { %11105 = vmatpush1.bf16.msra.mxu0 %v17632_v5  ;;  %11597 = vmatpush1.bf16.msra.mxu1 %v17634_v52  ;;  %v1616_v5 = vld [vmem:[%s19507_s18 + $0x2798] sm:$0xff] }
 0x609   : > { %11106 = vmatprep.subr.bf16.mxu0 %v17641_v30  ;;  %11598 = vmatprep.subr.bf16.mxu1 %v17643_v24  ;;  %v1620_v52 = vld [vmem:[%s19507_s18 + $0x27b8] sm:$0xff]  ;;  %v17688_v30 = vcombine.low %v1607_v55, %v1611_v56  ;;  %v17690_v24 = vcombine.low %v1608_v61, %v1612_v62  ;;  %v1663_v56 = vld [vmem:[%s19507_s18 + $0x2910] sm:$0xff] }
 0x60a   : > { %v17699_v39 = vcombine.high %v1616_v5, %v1620_v52  ;;  %v1667_v61 = vld [vmem:[%s19507_s18 + $0x2930] sm:$0xff]  ;;  %v1664_v62 = vld [vmem:[%s19507_s18 + $0x2918] sm:$0xff] }
 0x60c   : > { %11107 = vmatpush1.bf16.msra.mxu0 %v17640_v10  ;;  %11599 = vmatpush1.bf16.msra.mxu1 %v17642_v12  ;;  %v1624_v10 = vld [vmem:[%s19507_s18 + $0x27d8] sm:$0xff] }
 0x60d   : > { %11108 = vmatprep.subr.bf16.mxu0 %v17649_v13  ;;  %11600 = vmatprep.subr.bf16.mxu1 %v17651_v1  ;;  %v1628_v12 = vld [vmem:[%s19507_s18 + $0x27f8] sm:$0xff]  ;;  %v17696_v13 = vcombine.low %v1615_v58, %v1619_v59  ;;  %v17698_v1 = vcombine.low %v1616_v5, %v1620_v52  ;;  %v1671_v58 = vld [vmem:[%s19507_s18 + $0x2950] sm:$0xff] }
 0x60e   : > { %v17707_v14 = vcombine.high %v1624_v10, %v1628_v12  ;;  %v1675_v59 = vld [vmem:[%s19507_s18 + $0x2970] sm:$0xff]  ;;  %v1672_v5 = vld [vmem:[%s19507_s18 + $0x2958] sm:$0xff] }
 0x60f   : > { %v1676_v52 = vld [vmem:[%s19507_s18 + $0x2978] sm:$0xff] }
 0x610   : > { %11109 = vmatpush1.bf16.msra.mxu0 %v17648_v17  ;;  %11601 = vmatpush1.bf16.msra.mxu1 %v17650_v60  ;;  %v1632_v17 = vld [vmem:[%s19507_s18 + $0x2818] sm:$0xff] }
 0x611   : > { %11110 = vmatprep.subr.bf16.mxu0 %v17657_v33  ;;  %11602 = vmatprep.subr.bf16.mxu1 %v17659_v49  ;;  %v1636_v60 = vld [vmem:[%s19507_s18 + $0x2838] sm:$0xff]  ;;  %v17704_v33 = vcombine.low %v1623_v20, %v1627_v7  ;;  %v17706_v49 = vcombine.low %v1624_v10, %v1628_v12  ;;  %v1679_v20 = vld [vmem:[%s19507_s18 + $0x2990] sm:$0xff] }
 0x612   : > { %v17715_v22 = vcombine.high %v1632_v17, %v1636_v60  ;;  %v1683_v7 = vld [vmem:[%s19507_s18 + $0x29b0] sm:$0xff]  ;;  %v1680_v10 = vld [vmem:[%s19507_s18 + $0x2998] sm:$0xff] }
 0x613   : > { %v1684_v12 = vld [vmem:[%s19507_s18 + $0x29b8] sm:$0xff] }
 0x614   : > { %11111 = vmatpush1.bf16.msra.mxu0 %v17656_v23  ;;  %11603 = vmatpush1.bf16.msra.mxu1 %v17658_v25  ;;  %v1640_v23 = vld [vmem:[%s19507_s18 + $0x2858] sm:$0xff] }
 0x615   : > { %11112 = vmatprep.subr.bf16.mxu0 %v17665_v26  ;;  %11604 = vmatprep.subr.bf16.mxu1 %v17667_v27  ;;  %v1644_v25 = vld [vmem:[%s19507_s18 + $0x2878] sm:$0xff]  ;;  %v17712_v26 = vcombine.low %v1631_v15, %v1635_v18  ;;  %v17714_v27 = vcombine.low %v1632_v17, %v1636_v60  ;;  %v1687_v15 = vld [vmem:[%s19507_s18 + $0x29d0] sm:$0xff] }
 0x616   : > { %v17723_v31 = vcombine.high %v1640_v23, %v1644_v25  ;;  %v1691_v18 = vld [vmem:[%s19507_s18 + $0x29f0] sm:$0xff]  ;;  %v1688_v17 = vld [vmem:[%s19507_s18 + $0x29d8] sm:$0xff] }
 0x617   : > { %v1692_v60 = vld [vmem:[%s19507_s18 + $0x29f8] sm:$0xff] }
 0x618   : > { %11113 = vmatpush1.bf16.msra.mxu0 %v17664_v0  ;;  %11605 = vmatpush1.bf16.msra.mxu1 %v17666_v19  ;;  %v1648_v0 = vld [vmem:[%s19507_s18 + $0x2898] sm:$0xff] }
 0x619   : > { %11114 = vmatprep.subr.bf16.mxu0 %v17673_v34  ;;  %11606 = vmatprep.subr.bf16.mxu1 %v17675_v37  ;;  %v1652_v19 = vld [vmem:[%s19507_s18 + $0x28b8] sm:$0xff]  ;;  %v17720_v34 = vcombine.low %v1639_v57, %v1643_v8  ;;  %v17722_v37 = vcombine.low %v1640_v23, %v1644_v25  ;;  %v1695_v57 = vld [vmem:[%s19507_s18 + $0x2a10] sm:$0xff] }
 0x61a   : > { %v17731_v41 = vcombine.high %v1648_v0, %v1652_v19  ;;  %v1699_v8 = vld [vmem:[%s19507_s18 + $0x2a30] sm:$0xff]  ;;  %v1696_v23 = vld [vmem:[%s19507_s18 + $0x2a18] sm:$0xff] }
 0x61b   : > { %v1700_v25 = vld [vmem:[%s19507_s18 + $0x2a38] sm:$0xff] }
 0x61c   : > { %11115 = vmatpush1.bf16.msra.mxu0 %v17672_v35  ;;  %11607 = vmatpush1.bf16.msra.mxu1 %v17674_v51  ;;  %v1656_v35 = vld [vmem:[%s19507_s18 + $0x28d8] sm:$0xff] }
 0x61d   : > { %11116 = vmatprep.subr.bf16.mxu0 %v17681_v28  ;;  %11608 = vmatprep.subr.bf16.mxu1 %v17683_v53  ;;  %v1660_v51 = vld [vmem:[%s19507_s18 + $0x28f8] sm:$0xff]  ;;  %v17730_v28 = vcombine.low %v1648_v0, %v1652_v19  ;;  %v17737_v53 = vcombine.high %v1655_v46, %v1659_v47 }
 0x61e   : > { %v17739_v55 = vcombine.high %v1656_v35, %v1660_v51  ;;  %v1704_v0 = vld [vmem:[%s19507_s18 + $0x2a58] sm:$0xff] }
 0x61f   : > { %v1708_v19 = vld [vmem:[%s19507_s18 + $0x2a78] sm:$0xff] }
 0x620   : > { %11117 = vmatpush1.bf16.msra.mxu0 %v17680_v63  ;;  %11609 = vmatpush1.bf16.msra.mxu1 %v17682_v9  ;;  %v1668_v63 = vld [vmem:[%s19507_s18 + $0x2938] sm:$0xff]  ;;  %v17736_v9 = vcombine.low %v1655_v46, %v1659_v47  ;;  %v1711_v46 = vld [vmem:[%s19507_s18 + $0x2a90] sm:$0xff] }
 0x621   : > { %11118 = vmatprep.subr.bf16.mxu0 %v17689_v4  ;;  %11610 = vmatprep.subr.bf16.mxu1 %v17691_v38  ;;  %v17745_v4 = vcombine.high %v1663_v56, %v1667_v61  ;;  %v17747_v38 = vcombine.high %v1664_v62, %v1668_v63  ;;  %v1715_v47 = vld [vmem:[%s19507_s18 + $0x2ab0] sm:$0xff] }
 0x624   : > { %11119 = vmatpush1.bf16.msra.mxu0 %v17688_v30  ;;  %11611 = vmatpush1.bf16.msra.mxu1 %v17690_v24  ;;  %v17744_v30 = vcombine.low %v1663_v56, %v1667_v61  ;;  %v17746_v24 = vcombine.low %v1664_v62, %v1668_v63  ;;  %v1719_v56 = vld [vmem:[%s19507_s18 + $0x2ad0] sm:$0xff]  ;;  %v1720_v62 = vld [vmem:[%s19507_s18 + $0x2ad8] sm:$0xff] }
 0x625   : > { %11120 = vmatprep.subr.bf16.mxu0 %v17697_v44  ;;  %11612 = vmatprep.subr.bf16.mxu1 %v17699_v39  ;;  %v17753_v44 = vcombine.high %v1671_v58, %v1675_v59  ;;  %v17755_v39 = vcombine.high %v1672_v5, %v1676_v52  ;;  %v1723_v61 = vld [vmem:[%s19507_s18 + $0x2af0] sm:$0xff]  ;;  %v1724_v63 = vld [vmem:[%s19507_s18 + $0x2af8] sm:$0xff] }
 0x628   : > { %11121 = vmatpush1.bf16.msra.mxu0 %v17696_v13  ;;  %11613 = vmatpush1.bf16.msra.mxu1 %v17698_v1  ;;  %v17752_v13 = vcombine.low %v1671_v58, %v1675_v59  ;;  %v17754_v1 = vcombine.low %v1672_v5, %v1676_v52  ;;  %v1727_v58 = vld [vmem:[%s19507_s18 + $0x2b10] sm:$0xff]  ;;  %v1728_v5 = vld [vmem:[%s19507_s18 + $0x2b18] sm:$0xff] }
 0x629   : > { %11122 = vmatprep.subr.bf16.mxu0 %v17705_v6  ;;  %11614 = vmatprep.subr.bf16.mxu1 %v17707_v14  ;;  %v17761_v6 = vcombine.high %v1679_v20, %v1683_v7  ;;  %v17763_v14 = vcombine.high %v1680_v10, %v1684_v12  ;;  %v1731_v59 = vld [vmem:[%s19507_s18 + $0x2b30] sm:$0xff]  ;;  %v1732_v52 = vld [vmem:[%s19507_s18 + $0x2b38] sm:$0xff] }
 0x62c   : > { %11123 = vmatpush1.bf16.msra.mxu0 %v17704_v33  ;;  %11615 = vmatpush1.bf16.msra.mxu1 %v17706_v49  ;;  %v17760_v33 = vcombine.low %v1679_v20, %v1683_v7  ;;  %v17762_v49 = vcombine.low %v1680_v10, %v1684_v12  ;;  %v1735_v20 = vld [vmem:[%s19507_s18 + $0x2b50] sm:$0xff]  ;;  %v1736_v10 = vld [vmem:[%s19507_s18 + $0x2b58] sm:$0xff] }
 0x62d   : > { %11133 = vmatprep.subr.bf16.mxu0 %v17713_v21  ;;  %11625 = vmatprep.subr.bf16.mxu1 %v17715_v22  ;;  %v17769_v21 = vcombine.high %v1687_v15, %v1691_v18  ;;  %v17771_v22 = vcombine.high %v1688_v17, %v1692_v60  ;;  %v1739_v7 = vld [vmem:[%s19507_s18 + $0x2b70] sm:$0xff]  ;;  %v1740_v12 = vld [vmem:[%s19507_s18 + $0x2b78] sm:$0xff] }
 0x62f   : > { %11125 = vmatmul.mubr.bf16.vlgmr.msra.gmra.mrb[4].mxu0 %v20346_v3  ;;  %11617 = vmatmul.mubr.bf16.vlgmr.msra.gmra.mrb[4].mxu1 %v20346_v3  ;;  %v17728_v3 = vcombine.low %v1647_v32, %v1651_v11  ;;  %v1703_v32 = vld [vmem:[%s19507_s18 + $0x2a50] sm:$0xff] }
 0x630   : > { %11134 = vmatpush1.bf16.msra.mxu0 %v17712_v26  ;;  %11626 = vmatpush1.bf16.msra.mxu1 %v17714_v27  ;;  %v17768_v26 = vcombine.low %v1687_v15, %v1691_v18  ;;  %v17770_v27 = vcombine.low %v1688_v17, %v1692_v60  ;;  %v1707_v11 = vld [vmem:[%s19507_s18 + $0x2a70] sm:$0xff]  ;;  %v1744_v17 = vld [vmem:[%s19507_s18 + $0x2b98] sm:$0xff] }
 0x631   : > { %11135 = vmatprep.subr.bf16.mxu0 %v17721_v50  ;;  %11627 = vmatprep.subr.bf16.mxu1 %v17723_v31  ;;  %v17777_v50 = vcombine.high %v1695_v57, %v1699_v8  ;;  %v17779_v31 = vcombine.high %v1696_v23, %v1700_v25  ;;  %v1743_v15 = vld [vmem:[%s19507_s18 + $0x2b90] sm:$0xff]  ;;  %v1748_v60 = vld [vmem:[%s19507_s18 + $0x2bb8] sm:$0xff] }
 0x632   : > { %11165 = vmatprep.mubr.bf16.mxu0 %v20353_v16  ;;  %11657 = vmatprep.mubr.bf16.mxu1 %v20353_v16  ;;  %v17738_v16 = vcombine.low %v1656_v35, %v1660_v51  ;;  %v1712_v35 = vld [vmem:[%s19507_s18 + $0x2a98] sm:$0xff]  ;;  %v1747_v18 = vld [vmem:[%s19507_s18 + $0x2bb0] sm:$0xff] }
 0x633   : > { %v1716_v51 = vld [vmem:[%s19507_s18 + $0x2ab8] sm:$0xff] }
 0x634   : > { %11136 = vmatpush1.bf16.msra.mxu0 %v17720_v34  ;;  %11628 = vmatpush1.bf16.msra.mxu1 %v17722_v37  ;;  %v17776_v34 = vcombine.low %v1695_v57, %v1699_v8  ;;  %v17778_v37 = vcombine.low %v1696_v23, %v1700_v25  ;;  %v1751_v57 = vld [vmem:[%s19507_s18 + $0x2bd0] sm:$0xff]  ;;  %v1752_v23 = vld [vmem:[%s19507_s18 + $0x2bd8] sm:$0xff] }
 0x635   : > { %11137 = vmatprep.subr.bf16.mxu0 %v17729_v40  ;;  %11629 = vmatprep.subr.bf16.mxu1 %v17731_v41  ;;  %v17785_v40 = vcombine.high %v1703_v32, %v1707_v11  ;;  %v17787_v41 = vcombine.high %v1704_v0, %v1708_v19  ;;  %v1755_v8 = vld [vmem:[%s19507_s18 + $0x2bf0] sm:$0xff]  ;;  %v1756_v25 = vld [vmem:[%s19507_s18 + $0x2bf8] sm:$0xff] }
 0x638   : > { %11138 = vmatpush1.bf16.msra.mxu0 %v17728_v3  ;;  %11630 = vmatpush1.bf16.msra.mxu1 %v17730_v28  ;;  %v17784_v3 = vcombine.low %v1703_v32, %v1707_v11  ;;  %v17786_v28 = vcombine.low %v1704_v0, %v1708_v19  ;;  %v1759_v32 = vld [vmem:[%s19507_s18 + $0x2c10] sm:$0xff]  ;;  %v1760_v0 = vld [vmem:[%s19507_s18 + $0x2c18] sm:$0xff] }
 0x639   : > { %11139 = vmatprep.subr.bf16.mxu0 %v17737_v53  ;;  %11631 = vmatprep.subr.bf16.mxu1 %v17739_v55  ;;  %v17793_v53 = vcombine.high %v1711_v46, %v1715_v47  ;;  %v17795_v55 = vcombine.high %v1712_v35, %v1716_v51  ;;  %v1763_v11 = vld [vmem:[%s19507_s18 + $0x2c30] sm:$0xff]  ;;  %v1764_v19 = vld [vmem:[%s19507_s18 + $0x2c38] sm:$0xff] }
 0x63c   : > { %11140 = vmatpush1.bf16.msra.mxu0 %v17736_v9  ;;  %11632 = vmatpush1.bf16.msra.mxu1 %v17738_v16  ;;  %v17792_v9 = vcombine.low %v1711_v46, %v1715_v47  ;;  %v17794_v16 = vcombine.low %v1712_v35, %v1716_v51  ;;  %v1767_v46 = vld [vmem:[%s19507_s18 + $0x2c50] sm:$0xff]  ;;  %v1768_v35 = vld [vmem:[%s19507_s18 + $0x2c58] sm:$0xff] }
 0x63d   : > { %11141 = vmatprep.subr.bf16.mxu0 %v17745_v4  ;;  %11633 = vmatprep.subr.bf16.mxu1 %v17747_v38  ;;  %v17801_v4 = vcombine.high %v1719_v56, %v1723_v61  ;;  %v17803_v38 = vcombine.high %v1720_v62, %v1724_v63  ;;  %v1771_v47 = vld [vmem:[%s19507_s18 + $0x2c70] sm:$0xff]  ;;  %v1772_v51 = vld [vmem:[%s19507_s18 + $0x2c78] sm:$0xff] }
 0x640   : > { %11142 = vmatpush1.bf16.msra.mxu0 %v17744_v30  ;;  %11634 = vmatpush1.bf16.msra.mxu1 %v17746_v24  ;;  %v17800_v30 = vcombine.low %v1719_v56, %v1723_v61  ;;  %v17802_v24 = vcombine.low %v1720_v62, %v1724_v63  ;;  %v1775_v56 = vld [vmem:[%s19507_s18 + $0x2c90] sm:$0xff]  ;;  %v1776_v62 = vld [vmem:[%s19507_s18 + $0x2c98] sm:$0xff] }
 0x641   : > { %11143 = vmatprep.subr.bf16.mxu0 %v17753_v44  ;;  %11635 = vmatprep.subr.bf16.mxu1 %v17755_v39  ;;  %v17809_v44 = vcombine.high %v1727_v58, %v1731_v59  ;;  %v17811_v39 = vcombine.high %v1728_v5, %v1732_v52  ;;  %v1779_v61 = vld [vmem:[%s19507_s18 + $0x2cb0] sm:$0xff]  ;;  %v1780_v63 = vld [vmem:[%s19507_s18 + $0x2cb8] sm:$0xff] }
 0x644   : > { %11144 = vmatpush1.bf16.msra.mxu0 %v17752_v13  ;;  %11636 = vmatpush1.bf16.msra.mxu1 %v17754_v1  ;;  %v17808_v13 = vcombine.low %v1727_v58, %v1731_v59  ;;  %v17810_v1 = vcombine.low %v1728_v5, %v1732_v52  ;;  %v1783_v58 = vld [vmem:[%s19507_s18 + $0x2cd0] sm:$0xff]  ;;  %v1784_v5 = vld [vmem:[%s19507_s18 + $0x2cd8] sm:$0xff] }
 0x645   : > { %11145 = vmatprep.subr.bf16.mxu0 %v17761_v6  ;;  %11637 = vmatprep.subr.bf16.mxu1 %v17763_v14  ;;  %v17817_v6 = vcombine.high %v1735_v20, %v1739_v7  ;;  %v17819_v14 = vcombine.high %v1736_v10, %v1740_v12  ;;  %v1787_v59 = vld [vmem:[%s19507_s18 + $0x2cf0] sm:$0xff]  ;;  %v1788_v52 = vld [vmem:[%s19507_s18 + $0x2cf8] sm:$0xff] }
 0x648   : > { %11146 = vmatpush1.bf16.msra.mxu0 %v17760_v33  ;;  %11638 = vmatpush1.bf16.msra.mxu1 %v17762_v49  ;;  %v17816_v33 = vcombine.low %v1735_v20, %v1739_v7  ;;  %v17818_v49 = vcombine.low %v1736_v10, %v1740_v12  ;;  %v1795_v20 = vld [vmem:[%s19507_s18 + $0x2d30] sm:$0xff]  ;;  %v1792_v7 = vld [vmem:[%s19507_s18 + $0x2d18] sm:$0xff]  ;;  %v17864_v12 = vcombine.low %v1783_v58, %v1787_v59 }
 0x649   : > { %11147 = vmatprep.subr.bf16.mxu0 %v17769_v21  ;;  %11639 = vmatprep.subr.bf16.mxu1 %v17771_v22  ;;  %v17825_v21 = vcombine.high %v1743_v15, %v1747_v18  ;;  %v17827_v22 = vcombine.high %v1744_v17, %v1748_v60  ;;  %v1796_v10 = vld [vmem:[%s19507_s18 + $0x2d38] sm:$0xff] }
 0x64c   : > { %11148 = vmatpush1.bf16.msra.mxu0 %v17768_v26  ;;  %11640 = vmatpush1.bf16.msra.mxu1 %v17770_v27  ;;  %v17824_v26 = vcombine.low %v1743_v15, %v1747_v18  ;;  %v17826_v27 = vcombine.low %v1744_v17, %v1748_v60  ;;  %v1800_v15 = vld [vmem:[%s19507_s18 + $0x2d58] sm:$0xff]  ;;  %v17874_v60 = vcombine.low %v1792_v7, %v1796_v10 }
 0x64d   : > { %11149 = vmatprep.subr.bf16.mxu0 %v17777_v50  ;;  %11641 = vmatprep.subr.bf16.mxu1 %v17779_v31  ;;  %v17833_v50 = vcombine.high %v1751_v57, %v1755_v8  ;;  %v17835_v31 = vcombine.high %v1752_v23, %v1756_v25  ;;  %v1804_v18 = vld [vmem:[%s19507_s18 + $0x2d78] sm:$0xff] }
 0x650   : > { %11150 = vmatpush1.bf16.msra.mxu0 %v17776_v34  ;;  %11642 = vmatpush1.bf16.msra.mxu1 %v17778_v37  ;;  %v17832_v34 = vcombine.low %v1751_v57, %v1755_v8  ;;  %v17834_v37 = vcombine.low %v1752_v23, %v1756_v25  ;;  %v1808_v57 = vld [vmem:[%s19507_s18 + $0x2d98] sm:$0xff]  ;;  %v17882_v25 = vcombine.low %v1800_v15, %v1804_v18 }
 0x651   : > { %11151 = vmatprep.subr.bf16.mxu0 %v17785_v40  ;;  %11643 = vmatprep.subr.bf16.mxu1 %v17787_v41  ;;  %v17841_v40 = vcombine.high %v1759_v32, %v1763_v11  ;;  %v17843_v41 = vcombine.high %v1760_v0, %v1764_v19  ;;  %v1812_v8 = vld [vmem:[%s19507_s18 + $0x2db8] sm:$0xff] }
 0x654   : > { %11152 = vmatpush1.bf16.msra.mxu0 %v17784_v3  ;;  %11644 = vmatpush1.bf16.msra.mxu1 %v17786_v28  ;;  %v17840_v3 = vcombine.low %v1759_v32, %v1763_v11  ;;  %v17842_v28 = vcombine.low %v1760_v0, %v1764_v19  ;;  %v1816_v32 = vld [vmem:[%s19507_s18 + $0x2dd8] sm:$0xff]  ;;  %v17890_v19 = vcombine.low %v1808_v57, %v1812_v8 }
 0x655   : > { %11153 = vmatprep.subr.bf16.mxu0 %v17793_v53  ;;  %11645 = vmatprep.subr.bf16.mxu1 %v17795_v55  ;;  %v17849_v53 = vcombine.high %v1767_v46, %v1771_v47  ;;  %v17851_v55 = vcombine.high %v1768_v35, %v1772_v51  ;;  %v1820_v11 = vld [vmem:[%s19507_s18 + $0x2df8] sm:$0xff] }
 0x658   : > { %11154 = vmatpush1.bf16.msra.mxu0 %v17792_v9  ;;  %11646 = vmatpush1.bf16.msra.mxu1 %v17794_v16  ;;  %v17848_v9 = vcombine.low %v1767_v46, %v1771_v47  ;;  %v17850_v16 = vcombine.low %v1768_v35, %v1772_v51  ;;  %v1824_v46 = vld [vmem:[%s19507_s18 + $0x2e18] sm:$0xff]  ;;  %v17898_v51 = vcombine.low %v1816_v32, %v1820_v11 }
 0x659   : > { %11155 = vmatprep.subr.bf16.mxu0 %v17801_v4  ;;  %11647 = vmatprep.subr.bf16.mxu1 %v17803_v38  ;;  %v17857_v4 = vcombine.high %v1775_v56, %v1779_v61  ;;  %v17859_v38 = vcombine.high %v1776_v62, %v1780_v63  ;;  %v1828_v47 = vld [vmem:[%s19507_s18 + $0x2e38] sm:$0xff] }
 0x65c   : > { %11156 = vmatpush1.bf16.msra.mxu0 %v17800_v30  ;;  %11648 = vmatpush1.bf16.msra.mxu1 %v17802_v24  ;;  %v17858_v30 = vcombine.low %v1776_v62, %v1780_v63  ;;  %v17865_v24 = vcombine.high %v1783_v58, %v1787_v59  ;;  %v17906_v63 = vcombine.low %v1824_v46, %v1828_v47  ;;  %v1840_v58 = vld [vmem:[%s19507_s18 + $0x2e98] sm:$0xff] }
 0x65d   : > { %11157 = vmatprep.subr.bf16.mxu0 %v17809_v44  ;;  %11649 = vmatprep.subr.bf16.mxu1 %v17811_v39  ;;  %v17867_v44 = vcombine.high %v1784_v5, %v1788_v52  ;;  %v1791_v39 = vld [vmem:[%s19507_s18 + $0x2d10] sm:$0xff]  ;;  %v1844_v59 = vld [vmem:[%s19507_s18 + $0x2eb8] sm:$0xff] }
 0x65e   : > { %v17872_v17 = vcombine.low %v1791_v39, %v1795_v20 }
 0x660   : > { %11158 = vmatpush1.bf16.msra.mxu0 %v17808_v13  ;;  %11650 = vmatpush1.bf16.msra.mxu1 %v17810_v1  ;;  %v17873_v13 = vcombine.high %v1791_v39, %v1795_v20  ;;  %v17875_v1 = vcombine.high %v1792_v7, %v1796_v10  ;;  %v1848_v39 = vld [vmem:[%s19507_s18 + $0x2ed8] sm:$0xff]  ;;  %v17922_v10 = vcombine.low %v1840_v58, %v1844_v59 }
 0x661   : > { %11159 = vmatprep.subr.bf16.mxu0 %v17817_v6  ;;  %11651 = vmatprep.subr.bf16.mxu1 %v17819_v14  ;;  %v1799_v6 = vld [vmem:[%s19507_s18 + $0x2d50] sm:$0xff]  ;;  %v1852_v20 = vld [vmem:[%s19507_s18 + $0x2ef8] sm:$0xff] }
 0x662   : > { %v1803_v14 = vld [vmem:[%s19507_s18 + $0x2d70] sm:$0xff] }
 0x663   : > { %v17880_v23 = vcombine.low %v1799_v6, %v1803_v14 }
 0x664   : > { %11160 = vmatpush1.bf16.msra.mxu0 %v17816_v33  ;;  %11652 = vmatpush1.bf16.msra.mxu1 %v17818_v49  ;;  %v17881_v33 = vcombine.high %v1799_v6, %v1803_v14  ;;  %v17883_v49 = vcombine.high %v1800_v15, %v1804_v18  ;;  %v1856_v6 = vld [vmem:[%s19507_s18 + $0x2f18] sm:$0xff]  ;;  %v17930_v18 = vcombine.low %v1848_v39, %v1852_v20 }
 0x665   : > { %11161 = vmatprep.subr.bf16.mxu0 %v17825_v21  ;;  %11653 = vmatprep.subr.bf16.mxu1 %v17827_v22  ;;  %v1807_v21 = vld [vmem:[%s19507_s18 + $0x2d90] sm:$0xff]  ;;  %v1860_v14 = vld [vmem:[%s19507_s18 + $0x2f38] sm:$0xff] }
 0x666   : > { %v1811_v22 = vld [vmem:[%s19507_s18 + $0x2db0] sm:$0xff] }
 0x667   : > { %v17888_v0 = vcombine.low %v1807_v21, %v1811_v22 }
 0x668   : > { %11162 = vmatpush1.bf16.msra.mxu0 %v17824_v26  ;;  %11654 = vmatpush1.bf16.msra.mxu1 %v17826_v27  ;;  %v17889_v26 = vcombine.high %v1807_v21, %v1811_v22  ;;  %v17891_v27 = vcombine.high %v1808_v57, %v1812_v8  ;;  %v1864_v21 = vld [vmem:[%s19507_s18 + $0x2f58] sm:$0xff]  ;;  %v17938_v8 = vcombine.low %v1856_v6, %v1860_v14 }
 0x669   : > { %11163 = vmatprep.subr.bf16.mxu0 %v17833_v50  ;;  %11655 = vmatprep.subr.bf16.mxu1 %v17835_v31  ;;  %v1815_v50 = vld [vmem:[%s19507_s18 + $0x2dd0] sm:$0xff]  ;;  %v1868_v22 = vld [vmem:[%s19507_s18 + $0x2f78] sm:$0xff] }
 0x66a   : > { %v1819_v31 = vld [vmem:[%s19507_s18 + $0x2df0] sm:$0xff] }
 0x66b   : > { %v17896_v35 = vcombine.low %v1815_v50, %v1819_v31 }
 0x66c   : > { %11164 = vmatpush1.bf16.msra.mxu0 %v17832_v34  ;;  %11656 = vmatpush1.bf16.msra.mxu1 %v17834_v37  ;;  %v17897_v34 = vcombine.high %v1815_v50, %v1819_v31  ;;  %v17899_v37 = vcombine.high %v1816_v32, %v1820_v11  ;;  %v1872_v50 = vld [vmem:[%s19507_s18 + $0x2f98] sm:$0xff]  ;;  %v17946_v11 = vcombine.low %v1864_v21, %v1868_v22 }
 0x66d   : > { %11174 = vmatprep.subr.bf16.mxu0 %v17841_v40  ;;  %11666 = vmatprep.subr.bf16.mxu1 %v17843_v41  ;;  %v1823_v40 = vld [vmem:[%s19507_s18 + $0x2e10] sm:$0xff]  ;;  %v1876_v31 = vld [vmem:[%s19507_s18 + $0x2fb8] sm:$0xff] }
 0x66e   : > { %v1827_v41 = vld [vmem:[%s19507_s18 + $0x2e30] sm:$0xff] }
 0x66f   : > { %11166 = vmatmul.mubr.bf16.vlgmr.msra.gmra.mrb[4].mxu0 %v20421_v2  ;;  %11658 = vmatmul.mubr.bf16.vlgmr.msra.gmra.mrb[4].mxu1 %v20421_v2  ;;  %v17856_v2 = vcombine.low %v1775_v56, %v1779_v61  ;;  %v1832_v56 = vld [vmem:[%s19507_s18 + $0x2e58] sm:$0xff]  ;;  %v17904_v62 = vcombine.low %v1823_v40, %v1827_v41 }
 0x670   : > { %11175 = vmatpush1.bf16.msra.mxu0 %v17840_v3  ;;  %11667 = vmatpush1.bf16.msra.mxu1 %v17842_v28  ;;  %v17905_v3 = vcombine.high %v1823_v40, %v1827_v41  ;;  %v17907_v28 = vcombine.high %v1824_v46, %v1828_v47  ;;  %v1836_v61 = vld [vmem:[%s19507_s18 + $0x2e78] sm:$0xff]  ;;  %v17954_v47 = vcombine.low %v1872_v50, %v1876_v31 }
 0x671   : > { %11176 = vmatprep.subr.bf16.mxu0 %v17849_v53  ;;  %11668 = vmatprep.subr.bf16.mxu1 %v17851_v55  ;;  %v1831_v53 = vld [vmem:[%s19507_s18 + $0x2e50] sm:$0xff]  ;;  %v1880_v40 = vld [vmem:[%s19507_s18 + $0x2fd8] sm:$0xff] }
 0x672   : > { %11206 = vmatprep.mubr.bf16.mxu0 %v20429_v29  ;;  %11698 = vmatprep.mubr.bf16.mxu1 %v20429_v29  ;;  %v17866_v29 = vcombine.low %v1784_v5, %v1788_v52  ;;  %v1835_v55 = vld [vmem:[%s19507_s18 + $0x2e70] sm:$0xff]  ;;  %v17914_v52 = vcombine.low %v1832_v56, %v1836_v61  ;;  %v1884_v41 = vld [vmem:[%s19507_s18 + $0x2ff8] sm:$0xff] }
 0x673   : > { %v17912_v5 = vcombine.low %v1831_v53, %v1835_v55 }
 0x674   : > { %11177 = vmatpush1.bf16.msra.mxu0 %v17848_v9  ;;  %11669 = vmatpush1.bf16.msra.mxu1 %v17850_v16  ;;  %v17913_v9 = vcombine.high %v1831_v53, %v1835_v55  ;;  %v17915_v16 = vcombine.high %v1832_v56, %v1836_v61  ;;  %v11718_v53 = vld [vmem:[%s19514_s14 + $0x8] sm:$0xff]  ;;  %v17962_v61 = vcombine.low %v1880_v40, %v1884_v41 }
 0x675   : > { %11178 = vmatprep.subr.bf16.mxu0 %v17857_v4  ;;  %11670 = vmatprep.subr.bf16.mxu1 %v17859_v38  ;;  %v1839_v4 = vld [vmem:[%s19507_s18 + $0x2e90] sm:$0xff]  ;;  %v11722_v55 = vld [vmem:[%s19514_s14 + $0x28] sm:$0xff] }
 0x676   : > { %v1843_v38 = vld [vmem:[%s19507_s18 + $0x2eb0] sm:$0xff] }
 0x677   : > { %v17920_v7 = vcombine.low %v1839_v4, %v1843_v38 }
 0x678   : > { %11179 = vmatpush1.bf16.msra.mxu0 %v17856_v2  ;;  %11671 = vmatpush1.bf16.msra.mxu1 %v17858_v30  ;;  %v17921_v2 = vcombine.high %v1839_v4, %v1843_v38  ;;  %v17923_v30 = vcombine.high %v1840_v58, %v1844_v59  ;;  %v11726_v38 = vld [vmem:[%s19514_s14 + $0x48] sm:$0xff]  ;;  %v17966_v59 = vcombine.low %v11718_v53, %v11722_v55 }
 0x679   : > { %11180 = vmatprep.subr.bf16.mxu0 %v17865_v24  ;;  %11672 = vmatprep.subr.bf16.mxu1 %v17867_v44  ;;  %v1847_v24 = vld [vmem:[%s19507_s18 + $0x2ed0] sm:$0xff]  ;;  %v11730_v58 = vld [vmem:[%s19514_s14 + $0x68] sm:$0xff] }
 0x67a   : > { %v1851_v44 = vld [vmem:[%s19507_s18 + $0x2ef0] sm:$0xff] }
 0x67b   : > { %v17928_v15 = vcombine.low %v1847_v24, %v1851_v44 }
 0x67c   : > { %11181 = vmatpush1.bf16.msra.mxu0 %v17864_v12  ;;  %11673 = vmatpush1.bf16.msra.mxu1 %v17866_v29  ;;  %v17929_v12 = vcombine.high %v1847_v24, %v1851_v44  ;;  %v17931_v29 = vcombine.high %v1848_v39, %v1852_v20  ;;  %v17975_v24 = vcombine.high %v11726_v38, %v11730_v58  ;;  %v11734_v44 = vld [vmem:[%s19514_s14 + $0x88] sm:$0xff] }
 0x67d   : > { %11182 = vmatprep.subr.bf16.mxu0 %v17873_v13  ;;  %11674 = vmatprep.subr.bf16.mxu1 %v17875_v1  ;;  %v1855_v13 = vld [vmem:[%s19507_s18 + $0x2f10] sm:$0xff]  ;;  %v11738_v39 = vld [vmem:[%s19514_s14 + $0xa8] sm:$0xff] }
 0x67e   : > { %v1859_v1 = vld [vmem:[%s19507_s18 + $0x2f30] sm:$0xff] }
 0x67f   : > { %v17936_v57 = vcombine.low %v1855_v13, %v1859_v1 }
 0x680   : > { %11183 = vmatpush1.bf16.msra.mxu0 %v17872_v17  ;;  %11675 = vmatpush1.bf16.msra.mxu1 %v17874_v60  ;;  %v17937_v17 = vcombine.high %v1855_v13, %v1859_v1  ;;  %v17939_v60 = vcombine.high %v1856_v6, %v1860_v14  ;;  %v11742_v13 = vld [vmem:[%s19514_s14 + $0xc8] sm:$0xff]  ;;  %v17982_v6 = vcombine.low %v11734_v44, %v11738_v39 }
 0x681   : > { %11184 = vmatprep.subr.bf16.mxu0 %v17881_v33  ;;  %11676 = vmatprep.subr.bf16.mxu1 %v17883_v49  ;;  %v1863_v33 = vld [vmem:[%s19507_s18 + $0x2f50] sm:$0xff] }
 0x682   : > { %v1867_v49 = vld [vmem:[%s19507_s18 + $0x2f70] sm:$0xff] }
 0x683   : > { %v17944_v32 = vcombine.low %v1863_v33, %v1867_v49 }
 0x684   : > { %11185 = vmatpush1.bf16.msra.mxu0 %v17880_v23  ;;  %11677 = vmatpush1.bf16.msra.mxu1 %v17882_v25  ;;  %v17945_v23 = vcombine.high %v1863_v33, %v1867_v49  ;;  %v17947_v25 = vcombine.high %v1864_v21, %v1868_v22  ;;  %v11754_v33 = vld [vmem:[%s19514_s14 + $0x128] sm:$0xff] }
 0x685   : > { %11186 = vmatprep.subr.bf16.mxu0 %v17889_v26  ;;  %11678 = vmatprep.subr.bf16.mxu1 %v17891_v27  ;;  %v1871_v26 = vld [vmem:[%s19507_s18 + $0x2f90] sm:$0xff] }
 0x686   : > { %v1875_v27 = vld [vmem:[%s19507_s18 + $0x2fb0] sm:$0xff] }
 0x687   : > { %v17952_v46 = vcombine.low %v1871_v26, %v1875_v27 }
 0x688   : > { %11187 = vmatpush1.bf16.msra.mxu0 %v17888_v0  ;;  %11679 = vmatpush1.bf16.msra.mxu1 %v17890_v19  ;;  %v17953_v0 = vcombine.high %v1871_v26, %v1875_v27  ;;  %v17955_v19 = vcombine.high %v1872_v50, %v1876_v31  ;;  %v11762_v26 = vld [vmem:[%s19514_s14 + $0x168] sm:$0xff] }
 0x689   : > { %11188 = vmatprep.subr.bf16.mxu0 %v17897_v34  ;;  %11680 = vmatprep.subr.bf16.mxu1 %v17899_v37  ;;  %v1879_v34 = vld [vmem:[%s19507_s18 + $0x2fd0] sm:$0xff] }
 0x68a   : > { %v1883_v37 = vld [vmem:[%s19507_s18 + $0x2ff0] sm:$0xff] }
 0x68b   : > { %v17960_v56 = vcombine.low %v1879_v34, %v1883_v37 }
 0x68c   : > { %11189 = vmatpush1.bf16.msra.mxu0 %v17896_v35  ;;  %11681 = vmatpush1.bf16.msra.mxu1 %v17898_v51  ;;  %v17961_v35 = vcombine.high %v1879_v34, %v1883_v37  ;;  %v17963_v51 = vcombine.high %v1880_v40, %v1884_v41  ;;  %v11770_v34 = vld [vmem:[%s19514_s14 + $0x1a8] sm:$0xff] }
 0x68d   : > { %11190 = vmatprep.subr.bf16.mxu0 %v17905_v3  ;;  %11682 = vmatprep.subr.bf16.mxu1 %v17907_v28  ;;  %v11717_v3 = vld [vmem:[%s19514_s14] sm:$0xff] }
 0x68e   : > { %v11721_v28 = vld [vmem:[%s19514_s14 + $0x20] sm:$0xff] }
 0x68f   : > { %v17964_v4 = vcombine.low %v11717_v3, %v11721_v28 }
 0x690   : > { %11191 = vmatpush1.bf16.msra.mxu0 %v17904_v62  ;;  %11683 = vmatpush1.bf16.msra.mxu1 %v17906_v63  ;;  %v17965_v62 = vcombine.high %v11717_v3, %v11721_v28  ;;  %v17967_v63 = vcombine.high %v11718_v53, %v11722_v55  ;;  %v11778_v3 = vld [vmem:[%s19514_s14 + $0x1e8] sm:$0xff] }
 0x691   : > { %11192 = vmatprep.subr.bf16.mxu0 %v17913_v9  ;;  %11684 = vmatprep.subr.bf16.mxu1 %v17915_v16  ;;  %v11725_v9 = vld [vmem:[%s19514_s14 + $0x40] sm:$0xff] }
 0x692   : > { %v11729_v16 = vld [vmem:[%s19514_s14 + $0x60] sm:$0xff] }
 0x693   : > { %v17972_v20 = vcombine.low %v11725_v9, %v11729_v16 }
 0x694   : > { %11193 = vmatpush1.bf16.msra.mxu0 %v17912_v5  ;;  %11685 = vmatpush1.bf16.msra.mxu1 %v17914_v52  ;;  %v17973_v5 = vcombine.high %v11725_v9, %v11729_v16  ;;  %v11733_v52 = vld [vmem:[%s19514_s14 + $0x80] sm:$0xff]  ;;  %v11786_v9 = vld [vmem:[%s19514_s14 + $0x228] sm:$0xff] }
 0x695   : > { %11194 = vmatprep.subr.bf16.mxu0 %v17921_v2  ;;  %11686 = vmatprep.subr.bf16.mxu1 %v17923_v30  ;;  %v11737_v2 = vld [vmem:[%s19514_s14 + $0xa0] sm:$0xff]  ;;  %v21329_v30 = vpack.c.bf16 %v20735_v43, %v20735_v43  ;;  %v17983_v43 = vcombine.high %v11734_v44, %v11738_v39 }
 0x696   : > { %v17980_v1 = vcombine.low %v11733_v52, %v11737_v2 }
 0x698   : > { %11195 = vmatpush1.bf16.msra.mxu0 %v17920_v7  ;;  %11687 = vmatpush1.bf16.msra.mxu1 %v17922_v10  ;;  %v17974_v7 = vcombine.low %v11726_v38, %v11730_v58  ;;  %v17981_v10 = vcombine.high %v11733_v52, %v11737_v2  ;;  %v11790_v52 = vld [vmem:[%s19514_s14 + $0x248] sm:$0xff] }
 0x699   : > { %11196 = vmatprep.subr.bf16.mxu0 %v17929_v12  ;;  %11688 = vmatprep.subr.bf16.mxu1 %v17931_v29  ;;  %v11741_v12 = vld [vmem:[%s19514_s14 + $0xc0] sm:$0xff]  ;;  %v11794_v2 = vld [vmem:[%s19514_s14 + $0x268] sm:$0xff] }
 0x69a   : > { %v11745_v29 = vld [vmem:[%s19514_s14 + $0xe0] sm:$0xff] }
 0x69b   : > { %v17989_v14 = vcombine.high %v11741_v12, %v11745_v29  ;;  %v17988_v49 = vcombine.low %v11741_v12, %v11745_v29  ;;  %v11802_v12 = vld [vmem:[%s19514_s14 + $0x2a8] sm:$0xff] }
 0x69c   : > { %11197 = vmatpush1.bf16.msra.mxu0 %v17928_v15  ;;  %11689 = vmatpush1.bf16.msra.mxu1 %v17930_v18  ;;  %v11749_v18 = vld [vmem:[%s19514_s14 + $0x100] sm:$0xff] }
 0x69d   : > { %11198 = vmatprep.subr.bf16.mxu0 %v17937_v17  ;;  %11690 = vmatprep.subr.bf16.mxu1 %v17939_v60  ;;  %v11753_v17 = vld [vmem:[%s19514_s14 + $0x120] sm:$0xff]  ;;  %v11750_v60 = vld [vmem:[%s19514_s14 + $0x108] sm:$0xff] }
 0x69e   : > { %v17997_v22 = vcombine.high %v11749_v18, %v11753_v17  ;;  %v17996_v27 = vcombine.low %v11749_v18, %v11753_v17  ;;  %v17998_v50 = vcombine.low %v11750_v60, %v11754_v33  ;;  %v11810_v18 = vld [vmem:[%s19514_s14 + $0x2e8] sm:$0xff] }
 0x6a0   : > { %11199 = vmatpush1.bf16.msra.mxu0 %v17936_v57  ;;  %11691 = vmatpush1.bf16.msra.mxu1 %v17938_v8  ;;  %v17999_v57 = vcombine.high %v11750_v60, %v11754_v33  ;;  %v11757_v8 = vld [vmem:[%s19514_s14 + $0x140] sm:$0xff] }
 0x6a1   : > { %11200 = vmatprep.subr.bf16.mxu0 %v17945_v23  ;;  %11692 = vmatprep.subr.bf16.mxu1 %v17947_v25  ;;  %v11761_v23 = vld [vmem:[%s19514_s14 + $0x160] sm:$0xff]  ;;  %v11758_v25 = vld [vmem:[%s19514_s14 + $0x148] sm:$0xff] }
 0x6a2   : > { %v18005_v31 = vcombine.high %v11757_v8, %v11761_v23  ;;  %v18004_v37 = vcombine.low %v11757_v8, %v11761_v23  ;;  %v18006_v40 = vcombine.low %v11758_v25, %v11762_v26  ;;  %v11818_v8 = vld [vmem:[%s19514_s14 + $0x328] sm:$0xff] }
 0x6a4   : > { %11201 = vmatpush1.bf16.msra.mxu0 %v17944_v32  ;;  %11693 = vmatpush1.bf16.msra.mxu1 %v17946_v11  ;;  %v18007_v32 = vcombine.high %v11758_v25, %v11762_v26  ;;  %v11765_v11 = vld [vmem:[%s19514_s14 + $0x180] sm:$0xff] }
 0x6a5   : > { %11202 = vmatprep.subr.bf16.mxu0 %v17953_v0  ;;  %11694 = vmatprep.subr.bf16.mxu1 %v17955_v19  ;;  %v11769_v0 = vld [vmem:[%s19514_s14 + $0x1a0] sm:$0xff]  ;;  %v11766_v19 = vld [vmem:[%s19514_s14 + $0x188] sm:$0xff] }
 0x6a6   : > { %v18013_v41 = vcombine.high %v11765_v11, %v11769_v0  ;;  %v18012_v28 = vcombine.low %v11765_v11, %v11769_v0  ;;  %v18014_v53 = vcombine.low %v11766_v19, %v11770_v34  ;;  %v11826_v11 = vld [vmem:[%s19514_s14 + $0x368] sm:$0xff] }
 0x6a8   : > { %11203 = vmatpush1.bf16.msra.mxu0 %v17952_v46  ;;  %11695 = vmatpush1.bf16.msra.mxu1 %v17954_v47  ;;  %v18015_v46 = vcombine.high %v11766_v19, %v11770_v34  ;;  %v11773_v47 = vld [vmem:[%s19514_s14 + $0x1c0] sm:$0xff] }
 0x6a9   : > { %11204 = vmatprep.subr.bf16.mxu0 %v17961_v35  ;;  %11696 = vmatprep.subr.bf16.mxu1 %v17963_v51  ;;  %v11777_v35 = vld [vmem:[%s19514_s14 + $0x1e0] sm:$0xff]  ;;  %v11774_v51 = vld [vmem:[%s19514_s14 + $0x1c8] sm:$0xff] }
 0x6aa   : > { %v18021_v55 = vcombine.high %v11773_v47, %v11777_v35  ;;  %v18020_v16 = vcombine.low %v11773_v47, %v11777_v35  ;;  %v11834_v47 = vld [vmem:[%s19514_s14 + $0x3a8] sm:$0xff] }
 0x6ac   : > { %11205 = vmatpush1.bf16.msra.mxu0 %v17960_v56  ;;  %11697 = vmatpush1.bf16.msra.mxu1 %v17962_v61  ;;  %v18023_v56 = vcombine.high %v11774_v51, %v11778_v3  ;;  %v11781_v61 = vld [vmem:[%s19514_s14 + $0x200] sm:$0xff] }
 0x6ad   : > { %14789 = vmatprep.subr.bf16.mxu0 %v17965_v62  ;;  %14953 = vmatprep.subr.bf16.mxu1 %v17967_v63  ;;  %v11785_v62 = vld [vmem:[%s19514_s14 + $0x220] sm:$0xff]  ;;  %v11782_v63 = vld [vmem:[%s19514_s14 + $0x208] sm:$0xff] }
 0x6ae   : > { %v18029_v38 = vcombine.high %v11781_v61, %v11785_v62  ;;  %v18031_v58 = vcombine.high %v11782_v63, %v11786_v9  ;;  %v18030_v44 = vcombine.low %v11782_v63, %v11786_v9 }
 0x6af   : > { %11207 = vmatmul.mubr.bf16.vlgmr.msra.gmra.mrb[4].mxu0 %v20497_v54  ;;  %11699 = vmatmul.mubr.bf16.vlgmr.msra.gmra.mrb[4].mxu1 %v20497_v54  ;;  %v11746_v54 = vld [vmem:[%s19514_s14 + $0xe8] sm:$0xff] }
 0x6b0   : > { %14790 = vmatpush1.bf16.msra.mxu0 %v17964_v4  ;;  %14821 = vmatprep.mubr.bf16.mxu0 %v21329_v30  ;;  %v17991_v15 = vcombine.high %v11742_v13, %v11746_v54  ;;  %v17990_v21 = vcombine.low %v11742_v13, %v11746_v54  ;;  %v18022_v4 = vcombine.low %v11774_v51, %v11778_v3 }
 0x6b1   : > { %14954 = vmatpush1.bf16.msra.mxu1 %v17966_v59  ;;  %14985 = vmatprep.mubr.bf16.mxu1 %v21329_v30  ;;  %v11789_v59 = vld [vmem:[%s19514_s14 + $0x240] sm:$0xff]  ;;  %v18038_v13 = vcombine.low %v11790_v52, %v11794_v2 }
 0x6b2   : > { %14791 = vmatprep.subr.bf16.mxu0 %v17973_v5  ;;  %14955 = vmatprep.subr.bf16.mxu1 %v17975_v24  ;;  %v11793_v5 = vld [vmem:[%s19514_s14 + $0x260] sm:$0xff]  ;;  %v18028_v24 = vcombine.low %v11781_v61, %v11785_v62  ;;  %v11842_v61 = vld [vmem:[%s19514_s14 + $0x3e8] sm:$0xff] }
 0x6b3   : > { %v18037_v39 = vcombine.high %v11789_v59, %v11793_v5  ;;  %v18036_v29 = vcombine.low %v11789_v59, %v11793_v5  ;;  %v11850_v59 = vld [vmem:[%s19514_s14 + $0x428] sm:$0xff] }
 0x6b4   : > { %14792 = vmatpush1.bf16.msra.mxu0 %v17972_v20  ;;  %v18039_v20 = vcombine.high %v11790_v52, %v11794_v2 }
 0x6b5   : > { %14956 = vmatpush1.bf16.msra.mxu1 %v17974_v7  ;;  %14793 = vmatprep.subr.bf16.mxu0 %v17981_v10  ;;  %v11797_v7 = vld [vmem:[%s19514_s14 + $0x280] sm:$0xff] }
 0x6b6   : > { %14957 = vmatprep.subr.bf16.mxu1 %v17983_v43  ;;  %v11801_v10 = vld [vmem:[%s19514_s14 + $0x2a0] sm:$0xff]  ;;  %v11798_v43 = vld [vmem:[%s19514_s14 + $0x288] sm:$0xff] }
 0x6b7   : > { %v18045_v54 = vcombine.high %v11797_v7, %v11801_v10  ;;  %v18044_v17 = vcombine.low %v11797_v7, %v11801_v10  ;;  %v18046_v60 = vcombine.low %v11798_v43, %v11802_v12  ;;  %v11854_v7 = vld [vmem:[%s19514_s14 + $0x448] sm:$0xff] }
 0x6b8   : > { %14794 = vmatpush1.bf16.msra.mxu0 %v17980_v1  ;;  %v18047_v1 = vcombine.high %v11798_v43, %v11802_v12  ;;  %v11858_v10 = vld [vmem:[%s19514_s14 + $0x468] sm:$0xff]  ;;  %v21399_v43 = vpack.c.bf16 %v20729_v36, %v20729_v36 }
 0x6b9   : > { %14958 = vmatpush1.bf16.msra.mxu1 %v17982_v6  ;;  %14795 = vmatprep.subr.bf16.mxu0 %v17989_v14  ;;  %v11805_v6 = vld [vmem:[%s19514_s14 + $0x2c0] sm:$0xff]  ;;  %v11866_v36 = vld [vmem:[%s19514_s14 + $0x4a8] sm:$0xff] }
 0x6ba   : > { %14959 = vmatprep.subr.bf16.mxu1 %v17991_v15  ;;  %v11809_v14 = vld [vmem:[%s19514_s14 + $0x2e0] sm:$0xff]  ;;  %v11806_v15 = vld [vmem:[%s19514_s14 + $0x2c8] sm:$0xff] }
 0x6bb   : > { %v18053_v33 = vcombine.high %v11805_v6, %v11809_v14  ;;  %v18052_v23 = vcombine.low %v11805_v6, %v11809_v14  ;;  %v18054_v25 = vcombine.low %v11806_v15, %v11810_v18  ;;  %v18103_v6 = vcombine.high %v11854_v7, %v11858_v10  ;;  %v11862_v14 = vld [vmem:[%s19514_s14 + $0x488] sm:$0xff] }
 0x6bc   : > { %14796 = vmatpush1.bf16.msra.mxu0 %v17988_v49  ;;  %v18055_v49 = vcombine.high %v11806_v15, %v11810_v18  ;;  %v18102_v18 = vcombine.low %v11854_v7, %v11858_v10 }
 0x6bd   : > { %14960 = vmatpush1.bf16.msra.mxu1 %v17990_v21  ;;  %14797 = vmatprep.subr.bf16.mxu0 %v17997_v22  ;;  %v11813_v21 = vld [vmem:[%s19514_s14 + $0x300] sm:$0xff] }
 0x6be   : > { %14961 = vmatprep.subr.bf16.mxu1 %v17999_v57  ;;  %v11817_v22 = vld [vmem:[%s19514_s14 + $0x320] sm:$0xff]  ;;  %v11814_v57 = vld [vmem:[%s19514_s14 + $0x308] sm:$0xff] }
 0x6bf   : > { %v18061_v26 = vcombine.high %v11813_v21, %v11817_v22  ;;  %v18060_v0 = vcombine.low %v11813_v21, %v11817_v22  ;;  %v18062_v19 = vcombine.low %v11814_v57, %v11818_v8  ;;  %v11874_v21 = vld [vmem:[%s19514_s14 + $0x4e8] sm:$0xff] }
 0x6c0   : > { %14798 = vmatpush1.bf16.msra.mxu0 %v17996_v27  ;;  %v18063_v27 = vcombine.high %v11814_v57, %v11818_v8  ;;  %v18110_v57 = vcombine.low %v11862_v14, %v11866_v36 }
 0x6c1   : > { %14962 = vmatpush1.bf16.msra.mxu1 %v17998_v50  ;;  %14799 = vmatprep.subr.bf16.mxu0 %v18005_v31  ;;  %v11821_v50 = vld [vmem:[%s19514_s14 + $0x340] sm:$0xff] }
 0x6c2   : > { %14963 = vmatprep.subr.bf16.mxu1 %v18007_v32  ;;  %v11825_v31 = vld [vmem:[%s19514_s14 + $0x360] sm:$0xff]  ;;  %v11822_v32 = vld [vmem:[%s19514_s14 + $0x348] sm:$0xff] }
 0x6c3   : > { %v18069_v34 = vcombine.high %v11821_v50, %v11825_v31  ;;  %v18068_v35 = vcombine.low %v11821_v50, %v11825_v31  ;;  %v18070_v51 = vcombine.low %v11822_v32, %v11826_v11  ;;  %v11882_v50 = vld [vmem:[%s19514_s14 + $0x528] sm:$0xff] }
 0x6c4   : > { %14800 = vmatpush1.bf16.msra.mxu0 %v18004_v37  ;;  %v18071_v37 = vcombine.high %v11822_v32, %v11826_v11 }
 0x6c5   : > { %14964 = vmatpush1.bf16.msra.mxu1 %v18006_v40  ;;  %14801 = vmatprep.subr.bf16.mxu0 %v18013_v41  ;;  %v11829_v40 = vld [vmem:[%s19514_s14 + $0x380] sm:$0xff] }
 0x6c6   : > { %14965 = vmatprep.subr.bf16.mxu1 %v18015_v46  ;;  %v11833_v41 = vld [vmem:[%s19514_s14 + $0x3a0] sm:$0xff]  ;;  %v11830_v46 = vld [vmem:[%s19514_s14 + $0x388] sm:$0xff] }
 0x6c7   : > { %v18077_v3 = vcombine.high %v11829_v40, %v11833_v41  ;;  %v18076_v62 = vcombine.low %v11829_v40, %v11833_v41  ;;  %v18078_v63 = vcombine.low %v11830_v46, %v11834_v47  ;;  %v11890_v40 = vld [vmem:[%s19514_s14 + $0x568] sm:$0xff] }
 0x6c8   : > { %14802 = vmatpush1.bf16.msra.mxu0 %v18012_v28  ;;  %v18079_v28 = vcombine.high %v11830_v46, %v11834_v47 }
 0x6c9   : > { %14966 = vmatpush1.bf16.msra.mxu1 %v18014_v53  ;;  %14803 = vmatprep.subr.bf16.mxu0 %v18021_v55  ;;  %v11837_v53 = vld [vmem:[%s19514_s14 + $0x3c0] sm:$0xff] }
 0x6ca   : > { %14967 = vmatprep.subr.bf16.mxu1 %v18023_v56  ;;  %v11841_v55 = vld [vmem:[%s19514_s14 + $0x3e0] sm:$0xff]  ;;  %v11838_v56 = vld [vmem:[%s19514_s14 + $0x3c8] sm:$0xff] }
 0x6cb   : > { %v18085_v9 = vcombine.high %v11837_v53, %v11841_v55  ;;  %v18084_v5 = vcombine.low %v11837_v53, %v11841_v55  ;;  %v18086_v52 = vcombine.low %v11838_v56, %v11842_v61  ;;  %v11898_v53 = vld [vmem:[%s19514_s14 + $0x5a8] sm:$0xff] }
 0x6cc   : > { %14804 = vmatpush1.bf16.msra.mxu0 %v18020_v16  ;;  %v18087_v16 = vcombine.high %v11838_v56, %v11842_v61 }
 0x6cd   : > { %14968 = vmatpush1.bf16.msra.mxu1 %v18022_v4  ;;  %14805 = vmatprep.subr.bf16.mxu0 %v18029_v38  ;;  %v11845_v4 = vld [vmem:[%s19514_s14 + $0x400] sm:$0xff] }
 0x6ce   : > { %14969 = vmatprep.subr.bf16.mxu1 %v18031_v58  ;;  %v11849_v38 = vld [vmem:[%s19514_s14 + $0x420] sm:$0xff]  ;;  %v11846_v58 = vld [vmem:[%s19514_s14 + $0x408] sm:$0xff] }
 0x6cf   : > { %v18093_v2 = vcombine.high %v11845_v4, %v11849_v38  ;;  %v18094_v12 = vcombine.low %v11846_v58, %v11850_v59 }
 0x6d0   : > { %14806 = vmatpush1.bf16.msra.mxu0 %v18028_v24  ;;  %v18095_v24 = vcombine.high %v11846_v58, %v11850_v59 }
 0x6d1   : > { %14970 = vmatpush1.bf16.msra.mxu1 %v18030_v44  ;;  %14807 = vmatprep.subr.bf16.mxu0 %v18037_v39  ;;  %v11853_v44 = vld [vmem:[%s19514_s14 + $0x440] sm:$0xff] }
 0x6d2   : > { %14971 = vmatprep.subr.bf16.mxu1 %v18039_v20  ;;  %v11857_v39 = vld [vmem:[%s19514_s14 + $0x460] sm:$0xff]  ;;  %v18092_v20 = vcombine.low %v11845_v4, %v11849_v38  ;;  %v11906_v4 = vld [vmem:[%s19514_s14 + $0x5e8] sm:$0xff] }
 0x6d3   : > { %v18100_v15 = vcombine.low %v11853_v44, %v11857_v39 }
 0x6d4   : > { %14808 = vmatpush1.bf16.msra.mxu0 %v18036_v29  ;;  %v18101_v29 = vcombine.high %v11853_v44, %v11857_v39  ;;  %v11914_v44 = vld [vmem:[%s19514_s14 + $0x628] sm:$0xff] }
 0x6d5   : > { %14972 = vmatpush1.bf16.msra.mxu1 %v18038_v13  ;;  %14809 = vmatprep.subr.bf16.mxu0 %v18045_v54  ;;  %v11861_v13 = vld [vmem:[%s19514_s14 + $0x480] sm:$0xff] }
 0x6d6   : > { %14973 = vmatprep.subr.bf16.mxu1 %v18047_v1  ;;  %v11865_v54 = vld [vmem:[%s19514_s14 + $0x4a0] sm:$0xff]  ;;  %v21405_v1 = vpack.c.bf16 %v20739_v48, %v20739_v48  ;;  %v18111_v48 = vcombine.high %v11862_v14, %v11866_v36 }
 0x6d7   : > { %v18108_v22 = vcombine.low %v11861_v13, %v11865_v54 }
 0x6d8   : > { %14810 = vmatpush1.bf16.msra.mxu0 %v18044_v17  ;;  %v18109_v17 = vcombine.high %v11861_v13, %v11865_v54  ;;  %v11918_v13 = vld [vmem:[%s19514_s14 + $0x648] sm:$0xff] }
 0x6d9   : > { %14974 = vmatpush1.bf16.msra.mxu1 %v18046_v60  ;;  %14811 = vmatprep.subr.bf16.mxu0 %v18053_v33  ;;  %v11869_v60 = vld [vmem:[%s19514_s14 + $0x4c0] sm:$0xff]  ;;  %v11922_v54 = vld [vmem:[%s19514_s14 + $0x668] sm:$0xff] }
 0x6da   : > { %14975 = vmatprep.subr.bf16.mxu1 %v18055_v49  ;;  %v11873_v33 = vld [vmem:[%s19514_s14 + $0x4e0] sm:$0xff]  ;;  %v11870_v49 = vld [vmem:[%s19514_s14 + $0x4c8] sm:$0xff] }
 0x6db   : > { %v18117_v8 = vcombine.high %v11869_v60, %v11873_v33  ;;  %v18116_v31 = vcombine.low %v11869_v60, %v11873_v33  ;;  %v18118_v32 = vcombine.low %v11870_v49, %v11874_v21  ;;  %v11930_v60 = vld [vmem:[%s19514_s14 + $0x6a8] sm:$0xff] }
 0x6dc   : > { %14812 = vmatpush1.bf16.msra.mxu0 %v18052_v23  ;;  %v18119_v23 = vcombine.high %v11870_v49, %v11874_v21  ;;  %v18166_v49 = vcombine.low %v11918_v13, %v11922_v54 }
 0x6dd   : > { %14976 = vmatpush1.bf16.msra.mxu1 %v18054_v25  ;;  %14813 = vmatprep.subr.bf16.mxu0 %v18061_v26  ;;  %v11877_v25 = vld [vmem:[%s19514_s14 + $0x500] sm:$0xff] }
 0x6de   : > { %14977 = vmatprep.subr.bf16.mxu1 %v18063_v27  ;;  %v11881_v26 = vld [vmem:[%s19514_s14 + $0x520] sm:$0xff]  ;;  %v11878_v27 = vld [vmem:[%s19514_s14 + $0x508] sm:$0xff] }
 0x6df   : > { %v18125_v11 = vcombine.high %v11877_v25, %v11881_v26  ;;  %v18124_v41 = vcombine.low %v11877_v25, %v11881_v26  ;;  %v18126_v46 = vcombine.low %v11878_v27, %v11882_v50  ;;  %v11938_v25 = vld [vmem:[%s19514_s14 + $0x6e8] sm:$0xff] }
 0x6e0   : > { %14814 = vmatpush1.bf16.msra.mxu0 %v18060_v0  ;;  %v18127_v0 = vcombine.high %v11878_v27, %v11882_v50 }
 0x6e1   : > { %14978 = vmatpush1.bf16.msra.mxu1 %v18062_v19  ;;  %14815 = vmatprep.subr.bf16.mxu0 %v18069_v34  ;;  %v11885_v19 = vld [vmem:[%s19514_s14 + $0x540] sm:$0xff] }
 0x6e2   : > { %14979 = vmatprep.subr.bf16.mxu1 %v18071_v37  ;;  %v11889_v34 = vld [vmem:[%s19514_s14 + $0x560] sm:$0xff]  ;;  %v11886_v37 = vld [vmem:[%s19514_s14 + $0x548] sm:$0xff] }
 0x6e3   : > { %v18133_v47 = vcombine.high %v11885_v19, %v11889_v34  ;;  %v18132_v55 = vcombine.low %v11885_v19, %v11889_v34  ;;  %v18134_v56 = vcombine.low %v11886_v37, %v11890_v40  ;;  %v11946_v19 = vld [vmem:[%s19514_s14 + $0x728] sm:$0xff] }
 0x6e4   : > { %14816 = vmatpush1.bf16.msra.mxu0 %v18068_v35  ;;  %v18135_v35 = vcombine.high %v11886_v37, %v11890_v40 }
 0x6e5   : > { %14980 = vmatpush1.bf16.msra.mxu1 %v18070_v51  ;;  %14817 = vmatprep.subr.bf16.mxu0 %v18077_v3  ;;  %v11893_v51 = vld [vmem:[%s19514_s14 + $0x580] sm:$0xff] }
 0x6e6   : > { %14981 = vmatprep.subr.bf16.mxu1 %v18079_v28  ;;  %v11897_v3 = vld [vmem:[%s19514_s14 + $0x5a0] sm:$0xff]  ;;  %v11894_v28 = vld [vmem:[%s19514_s14 + $0x588] sm:$0xff] }
 0x6e7   : > { %v18141_v61 = vcombine.high %v11893_v51, %v11897_v3  ;;  %v18140_v38 = vcombine.low %v11893_v51, %v11897_v3  ;;  %v18142_v58 = vcombine.low %v11894_v28, %v11898_v53  ;;  %v11954_v51 = vld [vmem:[%s19514_s14 + $0x768] sm:$0xff] }
 0x6e8   : > { %14818 = vmatpush1.bf16.msra.mxu0 %v18076_v62  ;;  %v18143_v62 = vcombine.high %v11894_v28, %v11898_v53 }
 0x6e9   : > { %14982 = vmatpush1.bf16.msra.mxu1 %v18078_v63  ;;  %14819 = vmatprep.subr.bf16.mxu0 %v18085_v9  ;;  %v11901_v63 = vld [vmem:[%s19514_s14 + $0x5c0] sm:$0xff] }
 0x6ea   : > { %14983 = vmatprep.subr.bf16.mxu1 %v18087_v16  ;;  %v11905_v9 = vld [vmem:[%s19514_s14 + $0x5e0] sm:$0xff]  ;;  %v11902_v16 = vld [vmem:[%s19514_s14 + $0x5c8] sm:$0xff] }
 0x6eb   : > { %v18149_v59 = vcombine.high %v11901_v63, %v11905_v9  ;;  %v18148_v39 = vcombine.low %v11901_v63, %v11905_v9  ;;  %v11962_v63 = vld [vmem:[%s19514_s14 + $0x7a8] sm:$0xff] }
 0x6ec   : > { %14820 = vmatpush1.bf16.msra.mxu0 %v18084_v5  ;;  %v18151_v5 = vcombine.high %v11902_v16, %v11906_v4 }
 0x6ed   : > { %14984 = vmatpush1.bf16.msra.mxu1 %v18086_v52  ;;  %14830 = vmatprep.subr.bf16.mxu0 %v18093_v2  ;;  %v11909_v52 = vld [vmem:[%s19514_s14 + $0x600] sm:$0xff] }
 0x6ee   : > { %14994 = vmatprep.subr.bf16.mxu1 %v18095_v24  ;;  %v11913_v2 = vld [vmem:[%s19514_s14 + $0x620] sm:$0xff]  ;;  %v11910_v24 = vld [vmem:[%s19514_s14 + $0x608] sm:$0xff] }
 0x6ef   : > { %14822 = vmatmul.mubr.bf16.vlgmr.msra.gmra.mrb[8].mxu0 %v21399_v43  ;;  %v18157_v7 = vcombine.high %v11909_v52, %v11913_v2  ;;  %v18159_v10 = vcombine.high %v11910_v24, %v11914_v44  ;;  %v18158_v14 = vcombine.low %v11910_v24, %v11914_v44 }
 0x6f0   : > { %14986 = vmatmul.mubr.bf16.vlgmr.msra.gmra.mrb[8].mxu1 %v21399_v43  ;;  %14831 = vmatpush1.bf16.msra.mxu0 %v18092_v20  ;;  %v18150_v20 = vcombine.low %v11902_v16, %v11906_v4 }
 0x6f1   : > { %14862 = vmatprep.mubr.bf16.mxu0 %v21405_v1  ;;  %14995 = vmatpush1.bf16.msra.mxu1 %v18094_v12  ;;  %v11917_v12 = vld [vmem:[%s19514_s14 + $0x640] sm:$0xff] }
 0x6f2   : > { %15026 = vmatprep.mubr.bf16.mxu1 %v21405_v1  ;;  %14832 = vmatprep.subr.bf16.mxu0 %v18101_v29  ;;  %v11921_v29 = vld [vmem:[%s19514_s14 + $0x660] sm:$0xff] }
 0x6f3   : > { %14996 = vmatprep.subr.bf16.mxu1 %v18103_v6  ;;  %v18156_v6 = vcombine.low %v11909_v52, %v11913_v2  ;;  %v18165_v36 = vcombine.high %v11917_v12, %v11921_v29  ;;  %v18164_v33 = vcombine.low %v11917_v12, %v11921_v29  ;;  %v11970_v52 = vld [vmem:[%s19514_s14 + $0x7e8] sm:$0xff] }
 0x6f4   : > { %14833 = vmatpush1.bf16.msra.mxu0 %v18100_v15  ;;  %v18167_v15 = vcombine.high %v11918_v13, %v11922_v54  ;;  %v11978_v12 = vld [vmem:[%s19514_s14 + $0x828] sm:$0xff] }
 0x6f5   : > { %14997 = vmatpush1.bf16.msra.mxu1 %v18102_v18  ;;  %14834 = vmatprep.subr.bf16.mxu0 %v18109_v17  ;;  %v11925_v18 = vld [vmem:[%s19514_s14 + $0x680] sm:$0xff] }
 0x6f6   : > { %14998 = vmatprep.subr.bf16.mxu1 %v18111_v48  ;;  %v11929_v17 = vld [vmem:[%s19514_s14 + $0x6a0] sm:$0xff]  ;;  %v11926_v48 = vld [vmem:[%s19514_s14 + $0x688] sm:$0xff] }
 0x6f7   : > { %v18173_v21 = vcombine.high %v11925_v18, %v11929_v17  ;;  %v18172_v26 = vcombine.low %v11925_v18, %v11929_v17  ;;  %v18174_v27 = vcombine.low %v11926_v48, %v11930_v60  ;;  %v11986_v18 = vld [vmem:[%s19514_s14 + $0x868] sm:$0xff] }
 0x6f8   : > { %14835 = vmatpush1.bf16.msra.mxu0 %v18108_v22  ;;  %v18175_v22 = vcombine.high %v11926_v48, %v11930_v60  ;;  %v21475_v48 = vpack.c.bf16 %v20733_v42, %v20733_v42 }
 0x6f9   : > { %14999 = vmatpush1.bf16.msra.mxu1 %v18110_v57  ;;  %14836 = vmatprep.subr.bf16.mxu0 %v18117_v8  ;;  %v11933_v57 = vld [vmem:[%s19514_s14 + $0x6c0] sm:$0xff] }
 0x6fa   : > { %15000 = vmatprep.subr.bf16.mxu1 %v18119_v23  ;;  %v11937_v8 = vld [vmem:[%s19514_s14 + $0x6e0] sm:$0xff]  ;;  %v11934_v23 = vld [vmem:[%s19514_s14 + $0x6c8] sm:$0xff] }
 0x6fb   : > { %v18181_v50 = vcombine.high %v11933_v57, %v11937_v8  ;;  %v18180_v34 = vcombine.low %v11933_v57, %v11937_v8  ;;  %v18182_v37 = vcombine.low %v11934_v23, %v11938_v25  ;;  %v11990_v57 = vld [vmem:[%s19514_s14 + $0x888] sm:$0xff] }
 0x6fc   : > { %14837 = vmatpush1.bf16.msra.mxu0 %v18116_v31  ;;  %v18183_v31 = vcombine.high %v11934_v23, %v11938_v25  ;;  %v11994_v8 = vld [vmem:[%s19514_s14 + $0x8a8] sm:$0xff] }
 0x6fd   : > { %15001 = vmatpush1.bf16.msra.mxu1 %v18118_v32  ;;  %14838 = vmatprep.subr.bf16.mxu0 %v18125_v11  ;;  %v11941_v32 = vld [vmem:[%s19514_s14 + $0x700] sm:$0xff] }
 0x6fe   : > { %15002 = vmatprep.subr.bf16.mxu1 %v18127_v0  ;;  %v11945_v11 = vld [vmem:[%s19514_s14 + $0x720] sm:$0xff]  ;;  %v11942_v0 = vld [vmem:[%s19514_s14 + $0x708] sm:$0xff] }
 0x6ff   : > { %v18189_v40 = vcombine.high %v11941_v32, %v11945_v11  ;;  %v18188_v3 = vcombine.low %v11941_v32, %v11945_v11  ;;  %v18190_v28 = vcombine.low %v11942_v0, %v11946_v19  ;;  %v12002_v32 = vld [vmem:[%s19514_s14 + $0x8e8] sm:$0xff] }
 0x700   : > { %14839 = vmatpush1.bf16.msra.mxu0 %v18124_v41  ;;  %v18191_v41 = vcombine.high %v11942_v0, %v11946_v19  ;;  %v18238_v0 = vcombine.low %v11990_v57, %v11994_v8 }
 0x701   : > { %15003 = vmatpush1.bf16.msra.mxu1 %v18126_v46  ;;  %14840 = vmatprep.subr.bf16.mxu0 %v18133_v47  ;;  %v11949_v46 = vld [vmem:[%s19514_s14 + $0x740] sm:$0xff] }
 0x702   : > { %15004 = vmatprep.subr.bf16.mxu1 %v18135_v35  ;;  %v11953_v47 = vld [vmem:[%s19514_s14 + $0x760] sm:$0xff]  ;;  %v11950_v35 = vld [vmem:[%s19514_s14 + $0x748] sm:$0xff] }
 0x703   : > { %v18197_v53 = vcombine.high %v11949_v46, %v11953_v47  ;;  %v18196_v9 = vcombine.low %v11949_v46, %v11953_v47  ;;  %v18198_v16 = vcombine.low %v11950_v35, %v11954_v51  ;;  %v12010_v46 = vld [vmem:[%s19514_s14 + $0x928] sm:$0xff] }
 0x704   : > { %14841 = vmatpush1.bf16.msra.mxu0 %v18132_v55  ;;  %v18199_v55 = vcombine.high %v11950_v35, %v11954_v51 }
 0x705   : > { %15005 = vmatpush1.bf16.msra.mxu1 %v18134_v56  ;;  %14842 = vmatprep.subr.bf16.mxu0 %v18141_v61  ;;  %v11957_v56 = vld [vmem:[%s19514_s14 + $0x780] sm:$0xff] }
 0x706   : > { %15006 = vmatprep.subr.bf16.mxu1 %v18143_v62  ;;  %v11961_v61 = vld [vmem:[%s19514_s14 + $0x7a0] sm:$0xff]  ;;  %v11958_v62 = vld [vmem:[%s19514_s14 + $0x788] sm:$0xff] }
 0x707   : > { %v18205_v4 = vcombine.high %v11957_v56, %v11961_v61  ;;  %v18204_v2 = vcombine.low %v11957_v56, %v11961_v61  ;;  %v18206_v24 = vcombine.low %v11958_v62, %v11962_v63  ;;  %v12018_v56 = vld [vmem:[%s19514_s14 + $0x968] sm:$0xff] }
 0x708   : > { %14843 = vmatpush1.bf16.msra.mxu0 %v18140_v38  ;;  %v18207_v38 = vcombine.high %v11958_v62, %v11962_v63 }
 0x709   : > { %15007 = vmatpush1.bf16.msra.mxu1 %v18142_v58  ;;  %14844 = vmatprep.subr.bf16.mxu0 %v18149_v59  ;;  %v11965_v58 = vld [vmem:[%s19514_s14 + $0x7c0] sm:$0xff] }
 0x70a   : > { %15008 = vmatprep.subr.bf16.mxu1 %v18151_v5  ;;  %v11969_v59 = vld [vmem:[%s19514_s14 + $0x7e0] sm:$0xff]  ;;  %v11966_v5 = vld [vmem:[%s19514_s14 + $0x7c8] sm:$0xff] }
 0x70b   : > { %v18213_v44 = vcombine.high %v11965_v58, %v11969_v59  ;;  %v18212_v29 = vcombine.low %v11965_v58, %v11969_v59  ;;  %v18214_v13 = vcombine.low %v11966_v5, %v11970_v52  ;;  %v12026_v58 = vld [vmem:[%s19514_s14 + $0x9a8] sm:$0xff] }
 0x70c   : > { %14845 = vmatpush1.bf16.msra.mxu0 %v18148_v39  ;;  %v18215_v39 = vcombine.high %v11966_v5, %v11970_v52 }
 0x70d   : > { %15009 = vmatpush1.bf16.msra.mxu1 %v18150_v20  ;;  %14846 = vmatprep.subr.bf16.mxu0 %v18157_v7  ;;  %v11973_v20 = vld [vmem:[%s19514_s14 + $0x800] sm:$0xff] }
 0x70e   : > { %15010 = vmatprep.subr.bf16.mxu1 %v18159_v10  ;;  %v11977_v7 = vld [vmem:[%s19514_s14 + $0x820] sm:$0xff]  ;;  %v11974_v10 = vld [vmem:[%s19514_s14 + $0x808] sm:$0xff] }
 0x70f   : > { %v18221_v54 = vcombine.high %v11973_v20, %v11977_v7  ;;  %v18220_v17 = vcombine.low %v11973_v20, %v11977_v7  ;;  %v18222_v60 = vcombine.low %v11974_v10, %v11978_v12  ;;  %v12034_v20 = vld [vmem:[%s19514_s14 + $0x9e8] sm:$0xff] }
 0x710   : > { %14847 = vmatpush1.bf16.msra.mxu0 %v18156_v6  ;;  %v18223_v6 = vcombine.high %v11974_v10, %v11978_v12 }
 0x711   : > { %15011 = vmatpush1.bf16.msra.mxu1 %v18158_v14  ;;  %14848 = vmatprep.subr.bf16.mxu0 %v18165_v36  ;;  %v11981_v14 = vld [vmem:[%s19514_s14 + $0x840] sm:$0xff] }
 0x712   : > { %15012 = vmatprep.subr.bf16.mxu1 %v18167_v15  ;;  %v11985_v36 = vld [vmem:[%s19514_s14 + $0x860] sm:$0xff]  ;;  %v11982_v15 = vld [vmem:[%s19514_s14 + $0x848] sm:$0xff] }
 0x713   : > { %v18228_v42 = vcombine.low %v11981_v14, %v11985_v36  ;;  %v18230_v23 = vcombine.low %v11982_v15, %v11986_v18 }
 0x714   : > { %14849 = vmatpush1.bf16.msra.mxu0 %v18164_v33  ;;  %v18229_v33 = vcombine.high %v11981_v14, %v11985_v36  ;;  %v12042_v14 = vld [vmem:[%s19514_s14 + $0xa28] sm:$0xff] }
 0x715   : > { %15013 = vmatpush1.bf16.msra.mxu1 %v18166_v49  ;;  %14850 = vmatprep.subr.bf16.mxu0 %v18173_v21  ;;  %v18231_v49 = vcombine.high %v11982_v15, %v11986_v18  ;;  %v11989_v21 = vld [vmem:[%s19514_s14 + $0x880] sm:$0xff] }
 0x716   : > { %15014 = vmatprep.subr.bf16.mxu1 %v18175_v22  ;;  %v11993_v22 = vld [vmem:[%s19514_s14 + $0x8a0] sm:$0xff] }
 0x717   : > { %v18237_v25 = vcombine.high %v11989_v21, %v11993_v22  ;;  %v18236_v11 = vcombine.low %v11989_v21, %v11993_v22  ;;  %v12050_v21 = vld [vmem:[%s19514_s14 + $0xa68] sm:$0xff] }
 0x718   : > { %14851 = vmatpush1.bf16.msra.mxu0 %v18172_v26  ;;  %v18239_v26 = vcombine.high %v11990_v57, %v11994_v8 }
 0x719   : > { %15015 = vmatpush1.bf16.msra.mxu1 %v18174_v27  ;;  %14852 = vmatprep.subr.bf16.mxu0 %v18181_v50  ;;  %v11997_v27 = vld [vmem:[%s19514_s14 + $0x8c0] sm:$0xff] }
 0x71a   : > { %15016 = vmatprep.subr.bf16.mxu1 %v18183_v31  ;;  %v12001_v50 = vld [vmem:[%s19514_s14 + $0x8e0] sm:$0xff]  ;;  %v11998_v31 = vld [vmem:[%s19514_s14 + $0x8c8] sm:$0xff] }
 0x71b   : > { %v18245_v19 = vcombine.high %v11997_v27, %v12001_v50  ;;  %v18244_v47 = vcombine.low %v11997_v27, %v12001_v50  ;;  %v18246_v35 = vcombine.low %v11998_v31, %v12002_v32  ;;  %v12058_v27 = vld [vmem:[%s19514_s14 + $0xaa8] sm:$0xff] }
 0x71c   : > { %14853 = vmatpush1.bf16.msra.mxu0 %v18180_v34  ;;  %v18247_v34 = vcombine.high %v11998_v31, %v12002_v32 }
 0x71d   : > { %15017 = vmatpush1.bf16.msra.mxu1 %v18182_v37  ;;  %14854 = vmatprep.subr.bf16.mxu0 %v18189_v40  ;;  %v12005_v37 = vld [vmem:[%s19514_s14 + $0x900] sm:$0xff] }
 0x71e   : > { %15018 = vmatprep.subr.bf16.mxu1 %v18191_v41  ;;  %v12009_v40 = vld [vmem:[%s19514_s14 + $0x920] sm:$0xff]  ;;  %v12006_v41 = vld [vmem:[%s19514_s14 + $0x908] sm:$0xff] }
 0x71f   : > { %v18253_v51 = vcombine.high %v12005_v37, %v12009_v40  ;;  %v18252_v61 = vcombine.low %v12005_v37, %v12009_v40  ;;  %v18254_v62 = vcombine.low %v12006_v41, %v12010_v46  ;;  %v12066_v37 = vld [vmem:[%s19514_s14 + $0xae8] sm:$0xff] }
 0x720   : > { %14855 = vmatpush1.bf16.msra.mxu0 %v18188_v3  ;;  %v18255_v3 = vcombine.high %v12006_v41, %v12010_v46 }
 0x721   : > { %15019 = vmatpush1.bf16.msra.mxu1 %v18190_v28  ;;  %14856 = vmatprep.subr.bf16.mxu0 %v18197_v53  ;;  %v12013_v28 = vld [vmem:[%s19514_s14 + $0x940] sm:$0xff] }
 0x722   : > { %15020 = vmatprep.subr.bf16.mxu1 %v18199_v55  ;;  %v12017_v53 = vld [vmem:[%s19514_s14 + $0x960] sm:$0xff]  ;;  %v12014_v55 = vld [vmem:[%s19514_s14 + $0x948] sm:$0xff] }
 0x723   : > { %v18261_v63 = vcombine.high %v12013_v28, %v12017_v53  ;;  %v18260_v59 = vcombine.low %v12013_v28, %v12017_v53  ;;  %v18262_v5 = vcombine.low %v12014_v55, %v12018_v56  ;;  %v12074_v28 = vld [vmem:[%s19514_s14 + $0xb28] sm:$0xff] }
 0x724   : > { %14857 = vmatpush1.bf16.msra.mxu0 %v18196_v9  ;;  %v18263_v9 = vcombine.high %v12014_v55, %v12018_v56 }
 0x725   : > { %15021 = vmatpush1.bf16.msra.mxu1 %v18198_v16  ;;  %14858 = vmatprep.subr.bf16.mxu0 %v18205_v4  ;;  %v12021_v16 = vld [vmem:[%s19514_s14 + $0x980] sm:$0xff] }
 0x726   : > { %15022 = vmatprep.subr.bf16.mxu1 %v18207_v38  ;;  %v12025_v4 = vld [vmem:[%s19514_s14 + $0x9a0] sm:$0xff]  ;;  %v12022_v38 = vld [vmem:[%s19514_s14 + $0x988] sm:$0xff] }
 0x727   : > { %v18269_v52 = vcombine.high %v12021_v16, %v12025_v4  ;;  %v18268_v7 = vcombine.low %v12021_v16, %v12025_v4  ;;  %v18270_v10 = vcombine.low %v12022_v38, %v12026_v58  ;;  %v12082_v16 = vld [vmem:[%s19514_s14 + $0xb68] sm:$0xff] }
 0x728   : > { %14859 = vmatpush1.bf16.msra.mxu0 %v18204_v2  ;;  %v18271_v2 = vcombine.high %v12022_v38, %v12026_v58 }
 0x729   : > { %15023 = vmatpush1.bf16.msra.mxu1 %v18206_v24  ;;  %14860 = vmatprep.subr.bf16.mxu0 %v18213_v44  ;;  %v12029_v24 = vld [vmem:[%s19514_s14 + $0x9c0] sm:$0xff] }
 0x72a   : > { %15024 = vmatprep.subr.bf16.mxu1 %v18215_v39  ;;  %v12033_v44 = vld [vmem:[%s19514_s14 + $0x9e0] sm:$0xff]  ;;  %v12030_v39 = vld [vmem:[%s19514_s14 + $0x9c8] sm:$0xff] }
 0x72b   : > { %v18277_v12 = vcombine.high %v12029_v24, %v12033_v44  ;;  %v18276_v36 = vcombine.low %v12029_v24, %v12033_v44  ;;  %v18278_v15 = vcombine.low %v12030_v39, %v12034_v20  ;;  %v12090_v24 = vld [vmem:[%s19514_s14 + $0xba8] sm:$0xff] }
 0x72c   : > { %14861 = vmatpush1.bf16.msra.mxu0 %v18212_v29  ;;  %v18279_v29 = vcombine.high %v12030_v39, %v12034_v20 }
 0x72d   : > { %15025 = vmatpush1.bf16.msra.mxu1 %v18214_v13  ;;  %14871 = vmatprep.subr.bf16.mxu0 %v18221_v54  ;;  %v12037_v13 = vld [vmem:[%s19514_s14 + $0xa00] sm:$0xff] }
 0x72e   : > { %15035 = vmatprep.subr.bf16.mxu1 %v18223_v6  ;;  %v12041_v54 = vld [vmem:[%s19514_s14 + $0xa20] sm:$0xff]  ;;  %v12038_v6 = vld [vmem:[%s19514_s14 + $0xa08] sm:$0xff] }
 0x72f   : > { %14863 = vmatmul.mubr.bf16.vlgmr.msra.gmra.mrb[8].mxu0 %v21475_v48  ;;  %v18285_v18 = vcombine.high %v12037_v13, %v12041_v54  ;;  %v18284_v22 = vcombine.low %v12037_v13, %v12041_v54  ;;  %v18286_v57 = vcombine.low %v12038_v6, %v12042_v14  ;;  %v12098_v13 = vld [vmem:[%s19514_s14 + $0xbe8] sm:$0xff] }
 0x730   : > { %15027 = vmatmul.mubr.bf16.vlgmr.msra.gmra.mrb[8].mxu1 %v21475_v48  ;;  %14872 = vmatpush1.bf16.msra.mxu0 %v18220_v17  ;;  %v18287_v17 = vcombine.high %v12038_v6, %v12042_v14 }
 0x731   : > { %15036 = vmatpush1.bf16.msra.mxu1 %v18222_v60  ;;  %14873 = vmatprep.subr.bf16.mxu0 %v18229_v33  ;;  %v12045_v60 = vld [vmem:[%s19514_s14 + $0xa40] sm:$0xff] }
 0x732   : > { %15037 = vmatprep.subr.bf16.mxu1 %v18231_v49  ;;  %v12049_v33 = vld [vmem:[%s19514_s14 + $0xa60] sm:$0xff]  ;;  %v12046_v49 = vld [vmem:[%s19514_s14 + $0xa48] sm:$0xff] }
 0x733   : > { %v18293_v8 = vcombine.high %v12045_v60, %v12049_v33  ;;  %v18292_v50 = vcombine.low %v12045_v60, %v12049_v33  ;;  %v18294_v31 = vcombine.low %v12046_v49, %v12050_v21  ;;  %v12106_v60 = vld [vmem:[%s19514_s14 + $0xc28] sm:$0xff] }
 0x734   : > { %14874 = vmatpush1.bf16.msra.mxu0 %v18228_v42  ;;  %v18295_v42 = vcombine.high %v12046_v49, %v12050_v21 }
 0x735   : > { %15038 = vmatpush1.bf16.msra.mxu1 %v18230_v23  ;;  %14875 = vmatprep.subr.bf16.mxu0 %v18237_v25  ;;  %v12053_v23 = vld [vmem:[%s19514_s14 + $0xa80] sm:$0xff] }
 0x736   : > { %15039 = vmatprep.subr.bf16.mxu1 %v18239_v26  ;;  %v12057_v25 = vld [vmem:[%s19514_s14 + $0xaa0] sm:$0xff]  ;;  %v12054_v26 = vld [vmem:[%s19514_s14 + $0xa88] sm:$0xff] }
 0x737   : > { %v18301_v32 = vcombine.high %v12053_v23, %v12057_v25  ;;  %v18300_v40 = vcombine.low %v12053_v23, %v12057_v25  ;;  %v18302_v41 = vcombine.low %v12054_v26, %v12058_v27  ;;  %v12113_v25 = vld [vmem:[%s19514_s14 + $0xc60] sm:$0xff] }
 0x738   : > { %14876 = vmatpush1.bf16.msra.mxu0 %v18236_v11  ;;  %v18303_v11 = vcombine.high %v12054_v26, %v12058_v27  ;;  %v12110_v26 = vld [vmem:[%s19514_s14 + $0xc48] sm:$0xff] }
 0x739   : > { %15040 = vmatpush1.bf16.msra.mxu1 %v18238_v0  ;;  %14877 = vmatprep.subr.bf16.mxu0 %v18245_v19  ;;  %v12061_v0 = vld [vmem:[%s19514_s14 + $0xac0] sm:$0xff]  ;;  %v12114_v27 = vld [vmem:[%s19514_s14 + $0xc68] sm:$0xff] }
 0x73a   : > { %15041 = vmatprep.subr.bf16.mxu1 %v18247_v34  ;;  %v12065_v19 = vld [vmem:[%s19514_s14 + $0xae0] sm:$0xff]  ;;  %v12062_v34 = vld [vmem:[%s19514_s14 + $0xac8] sm:$0xff] }
 0x73b   : > { %v18309_v46 = vcombine.high %v12061_v0, %v12065_v19  ;;  %v18308_v53 = vcombine.low %v12061_v0, %v12065_v19  ;;  %v18310_v55 = vcombine.low %v12062_v34, %v12066_v37 }
 0x73c   : > { %14878 = vmatpush1.bf16.msra.mxu0 %v18244_v47  ;;  %v18311_v47 = vcombine.high %v12062_v34, %v12066_v37 }
 0x73d   : > { %15042 = vmatpush1.bf16.msra.mxu1 %v18246_v35  ;;  %14879 = vmatprep.subr.bf16.mxu0 %v18253_v51  ;;  %v12069_v35 = vld [vmem:[%s19514_s14 + $0xb00] sm:$0xff] }
 0x73e   : > { %15043 = vmatprep.subr.bf16.mxu1 %v18255_v3  ;;  %v12073_v51 = vld [vmem:[%s19514_s14 + $0xb20] sm:$0xff]  ;;  %v12070_v3 = vld [vmem:[%s19514_s14 + $0xb08] sm:$0xff] }
 0x73f   : > { %v18317_v56 = vcombine.high %v12069_v35, %v12073_v51  ;;  %v18316_v4 = vcombine.low %v12069_v35, %v12073_v51  ;;  %v18318_v38 = vcombine.low %v12070_v3, %v12074_v28  ;;  %v12121_v35 = vld [vmem:[%s19514_s14 + $0xca0] sm:$0xff]  ;;  %v12118_v51 = vld [vmem:[%s19514_s14 + $0xc88] sm:$0xff] }
 0x740   : > { %14880 = vmatpush1.bf16.msra.mxu0 %v18252_v61  ;;  %v18319_v61 = vcombine.high %v12070_v3, %v12074_v28  ;;  %v12122_v3 = vld [vmem:[%s19514_s14 + $0xca8] sm:$0xff] }
 0x741   : > { %15044 = vmatpush1.bf16.msra.mxu1 %v18254_v62  ;;  %14881 = vmatprep.subr.bf16.mxu0 %v18261_v63  ;;  %v12077_v62 = vld [vmem:[%s19514_s14 + $0xb40] sm:$0xff] }
 0x742   : > { %15045 = vmatprep.subr.bf16.mxu1 %v18263_v9  ;;  %v12081_v63 = vld [vmem:[%s19514_s14 + $0xb60] sm:$0xff]  ;;  %v12078_v9 = vld [vmem:[%s19514_s14 + $0xb48] sm:$0xff] }
 0x743   : > { %v18325_v58 = vcombine.high %v12077_v62, %v12081_v63  ;;  %v18324_v44 = vcombine.low %v12077_v62, %v12081_v63  ;;  %v18326_v39 = vcombine.low %v12078_v9, %v12082_v16  ;;  %v12125_v62 = vld [vmem:[%s19514_s14 + $0xcc0] sm:$0xff] }
 0x744   : > { %14882 = vmatpush1.bf16.msra.mxu0 %v18260_v59  ;;  %v18327_v59 = vcombine.high %v12078_v9, %v12082_v16  ;;  %v12129_v63 = vld [vmem:[%s19514_s14 + $0xce0] sm:$0xff]  ;;  %v12126_v9 = vld [vmem:[%s19514_s14 + $0xcc8] sm:$0xff] }
 0x745   : > { %15046 = vmatpush1.bf16.msra.mxu1 %v18262_v5  ;;  %14883 = vmatprep.subr.bf16.mxu0 %v18269_v52  ;;  %v12085_v5 = vld [vmem:[%s19514_s14 + $0xb80] sm:$0xff]  ;;  %v12130_v16 = vld [vmem:[%s19514_s14 + $0xce8] sm:$0xff] }
 0x746   : > { %15047 = vmatprep.subr.bf16.mxu1 %v18271_v2  ;;  %v12089_v52 = vld [vmem:[%s19514_s14 + $0xba0] sm:$0xff]  ;;  %v12086_v2 = vld [vmem:[%s19514_s14 + $0xb88] sm:$0xff] }
 0x747   : > { %v18333_v20 = vcombine.high %v12085_v5, %v12089_v52  ;;  %v18332_v54 = vcombine.low %v12085_v5, %v12089_v52  ;;  %v18334_v6 = vcombine.low %v12086_v2, %v12090_v24  ;;  %v12133_v5 = vld [vmem:[%s19514_s14 + $0xd00] sm:$0xff] }
 0x748   : > { %14884 = vmatpush1.bf16.msra.mxu0 %v18268_v7  ;;  %v18335_v7 = vcombine.high %v12086_v2, %v12090_v24  ;;  %v12137_v52 = vld [vmem:[%s19514_s14 + $0xd20] sm:$0xff]  ;;  %v12134_v2 = vld [vmem:[%s19514_s14 + $0xd08] sm:$0xff] }
 0x749   : > { %15048 = vmatpush1.bf16.msra.mxu1 %v18270_v10  ;;  %14885 = vmatprep.subr.bf16.mxu0 %v18277_v12  ;;  %v12093_v10 = vld [vmem:[%s19514_s14 + $0xbc0] sm:$0xff]  ;;  %v12138_v24 = vld [vmem:[%s19514_s14 + $0xd28] sm:$0xff] }
 0x74a   : > { %15049 = vmatprep.subr.bf16.mxu1 %v18279_v29  ;;  %v12097_v12 = vld [vmem:[%s19514_s14 + $0xbe0] sm:$0xff]  ;;  %v12094_v29 = vld [vmem:[%s19514_s14 + $0xbc8] sm:$0xff] }
 0x74b   : > { %v18341_v14 = vcombine.high %v12093_v10, %v12097_v12  ;;  %v18340_v33 = vcombine.low %v12093_v10, %v12097_v12  ;;  %v18342_v49 = vcombine.low %v12094_v29, %v12098_v13  ;;  %v12141_v10 = vld [vmem:[%s19514_s14 + $0xd40] sm:$0xff] }
 0x74c   : > { %14886 = vmatpush1.bf16.msra.mxu0 %v18276_v36  ;;  %v18343_v36 = vcombine.high %v12094_v29, %v12098_v13  ;;  %v12145_v12 = vld [vmem:[%s19514_s14 + $0xd60] sm:$0xff]  ;;  %v12142_v29 = vld [vmem:[%s19514_s14 + $0xd48] sm:$0xff] }
 0x74d   : > { %15050 = vmatpush1.bf16.msra.mxu1 %v18278_v15  ;;  %14887 = vmatprep.subr.bf16.mxu0 %v18285_v18  ;;  %v12101_v15 = vld [vmem:[%s19514_s14 + $0xc00] sm:$0xff]  ;;  %v12146_v13 = vld [vmem:[%s19514_s14 + $0xd68] sm:$0xff] }
 0x74e   : > { %15051 = vmatprep.subr.bf16.mxu1 %v18287_v17  ;;  %v12105_v18 = vld [vmem:[%s19514_s14 + $0xc20] sm:$0xff]  ;;  %v12102_v17 = vld [vmem:[%s19514_s14 + $0xc08] sm:$0xff] }
 0x74f   : > { %v18349_v21 = vcombine.high %v12101_v15, %v12105_v18  ;;  %v18350_v0 = vcombine.low %v12102_v17, %v12106_v60 }
 0x750   : > { %14888 = vmatpush1.bf16.msra.mxu0 %v18284_v22  ;;  %v18351_v22 = vcombine.high %v12102_v17, %v12106_v60  ;;  %v12150_v17 = vld [vmem:[%s19514_s14 + $0xd88] sm:$0xff] }
 0x751   : > { %15052 = vmatpush1.bf16.msra.mxu1 %v18286_v57  ;;  %14889 = vmatprep.subr.bf16.mxu0 %v18293_v8  ;;  %v12109_v8 = vld [vmem:[%s19514_s14 + $0xc40] sm:$0xff]  ;;  %v12154_v60 = vld [vmem:[%s19514_s14 + $0xda8] sm:$0xff] }
 0x752   : > { %15053 = vmatprep.subr.bf16.mxu1 %v18295_v42 }
 0x754   : > { %14890 = vmatpush1.bf16.msra.mxu0 %v18292_v50 }
 0x755   : > { %15054 = vmatpush1.bf16.msra.mxu1 %v18294_v31  ;;  %14891 = vmatprep.subr.bf16.mxu0 %v18301_v32 }
 0x756   : > { %15055 = vmatprep.subr.bf16.mxu1 %v18303_v11  ;;  %v18348_v11 = vcombine.low %v12101_v15, %v12105_v18  ;;  %v12149_v15 = vld [vmem:[%s19514_s14 + $0xd80] sm:$0xff] }
 0x757   : > { %v12153_v18 = vld [vmem:[%s19514_s14 + $0xda0] sm:$0xff] }
 0x758   : > { %14892 = vmatpush1.bf16.msra.mxu0 %v18300_v40  ;;  %v12117_v40 = vld [vmem:[%s19514_s14 + $0xc80] sm:$0xff] }
 0x759   : > { %15056 = vmatpush1.bf16.msra.mxu1 %v18302_v41  ;;  %14893 = vmatprep.subr.bf16.mxu0 %v18309_v46  ;;  %v18357_v46 = vcombine.high %v12109_v8, %v12113_v25 }
 0x75a   : > { %15057 = vmatprep.subr.bf16.mxu1 %v18311_v47  ;;  %v18359_v47 = vcombine.high %v12110_v26, %v12114_v27 }
 0x75c   : > { %14894 = vmatpush1.bf16.msra.mxu0 %v18308_v53  ;;  %v18356_v53 = vcombine.low %v12109_v8, %v12113_v25  ;;  %v12161_v8 = vld [vmem:[%s19514_s14 + $0xde0] sm:$0xff]  ;;  %v12162_v25 = vld [vmem:[%s19514_s14 + $0xde8] sm:$0xff] }
 0x75d   : > { %15058 = vmatpush1.bf16.msra.mxu1 %v18310_v55  ;;  %14895 = vmatprep.subr.bf16.mxu0 %v18317_v56  ;;  %v18358_v55 = vcombine.low %v12110_v26, %v12114_v27  ;;  %v18365_v56 = vcombine.high %v12117_v40, %v12121_v35  ;;  %v18396_v26 = vcombine.low %v12149_v15, %v12153_v18 }
 0x75e   : > { %15059 = vmatprep.subr.bf16.mxu1 %v18319_v61  ;;  %v18367_v61 = vcombine.high %v12118_v51, %v12122_v3  ;;  %v18398_v27 = vcombine.low %v12150_v17, %v12154_v60 }
 0x760   : > { %14896 = vmatpush1.bf16.msra.mxu0 %v18316_v4  ;;  %v18364_v4 = vcombine.low %v12117_v40, %v12121_v35  ;;  %v12173_v35 = vld [vmem:[%s19514_s14 + $0xe40] sm:$0xff] }
 0x761   : > { %15060 = vmatpush1.bf16.msra.mxu1 %v18318_v38  ;;  %14897 = vmatprep.subr.bf16.mxu0 %v18325_v58  ;;  %v18366_v38 = vcombine.low %v12118_v51, %v12122_v3  ;;  %v18373_v58 = vcombine.high %v12125_v62, %v12129_v63  ;;  %v12177_v51 = vld [vmem:[%s19514_s14 + $0xe60] sm:$0xff]  ;;  %v12174_v3 = vld [vmem:[%s19514_s14 + $0xe48] sm:$0xff] }
 0x762   : > { %15061 = vmatprep.subr.bf16.mxu1 %v18327_v59  ;;  %v18375_v59 = vcombine.high %v12126_v9, %v12130_v16 }
 0x764   : > { %14898 = vmatpush1.bf16.msra.mxu0 %v18324_v44  ;;  %v18372_v44 = vcombine.low %v12125_v62, %v12129_v63  ;;  %v12181_v63 = vld [vmem:[%s19514_s14 + $0xe80] sm:$0xff] }
 0x765   : > { %15062 = vmatpush1.bf16.msra.mxu1 %v18326_v39  ;;  %14899 = vmatprep.subr.bf16.mxu0 %v18333_v20  ;;  %v18374_v39 = vcombine.low %v12126_v9, %v12130_v16  ;;  %v18381_v20 = vcombine.high %v12133_v5, %v12137_v52  ;;  %v12185_v9 = vld [vmem:[%s19514_s14 + $0xea0] sm:$0xff]  ;;  %v12182_v16 = vld [vmem:[%s19514_s14 + $0xe88] sm:$0xff] }
 0x766   : > { %15063 = vmatprep.subr.bf16.mxu1 %v18335_v7  ;;  %v18383_v7 = vcombine.high %v12134_v2, %v12138_v24 }
 0x768   : > { %14900 = vmatpush1.bf16.msra.mxu0 %v18332_v54  ;;  %v18380_v54 = vcombine.low %v12133_v5, %v12137_v52  ;;  %v12189_v52 = vld [vmem:[%s19514_s14 + $0xec0] sm:$0xff] }
 0x769   : > { %15064 = vmatpush1.bf16.msra.mxu1 %v18334_v6  ;;  %14901 = vmatprep.subr.bf16.mxu0 %v18341_v14  ;;  %v18382_v6 = vcombine.low %v12134_v2, %v12138_v24  ;;  %v18389_v14 = vcombine.high %v12141_v10, %v12145_v12  ;;  %v12193_v2 = vld [vmem:[%s19514_s14 + $0xee0] sm:$0xff]  ;;  %v12190_v24 = vld [vmem:[%s19514_s14 + $0xec8] sm:$0xff] }
 0x76a   : > { %15065 = vmatprep.subr.bf16.mxu1 %v18343_v36  ;;  %v18391_v36 = vcombine.high %v12142_v29, %v12146_v13 }
 0x76c   : > { %14902 = vmatpush1.bf16.msra.mxu0 %v18340_v33  ;;  %v18388_v33 = vcombine.low %v12141_v10, %v12145_v12  ;;  %v12197_v12 = vld [vmem:[%s19514_s14 + $0xf00] sm:$0xff] }
 0x76d   : > { %15066 = vmatpush1.bf16.msra.mxu1 %v18342_v49  ;;  %14912 = vmatprep.subr.bf16.mxu0 %v18349_v21  ;;  %v18390_v49 = vcombine.low %v12142_v29, %v12146_v13  ;;  %v18397_v21 = vcombine.high %v12149_v15, %v12153_v18  ;;  %v12201_v29 = vld [vmem:[%s19514_s14 + $0xf20] sm:$0xff]  ;;  %v12198_v13 = vld [vmem:[%s19514_s14 + $0xf08] sm:$0xff] }
 0x76e   : > { %15076 = vmatprep.subr.bf16.mxu1 %v18351_v22  ;;  %v18399_v22 = vcombine.high %v12150_v17, %v12154_v60  ;;  %v12205_v18 = vld [vmem:[%s19514_s14 + $0xf40] sm:$0xff]  ;;  %v12206_v60 = vld [vmem:[%s19514_s14 + $0xf48] sm:$0xff] }
 0x76f   : > { %v12209_v17 = vld [vmem:[%s19514_s14 + $0xf60] sm:$0xff] }
 0x782   : > { %v11208_v57 = vpop.f32.mrb[4].mxu0  ;;  %v21540_v42 = vpop.f32.mrb[4].mxu1 }
 0x783   : > { %v11210_v23 = vpop.f32.mrb[5].mxu0  ;;  %v11702_v31 = vpop.f32.mrb[5].mxu1  ;;  %v21547_v19 = vpack.c.bf16 %v11208_v57, %v11208_v57  ;;  %v12157_v57 = vld [vmem:[%s19514_s14 + $0xdc0] sm:$0xff] }
 0x784   : > { %v21545_v50 = vpack.c.bf16 %v11210_v23, %v11210_v23  ;;  %v11212_v32 = vpop.f32.mrb[6].mxu0  ;;  %v11704_v34 = vpop.f32.mrb[6].mxu1  ;;  %v21555_v28 = vpack.c.bf16 %v11702_v31, %v11702_v31  ;;  %v12158_v23 = vld [vmem:[%s19514_s14 + $0xdc8] sm:$0xff]  ;;  %v18405_v31 = vcombine.high %v12157_v57, %v12161_v8  ;;  %v18404_v40 = vcombine.low %v12157_v57, %v12161_v8  ;;  %v12213_v8 = vld [vmem:[%s19514_s14 + $0xf80] sm:$0xff] }
 0x785   : > { %v11213_v37 = vpop.f32.mrb[7].mxu0  ;;  %v11705_v41 = vpop.f32.mrb[7].mxu1  ;;  %v18407_v32 = vcombine.high %v12158_v23, %v12162_v25  ;;  %v12166_v34 = vld [vmem:[%s19514_s14 + $0xe08] sm:$0xff] }
 0x786   : > { %14903 = vmatprep.mubr.bf16.mxu0 %v21545_v50  ;;  %15067 = vmatprep.mubr.bf16.mxu1 %v21545_v50  ;;  %v12170_v37 = vld [vmem:[%s19514_s14 + $0xe28] sm:$0xff]  ;;  %v18406_v41 = vcombine.low %v12158_v23, %v12162_v25  ;;  %v12217_v23 = vld [vmem:[%s19514_s14 + $0xfa0] sm:$0xff] }
 0x787   : > { %14904 = vmatmul.mubr.bf16.vlgmr.msra.gmra.mrb[8].mxu0 %v21547_v19  ;;  %15068 = vmatmul.mubr.bf16.vlgmr.msra.gmra.mrb[8].mxu1 %v21547_v19  ;;  %v12214_v25 = vld [vmem:[%s19514_s14 + $0xf88] sm:$0xff] }
 0x788   : > { %14913 = vmatpush1.bf16.msra.mxu0 %v18348_v11  ;;  %15077 = vmatpush1.bf16.msra.mxu1 %v18350_v0  ;;  %v12165_v11 = vld [vmem:[%s19514_s14 + $0xe00] sm:$0xff] }
 0x789   : > { %14944 = vmatprep.mubr.bf16.mxu0 %v21555_v28  ;;  %15108 = vmatprep.mubr.bf16.mxu1 %v21555_v28  ;;  %v12169_v0 = vld [vmem:[%s19514_s14 + $0xe20] sm:$0xff] }
 0x78a   : > { %14914 = vmatprep.subr.bf16.mxu0 %v18357_v46  ;;  %15078 = vmatprep.subr.bf16.mxu1 %v18359_v47  ;;  %v18413_v46 = vcombine.high %v12165_v11, %v12169_v0  ;;  %v18415_v47 = vcombine.high %v12166_v34, %v12170_v37 }
 0x78c   : > { %14915 = vmatpush1.bf16.msra.mxu0 %v18356_v53  ;;  %15079 = vmatpush1.bf16.msra.mxu1 %v18358_v55  ;;  %v12178_v53 = vld [vmem:[%s19514_s14 + $0xe68] sm:$0xff]  ;;  %v18412_v55 = vcombine.low %v12165_v11, %v12169_v0  ;;  %v12221_v0 = vld [vmem:[%s19514_s14 + $0xfc0] sm:$0xff] }
 0x78d   : > { %14916 = vmatprep.subr.bf16.mxu0 %v18365_v56  ;;  %15080 = vmatprep.subr.bf16.mxu1 %v18367_v61  ;;  %v18414_v56 = vcombine.low %v12166_v34, %v12170_v37  ;;  %v18421_v61 = vcombine.high %v12173_v35, %v12177_v51  ;;  %v18423_v62 = vcombine.high %v12174_v3, %v12178_v53  ;;  %v12225_v34 = vld [vmem:[%s19514_s14 + $0xfe0] sm:$0xff]  ;;  %v12222_v37 = vld [vmem:[%s19514_s14 + $0xfc8] sm:$0xff] }
 0x790   : > { %14917 = vmatpush1.bf16.msra.mxu0 %v18364_v4  ;;  %15081 = vmatpush1.bf16.msra.mxu1 %v18366_v38  ;;  %v12186_v4 = vld [vmem:[%s19514_s14 + $0xea8] sm:$0xff]  ;;  %v18420_v38 = vcombine.low %v12173_v35, %v12177_v51  ;;  %v11719_v51 = vld [vmem:[%s19514_s14 + $0x10] sm:$0xff] }
 0x791   : > { %14918 = vmatprep.subr.bf16.mxu0 %v18373_v58  ;;  %15082 = vmatprep.subr.bf16.mxu1 %v18375_v59  ;;  %v18422_v58 = vcombine.low %v12174_v3, %v12178_v53  ;;  %v18429_v59 = vcombine.high %v12181_v63, %v12185_v9  ;;  %v18431_v5 = vcombine.high %v12182_v16, %v12186_v4  ;;  %v11723_v3 = vld [vmem:[%s19514_s14 + $0x30] sm:$0xff]  ;;  %v11720_v53 = vld [vmem:[%s19514_s14 + $0x18] sm:$0xff] }
 0x794   : > { %14919 = vmatpush1.bf16.msra.mxu0 %v18372_v44  ;;  %15083 = vmatpush1.bf16.msra.mxu1 %v18374_v39  ;;  %v12194_v44 = vld [vmem:[%s19514_s14 + $0xee8] sm:$0xff]  ;;  %v18428_v39 = vcombine.low %v12181_v63, %v12185_v9  ;;  %v11727_v9 = vld [vmem:[%s19514_s14 + $0x50] sm:$0xff] }
 0x795   : > { %14920 = vmatprep.subr.bf16.mxu0 %v18381_v20  ;;  %15084 = vmatprep.subr.bf16.mxu1 %v18383_v7  ;;  %v18430_v20 = vcombine.low %v12182_v16, %v12186_v4  ;;  %v18437_v7 = vcombine.high %v12189_v52, %v12193_v2  ;;  %v18439_v10 = vcombine.high %v12190_v24, %v12194_v44  ;;  %v11731_v16 = vld [vmem:[%s19514_s14 + $0x70] sm:$0xff]  ;;  %v11728_v4 = vld [vmem:[%s19514_s14 + $0x58] sm:$0xff] }
 0x798   : > { %14921 = vmatpush1.bf16.msra.mxu0 %v18380_v54  ;;  %15085 = vmatpush1.bf16.msra.mxu1 %v18382_v6  ;;  %v12202_v54 = vld [vmem:[%s19514_s14 + $0xf28] sm:$0xff]  ;;  %v18436_v6 = vcombine.low %v12189_v52, %v12193_v2  ;;  %v17977_v52 = vcombine.high %v11727_v9, %v11731_v16 }
 0x799   : > { %14922 = vmatprep.subr.bf16.mxu0 %v18389_v14  ;;  %15086 = vmatprep.subr.bf16.mxu1 %v18391_v36  ;;  %v18438_v14 = vcombine.low %v12190_v24, %v12194_v44  ;;  %v18445_v36 = vcombine.high %v12197_v12, %v12201_v29  ;;  %v18447_v15 = vcombine.high %v12198_v13, %v12202_v54  ;;  %v11735_v24 = vld [vmem:[%s19514_s14 + $0x90] sm:$0xff] }
 0x79a   : > { %v11739_v44 = vld [vmem:[%s19514_s14 + $0xb0] sm:$0xff] }
 0x79c   : > { %14923 = vmatpush1.bf16.msra.mxu0 %v18388_v33  ;;  %15087 = vmatpush1.bf16.msra.mxu1 %v18390_v49  ;;  %v12210_v33 = vld [vmem:[%s19514_s14 + $0xf68] sm:$0xff]  ;;  %v18444_v49 = vcombine.low %v12197_v12, %v12201_v29  ;;  %v11743_v29 = vld [vmem:[%s19514_s14 + $0xd0] sm:$0xff] }
 0x79d   : > { %14924 = vmatprep.subr.bf16.mxu0 %v18397_v21  ;;  %15088 = vmatprep.subr.bf16.mxu1 %v18399_v22  ;;  %v18446_v21 = vcombine.low %v12198_v13, %v12202_v54  ;;  %v18453_v22 = vcombine.high %v12205_v18, %v12209_v17  ;;  %v18455_v57 = vcombine.high %v12206_v60, %v12210_v33  ;;  %v11747_v13 = vld [vmem:[%s19514_s14 + $0xf0] sm:$0xff]  ;;  %v11744_v54 = vld [vmem:[%s19514_s14 + $0xd8] sm:$0xff] }
 0x7a0   : > { %14925 = vmatpush1.bf16.msra.mxu0 %v18396_v26  ;;  %15089 = vmatpush1.bf16.msra.mxu1 %v18398_v27  ;;  %v12218_v26 = vld [vmem:[%s19514_s14 + $0xfa8] sm:$0xff]  ;;  %v18452_v27 = vcombine.low %v12205_v18, %v12209_v17  ;;  %v11751_v18 = vld [vmem:[%s19514_s14 + $0x110] sm:$0xff] }
 0x7a1   : > { %14926 = vmatprep.subr.bf16.mxu0 %v18405_v31  ;;  %15090 = vmatprep.subr.bf16.mxu1 %v18407_v32  ;;  %v18454_v31 = vcombine.low %v12206_v60, %v12210_v33  ;;  %v18461_v32 = vcombine.high %v12213_v8, %v12217_v23  ;;  %v18463_v11 = vcombine.high %v12214_v25, %v12218_v26  ;;  %v11755_v17 = vld [vmem:[%s19514_s14 + $0x130] sm:$0xff]  ;;  %v11752_v60 = vld [vmem:[%s19514_s14 + $0x118] sm:$0xff] }
 0x7a2   : > { %v11756_v33 = vld [vmem:[%s19514_s14 + $0x138] sm:$0xff] }
 0x7a4   : > { %14927 = vmatpush1.bf16.msra.mxu0 %v18404_v40  ;;  %15091 = vmatpush1.bf16.msra.mxu1 %v18406_v41  ;;  %v12226_v40 = vld [vmem:[%s19514_s14 + $0xfe8] sm:$0xff]  ;;  %v18460_v41 = vcombine.low %v12213_v8, %v12217_v23  ;;  %v11759_v8 = vld [vmem:[%s19514_s14 + $0x150] sm:$0xff] }
 0x7a5   : > { %14928 = vmatprep.subr.bf16.mxu0 %v18413_v46  ;;  %15092 = vmatprep.subr.bf16.mxu1 %v18415_v47  ;;  %v18462_v46 = vcombine.low %v12214_v25, %v12218_v26  ;;  %v18469_v47 = vcombine.high %v12221_v0, %v12225_v34  ;;  %v18471_v35 = vcombine.high %v12222_v37, %v12226_v40  ;;  %v11763_v23 = vld [vmem:[%s19514_s14 + $0x170] sm:$0xff]  ;;  %v11760_v25 = vld [vmem:[%s19514_s14 + $0x158] sm:$0xff] }
 0x7a6   : > { %v11764_v26 = vld [vmem:[%s19514_s14 + $0x178] sm:$0xff] }
 0x7a8   : > { %14929 = vmatpush1.bf16.msra.mxu0 %v18412_v55  ;;  %15093 = vmatpush1.bf16.msra.mxu1 %v18414_v56  ;;  %v11724_v55 = vld [vmem:[%s19514_s14 + $0x38] sm:$0xff]  ;;  %v18468_v56 = vcombine.low %v12221_v0, %v12225_v34  ;;  %v11767_v0 = vld [vmem:[%s19514_s14 + $0x190] sm:$0xff] }
 0x7a9   : > { %14930 = vmatprep.subr.bf16.mxu0 %v18421_v61  ;;  %15094 = vmatprep.subr.bf16.mxu1 %v18423_v62  ;;  %v18470_v61 = vcombine.low %v12222_v37, %v12226_v40  ;;  %v17969_v62 = vcombine.high %v11719_v51, %v11723_v3  ;;  %v17971_v63 = vcombine.high %v11720_v53, %v11724_v55  ;;  %v11771_v34 = vld [vmem:[%s19514_s14 + $0x1b0] sm:$0xff]  ;;  %v11768_v37 = vld [vmem:[%s19514_s14 + $0x198] sm:$0xff] }
 0x7aa   : > { %v11772_v40 = vld [vmem:[%s19514_s14 + $0x1b8] sm:$0xff] }
 0x7ac   : > { %14931 = vmatpush1.bf16.msra.mxu0 %v18420_v38  ;;  %15095 = vmatpush1.bf16.msra.mxu1 %v18422_v58  ;;  %v11732_v38 = vld [vmem:[%s19514_s14 + $0x78] sm:$0xff]  ;;  %v17968_v58 = vcombine.low %v11719_v51, %v11723_v3  ;;  %v11775_v51 = vld [vmem:[%s19514_s14 + $0x1d0] sm:$0xff] }
 0x7ad   : > { %14932 = vmatprep.subr.bf16.mxu0 %v18429_v59  ;;  %15096 = vmatprep.subr.bf16.mxu1 %v18431_v5  ;;  %v21623_v59 = vpack.c.bf16 %v21540_v42, %v21540_v42  ;;  %v17970_v5 = vcombine.low %v11720_v53, %v11724_v55  ;;  %v17979_v2 = vcombine.high %v11728_v4, %v11732_v38  ;;  %v11779_v3 = vld [vmem:[%s19514_s14 + $0x1f0] sm:$0xff]  ;;  %v11776_v53 = vld [vmem:[%s19514_s14 + $0x1d8] sm:$0xff] }
 0x7ae   : > { %v17976_v42 = vcombine.low %v11727_v9, %v11731_v16  ;;  %v11780_v55 = vld [vmem:[%s19514_s14 + $0x1f8] sm:$0xff]  ;;  %v11783_v9 = vld [vmem:[%s19514_s14 + $0x210] sm:$0xff] }
 0x7af   : > { %v11787_v16 = vld [vmem:[%s19514_s14 + $0x230] sm:$0xff] }
 0x7b0   : > { %14933 = vmatpush1.bf16.msra.mxu0 %v18428_v39  ;;  %15097 = vmatpush1.bf16.msra.mxu1 %v18430_v20  ;;  %v11736_v39 = vld [vmem:[%s19514_s14 + $0x98] sm:$0xff] }
 0x7b1   : > { %14934 = vmatprep.subr.bf16.mxu0 %v18437_v7  ;;  %15098 = vmatprep.subr.bf16.mxu1 %v18439_v10  ;;  %v11740_v20 = vld [vmem:[%s19514_s14 + $0xb8] sm:$0xff]  ;;  %v17978_v7 = vcombine.low %v11728_v4, %v11732_v38  ;;  %v17985_v10 = vcombine.high %v11735_v24, %v11739_v44 }
 0x7b2   : > { %v17987_v12 = vcombine.high %v11736_v39, %v11740_v20  ;;  %v11784_v4 = vld [vmem:[%s19514_s14 + $0x218] sm:$0xff] }
 0x7b3   : > { %v11788_v38 = vld [vmem:[%s19514_s14 + $0x238] sm:$0xff] }
 0x7b4   : > { %14935 = vmatpush1.bf16.msra.mxu0 %v18436_v6  ;;  %15099 = vmatpush1.bf16.msra.mxu1 %v18438_v14  ;;  %v11748_v6 = vld [vmem:[%s19514_s14 + $0xf8] sm:$0xff]  ;;  %v17984_v14 = vcombine.low %v11735_v24, %v11739_v44  ;;  %v11791_v24 = vld [vmem:[%s19514_s14 + $0x250] sm:$0xff] }
 0x7b5   : > { %14936 = vmatprep.subr.bf16.mxu0 %v18445_v36  ;;  %15100 = vmatprep.subr.bf16.mxu1 %v18447_v15  ;;  %v17986_v36 = vcombine.low %v11736_v39, %v11740_v20  ;;  %v17995_v15 = vcombine.high %v11744_v54, %v11748_v6  ;;  %v11795_v44 = vld [vmem:[%s19514_s14 + $0x270] sm:$0xff]  ;;  %v11792_v39 = vld [vmem:[%s19514_s14 + $0x258] sm:$0xff] }
 0x7b6   : > { %v11796_v20 = vld [vmem:[%s19514_s14 + $0x278] sm:$0xff] }
 0x7b8   : > { %14937 = vmatpush1.bf16.msra.mxu0 %v18444_v49  ;;  %15101 = vmatpush1.bf16.msra.mxu1 %v18446_v21  ;;  %v17992_v49 = vcombine.low %v11743_v29, %v11747_v13  ;;  %v17994_v21 = vcombine.low %v11744_v54, %v11748_v6  ;;  %v11800_v54 = vld [vmem:[%s19514_s14 + $0x298] sm:$0xff] }
 0x7b9   : > { %14938 = vmatprep.subr.bf16.mxu0 %v18453_v22  ;;  %15102 = vmatprep.subr.bf16.mxu1 %v18455_v57  ;;  %v18001_v22 = vcombine.high %v11751_v18, %v11755_v17  ;;  %v18003_v57 = vcombine.high %v11752_v60, %v11756_v33  ;;  %v11804_v6 = vld [vmem:[%s19514_s14 + $0x2b8] sm:$0xff] }
 0x7bc   : > { %14939 = vmatpush1.bf16.msra.mxu0 %v18452_v27  ;;  %15103 = vmatpush1.bf16.msra.mxu1 %v18454_v31  ;;  %v18000_v27 = vcombine.low %v11751_v18, %v11755_v17  ;;  %v18002_v31 = vcombine.low %v11752_v60, %v11756_v33  ;;  %v11807_v18 = vld [vmem:[%s19514_s14 + $0x2d0] sm:$0xff]  ;;  %v11808_v60 = vld [vmem:[%s19514_s14 + $0x2d8] sm:$0xff] }
 0x7bd   : > { %14940 = vmatprep.subr.bf16.mxu0 %v18461_v32  ;;  %15104 = vmatprep.subr.bf16.mxu1 %v18463_v11  ;;  %v18009_v32 = vcombine.high %v11759_v8, %v11763_v23  ;;  %v18011_v11 = vcombine.high %v11760_v25, %v11764_v26  ;;  %v11811_v17 = vld [vmem:[%s19514_s14 + $0x2f0] sm:$0xff]  ;;  %v11812_v33 = vld [vmem:[%s19514_s14 + $0x2f8] sm:$0xff] }
 0x7c0   : > { %14941 = vmatpush1.bf16.msra.mxu0 %v18460_v41  ;;  %15105 = vmatpush1.bf16.msra.mxu1 %v18462_v46  ;;  %v18008_v41 = vcombine.low %v11759_v8, %v11763_v23  ;;  %v18010_v46 = vcombine.low %v11760_v25, %v11764_v26  ;;  %v11815_v8 = vld [vmem:[%s19514_s14 + $0x310] sm:$0xff]  ;;  %v11816_v25 = vld [vmem:[%s19514_s14 + $0x318] sm:$0xff] }
 0x7c1   : > { %14942 = vmatprep.subr.bf16.mxu0 %v18469_v47  ;;  %15106 = vmatprep.subr.bf16.mxu1 %v18471_v35  ;;  %v18017_v47 = vcombine.high %v11767_v0, %v11771_v34  ;;  %v18019_v35 = vcombine.high %v11768_v37, %v11772_v40  ;;  %v11819_v23 = vld [vmem:[%s19514_s14 + $0x330] sm:$0xff]  ;;  %v11820_v26 = vld [vmem:[%s19514_s14 + $0x338] sm:$0xff] }
 0x7c4   : > { %14943 = vmatpush1.bf16.msra.mxu0 %v18468_v56  ;;  %15107 = vmatpush1.bf16.msra.mxu1 %v18470_v61  ;;  %v18016_v56 = vcombine.low %v11767_v0, %v11771_v34  ;;  %v18018_v61 = vcombine.low %v11768_v37, %v11772_v40  ;;  %v11823_v0 = vld [vmem:[%s19514_s14 + $0x350] sm:$0xff]  ;;  %v11824_v37 = vld [vmem:[%s19514_s14 + $0x358] sm:$0xff] }
 0x7c5   : > { %15117 = vmatprep.subr.bf16.mxu0 %v17969_v62  ;;  %15281 = vmatprep.subr.bf16.mxu1 %v17971_v63  ;;  %v18025_v62 = vcombine.high %v11775_v51, %v11779_v3  ;;  %v18027_v63 = vcombine.high %v11776_v53, %v11780_v55  ;;  %v11827_v34 = vld [vmem:[%s19514_s14 + $0x370] sm:$0xff]  ;;  %v11828_v40 = vld [vmem:[%s19514_s14 + $0x378] sm:$0xff] }
 0x7c7   : > { %14945 = vmatmul.mubr.bf16.vlgmr.msra.gmra.mrb[8].mxu0 %v21623_v59  ;;  %15109 = vmatmul.mubr.bf16.vlgmr.msra.gmra.mrb[8].mxu1 %v21623_v59 }
 0x7c8   : > { %15118 = vmatpush1.bf16.msra.mxu0 %v17968_v58  ;;  %15149 = vmatprep.mubr.bf16.mxu0 %v21329_v30  ;;  %v18024_v58 = vcombine.low %v11775_v51, %v11779_v3  ;;  %v11831_v51 = vld [vmem:[%s19514_s14 + $0x390] sm:$0xff] }
 0x7c9   : > { %15282 = vmatpush1.bf16.msra.mxu1 %v17970_v5  ;;  %15313 = vmatprep.mubr.bf16.mxu1 %v21329_v30  ;;  %v17993_v30 = vcombine.high %v11743_v29, %v11747_v13  ;;  %v18026_v5 = vcombine.low %v11776_v53, %v11780_v55  ;;  %v11799_v29 = vld [vmem:[%s19514_s14 + $0x290] sm:$0xff]  ;;  %v11832_v53 = vld [vmem:[%s19514_s14 + $0x398] sm:$0xff] }
 0x7ca   : > { %15119 = vmatprep.subr.bf16.mxu0 %v17977_v52  ;;  %15283 = vmatprep.subr.bf16.mxu1 %v17979_v2  ;;  %v18033_v52 = vcombine.high %v11783_v9, %v11787_v16  ;;  %v18035_v2 = vcombine.high %v11784_v4, %v11788_v38  ;;  %v11803_v13 = vld [vmem:[%s19514_s14 + $0x2b0] sm:$0xff]  ;;  %v11836_v55 = vld [vmem:[%s19514_s14 + $0x3b8] sm:$0xff] }
 0x7cb   : > { %v11835_v3 = vld [vmem:[%s19514_s14 + $0x3b0] sm:$0xff] }
 0x7cc   : > { %15120 = vmatpush1.bf16.msra.mxu0 %v17976_v42  ;;  %v18032_v42 = vcombine.low %v11783_v9, %v11787_v16  ;;  %v11839_v9 = vld [vmem:[%s19514_s14 + $0x3d0] sm:$0xff] }
 0x7cd   : > { %15284 = vmatpush1.bf16.msra.mxu1 %v17978_v7  ;;  %15121 = vmatprep.subr.bf16.mxu0 %v17985_v10  ;;  %v18034_v7 = vcombine.low %v11784_v4, %v11788_v38  ;;  %v18041_v10 = vcombine.high %v11791_v24, %v11795_v44  ;;  %v11843_v16 = vld [vmem:[%s19514_s14 + $0x3f0] sm:$0xff]  ;;  %v11840_v4 = vld [vmem:[%s19514_s14 + $0x3d8] sm:$0xff] }
 0x7ce   : > { %15285 = vmatprep.subr.bf16.mxu1 %v17987_v12  ;;  %v18043_v12 = vcombine.high %v11792_v39, %v11796_v20  ;;  %v11844_v38 = vld [vmem:[%s19514_s14 + $0x3f8] sm:$0xff] }
 0x7d0   : > { %15122 = vmatpush1.bf16.msra.mxu0 %v17984_v14  ;;  %v18040_v14 = vcombine.low %v11791_v24, %v11795_v44  ;;  %v11847_v24 = vld [vmem:[%s19514_s14 + $0x410] sm:$0xff] }
 0x7d1   : > { %15286 = vmatpush1.bf16.msra.mxu1 %v17986_v36  ;;  %15123 = vmatprep.subr.bf16.mxu0 %v17993_v30  ;;  %v18042_v36 = vcombine.low %v11792_v39, %v11796_v20  ;;  %v18049_v30 = vcombine.high %v11799_v29, %v11803_v13  ;;  %v11851_v44 = vld [vmem:[%s19514_s14 + $0x430] sm:$0xff]  ;;  %v11848_v39 = vld [vmem:[%s19514_s14 + $0x418] sm:$0xff] }
 0x7d2   : > { %15287 = vmatprep.subr.bf16.mxu1 %v17995_v15  ;;  %v18051_v15 = vcombine.high %v11800_v54, %v11804_v6  ;;  %v11852_v20 = vld [vmem:[%s19514_s14 + $0x438] sm:$0xff] }
 0x7d4   : > { %15124 = vmatpush1.bf16.msra.mxu0 %v17992_v49  ;;  %v18048_v49 = vcombine.low %v11799_v29, %v11803_v13  ;;  %v11855_v29 = vld [vmem:[%s19514_s14 + $0x450] sm:$0xff] }
 0x7d5   : > { %15288 = vmatpush1.bf16.msra.mxu1 %v17994_v21  ;;  %15125 = vmatprep.subr.bf16.mxu0 %v18001_v22  ;;  %v18050_v21 = vcombine.low %v11800_v54, %v11804_v6  ;;  %v18057_v22 = vcombine.high %v11807_v18, %v11811_v17  ;;  %v11859_v13 = vld [vmem:[%s19514_s14 + $0x470] sm:$0xff]  ;;  %v18096_v54 = vcombine.low %v11847_v24, %v11851_v44  ;;  %v11856_v6 = vld [vmem:[%s19514_s14 + $0x458] sm:$0xff] }
 0x7d6   : > { %15289 = vmatprep.subr.bf16.mxu1 %v18003_v57  ;;  %v18059_v57 = vcombine.high %v11808_v60, %v11812_v33 }
 0x7d8   : > { %15126 = vmatpush1.bf16.msra.mxu0 %v18000_v27  ;;  %v18056_v27 = vcombine.low %v11807_v18, %v11811_v17  ;;  %v11867_v18 = vld [vmem:[%s19514_s14 + $0x4b0] sm:$0xff] }
 0x7d9   : > { %15290 = vmatpush1.bf16.msra.mxu1 %v18002_v31  ;;  %15127 = vmatprep.subr.bf16.mxu0 %v18009_v32  ;;  %v18058_v31 = vcombine.low %v11808_v60, %v11812_v33  ;;  %v18065_v32 = vcombine.high %v11815_v8, %v11819_v23  ;;  %v11864_v60 = vld [vmem:[%s19514_s14 + $0x498] sm:$0xff] }
 0x7da   : > { %15291 = vmatprep.subr.bf16.mxu1 %v18011_v11  ;;  %v18067_v11 = vcombine.high %v11816_v25, %v11820_v26  ;;  %v11868_v33 = vld [vmem:[%s19514_s14 + $0x4b8] sm:$0xff] }
 0x7dc   : > { %15128 = vmatpush1.bf16.msra.mxu0 %v18008_v41  ;;  %v18064_v41 = vcombine.low %v11815_v8, %v11819_v23  ;;  %v11871_v8 = vld [vmem:[%s19514_s14 + $0x4d0] sm:$0xff] }
 0x7dd   : > { %15292 = vmatpush1.bf16.msra.mxu1 %v18010_v46  ;;  %15129 = vmatprep.subr.bf16.mxu0 %v18017_v47  ;;  %v18066_v46 = vcombine.low %v11816_v25, %v11820_v26  ;;  %v18073_v47 = vcombine.high %v11823_v0, %v11827_v34  ;;  %v11875_v23 = vld [vmem:[%s19514_s14 + $0x4f0] sm:$0xff]  ;;  %v11872_v25 = vld [vmem:[%s19514_s14 + $0x4d8] sm:$0xff] }
 0x7de   : > { %15293 = vmatprep.subr.bf16.mxu1 %v18019_v35  ;;  %v18075_v35 = vcombine.high %v11824_v37, %v11828_v40 }
 0x7e0   : > { %15130 = vmatpush1.bf16.msra.mxu0 %v18016_v56  ;;  %v18072_v56 = vcombine.low %v11823_v0, %v11827_v34  ;;  %v11880_v0 = vld [vmem:[%s19514_s14 + $0x518] sm:$0xff] }
 0x7e1   : > { %15294 = vmatpush1.bf16.msra.mxu1 %v18018_v61  ;;  %15131 = vmatprep.subr.bf16.mxu0 %v18025_v62  ;;  %v18074_v61 = vcombine.low %v11824_v37, %v11828_v40  ;;  %v18081_v62 = vcombine.high %v11831_v51, %v11835_v3  ;;  %v11884_v34 = vld [vmem:[%s19514_s14 + $0x538] sm:$0xff]  ;;  %v18120_v37 = vcombine.low %v11871_v8, %v11875_v23 }
 0x7e2   : > { %15295 = vmatprep.subr.bf16.mxu1 %v18027_v63  ;;  %v18083_v63 = vcombine.high %v11832_v53, %v11836_v55 }
 0x7e4   : > { %15132 = vmatpush1.bf16.msra.mxu0 %v18024_v58  ;;  %v18080_v58 = vcombine.low %v11831_v51, %v11835_v3  ;;  %v11888_v51 = vld [vmem:[%s19514_s14 + $0x558] sm:$0xff] }
 0x7e5   : > { %15296 = vmatpush1.bf16.msra.mxu1 %v18026_v5  ;;  %15133 = vmatprep.subr.bf16.mxu0 %v18033_v52  ;;  %v18082_v5 = vcombine.low %v11832_v53, %v11836_v55  ;;  %v18089_v52 = vcombine.high %v11839_v9, %v11843_v16  ;;  %v11892_v3 = vld [vmem:[%s19514_s14 + $0x578] sm:$0xff]  ;;  %v18130_v55 = vcombine.low %v11880_v0, %v11884_v34 }
 0x7e6   : > { %15297 = vmatprep.subr.bf16.mxu1 %v18035_v2  ;;  %v18091_v2 = vcombine.high %v11840_v4, %v11844_v38 }
 0x7e8   : > { %15134 = vmatpush1.bf16.msra.mxu0 %v18032_v42  ;;  %v18088_v42 = vcombine.low %v11839_v9, %v11843_v16  ;;  %v11896_v9 = vld [vmem:[%s19514_s14 + $0x598] sm:$0xff] }
 0x7e9   : > { %15298 = vmatpush1.bf16.msra.mxu1 %v18034_v7  ;;  %15135 = vmatprep.subr.bf16.mxu0 %v18041_v10  ;;  %v18090_v7 = vcombine.low %v11840_v4, %v11844_v38  ;;  %v18097_v10 = vcombine.high %v11847_v24, %v11851_v44  ;;  %v11900_v16 = vld [vmem:[%s19514_s14 + $0x5b8] sm:$0xff]  ;;  %v18138_v38 = vcombine.low %v11888_v51, %v11892_v3 }
 0x7ea   : > { %15299 = vmatprep.subr.bf16.mxu1 %v18043_v12  ;;  %v18099_v12 = vcombine.high %v11848_v39, %v11852_v20  ;;  %v11904_v24 = vld [vmem:[%s19514_s14 + $0x5d8] sm:$0xff] }
 0x7eb   : > { %v11908_v44 = vld [vmem:[%s19514_s14 + $0x5f8] sm:$0xff] }
 0x7ec   : > { %15136 = vmatpush1.bf16.msra.mxu0 %v18040_v14  ;;  %v11860_v14 = vld [vmem:[%s19514_s14 + $0x478] sm:$0xff] }
 0x7ed   : > { %15300 = vmatpush1.bf16.msra.mxu1 %v18042_v36  ;;  %15137 = vmatprep.subr.bf16.mxu0 %v18049_v30  ;;  %v18098_v36 = vcombine.low %v11848_v39, %v11852_v20  ;;  %v18105_v30 = vcombine.high %v11855_v29, %v11859_v13  ;;  %v18107_v17 = vcombine.high %v11856_v6, %v11860_v14 }
 0x7ee   : > { %15301 = vmatprep.subr.bf16.mxu1 %v18051_v15  ;;  %v11863_v15 = vld [vmem:[%s19514_s14 + $0x490] sm:$0xff]  ;;  %v18146_v20 = vcombine.low %v11896_v9, %v11900_v16 }
 0x7ef   : > { %v18112_v26 = vcombine.low %v11863_v15, %v11867_v18 }
 0x7f0   : > { %15138 = vmatpush1.bf16.msra.mxu0 %v18048_v49  ;;  %v18104_v49 = vcombine.low %v11855_v29, %v11859_v13  ;;  %v11912_v29 = vld [vmem:[%s19514_s14 + $0x618] sm:$0xff] }
 0x7f1   : > { %15302 = vmatpush1.bf16.msra.mxu1 %v18050_v21  ;;  %15139 = vmatprep.subr.bf16.mxu0 %v18057_v22  ;;  %v18106_v21 = vcombine.low %v11856_v6, %v11860_v14  ;;  %v18113_v22 = vcombine.high %v11863_v15, %v11867_v18  ;;  %v11916_v13 = vld [vmem:[%s19514_s14 + $0x638] sm:$0xff]  ;;  %v18154_v6 = vcombine.low %v11904_v24, %v11908_v44  ;;  %v11923_v15 = vld [vmem:[%s19514_s14 + $0x670] sm:$0xff] }
 0x7f2   : > { %15303 = vmatprep.subr.bf16.mxu1 %v18059_v57  ;;  %v18115_v57 = vcombine.high %v11864_v60, %v11868_v33  ;;  %v11920_v18 = vld [vmem:[%s19514_s14 + $0x658] sm:$0xff] }
 0x7f4   : > { %15140 = vmatpush1.bf16.msra.mxu0 %v18056_v27  ;;  %v18114_v27 = vcombine.low %v11864_v60, %v11868_v33  ;;  %v18162_v33 = vcombine.low %v11912_v29, %v11916_v13 }
 0x7f5   : > { %15304 = vmatpush1.bf16.msra.mxu1 %v18058_v31  ;;  %15141 = vmatprep.subr.bf16.mxu0 %v18065_v32  ;;  %v18121_v31 = vcombine.high %v11871_v8, %v11875_v23  ;;  %v11879_v32 = vld [vmem:[%s19514_s14 + $0x510] sm:$0xff]  ;;  %v11928_v8 = vld [vmem:[%s19514_s14 + $0x698] sm:$0xff] }
 0x7f6   : > { %15305 = vmatprep.subr.bf16.mxu1 %v18067_v11  ;;  %v11883_v11 = vld [vmem:[%s19514_s14 + $0x530] sm:$0xff]  ;;  %v11932_v23 = vld [vmem:[%s19514_s14 + $0x6b8] sm:$0xff] }
 0x7f7   : > { %v18128_v53 = vcombine.low %v11879_v32, %v11883_v11 }
 0x7f8   : > { %15142 = vmatpush1.bf16.msra.mxu0 %v18064_v41  ;;  %v18129_v41 = vcombine.high %v11879_v32, %v11883_v11  ;;  %v11936_v32 = vld [vmem:[%s19514_s14 + $0x6d8] sm:$0xff] }
 0x7f9   : > { %15306 = vmatpush1.bf16.msra.mxu1 %v18066_v46  ;;  %15143 = vmatprep.subr.bf16.mxu0 %v18073_v47  ;;  %v18131_v46 = vcombine.high %v11880_v0, %v11884_v34  ;;  %v11887_v47 = vld [vmem:[%s19514_s14 + $0x550] sm:$0xff]  ;;  %v11940_v11 = vld [vmem:[%s19514_s14 + $0x6f8] sm:$0xff]  ;;  %v18178_v34 = vcombine.low %v11928_v8, %v11932_v23 }
 0x7fa   : > { %15307 = vmatprep.subr.bf16.mxu1 %v18075_v35  ;;  %v11891_v35 = vld [vmem:[%s19514_s14 + $0x570] sm:$0xff] }
 0x7fb   : > { %v18136_v4 = vcombine.low %v11887_v47, %v11891_v35 }
 0x7fc   : > { %15144 = vmatpush1.bf16.msra.mxu0 %v18072_v56  ;;  %v18137_v56 = vcombine.high %v11887_v47, %v11891_v35  ;;  %v11944_v47 = vld [vmem:[%s19514_s14 + $0x718] sm:$0xff] }
 0x7fd   : > { %15308 = vmatpush1.bf16.msra.mxu1 %v18074_v61  ;;  %15145 = vmatprep.subr.bf16.mxu0 %v18081_v62  ;;  %v18139_v61 = vcombine.high %v11888_v51, %v11892_v3  ;;  %v11895_v62 = vld [vmem:[%s19514_s14 + $0x590] sm:$0xff]  ;;  %v11948_v35 = vld [vmem:[%s19514_s14 + $0x738] sm:$0xff]  ;;  %v18186_v3 = vcombine.low %v11936_v32, %v11940_v11 }
 0x7fe   : > { %15309 = vmatprep.subr.bf16.mxu1 %v18083_v63  ;;  %v11899_v63 = vld [vmem:[%s19514_s14 + $0x5b0] sm:$0xff] }
 0x7ff   : > { %v18144_v39 = vcombine.low %v11895_v62, %v11899_v63 }
 0x800   : > { %15146 = vmatpush1.bf16.msra.mxu0 %v18080_v58  ;;  %v18145_v58 = vcombine.high %v11895_v62, %v11899_v63  ;;  %v11952_v62 = vld [vmem:[%s19514_s14 + $0x758] sm:$0xff] }
 0x801   : > { %15310 = vmatpush1.bf16.msra.mxu1 %v18082_v5  ;;  %15147 = vmatprep.subr.bf16.mxu0 %v18089_v52  ;;  %v18147_v5 = vcombine.high %v11896_v9, %v11900_v16  ;;  %v11903_v52 = vld [vmem:[%s19514_s14 + $0x5d0] sm:$0xff]  ;;  %v11956_v63 = vld [vmem:[%s19514_s14 + $0x778] sm:$0xff]  ;;  %v18194_v16 = vcombine.low %v11944_v47, %v11948_v35 }
 0x802   : > { %15311 = vmatprep.subr.bf16.mxu1 %v18091_v2  ;;  %v11907_v2 = vld [vmem:[%s19514_s14 + $0x5f0] sm:$0xff] }
 0x804   : > { %15148 = vmatpush1.bf16.msra.mxu0 %v18088_v42  ;;  %v18153_v42 = vcombine.high %v11903_v52, %v11907_v2 }
 0x805   : > { %15312 = vmatpush1.bf16.msra.mxu1 %v18090_v7  ;;  %15158 = vmatprep.subr.bf16.mxu0 %v18097_v10  ;;  %v18155_v7 = vcombine.high %v11904_v24, %v11908_v44  ;;  %v11911_v10 = vld [vmem:[%s19514_s14 + $0x610] sm:$0xff]  ;;  %v18202_v44 = vcombine.low %v11952_v62, %v11956_v63 }
 0x806   : > { %15322 = vmatprep.subr.bf16.mxu1 %v18099_v12  ;;  %v11915_v12 = vld [vmem:[%s19514_s14 + $0x630] sm:$0xff] }
 0x807   : > { %15150 = vmatmul.mubr.bf16.vlgmr.msra.gmra.mrb[12].mxu0 %v21399_v43  ;;  %v18161_v14 = vcombine.high %v11911_v10, %v11915_v12  ;;  %v18160_v60 = vcombine.low %v11911_v10, %v11915_v12  ;;  %v11968_v10 = vld [vmem:[%s19514_s14 + $0x7d8] sm:$0xff] }
 0x808   : > { %15314 = vmatmul.mubr.bf16.vlgmr.msra.gmra.mrb[12].mxu1 %v21399_v43  ;;  %15159 = vmatpush1.bf16.msra.mxu0 %v18096_v54  ;;  %v11876_v43 = vld [vmem:[%s19514_s14 + $0x4f8] sm:$0xff]  ;;  %v18152_v54 = vcombine.low %v11903_v52, %v11907_v2 }
 0x809   : > { %15190 = vmatprep.mubr.bf16.mxu0 %v21405_v1  ;;  %15323 = vmatpush1.bf16.msra.mxu1 %v18098_v36  ;;  %v18122_v40 = vcombine.low %v11872_v25, %v11876_v43  ;;  %v18163_v36 = vcombine.high %v11912_v29, %v11916_v13  ;;  %v11960_v52 = vld [vmem:[%s19514_s14 + $0x798] sm:$0xff] }
 0x80a   : > { %15354 = vmatprep.mubr.bf16.mxu1 %v21405_v1  ;;  %15160 = vmatprep.subr.bf16.mxu0 %v18105_v30  ;;  %v18123_v1 = vcombine.high %v11872_v25, %v11876_v43  ;;  %v11919_v30 = vld [vmem:[%s19514_s14 + $0x650] sm:$0xff]  ;;  %v11964_v2 = vld [vmem:[%s19514_s14 + $0x7b8] sm:$0xff] }
 0x80b   : > { %15324 = vmatprep.subr.bf16.mxu1 %v18107_v17  ;;  %v11924_v17 = vld [vmem:[%s19514_s14 + $0x678] sm:$0xff]  ;;  %v18168_v25 = vcombine.low %v11919_v30, %v11923_v15  ;;  %v18210_v13 = vcombine.low %v11960_v52, %v11964_v2 }
 0x80c   : > { %15161 = vmatpush1.bf16.msra.mxu0 %v18104_v49  ;;  %v18169_v49 = vcombine.high %v11919_v30, %v11923_v15  ;;  %v18170_v43 = vcombine.low %v11920_v18, %v11924_v17  ;;  %v11972_v12 = vld [vmem:[%s19514_s14 + $0x7f8] sm:$0xff] }
 0x80d   : > { %15325 = vmatpush1.bf16.msra.mxu1 %v18106_v21  ;;  %15162 = vmatprep.subr.bf16.mxu0 %v18113_v22  ;;  %v18171_v21 = vcombine.high %v11920_v18, %v11924_v17  ;;  %v11927_v22 = vld [vmem:[%s19514_s14 + $0x690] sm:$0xff]  ;;  %v11976_v30 = vld [vmem:[%s19514_s14 + $0x818] sm:$0xff]  ;;  %v18218_v17 = vcombine.low %v11968_v10, %v11972_v12 }
 0x80e   : > { %15326 = vmatprep.subr.bf16.mxu1 %v18115_v57  ;;  %v11931_v57 = vld [vmem:[%s19514_s14 + $0x6b0] sm:$0xff]  ;;  %v11980_v15 = vld [vmem:[%s19514_s14 + $0x838] sm:$0xff] }
 0x80f   : > { %v18176_v0 = vcombine.low %v11927_v22, %v11931_v57 }
 0x810   : > { %15163 = vmatpush1.bf16.msra.mxu0 %v18112_v26  ;;  %v18177_v26 = vcombine.high %v11927_v22, %v11931_v57  ;;  %v11984_v57 = vld [vmem:[%s19514_s14 + $0x858] sm:$0xff] }
 0x811   : > { %15327 = vmatpush1.bf16.msra.mxu1 %v18114_v27  ;;  %15164 = vmatprep.subr.bf16.mxu0 %v18121_v31  ;;  %v18179_v27 = vcombine.high %v11928_v8, %v11932_v23  ;;  %v11935_v31 = vld [vmem:[%s19514_s14 + $0x6d0] sm:$0xff]  ;;  %v11988_v8 = vld [vmem:[%s19514_s14 + $0x878] sm:$0xff]  ;;  %v18226_v23 = vcombine.low %v11976_v30, %v11980_v15 }
 0x812   : > { %15328 = vmatprep.subr.bf16.mxu1 %v18123_v1  ;;  %v11939_v1 = vld [vmem:[%s19514_s14 + $0x6f0] sm:$0xff] }
 0x813   : > { %v18184_v51 = vcombine.low %v11935_v31, %v11939_v1 }
 0x814   : > { %15165 = vmatpush1.bf16.msra.mxu0 %v18120_v37  ;;  %v18185_v37 = vcombine.high %v11935_v31, %v11939_v1  ;;  %v11992_v31 = vld [vmem:[%s19514_s14 + $0x898] sm:$0xff] }
 0x815   : > { %15329 = vmatpush1.bf16.msra.mxu1 %v18122_v40  ;;  %15166 = vmatprep.subr.bf16.mxu0 %v18129_v41  ;;  %v18187_v40 = vcombine.high %v11936_v32, %v11940_v11  ;;  %v11943_v41 = vld [vmem:[%s19514_s14 + $0x710] sm:$0xff]  ;;  %v11996_v1 = vld [vmem:[%s19514_s14 + $0x8b8] sm:$0xff]  ;;  %v18234_v11 = vcombine.low %v11984_v57, %v11988_v8 }
 0x816   : > { %15330 = vmatprep.subr.bf16.mxu1 %v18131_v46  ;;  %v11947_v46 = vld [vmem:[%s19514_s14 + $0x730] sm:$0xff] }
 0x817   : > { %v18192_v9 = vcombine.low %v11943_v41, %v11947_v46 }
 0x818   : > { %15167 = vmatpush1.bf16.msra.mxu0 %v18128_v53  ;;  %v18193_v53 = vcombine.high %v11943_v41, %v11947_v46  ;;  %v12000_v41 = vld [vmem:[%s19514_s14 + $0x8d8] sm:$0xff] }
 0x819   : > { %15331 = vmatpush1.bf16.msra.mxu1 %v18130_v55  ;;  %15168 = vmatprep.subr.bf16.mxu0 %v18137_v56  ;;  %v18195_v55 = vcombine.high %v11944_v47, %v11948_v35  ;;  %v11951_v56 = vld [vmem:[%s19514_s14 + $0x750] sm:$0xff]  ;;  %v18242_v47 = vcombine.low %v11992_v31, %v11996_v1 }
 0x81a   : > { %15332 = vmatprep.subr.bf16.mxu1 %v18139_v61  ;;  %v11955_v61 = vld [vmem:[%s19514_s14 + $0x770] sm:$0xff] }
 0x81b   : > { %v18200_v24 = vcombine.low %v11951_v56, %v11955_v61 }
 0x81c   : > { %15169 = vmatpush1.bf16.msra.mxu0 %v18136_v4  ;;  %v18201_v4 = vcombine.high %v11951_v56, %v11955_v61 }
 0x81d   : > { %15333 = vmatpush1.bf16.msra.mxu1 %v18138_v38  ;;  %15170 = vmatprep.subr.bf16.mxu0 %v18145_v58  ;;  %v18203_v38 = vcombine.high %v11952_v62, %v11956_v63  ;;  %v11959_v58 = vld [vmem:[%s19514_s14 + $0x790] sm:$0xff] }
 0x81e   : > { %15334 = vmatprep.subr.bf16.mxu1 %v18147_v5  ;;  %v11963_v5 = vld [vmem:[%s19514_s14 + $0x7b0] sm:$0xff] }
 0x81f   : > { %v18208_v29 = vcombine.low %v11959_v58, %v11963_v5 }
 0x820   : > { %15171 = vmatpush1.bf16.msra.mxu0 %v18144_v39  ;;  %v18209_v39 = vcombine.high %v11959_v58, %v11963_v5 }
 0x821   : > { %15335 = vmatpush1.bf16.msra.mxu1 %v18146_v20  ;;  %15172 = vmatprep.subr.bf16.mxu0 %v18153_v42  ;;  %v18211_v20 = vcombine.high %v11960_v52, %v11964_v2  ;;  %v11967_v42 = vld [vmem:[%s19514_s14 + $0x7d0] sm:$0xff] }
 0x822   : > { %15336 = vmatprep.subr.bf16.mxu1 %v18155_v7  ;;  %v11971_v7 = vld [vmem:[%s19514_s14 + $0x7f0] sm:$0xff] }
 0x823   : > { %v18216_v18 = vcombine.low %v11967_v42, %v11971_v7 }
 0x824   : > { %15173 = vmatpush1.bf16.msra.mxu0 %v18152_v54  ;;  %v18217_v54 = vcombine.high %v11967_v42, %v11971_v7 }
 0x825   : > { %15337 = vmatpush1.bf16.msra.mxu1 %v18154_v6  ;;  %15174 = vmatprep.subr.bf16.mxu0 %v18161_v14  ;;  %v18219_v6 = vcombine.high %v11968_v10, %v11972_v12  ;;  %v11975_v14 = vld [vmem:[%s19514_s14 + $0x810] sm:$0xff] }
 0x826   : > { %15338 = vmatprep.subr.bf16.mxu1 %v18163_v36  ;;  %v11979_v36 = vld [vmem:[%s19514_s14 + $0x830] sm:$0xff] }
 0x827   : > { %v18224_v22 = vcombine.low %v11975_v14, %v11979_v36 }
 0x828   : > { %15175 = vmatpush1.bf16.msra.mxu0 %v18160_v60  ;;  %v18225_v60 = vcombine.high %v11975_v14, %v11979_v36 }
 0x829   : > { %15339 = vmatpush1.bf16.msra.mxu1 %v18162_v33  ;;  %15176 = vmatprep.subr.bf16.mxu0 %v18169_v49  ;;  %v18227_v33 = vcombine.high %v11976_v30, %v11980_v15  ;;  %v11983_v49 = vld [vmem:[%s19514_s14 + $0x850] sm:$0xff] }
 0x82a   : > { %15340 = vmatprep.subr.bf16.mxu1 %v18171_v21  ;;  %v11987_v21 = vld [vmem:[%s19514_s14 + $0x870] sm:$0xff] }
 0x82b   : > { %v18232_v32 = vcombine.low %v11983_v49, %v11987_v21 }
 0x82c   : > { %15177 = vmatpush1.bf16.msra.mxu0 %v18168_v25  ;;  %v18233_v25 = vcombine.high %v11983_v49, %v11987_v21 }
 0x82d   : > { %15341 = vmatpush1.bf16.msra.mxu1 %v18170_v43  ;;  %15178 = vmatprep.subr.bf16.mxu0 %v18177_v26  ;;  %v11991_v43 = vld [vmem:[%s19514_s14 + $0x890] sm:$0xff] }
 0x82e   : > { %15342 = vmatprep.subr.bf16.mxu1 %v18179_v27  ;;  %v11995_v26 = vld [vmem:[%s19514_s14 + $0x8b0] sm:$0xff]  ;;  %v18235_v27 = vcombine.high %v11984_v57, %v11988_v8 }
 0x82f   : > { %v18240_v46 = vcombine.low %v11991_v43, %v11995_v26  ;;  %v12047_v8 = vld [vmem:[%s19514_s14 + $0xa50] sm:$0xff] }
 0x830   : > { %15179 = vmatpush1.bf16.msra.mxu0 %v18176_v0  ;;  %v18241_v0 = vcombine.high %v11991_v43, %v11995_v26  ;;  %v12052_v43 = vld [vmem:[%s19514_s14 + $0xa78] sm:$0xff] }
 0x831   : > { %15343 = vmatpush1.bf16.msra.mxu1 %v18178_v34  ;;  %15180 = vmatprep.subr.bf16.mxu0 %v18185_v37  ;;  %v18243_v34 = vcombine.high %v11992_v31, %v11996_v1  ;;  %v11999_v37 = vld [vmem:[%s19514_s14 + $0x8d0] sm:$0xff] }
 0x832   : > { %15344 = vmatprep.subr.bf16.mxu1 %v18187_v40  ;;  %v12003_v40 = vld [vmem:[%s19514_s14 + $0x8f0] sm:$0xff] }
 0x833   : > { %v18249_v35 = vcombine.high %v11999_v37, %v12003_v40  ;;  %v18248_v56 = vcombine.low %v11999_v37, %v12003_v40 }
 0x834   : > { %15181 = vmatpush1.bf16.msra.mxu0 %v18184_v51  ;;  %v12007_v51 = vld [vmem:[%s19514_s14 + $0x910] sm:$0xff] }
 0x835   : > { %15345 = vmatpush1.bf16.msra.mxu1 %v18186_v3  ;;  %15182 = vmatprep.subr.bf16.mxu0 %v18193_v53  ;;  %v12011_v3 = vld [vmem:[%s19514_s14 + $0x930] sm:$0xff]  ;;  %v12008_v53 = vld [vmem:[%s19514_s14 + $0x918] sm:$0xff] }
 0x836   : > { %15346 = vmatprep.subr.bf16.mxu1 %v18195_v55  ;;  %v12012_v55 = vld [vmem:[%s19514_s14 + $0x938] sm:$0xff]  ;;  %v18257_v62 = vcombine.high %v12007_v51, %v12011_v3  ;;  %v18256_v58 = vcombine.low %v12007_v51, %v12011_v3 }
 0x837   : > { %v18259_v63 = vcombine.high %v12008_v53, %v12012_v55  ;;  %v18258_v5 = vcombine.low %v12008_v53, %v12012_v55 }
 0x838   : > { %15183 = vmatpush1.bf16.msra.mxu0 %v18192_v9  ;;  %v12015_v9 = vld [vmem:[%s19514_s14 + $0x950] sm:$0xff] }
 0x839   : > { %15347 = vmatpush1.bf16.msra.mxu1 %v18194_v16  ;;  %15184 = vmatprep.subr.bf16.mxu0 %v18201_v4  ;;  %v12019_v16 = vld [vmem:[%s19514_s14 + $0x970] sm:$0xff]  ;;  %v12016_v4 = vld [vmem:[%s19514_s14 + $0x958] sm:$0xff] }
 0x83a   : > { %15348 = vmatprep.subr.bf16.mxu1 %v18203_v38  ;;  %v12020_v38 = vld [vmem:[%s19514_s14 + $0x978] sm:$0xff]  ;;  %v18265_v52 = vcombine.high %v12015_v9, %v12019_v16  ;;  %v18264_v42 = vcombine.low %v12015_v9, %v12019_v16 }
 0x83b   : > { %v18267_v2 = vcombine.high %v12016_v4, %v12020_v38  ;;  %v18266_v7 = vcombine.low %v12016_v4, %v12020_v38 }
 0x83c   : > { %15185 = vmatpush1.bf16.msra.mxu0 %v18200_v24  ;;  %v12023_v24 = vld [vmem:[%s19514_s14 + $0x990] sm:$0xff] }
 0x83d   : > { %15349 = vmatpush1.bf16.msra.mxu1 %v18202_v44  ;;  %15186 = vmatprep.subr.bf16.mxu0 %v18209_v39  ;;  %v12027_v44 = vld [vmem:[%s19514_s14 + $0x9b0] sm:$0xff]  ;;  %v12024_v39 = vld [vmem:[%s19514_s14 + $0x998] sm:$0xff] }
 0x83e   : > { %15350 = vmatprep.subr.bf16.mxu1 %v18211_v20  ;;  %v12028_v20 = vld [vmem:[%s19514_s14 + $0x9b8] sm:$0xff]  ;;  %v18273_v10 = vcombine.high %v12023_v24, %v12027_v44  ;;  %v18272_v14 = vcombine.low %v12023_v24, %v12027_v44 }
 0x83f   : > { %v18275_v12 = vcombine.high %v12024_v39, %v12028_v20  ;;  %v18274_v36 = vcombine.low %v12024_v39, %v12028_v20 }
 0x840   : > { %15187 = vmatpush1.bf16.msra.mxu0 %v18208_v29  ;;  %v12031_v29 = vld [vmem:[%s19514_s14 + $0x9d0] sm:$0xff] }
 0x841   : > { %15351 = vmatpush1.bf16.msra.mxu1 %v18210_v13  ;;  %15188 = vmatprep.subr.bf16.mxu0 %v18217_v54  ;;  %v12035_v13 = vld [vmem:[%s19514_s14 + $0x9f0] sm:$0xff]  ;;  %v12032_v54 = vld [vmem:[%s19514_s14 + $0x9d8] sm:$0xff] }
 0x842   : > { %15352 = vmatprep.subr.bf16.mxu1 %v18219_v6  ;;  %v12036_v6 = vld [vmem:[%s19514_s14 + $0x9f8] sm:$0xff]  ;;  %v18281_v30 = vcombine.high %v12031_v29, %v12035_v13  ;;  %v18280_v49 = vcombine.low %v12031_v29, %v12035_v13 }
 0x843   : > { %v18283_v15 = vcombine.high %v12032_v54, %v12036_v6  ;;  %v18282_v21 = vcombine.low %v12032_v54, %v12036_v6 }
 0x844   : > { %15189 = vmatpush1.bf16.msra.mxu0 %v18216_v18  ;;  %v12039_v18 = vld [vmem:[%s19514_s14 + $0xa10] sm:$0xff] }
 0x845   : > { %15353 = vmatpush1.bf16.msra.mxu1 %v18218_v17  ;;  %15199 = vmatprep.subr.bf16.mxu0 %v18225_v60  ;;  %v12043_v17 = vld [vmem:[%s19514_s14 + $0xa30] sm:$0xff]  ;;  %v12040_v60 = vld [vmem:[%s19514_s14 + $0xa18] sm:$0xff] }
 0x846   : > { %15363 = vmatprep.subr.bf16.mxu1 %v18227_v33  ;;  %v12044_v33 = vld [vmem:[%s19514_s14 + $0xa38] sm:$0xff]  ;;  %v18288_v26 = vcombine.low %v12039_v18, %v12043_v17 }
 0x847   : > { %15191 = vmatmul.mubr.bf16.vlgmr.msra.gmra.mrb[12].mxu0 %v21475_v48  ;;  %v18291_v57 = vcombine.high %v12040_v60, %v12044_v33 }
 0x848   : > { %15355 = vmatmul.mubr.bf16.vlgmr.msra.gmra.mrb[12].mxu1 %v21475_v48  ;;  %15200 = vmatpush1.bf16.msra.mxu0 %v18224_v22  ;;  %v12004_v48 = vld [vmem:[%s19514_s14 + $0x8f8] sm:$0xff]  ;;  %v18289_v22 = vcombine.high %v12039_v18, %v12043_v17 }
 0x849   : > { %15231 = vmatprep.mubr.bf16.mxu0 %v21545_v50  ;;  %15364 = vmatpush1.bf16.msra.mxu1 %v18226_v23  ;;  %v18250_v61 = vcombine.low %v12000_v41, %v12004_v48  ;;  %v12051_v23 = vld [vmem:[%s19514_s14 + $0xa70] sm:$0xff] }
 0x84a   : > { %15395 = vmatprep.mubr.bf16.mxu1 %v21545_v50  ;;  %15201 = vmatprep.subr.bf16.mxu0 %v18233_v25  ;;  %v18251_v50 = vcombine.high %v12000_v41, %v12004_v48  ;;  %v12048_v25 = vld [vmem:[%s19514_s14 + $0xa58] sm:$0xff]  ;;  %v18297_v31 = vcombine.high %v12047_v8, %v12051_v23  ;;  %v18296_v37 = vcombine.low %v12047_v8, %v12051_v23 }
 0x84b   : > { %15365 = vmatprep.subr.bf16.mxu1 %v18235_v27  ;;  %v18290_v27 = vcombine.low %v12040_v60, %v12044_v33  ;;  %v18299_v1 = vcombine.high %v12048_v25, %v12052_v43  ;;  %v18298_v40 = vcombine.low %v12048_v25, %v12052_v43 }
 0x84c   : > { %15202 = vmatpush1.bf16.msra.mxu0 %v18232_v32  ;;  %v12055_v32 = vld [vmem:[%s19514_s14 + $0xa90] sm:$0xff] }
 0x84d   : > { %15366 = vmatpush1.bf16.msra.mxu1 %v18234_v11  ;;  %15203 = vmatprep.subr.bf16.mxu0 %v18241_v0  ;;  %v12059_v11 = vld [vmem:[%s19514_s14 + $0xab0] sm:$0xff]  ;;  %v12056_v0 = vld [vmem:[%s19514_s14 + $0xa98] sm:$0xff] }
 0x84e   : > { %15367 = vmatprep.subr.bf16.mxu1 %v18243_v34  ;;  %v12060_v34 = vld [vmem:[%s19514_s14 + $0xab8] sm:$0xff]  ;;  %v18305_v41 = vcombine.high %v12055_v32, %v12059_v11  ;;  %v18304_v51 = vcombine.low %v12055_v32, %v12059_v11 }
 0x84f   : > { %v18307_v48 = vcombine.high %v12056_v0, %v12060_v34  ;;  %v18306_v3 = vcombine.low %v12056_v0, %v12060_v34  ;;  %v12116_v32 = vld [vmem:[%s19514_s14 + $0xc78] sm:$0xff]  ;;  %v12119_v34 = vld [vmem:[%s19514_s14 + $0xc90] sm:$0xff] }
 0x850   : > { %15204 = vmatpush1.bf16.msra.mxu0 %v18240_v46  ;;  %v12063_v46 = vld [vmem:[%s19514_s14 + $0xad0] sm:$0xff] }
 0x851   : > { %15368 = vmatpush1.bf16.msra.mxu1 %v18242_v47  ;;  %15205 = vmatprep.subr.bf16.mxu0 %v18249_v35  ;;  %v12067_v47 = vld [vmem:[%s19514_s14 + $0xaf0] sm:$0xff]  ;;  %v12064_v35 = vld [vmem:[%s19514_s14 + $0xad8] sm:$0xff] }
 0x852   : > { %15369 = vmatprep.subr.bf16.mxu1 %v18251_v50  ;;  %v12068_v50 = vld [vmem:[%s19514_s14 + $0xaf8] sm:$0xff]  ;;  %v18313_v53 = vcombine.high %v12063_v46, %v12067_v47  ;;  %v18312_v9 = vcombine.low %v12063_v46, %v12067_v47 }
 0x853   : > { %v18315_v55 = vcombine.high %v12064_v35, %v12068_v50  ;;  %v18314_v16 = vcombine.low %v12064_v35, %v12068_v50 }
 0x854   : > { %15206 = vmatpush1.bf16.msra.mxu0 %v18248_v56  ;;  %v12071_v56 = vld [vmem:[%s19514_s14 + $0xb10] sm:$0xff] }
 0x855   : > { %15370 = vmatpush1.bf16.msra.mxu1 %v18250_v61  ;;  %15207 = vmatprep.subr.bf16.mxu0 %v18257_v62  ;;  %v12075_v61 = vld [vmem:[%s19514_s14 + $0xb30] sm:$0xff]  ;;  %v12072_v62 = vld [vmem:[%s19514_s14 + $0xb18] sm:$0xff] }
 0x856   : > { %15371 = vmatprep.subr.bf16.mxu1 %v18259_v63  ;;  %v12076_v63 = vld [vmem:[%s19514_s14 + $0xb38] sm:$0xff]  ;;  %v18321_v4 = vcombine.high %v12071_v56, %v12075_v61  ;;  %v18320_v24 = vcombine.low %v12071_v56, %v12075_v61 }
 0x857   : > { %v18323_v38 = vcombine.high %v12072_v62, %v12076_v63  ;;  %v18322_v44 = vcombine.low %v12072_v62, %v12076_v63  ;;  %v12135_v62 = vld [vmem:[%s19514_s14 + $0xd10] sm:$0xff] }
 0x858   : > { %15208 = vmatpush1.bf16.msra.mxu0 %v18256_v58  ;;  %v12079_v58 = vld [vmem:[%s19514_s14 + $0xb50] sm:$0xff] }
 0x859   : > { %15372 = vmatpush1.bf16.msra.mxu1 %v18258_v5  ;;  %15209 = vmatprep.subr.bf16.mxu0 %v18265_v52  ;;  %v12083_v5 = vld [vmem:[%s19514_s14 + $0xb70] sm:$0xff]  ;;  %v12080_v52 = vld [vmem:[%s19514_s14 + $0xb58] sm:$0xff] }
 0x85a   : > { %15373 = vmatprep.subr.bf16.mxu1 %v18267_v2  ;;  %v12084_v2 = vld [vmem:[%s19514_s14 + $0xb78] sm:$0xff]  ;;  %v18329_v39 = vcombine.high %v12079_v58, %v12083_v5  ;;  %v18328_v29 = vcombine.low %v12079_v58, %v12083_v5  ;;  %v12139_v63 = vld [vmem:[%s19514_s14 + $0xd30] sm:$0xff] }
 0x85b   : > { %v18331_v20 = vcombine.high %v12080_v52, %v12084_v2  ;;  %v18330_v13 = vcombine.low %v12080_v52, %v12084_v2  ;;  %v18385_v58 = vcombine.high %v12135_v62, %v12139_v63  ;;  %v19252_v52 = vmov 1983009808  }
 0x85c   : > { %15210 = vmatpush1.bf16.msra.mxu0 %v18264_v42  ;;  %v12087_v42 = vld [vmem:[%s19514_s14 + $0xb90] sm:$0xff]  ;;  %v15456_v2 = vunpack.c.l.s4 %v19252_v52  ;;  %v12188_v52 = vld [vmem:[%s19514_s14 + $0xeb8] sm:$0xff] }
 0x85d   : > { %15374 = vmatpush1.bf16.msra.mxu1 %v18266_v7  ;;  %15211 = vmatprep.subr.bf16.mxu0 %v18273_v10  ;;  %v12091_v7 = vld [vmem:[%s19514_s14 + $0xbb0] sm:$0xff]  ;;  %v12088_v10 = vld [vmem:[%s19514_s14 + $0xb98] sm:$0xff] }
 0x85e   : > { %15375 = vmatprep.subr.bf16.mxu1 %v18275_v12  ;;  %v12092_v12 = vld [vmem:[%s19514_s14 + $0xbb8] sm:$0xff]  ;;  %v18337_v54 = vcombine.high %v12087_v42, %v12091_v7  ;;  %v18336_v18 = vcombine.low %v12087_v42, %v12091_v7  ;;  %v18384_v42 = vcombine.low %v12135_v62, %v12139_v63 }
 0x85f   : > { %v18339_v6 = vcombine.high %v12088_v10, %v12092_v12  ;;  %v18338_v17 = vcombine.low %v12088_v10, %v12092_v12  ;;  %v15457_v12 = vunpack.c.0.s8 %v15456_v2  ;;  %v12180_v62 = vld [vmem:[%s19514_s14 + $0xe78] sm:$0xff] }
 0x860   : > { %15212 = vmatpush1.bf16.msra.mxu0 %v18272_v14  ;;  %v12095_v14 = vld [vmem:[%s19514_s14 + $0xbd0] sm:$0xff] }
 0x861   : > { %15376 = vmatpush1.bf16.msra.mxu1 %v18274_v36  ;;  %15213 = vmatprep.subr.bf16.mxu0 %v18281_v30  ;;  %v12099_v36 = vld [vmem:[%s19514_s14 + $0xbf0] sm:$0xff]  ;;  %v12096_v30 = vld [vmem:[%s19514_s14 + $0xbd8] sm:$0xff] }
 0x862   : > { %15377 = vmatprep.subr.bf16.mxu1 %v18283_v15  ;;  %v12100_v15 = vld [vmem:[%s19514_s14 + $0xbf8] sm:$0xff]  ;;  %v18345_v60 = vcombine.high %v12095_v14, %v12099_v36  ;;  %v18344_v8 = vcombine.low %v12095_v14, %v12099_v36 }
 0x863   : > { %v18347_v33 = vcombine.high %v12096_v30, %v12100_v15  ;;  %v18346_v23 = vcombine.low %v12096_v30, %v12100_v15  ;;  %v12156_v14 = vld [vmem:[%s19514_s14 + $0xdb8] sm:$0xff] }
 0x864   : > { %15214 = vmatpush1.bf16.msra.mxu0 %v18280_v49  ;;  %v12103_v49 = vld [vmem:[%s19514_s14 + $0xc10] sm:$0xff] }
 0x865   : > { %15378 = vmatpush1.bf16.msra.mxu1 %v18282_v21  ;;  %15215 = vmatprep.subr.bf16.mxu0 %v18289_v22  ;;  %v12107_v21 = vld [vmem:[%s19514_s14 + $0xc30] sm:$0xff]  ;;  %v12104_v22 = vld [vmem:[%s19514_s14 + $0xc18] sm:$0xff] }
 0x866   : > { %15379 = vmatprep.subr.bf16.mxu1 %v18291_v57  ;;  %v12108_v57 = vld [vmem:[%s19514_s14 + $0xc38] sm:$0xff]  ;;  %v18353_v25 = vcombine.high %v12103_v49, %v12107_v21 }
 0x867   : > { %v18355_v43 = vcombine.high %v12104_v22, %v12108_v57  ;;  %v18354_v11 = vcombine.low %v12104_v22, %v12108_v57 }
 0x868   : > { %15216 = vmatpush1.bf16.msra.mxu0 %v18288_v26  ;;  %v12111_v26 = vld [vmem:[%s19514_s14 + $0xc50] sm:$0xff] }
 0x869   : > { %15380 = vmatpush1.bf16.msra.mxu1 %v18290_v27  ;;  %15217 = vmatprep.subr.bf16.mxu0 %v18297_v31  ;;  %v12115_v27 = vld [vmem:[%s19514_s14 + $0xc70] sm:$0xff]  ;;  %v18352_v31 = vcombine.low %v12103_v49, %v12107_v21 }
 0x86a   : > { %15381 = vmatprep.subr.bf16.mxu1 %v18299_v1  ;;  %v12112_v1 = vld [vmem:[%s19514_s14 + $0xc58] sm:$0xff]  ;;  %v18361_v0 = vcombine.high %v12111_v26, %v12115_v27  ;;  %v18360_v46 = vcombine.low %v12111_v26, %v12115_v27  ;;  %v12159_v49 = vld [vmem:[%s19514_s14 + $0xdd0] sm:$0xff] }
 0x86b   : > { %v18362_v47 = vcombine.low %v12112_v1, %v12116_v32  ;;  %v12163_v21 = vld [vmem:[%s19514_s14 + $0xdf0] sm:$0xff] }
 0x86c   : > { %15218 = vmatpush1.bf16.msra.mxu0 %v18296_v37  ;;  %v12123_v37 = vld [vmem:[%s19514_s14 + $0xcb0] sm:$0xff] }
 0x86d   : > { %15382 = vmatpush1.bf16.msra.mxu1 %v18298_v40  ;;  %15219 = vmatprep.subr.bf16.mxu0 %v18305_v41  ;;  %v18363_v40 = vcombine.high %v12112_v1, %v12116_v32  ;;  %v12120_v41 = vld [vmem:[%s19514_s14 + $0xc98] sm:$0xff]  ;;  %v18369_v35 = vcombine.high %v12119_v34, %v12123_v37 }
 0x86e   : > { %15383 = vmatprep.subr.bf16.mxu1 %v18307_v48  ;;  %v12124_v48 = vld [vmem:[%s19514_s14 + $0xcb8] sm:$0xff] }
 0x86f   : > { %v18371_v50 = vcombine.high %v12120_v41, %v12124_v48  ;;  %v18370_v56 = vcombine.low %v12120_v41, %v12124_v48  ;;  %v12167_v41 = vld [vmem:[%s19514_s14 + $0xe10] sm:$0xff] }
 0x870   : > { %15220 = vmatpush1.bf16.msra.mxu0 %v18304_v51  ;;  %v12127_v51 = vld [vmem:[%s19514_s14 + $0xcd0] sm:$0xff] }
 0x871   : > { %15384 = vmatpush1.bf16.msra.mxu1 %v18306_v3  ;;  %15221 = vmatprep.subr.bf16.mxu0 %v18313_v53  ;;  %v12131_v3 = vld [vmem:[%s19514_s14 + $0xcf0] sm:$0xff]  ;;  %v12128_v53 = vld [vmem:[%s19514_s14 + $0xcd8] sm:$0xff] }
 0x872   : > { %15385 = vmatprep.subr.bf16.mxu1 %v18315_v55  ;;  %v18368_v55 = vcombine.low %v12119_v34, %v12123_v37  ;;  %v18377_v61 = vcombine.high %v12127_v51, %v12131_v3  ;;  %v12171_v48 = vld [vmem:[%s19514_s14 + $0xe30] sm:$0xff] }
 0x873   : > { %v18416_v63 = vcombine.low %v12167_v41, %v12171_v48 }
 0x874   : > { %15222 = vmatpush1.bf16.msra.mxu0 %v18312_v9  ;;  %v12136_v9 = vld [vmem:[%s19514_s14 + $0xd18] sm:$0xff] }
 0x875   : > { %15386 = vmatpush1.bf16.msra.mxu1 %v18314_v16  ;;  %15223 = vmatprep.subr.bf16.mxu0 %v18321_v4  ;;  %v12140_v16 = vld [vmem:[%s19514_s14 + $0xd38] sm:$0xff]  ;;  %v18376_v4 = vcombine.low %v12127_v51, %v12131_v3  ;;  %v18408_v51 = vcombine.low %v12159_v49, %v12163_v21 }
 0x876   : > { %15387 = vmatprep.subr.bf16.mxu1 %v18323_v38  ;;  %v18387_v5 = vcombine.high %v12136_v9, %v12140_v16  ;;  %v18386_v7 = vcombine.low %v12136_v9, %v12140_v16 }
 0x878   : > { %15224 = vmatpush1.bf16.msra.mxu0 %v18320_v24  ;;  %v12143_v24 = vld [vmem:[%s19514_s14 + $0xd50] sm:$0xff] }
 0x879   : > { %15388 = vmatpush1.bf16.msra.mxu1 %v18322_v44  ;;  %15225 = vmatprep.subr.bf16.mxu0 %v18329_v39  ;;  %v12147_v44 = vld [vmem:[%s19514_s14 + $0xd70] sm:$0xff]  ;;  %v12144_v39 = vld [vmem:[%s19514_s14 + $0xd58] sm:$0xff] }
 0x87a   : > { %15389 = vmatprep.subr.bf16.mxu1 %v18331_v20  ;;  %v12148_v20 = vld [vmem:[%s19514_s14 + $0xd78] sm:$0xff]  ;;  %v18393_v10 = vcombine.high %v12143_v24, %v12147_v44  ;;  %v18392_v36 = vcombine.low %v12143_v24, %v12147_v44 }
 0x87b   : > { %v18394_v30 = vcombine.low %v12144_v39, %v12148_v20 }
 0x87c   : > { %15226 = vmatpush1.bf16.msra.mxu0 %v18328_v29  ;;  %v18395_v29 = vcombine.high %v12144_v39, %v12148_v20  ;;  %v12191_v20 = vld [vmem:[%s19514_s14 + $0xed0] sm:$0xff] }
 0x87d   : > { %15390 = vmatpush1.bf16.msra.mxu1 %v18330_v13  ;;  %15227 = vmatprep.subr.bf16.mxu0 %v18337_v54  ;;  %v12151_v13 = vld [vmem:[%s19514_s14 + $0xd90] sm:$0xff] }
 0x87e   : > { %15391 = vmatprep.subr.bf16.mxu1 %v18339_v6  ;;  %v12155_v54 = vld [vmem:[%s19514_s14 + $0xdb0] sm:$0xff]  ;;  %v12152_v6 = vld [vmem:[%s19514_s14 + $0xd98] sm:$0xff] }
 0x87f   : > { %v18401_v15 = vcombine.high %v12151_v13, %v12155_v54 }
 0x880   : > { %15228 = vmatpush1.bf16.msra.mxu0 %v18336_v18 }
 0x881   : > { %15392 = vmatpush1.bf16.msra.mxu1 %v18338_v17  ;;  %15229 = vmatprep.subr.bf16.mxu0 %v18345_v60  ;;  %v21854_v60 = vsub.s32 %v15457_v12, %v19552_v45 }
 0x882   : > { %15393 = vmatprep.subr.bf16.mxu1 %v18347_v33  ;;  %v18403_v33 = vcombine.high %v12152_v6, %v12156_v14 }
 0x884   : > { %15230 = vmatpush1.bf16.msra.mxu0 %v18344_v8  ;;  %v12160_v8 = vld [vmem:[%s19514_s14 + $0xdd8] sm:$0xff] }
 0x885   : > { %15394 = vmatpush1.bf16.msra.mxu1 %v18346_v23  ;;  %15240 = vmatprep.subr.bf16.mxu0 %v18353_v25  ;;  %v12164_v23 = vld [vmem:[%s19514_s14 + $0xdf8] sm:$0xff] }
 0x886   : > { %15404 = vmatprep.subr.bf16.mxu1 %v18355_v43  ;;  %v18410_v3 = vcombine.low %v12160_v8, %v12164_v23 }
 0x887   : > { %15232 = vmatmul.mubr.bf16.vlgmr.msra.gmra.mrb[12].mxu0 %v21547_v19 }
 0x888   : > { %15396 = vmatmul.mubr.bf16.vlgmr.msra.gmra.mrb[12].mxu1 %v21547_v19  ;;  %15241 = vmatpush1.bf16.msra.mxu0 %v18352_v31  ;;  %v12132_v19 = vld [vmem:[%s19514_s14 + $0xcf8] sm:$0xff]  ;;  %v18400_v31 = vcombine.low %v12151_v13, %v12155_v54 }
 0x889   : > { %15272 = vmatprep.mubr.bf16.mxu0 %v21555_v28  ;;  %15405 = vmatpush1.bf16.msra.mxu1 %v18354_v11  ;;  %v18378_v38 = vcombine.low %v12128_v53, %v12132_v19  ;;  %v18402_v11 = vcombine.low %v12152_v6, %v12156_v14  ;;  %v12199_v6 = vld [vmem:[%s19514_s14 + $0xf10] sm:$0xff] }
 0x88a   : > { %15436 = vmatprep.mubr.bf16.mxu1 %v21555_v28  ;;  %15242 = vmatprep.subr.bf16.mxu0 %v18361_v0  ;;  %v18379_v28 = vcombine.high %v12128_v53, %v12132_v19  ;;  %v18409_v0 = vcombine.high %v12159_v49, %v12163_v21  ;;  %v18417_v53 = vcombine.high %v12167_v41, %v12171_v48  ;;  %v12203_v14 = vld [vmem:[%s19514_s14 + $0xf30] sm:$0xff]  ;;  %v12224_v41 = vld [vmem:[%s19514_s14 + $0xfd8] sm:$0xff] }
 0x88b   : > { %15406 = vmatprep.subr.bf16.mxu1 %v18363_v40  ;;  %v18411_v40 = vcombine.high %v12160_v8, %v12164_v23  ;;  %v12207_v49 = vld [vmem:[%s19514_s14 + $0xf50] sm:$0xff]  ;;  %v18448_v8 = vcombine.low %v12199_v6, %v12203_v14  ;;  %v12228_v48 = vld [vmem:[%s19514_s14 + $0xff8] sm:$0xff] }
 0x88c   : > { %15243 = vmatpush1.bf16.msra.mxu0 %v18360_v46  ;;  %v11707_v46 = vld [vmem:[#allocation2] sm:$0xff] }
 0x88d   : > { %15407 = vmatpush1.bf16.msra.mxu1 %v18362_v47  ;;  %15244 = vmatprep.subr.bf16.mxu0 %v18369_v35  ;;  %v12168_v47 = vld [vmem:[%s19514_s14 + $0xe18] sm:$0xff]  ;;  %v12211_v21 = vld [vmem:[%s19514_s14 + $0xf70] sm:$0xff] }
 0x88e   : > { %15408 = vmatprep.subr.bf16.mxu1 %v18371_v50  ;;  %v12172_v35 = vld [vmem:[%s19514_s14 + $0xe38] sm:$0xff] }
 0x88f   : > { %v18418_v9 = vcombine.low %v12168_v47, %v12172_v35 }
 0x890   : > { %15245 = vmatpush1.bf16.msra.mxu0 %v18368_v55  ;;  %v18419_v55 = vcombine.high %v12168_v47, %v12172_v35 }
 0x891   : > { %15409 = vmatpush1.bf16.msra.mxu1 %v18370_v56  ;;  %15246 = vmatprep.subr.bf16.mxu0 %v18377_v61  ;;  %v12175_v56 = vld [vmem:[%s19514_s14 + $0xe50] sm:$0xff] }
 0x892   : > { %15410 = vmatprep.subr.bf16.mxu1 %v18379_v28  ;;  %v12179_v61 = vld [vmem:[%s19514_s14 + $0xe70] sm:$0xff]  ;;  %v12176_v28 = vld [vmem:[%s19514_s14 + $0xe58] sm:$0xff] }
 0x893   : > { %v18425_v16 = vcombine.high %v12175_v56, %v12179_v61  ;;  %v18424_v2 = vcombine.low %v12175_v56, %v12179_v61  ;;  %v18426_v24 = vcombine.low %v12176_v28, %v12180_v62 }
 0x894   : > { %15247 = vmatpush1.bf16.msra.mxu0 %v18376_v4  ;;  %v18427_v4 = vcombine.high %v12176_v28, %v12180_v62 }
 0x895   : > { %15411 = vmatpush1.bf16.msra.mxu1 %v18378_v38  ;;  %15248 = vmatprep.subr.bf16.mxu0 %v18385_v58  ;;  %v12183_v38 = vld [vmem:[%s19514_s14 + $0xe90] sm:$0xff] }
 0x896   : > { %15412 = vmatprep.subr.bf16.mxu1 %v18387_v5  ;;  %v12187_v58 = vld [vmem:[%s19514_s14 + $0xeb0] sm:$0xff]  ;;  %v12184_v5 = vld [vmem:[%s19514_s14 + $0xe98] sm:$0xff] }
 0x897   : > { %v18433_v44 = vcombine.high %v12183_v38, %v12187_v58  ;;  %v18435_v39 = vcombine.high %v12184_v5, %v12188_v52  ;;  %v18432_v12 = vcombine.low %v12183_v38, %v12187_v58  ;;  %v11708_v58 = vld [vmem:[#allocation2 + $0x8] sm:$0xff] }
 0x898   : > { %15249 = vmatpush1.bf16.msra.mxu0 %v18384_v42  ;;  %v12195_v42 = vld [vmem:[%s19514_s14 + $0xef0] sm:$0xff] }
 0x899   : > { %15413 = vmatpush1.bf16.msra.mxu1 %v18386_v7  ;;  %15250 = vmatprep.subr.bf16.mxu0 %v18393_v10  ;;  %v12192_v7 = vld [vmem:[%s19514_s14 + $0xed8] sm:$0xff]  ;;  %v18441_v13 = vcombine.high %v12191_v20, %v12195_v42 }
 0x89a   : > { %v14946_v18 = vpop.f32.mrb[8].mxu0  ;;  %v15110_v17 = vpop.f32.mrb[8].mxu1  ;;  %15414 = vmatprep.subr.bf16.mxu1 %v18395_v29  ;;  %v12196_v10 = vld [vmem:[%s19514_s14 + $0xef8] sm:$0xff]  ;;  %v18434_v29 = vcombine.low %v12184_v5, %v12188_v52 }
 0x89b   : > { %v14948_v22 = vpop.f32.mrb[9].mxu0  ;;  %v15112_v57 = vpop.f32.mrb[9].mxu1  ;;  %v18443_v54 = vcombine.high %v12192_v7, %v12196_v10 }
 0x89c   : > { %v15453_v25 = vcombine.low %v14946_v18, %v14948_v22  ;;  %v15454_v43 = vcombine.low %v15110_v17, %v15112_v57  ;;  %v14950_v26 = vpop.f32.mrb[10].mxu0  ;;  %v15114_v27 = vpop.f32.mrb[10].mxu1  ;;  %15251 = vmatpush1.bf16.msra.mxu0 %v18392_v36  ;;  %v12200_v36 = vld [vmem:[%s19514_s14 + $0xf18] sm:$0xff]  ;;  %v18442_v18 = vcombine.low %v12192_v7, %v12196_v10  ;;  %v18449_v17 = vcombine.high %v12199_v6, %v12203_v14  ;;  %v18962_v7 = vld [vmem:[#allocation9 + $0x88] sm:$0xff] (!%p18476_p12)   ;;  %v18968_v6 = vld [vmem:[#allocation9 + $0xd8] sm:$0xff] (!%p18476_p12)  }
 0x89d   : > { %15415 = vmatpush1.bf16.msra.mxu1 %v18394_v30  ;;  %v14951_v1 = vpop.f32.mrb[11].mxu0  ;;  %v15115_v32 = vpop.f32.mrb[11].mxu1  ;;  %15252 = vmatprep.subr.bf16.mxu0 %v18401_v15  ;;  %v12204_v30 = vld [vmem:[%s19514_s14 + $0xf38] sm:$0xff]  ;;  %v18440_v15 = vcombine.low %v12191_v20, %v12195_v42  ;;  %v12215_v26 = vld [vmem:[%s19514_s14 + $0xf90] sm:$0xff]  ;;  %v18969_v14 = vld [vmem:[#allocation9 + $0x18] sm:$0xff] (!%p18476_p12)  }
 0x89e   : > { %v15461_v34 = vrot.slane %v15453_v25, %v21854_v60  ;;  %v15468_v37 = vrot.slane %v15454_v43, %v21854_v60  ;;  %15416 = vmatprep.subr.bf16.mxu1 %v18403_v33  ;;  %v18451_v33 = vcombine.high %v12200_v36, %v12204_v30  ;;  %v12208_v22 = vld [vmem:[%s19514_s14 + $0xf58] sm:$0xff]  ;;  %v18450_v23 = vcombine.low %v12200_v36, %v12204_v30  ;;  %v12219_v27 = vld [vmem:[%s19514_s14 + $0xfb0] sm:$0xff]  ;;  %v18970_v36 = vld [vmem:[#allocation9 + $0x98] sm:$0xff] (!%p18476_p12)  }
 0x89f   : > { %v12212_v57 = vld [vmem:[%s19514_s14 + $0xf78] sm:$0xff]  ;;  %v18457_v25 = vcombine.high %v12207_v49, %v12211_v21  ;;  %v18456_v32 = vcombine.low %v12207_v49, %v12211_v21  ;;  %v18960_v20 = vld [vmem:[#allocation9 + $0xc8] sm:$0xff] (!%p18476_p12)   ;;  %v18971_v30 = vld [vmem:[#allocation9 + $0x60] sm:$0xff] (!%p18476_p12)  }
 0x8a0   : > { %v15469_v50 = vcombine.low %v15461_v34, %v15468_v37  ;;  %15253 = vmatpush1.bf16.msra.mxu0 %v18400_v31  ;;  %v18459_v43 = vcombine.high %v12208_v22, %v12212_v57  ;;  %v12216_v31 = vld [vmem:[%s19514_s14 + $0xf98] sm:$0xff]  ;;  %v12223_v37 = vld [vmem:[%s19514_s14 + $0xfd0] sm:$0xff] }
 0x8a1   : > { %15417 = vmatpush1.bf16.msra.mxu1 %v18402_v11  ;;  %15254 = vmatprep.subr.bf16.mxu0 %v18409_v0  ;;  %v12220_v1 = vld [vmem:[%s19514_s14 + $0xfb8] sm:$0xff]  ;;  %v18458_v11 = vcombine.low %v12208_v22, %v12212_v57  ;;  %v18465_v0 = vcombine.high %v12215_v26, %v12219_v27  ;;  %v18961_v42 = vld [vmem:[#allocation9 + $0x8] sm:$0xff] (!%p18476_p12)  }
 0x8a2   : > { %v15489_v19 = vadd.f32 %v15469_v50, %v11707_v46  ;;  %15418 = vmatprep.subr.bf16.mxu1 %v18411_v40  ;;  %v18467_v34 = vcombine.high %v12216_v31, %v12220_v1  ;;  %v12227_v40 = vld [vmem:[%s19514_s14 + $0xff0] sm:$0xff]  ;;  %v18464_v46 = vcombine.low %v12215_v26, %v12219_v27  ;;  %v18466_v47 = vcombine.low %v12216_v31, %v12220_v1  ;;  %v18963_v10 = vld [vmem:[#allocation9 + $0x50] sm:$0xff] (!%p18476_p12)   ;;  %v18983_v27 = vld [vmem:[#allocation9 + $0x78] sm:$0xff] (!%p18476_p12)  }
 0x8a3   : > { %v18473_v35 = vcombine.high %v12223_v37, %v12227_v40  ;;  %v18475_v50 = vcombine.high %v12224_v41, %v12228_v48  ;;  %v18976_v49 = vld [vmem:[#allocation9 + $0xe8] sm:$0xff] (!%p18476_p12)   ;;  %v18979_v57 = vld [vmem:[#allocation9 + $0x70] sm:$0xff] (!%p18476_p12)   ;;  %v15507_v26 = vsub.s32 (!%p18476_p12), 1, %v19552_v45  ;;  %v15511_v31 = vsub.s32 (!%p18476_p12), 2, %v19552_v45  ;;  %v18984_v1 = vld [vmem:[#allocation9 + $0xf8] sm:$0xff] (!%p18476_p12)  }
 0x8a4   : > { %15491 = vst [vmem:[#allocation2] sm:$0xff] %v15489_v19  ;;  %15255 = vmatpush1.bf16.msra.mxu0 %v18408_v51  ;;  %v18472_v51 = vcombine.low %v12223_v37, %v12227_v40  ;;  %v18977_v21 = vld [vmem:[#allocation9 + $0x28] sm:$0xff] (!%p18476_p12)  }
 0x8a5   : > { %15419 = vmatpush1.bf16.msra.mxu1 %v18410_v3  ;;  %15256 = vmatprep.subr.bf16.mxu0 %v18417_v53  ;;  %v18474_v3 = vcombine.low %v12224_v41, %v12228_v48  ;;  %v18978_v22 = vld [vmem:[#allocation9 + $0xa8] sm:$0xff] (!%p18476_p12)  }
 0x8a6   : > { %15420 = vmatprep.subr.bf16.mxu1 %v18419_v55 }
 0x8a8   : > { %15257 = vmatpush1.bf16.msra.mxu0 %v18416_v63 }
 0x8a9   : > { %15421 = vmatpush1.bf16.msra.mxu1 %v18418_v9  ;;  %15258 = vmatprep.subr.bf16.mxu0 %v18425_v16 }
 0x8aa   : > { %15422 = vmatprep.subr.bf16.mxu1 %v18427_v4 }
 0x8ac   : > { %15259 = vmatpush1.bf16.msra.mxu0 %v18424_v2  ;;  %v18956_v2 = vld [vmem:[#allocation9 + $0xc0] sm:$0xff] (!%p18476_p12)  }
 0x8ad   : > { %15423 = vmatpush1.bf16.msra.mxu1 %v18426_v24  ;;  %15260 = vmatprep.subr.bf16.mxu0 %v18433_v44  ;;  %v18957_v24 = vld [vmem:[#allocation9] sm:$0xff] (!%p18476_p12)  }
 0x8ae   : > { %15424 = vmatprep.subr.bf16.mxu1 %v18435_v39  ;;  %v18958_v44 = vld [vmem:[#allocation9 + $0x80] sm:$0xff] (!%p18476_p12)   ;;  %v18959_v39 = vld [vmem:[#allocation9 + $0x48] sm:$0xff] (!%p18476_p12)  }
 0x8b0   : > { %15261 = vmatpush1.bf16.msra.mxu0 %v18432_v12  ;;  %v18964_v12 = vld [vmem:[#allocation9 + $0xd0] sm:$0xff] (!%p18476_p12)  }
 0x8b1   : > { %15425 = vmatpush1.bf16.msra.mxu1 %v18434_v29  ;;  %15262 = vmatprep.subr.bf16.mxu0 %v18441_v13  ;;  %v18965_v29 = vld [vmem:[#allocation9 + $0x10] sm:$0xff] (!%p18476_p12)  }
 0x8b2   : > { %15426 = vmatprep.subr.bf16.mxu1 %v18443_v54  ;;  %v18966_v13 = vld [vmem:[#allocation9 + $0x90] sm:$0xff] (!%p18476_p12)   ;;  %v18967_v54 = vld [vmem:[#allocation9 + $0x58] sm:$0xff] (!%p18476_p12)  }
 0x8b4   : > { %15263 = vmatpush1.bf16.msra.mxu0 %v18440_v15  ;;  %v18972_v15 = vld [vmem:[#allocation9 + $0xe0] sm:$0xff] (!%p18476_p12)  }
 0x8b5   : > { %15427 = vmatpush1.bf16.msra.mxu1 %v18442_v18  ;;  %15264 = vmatprep.subr.bf16.mxu0 %v18449_v17  ;;  %v18973_v18 = vld [vmem:[#allocation9 + $0x20] sm:$0xff] (!%p18476_p12)  }
 0x8b6   : > { %15428 = vmatprep.subr.bf16.mxu1 %v18451_v33  ;;  %v18974_v17 = vld [vmem:[#allocation9 + $0xa0] sm:$0xff] (!%p18476_p12)   ;;  %v18975_v33 = vld [vmem:[#allocation9 + $0x68] sm:$0xff] (!%p18476_p12)  }
 0x8b8   : > { %15265 = vmatpush1.bf16.msra.mxu0 %v18448_v8  ;;  %v18980_v8 = vld [vmem:[#allocation9 + $0xf0] sm:$0xff] (!%p18476_p12)  }
 0x8b9   : > { %15429 = vmatpush1.bf16.msra.mxu1 %v18450_v23  ;;  %15266 = vmatprep.subr.bf16.mxu0 %v18457_v25  ;;  %v18981_v23 = vld [vmem:[#allocation9 + $0x30] sm:$0xff] (!%p18476_p12)   ;;  %v15503_v25 = vsub.s32 (!%p18476_p12), 0, %v19552_v45 }
 0x8ba   : > { %15430 = vmatprep.subr.bf16.mxu1 %v18459_v43  ;;  %v18982_v43 = vld [vmem:[#allocation9 + $0xb0] sm:$0xff] (!%p18476_p12)  }
 0x8bc   : > { %15267 = vmatpush1.bf16.msra.mxu0 %v18456_v32  ;;  %v15515_v32 = vsub.s32 (!%p18476_p12), 3, %v19552_v45 }
 0x8bd   : > { %15431 = vmatpush1.bf16.msra.mxu1 %v18458_v11  ;;  %15268 = vmatprep.subr.bf16.mxu0 %v18465_v0  ;;  %v18985_v11 = vld [vmem:[#allocation9 + $0x38] sm:$0xff] (!%p18476_p12)  }
 0x8be   : > { %15432 = vmatprep.subr.bf16.mxu1 %v18467_v34  ;;  %v18986_v0 = vld [vmem:[#allocation9 + $0xb8] sm:$0xff] (!%p18476_p12)  }
 0x8bf   : > { %v15499_v34 = vld [vmem:[#allocation8] sm:$0xff] (!%p18476_p12) }
 0x8c0   : > { %15269 = vmatpush1.bf16.msra.mxu0 %v18464_v46  ;;  %v15504_v37 = vrot.slane (!%p18476_p12), %v15499_v34, %v15503_v25  ;;  %v15508_v40 = vrot.slane (!%p18476_p12), %v15499_v34, %v15507_v26  ;;  %v15512_v41 = vrot.slane (!%p18476_p12), %v15499_v34, %v15511_v31  ;;  %v15516_v48 = vrot.slane (!%p18476_p12), %v15499_v34, %v15515_v32  ;;  %v18987_v46 = vld [vmem:[#allocation9 + $0x140] sm:$0xff] (!%p18476_p12)   ;;  %v19009_v31 = vld [vmem:[#allocation9 + $0x128] sm:$0xff] (!%p18476_p12)  }
 0x8c1   : > { %15433 = vmatpush1.bf16.msra.mxu1 %v18466_v47  ;;  %15270 = vmatprep.subr.bf16.mxu0 %v18473_v35  ;;  %v18988_v47 = vld [vmem:[#allocation9 + $0x1c0] sm:$0xff] (!%p18476_p12)  }
 0x8c2   : > { %15434 = vmatprep.subr.bf16.mxu1 %v18475_v50  ;;  %v15533_v35 = vcombine.low (!%p18476_p12), %v15504_v37, %v15508_v40  ;;  %v15534_v50 = vcombine.low (!%p18476_p12), %v15512_v41, %v15516_v48  ;;  %v19012_v40 = vld [vmem:[#allocation9 + $0x1f0] sm:$0xff] (!%p18476_p12)  }
 0x8c3   : > { %v19013_v41 = vld [vmem:[#allocation9 + $0x130] sm:$0xff] (!%p18476_p12)  }
 0x8c4   : > { %15271 = vmatpush1.bf16.msra.mxu0 %v18472_v51  ;;  %v15541_v51 = vrot.slane (!%p18476_p12), %v15533_v35, %v21854_v60  ;;  %v19014_v35 = vld [vmem:[#allocation9 + $0x1b0] sm:$0xff] (!%p18476_p12)  }
 0x8c5   : > { %15435 = vmatpush1.bf16.msra.mxu1 %v18474_v3  ;;  %v15548_v3 = vrot.slane (!%p18476_p12), %v15534_v50, %v21854_v60 }
 0x8c6   : > { %18570 = vmatprep.subr.bf16.mxu1 (!%p18476_p12), %v18956_v2  ;;  %v18991_v2 = vld [vmem:[#allocation9 + $0x148] sm:$0xff] (!%p18476_p12)  }
 0x8c7   : > { %15273 = vmatmul.mubr.bf16.vlgmr.msra.gmra.mrb[12].mxu0 %v21623_v59 }
 0x8c8   : > { %15437 = vmatmul.mubr.bf16.vlgmr.msra.gmra.mrb[12].mxu1 %v21623_v59  ;;  %v18955_v59 = vld [vmem:[#allocation9 + $0x40] sm:$0xff] (!%p18476_p12)  }
 0x8c9   : > { %18548 = vmatprep.subr.bf16.mxu0 (!%p18476_p12), %v18955_v59  ;;  %18571 = vmatpush3.bf16.msra.mxu1 (!%p18476_p12), %v18958_v44 }
 0x8ca   : > { %18549 = vmatpush3.bf16.msra.mxu0 (!%p18476_p12), %v18957_v24  ;;  %18572 = vmatprep.subr.bf16.mxu1 (!%p18476_p12), %v18960_v20 }
 0x8cb   : > { %18550 = vmatprep.subr.bf16.mxu0 (!%p18476_p12), %v18959_v39  ;;  %v18990_v39 = vld [vmem:[#allocation9 + $0x180] sm:$0xff] (!%p18476_p12)  }
 0x8cd   : > { %18573 = vmatpush3.bf16.msra.mxu1 (!%p18476_p12), %v18962_v7 }
 0x8ce   : > { %18551 = vmatpush3.bf16.msra.mxu0 (!%p18476_p12), %v18961_v42  ;;  %18574 = vmatprep.subr.bf16.mxu1 (!%p18476_p12), %v18964_v12  ;;  %v18993_v12 = vld [vmem:[#allocation9 + $0x108] sm:$0xff] (!%p18476_p12)  }
 0x8cf   : > { %18552 = vmatprep.subr.bf16.mxu0 (!%p18476_p12), %v18963_v10  ;;  %v18992_v10 = vld [vmem:[#allocation9 + $0x1c8] sm:$0xff] (!%p18476_p12)  }
 0x8d1   : > { %18575 = vmatpush3.bf16.msra.mxu1 (!%p18476_p12), %v18966_v13 }
 0x8d2   : > { %18553 = vmatpush3.bf16.msra.mxu0 (!%p18476_p12), %v18965_v29  ;;  %18576 = vmatprep.subr.bf16.mxu1 (!%p18476_p12), %v18968_v6  ;;  %v18994_v29 = vld [vmem:[#allocation9 + $0x188] sm:$0xff] (!%p18476_p12)   ;;  %v18996_v6 = vld [vmem:[#allocation9 + $0x1d0] sm:$0xff] (!%p18476_p12)  }
 0x8d3   : > { %18554 = vmatprep.subr.bf16.mxu0 (!%p18476_p12), %v18967_v54 }
 0x8d5   : > { %18577 = vmatpush3.bf16.msra.mxu1 (!%p18476_p12), %v18970_v36  ;;  %v18999_v36 = vld [vmem:[#allocation9 + $0x158] sm:$0xff] (!%p18476_p12)  }
 0x8d6   : > { %18555 = vmatpush3.bf16.msra.mxu0 (!%p18476_p12), %v18969_v14  ;;  %18578 = vmatprep.subr.bf16.mxu1 (!%p18476_p12), %v18972_v15  ;;  %v18997_v14 = vld [vmem:[#allocation9 + $0x110] sm:$0xff] (!%p18476_p12)  }
 0x8d7   : > { %18556 = vmatprep.subr.bf16.mxu0 (!%p18476_p12), %v18971_v30  ;;  %v18998_v30 = vld [vmem:[#allocation9 + $0x190] sm:$0xff] (!%p18476_p12)  }
 0x8d9   : > { %18579 = vmatpush3.bf16.msra.mxu1 (!%p18476_p12), %v18974_v17  ;;  %v19000_v17 = vld [vmem:[#allocation9 + $0x1d8] sm:$0xff] (!%p18476_p12)  }
 0x8da   : > { %18557 = vmatpush3.bf16.msra.mxu0 (!%p18476_p12), %v18973_v18  ;;  %18580 = vmatprep.subr.bf16.mxu1 (!%p18476_p12), %v18976_v49  ;;  %v19003_v49 = vld [vmem:[#allocation9 + $0x160] sm:$0xff] (!%p18476_p12)  }
 0x8db   : > { %18558 = vmatprep.subr.bf16.mxu0 (!%p18476_p12), %v18975_v33  ;;  %v19001_v33 = vld [vmem:[#allocation9 + $0x118] sm:$0xff] (!%p18476_p12)  }
 0x8dd   : > { %18581 = vmatpush3.bf16.msra.mxu1 (!%p18476_p12), %v18978_v22 }
 0x8de   : > { %18559 = vmatpush3.bf16.msra.mxu0 (!%p18476_p12), %v18977_v21  ;;  %18582 = vmatprep.subr.bf16.mxu1 (!%p18476_p12), %v18980_v8  ;;  %v19002_v21 = vld [vmem:[#allocation9 + $0x198] sm:$0xff] (!%p18476_p12)   ;;  %v19005_v8 = vld [vmem:[#allocation9 + $0x120] sm:$0xff] (!%p18476_p12)  }
 0x8df   : > { %18560 = vmatprep.subr.bf16.mxu0 (!%p18476_p12), %v18979_v57  ;;  %v19004_v57 = vld [vmem:[#allocation9 + $0x1e0] sm:$0xff] (!%p18476_p12)  }
 0x8e1   : > { %18583 = vmatpush3.bf16.msra.mxu1 (!%p18476_p12), %v18982_v43  ;;  %v19006_v43 = vld [vmem:[#allocation9 + $0x1a0] sm:$0xff] (!%p18476_p12)  }
 0x8e2   : > { %18561 = vmatpush3.bf16.msra.mxu0 (!%p18476_p12), %v18981_v23  ;;  %18584 = vmatprep.subr.bf16.mxu1 (!%p18476_p12), %v18984_v1  ;;  %v19007_v23 = vld [vmem:[#allocation9 + $0x168] sm:$0xff] (!%p18476_p12)  }
 0x8e3   : > { %18562 = vmatprep.subr.bf16.mxu0 (!%p18476_p12), %v18983_v27  ;;  %v19008_v27 = vld [vmem:[#allocation9 + $0x1e8] sm:$0xff] (!%p18476_p12)  }
 0x8e5   : > { %18585 = vmatpush3.bf16.msra.mxu1 (!%p18476_p12), %v18986_v0  ;;  %v19010_v0 = vld [vmem:[#allocation9 + $0x1a8] sm:$0xff] (!%p18476_p12)  }
 0x8e6   : > { %18563 = vmatpush3.bf16.msra.mxu0 (!%p18476_p12), %v18985_v11  ;;  %18614 = vmatprep.subr.bf16.mxu1 (!%p18476_p12), %v18988_v47  ;;  %v19011_v11 = vld [vmem:[#allocation9 + $0x170] sm:$0xff] (!%p18476_p12)   ;;  %v19015_v47 = vld [vmem:[#allocation9 + $0x178] sm:$0xff] (!%p18476_p12)  }
 0x8e7   : > { %18592 = vmatprep.subr.bf16.mxu0 (!%p18476_p12), %v18987_v46 }
 0x99a   : > { %v15274_v53 = vpop.f32.mrb[12].mxu0 }
 0x99b   : > { %v15438_v19 = vpop.f32.mrb[12].mxu1  ;;  %v15276_v55 = vpop.f32.mrb[13].mxu0 }
 0x99c   : > { %v15470_v56 = vcombine.low %v15274_v53, %v15276_v55  ;;  %v15440_v61 = vpop.f32.mrb[13].mxu1  ;;  %v15278_v28 = vpop.f32.mrb[14].mxu0  ;;  %v15497_v53 = vld [vmem:[#allocation2] sm:$0xff] (!%p18476_p12) }
 0x99d   : > { %v15471_v62 = vcombine.low %v15438_v19, %v15440_v61  ;;  %v15442_v63 = vpop.f32.mrb[14].mxu1  ;;  %v15279_v9 = vpop.f32.mrb[15].mxu0  ;;  %v15549_v19 = vcombine.low (!%p18476_p12), %v15541_v51, %v15548_v3  ;;  %v15519_v28 = vsub.s32 (!%p18476_p12), 4, %v19552_v45  ;;  %v19016_v51 = vld [vmem:[#allocation9 + $0x1f8] sm:$0xff] (!%p18476_p12)  }
 0x99e   : > { %v15478_v16 = vrot.slane %v15470_v56, %v21854_v60  ;;  %v15443_v4 = vpop.f32.mrb[15].mxu1  ;;  %v19017_v3 = vld [vmem:[#allocation9 + $0x138] sm:$0xff] (!%p18476_p12)  }
 0x99f   : > { %v15485_v38 = vrot.slane %v15471_v62, %v21854_v60  ;;  %15496 = sbr.rel (%p18476_p12) target bundleno = 2724 (0xaa4), region = 72  ;;  %v15569_v55 = vadd.f32 (!%p18476_p12), %v15549_v19, %v15497_v53  ;;  %v15523_v62 = vsub.s32 (!%p18476_p12), 5, %v19552_v45  ;;  %v15531_v4 = vsub.s32 (!%p18476_p12), 7, %v19552_v45 }
 0x9a0   : > { %v15520_v24 = vrot.slane (!%p18476_p12), %v15499_v34, %v15519_v28 }
 0x9a1   : > { %v15486_v5 = vcombine.low %v15478_v16, %v15485_v38  ;;  %v15580_v56 = vrot.slane (!%p18476_p12), %v15569_v55, %v21854_v60  ;;  %v15573_v61 = vcombine.high (!%p18476_p12), %v15569_v55, %v15569_v55  ;;  %v15527_v16 = vsub.s32 (!%p18476_p12), 6, %v19552_v45  ;;  %v18995_v45 = vld [vmem:[#allocation9 + $0x150] sm:$0xff] (!%p18476_p12)  }
 0x9a2   : > { %v15524_v20 = vrot.slane (!%p18476_p12), %v15499_v34, %v15523_v62  ;;  %v15532_v7 = vrot.slane (!%p18476_p12), %v15499_v34, %v15531_v4 }
 0x9a3   : > { %v15490_v52 = vadd.f32 %v15486_v5, %v11708_v58  ;;  %v15588_v63 = vcombine.high (!%p18476_p12), %v15580_v56, %v15580_v56  ;;  %v15587_v9 = vrot.slane (!%p18476_p12), %v15573_v61, %v21854_v60  ;;  %v15615_v38 = vpack.c.bf16 (!%p18476_p12), %v15580_v56, %v15580_v56  ;;  %v18477_v56 = vld [vmem:[#allocation11] ss:$0 sm:$0xff] (!%p18476_p12) }
 0x9a4   : > { %v15528_v42 = vrot.slane (!%p18476_p12), %v15499_v34, %v15527_v16  ;;  %v15550_v13 = vcombine.low (!%p18476_p12), %v15520_v24, %v15524_v20 }
 0x9a5   : > { %15492 = vst [vmem:[#allocation2 + $0x8] sm:$0xff] %v15490_v52  ;;  %v15616_v58 = vpack.c.bf16 (!%p18476_p12), %v15588_v63, %v15588_v63  ;;  %v15589_v5 = vcombine.high (!%p18476_p12), %v15587_v9, %v15587_v9  ;;  %v18989_v52 = vld [vmem:[#allocation9 + $0x100] sm:$0xff] (!%p18476_p12)   ;;  %v15617_v59 = vpack.c.bf16 (!%p18476_p12), %v15587_v9, %v15587_v9 }
 0x9a6   : > { %v15551_v54 = vcombine.low %v15528_v42, %v15532_v7  ;;  %v15558_v15 = vrot.slane %v15550_v13, %v21854_v60 }
 0x9a7   : > { %16174 = vmatprep.mubr.bf16.mxu0 %v15616_v58  ;;  %v15618_v44 = vpack.c.bf16 %v15589_v5, %v15589_v5 }
 0x9a8   : > { %16175 = vmatmul.mubr.bf16.vlgmr.msra.gmra.mrb[0].mxu0 %v15615_v38  ;;  %v15565_v18 = vrot.slane %v15551_v54, %v21854_v60 }
 0x9a9   : > { %16214 = vmatprep.mubr.bf16.mxu1 %v15618_v44  ;;  %18593 = vmatpush3.bf16.msra.mxu0 %v18989_v52 }
 0x9aa   : > { %16215 = vmatmul.mubr.bf16.vlgmr.msra.gmra.mrb[0].mxu1 %v15617_v59  ;;  %18594 = vmatprep.subr.bf16.mxu0 %v18991_v2  ;;  %v15566_v22 = vcombine.low %v15558_v15, %v15565_v18 }
 0x9ab   : > { %18615 = vmatpush3.bf16.msra.mxu1 %v18990_v39 }
 0x9ac   : > { %18616 = vmatprep.subr.bf16.mxu1 %v18992_v10  ;;  %v15498_v25 = vld [vmem:[#allocation2 + $0x8] sm:$0xff] }
 0x9ad   : > { %18595 = vmatpush3.bf16.msra.mxu0 %v18993_v12  ;;  %v15570_v26 = vadd.f32 %v15566_v22, %v15498_v25 }
 0x9ae   : > { %18596 = vmatprep.subr.bf16.mxu0 %v18995_v45 }
 0x9af   : > { %18617 = vmatpush3.bf16.msra.mxu1 %v18994_v29  ;;  %v15597_v1 = vrot.slane %v15570_v26, %v21854_v60  ;;  %v15590_v32 = vcombine.high %v15570_v26, %v15570_v26 }
 0x9b0   : > { %18618 = vmatprep.subr.bf16.mxu1 %v18996_v6 }
 0x9b1   : > { %18597 = vmatpush3.bf16.msra.mxu0 %v18997_v14  ;;  %v15605_v34 = vcombine.high %v15597_v1, %v15597_v1  ;;  %v15604_v37 = vrot.slane %v15590_v32, %v21854_v60  ;;  %v19018_v60 = vld [vmem:[#allocation9 + $0x1b8] sm:$0xff]   ;;  %v15619_v53 = vpack.c.bf16 %v15597_v1, %v15597_v1 }
 0x9b2   : > { %18598 = vmatprep.subr.bf16.mxu0 %v18999_v36 }
 0x9b3   : > { %18619 = vmatpush3.bf16.msra.mxu1 %v18998_v30  ;;  %v15620_v48 = vpack.c.bf16 %v15605_v34, %v15605_v34  ;;  %v15606_v46 = vcombine.high %v15604_v37, %v15604_v37  ;;  %v15621_v19 = vpack.c.bf16 %v15604_v37, %v15604_v37 }
 0x9b4   : > { %18620 = vmatprep.subr.bf16.mxu1 %v19000_v17 }
 0x9b5   : > { %18599 = vmatpush3.bf16.msra.mxu0 %v19001_v33  ;;  %16254 = vmatprep.mubr.bf16.mxu0 %v15620_v48  ;;  %v15622_v50 = vpack.c.bf16 %v15606_v46, %v15606_v46 }
 0x9b6   : > { %18600 = vmatprep.subr.bf16.mxu0 %v19003_v49 }
 0x9b7   : > { %18621 = vmatpush3.bf16.msra.mxu1 %v19002_v21  ;;  %16294 = vmatprep.mubr.bf16.mxu1 %v15622_v50 }
 0x9b8   : > { %18622 = vmatprep.subr.bf16.mxu1 %v19004_v57 }
 0x9b9   : > { %18601 = vmatpush3.bf16.msra.mxu0 %v19005_v8 }
 0x9ba   : > { %18602 = vmatprep.subr.bf16.mxu0 %v19007_v23 }
 0x9bb   : > { %18623 = vmatpush3.bf16.msra.mxu1 %v19006_v43 }
 0x9bc   : > { %18624 = vmatprep.subr.bf16.mxu1 %v19008_v27 }
 0x9bd   : > { %18603 = vmatpush3.bf16.msra.mxu0 %v19009_v31 }
 0x9be   : > { %18604 = vmatprep.subr.bf16.mxu0 %v19011_v11 }
 0x9bf   : > { %18625 = vmatpush3.bf16.msra.mxu1 %v19010_v0 }
 0x9c0   : > { %18626 = vmatprep.subr.bf16.mxu1 %v19012_v40 }
 0x9c1   : > { %18605 = vmatpush3.bf16.msra.mxu0 %v19013_v41 }
 0x9c2   : > { %18606 = vmatprep.subr.bf16.mxu0 %v19015_v47 }
 0x9c3   : > { %18627 = vmatpush3.bf16.msra.mxu1 %v19014_v35 }
 0x9c4   : > { %18628 = vmatprep.subr.bf16.mxu1 %v19016_v51 }
 0x9c5   : > { %18607 = vmatpush3.bf16.msra.mxu0 %v19017_v3 }
 0x9c7   : > { %18629 = vmatpush3.bf16.msra.mxu1 %v19018_v60 }
 0x9c8   : > { %16255 = vmatmul.mubr.bf16.vlgmr.msra.gmra.mrb[4].mxu0 %v15619_v53 }
 0x9ca   : > { %16295 = vmatmul.mubr.bf16.vlgmr.msra.gmra.mrb[4].mxu1 %v15621_v19 }
 0xa7b   : > { %v18564_v55 = vpop.f32.mrb[0].mxu0 }
 0xa7c   : > { %v18565_v61 = vpop.f32.mrb[1].mxu0 }
 0xa7d   : > { %v18586_v28 = vpop.f32.mrb[0].mxu1  ;;  %v18566_v62 = vadd.f32 %v18565_v61, %v18564_v55  ;;  %v18567_v63 = vpop.f32.mrb[2].mxu0 }
 0xa7e   : > { %v18587_v9 = vpop.f32.mrb[1].mxu1  ;;  %v18568_v16 = vpop.f32.mrb[3].mxu0 }
 0xa7f   : > { %v16177_v4 = vadd.f32 %v18566_v62, %v18477_v56  ;;  %v18588_v38 = vadd.f32 %v18587_v9, %v18586_v28  ;;  %v18589_v58 = vpop.f32.mrb[2].mxu1 }
 0xa80   : > { %v18590_v5 = vpop.f32.mrb[3].mxu1 }
 0xa81   : > { %v16217_v52 = vadd.f32 %v18588_v38, %v16177_v4 }
 0xa9b   : > { %v18608_v59 = vpop.f32.mrb[4].mxu0 }
 0xa9c   : > { %v18609_v2 = vpop.f32.mrb[5].mxu0 }
 0xa9d   : > { %v18630_v24 = vpop.f32.mrb[4].mxu1  ;;  %v18610_v44 = vadd.f32 %v18609_v2, %v18608_v59  ;;  %v18611_v39 = vpop.f32.mrb[6].mxu0 }
 0xa9e   : > { %v18631_v20 = vpop.f32.mrb[5].mxu1  ;;  %v18612_v42 = vpop.f32.mrb[7].mxu0 }
 0xa9f   : > { %v16257_v7 = vadd.f32 %v18610_v44, %v16217_v52  ;;  %v18632_v10 = vadd.f32 %v18631_v20, %v18630_v24  ;;  %v18633_v12 = vpop.f32.mrb[6].mxu1 }
 0xaa0   : > { %v18634_v45 = vpop.f32.mrb[7].mxu1 }
 0xaa1   : > { %v16297_v29 = vadd.f32 %v18632_v10, %v16257_v7 }
 0xaa3   : > { %16302 = vst [vmem:[#allocation12] sm:$0x3] %v16297_v29 }
 0xaa4 PF: > { %p18907_p0 = scmp.eq.s32.totalorder %s19308_s25, 1  ;;  %s19253_s13 = smov [#allocation12]  }
 0xaa5   : > { %s16310_s15 = sshll.u32 %s19253_s13, 4  ;;  %s16311_s15 = int_to_ptr.vmem [resolvable:$true] %s16310_s15 }
 0xaa6   : > { %s19163_s24 = scalar_lea.vmem %s16311_s15, 32  ;;  %p19170_p10 = scmp.lt.s32.totalorder %s16311_s15, %s16311_s15 }
 0xaa7   : > { %p19164_p2 = scmp.ne.s32.totalorder %s16311_s15, %s19163_s24  ;;  %p19171_p9 = scmp.lt.s32.totalorder %s19163_s24, %s19163_s24 }
 0xaa9   : > { %p19165_p13 = pnand %p19164_p2, %p18907_p0  ;;  %p19172_p6 = por %p19171_p9, %p19170_p10 }
 0xaab   : > { %p19166_p3 = pneg %p19165_p13 }
 0xaad   : > { %p19173_p7 = pnand %p19172_p6, %p19166_p3 }
 0xaaf   : > { %19176 = shalt.err (!%p19173_p7)
}
 0xab0   : > { %s19177_s8 = scalar_lea.hbm %s21957_s6, 32 }
 0xab1   : > { %p19178_p8 = scmp.ne.s32.totalorder %s21957_s6, %s19177_s8  ;;  %p19183_p4 = scmp.lt.u32.totalorder %s19177_s8, %s21957_s6 }
 0xab3   : > { %p19179_p11 = pnand %p19178_p8, %p18907_p0 }
 0xab5   : > { %p19180_p1 = pneg %p19179_p11 }
 0xab7   : > { %p19185_p5 = pnand %p19183_p4, %p19180_p1 }
 0xab9   : > { %19188 = shalt.err (!%p19185_p5)
}
 0xaba   : > { %18880 = dma.vmem_to_hbm [thread:$0]  (%p18907_p0), %s16311_s15, 32, %s21957_s6, [#allocation5]  }
 0xabb   : > { %19222 = dma.done.wait (%p18907_p0), [#allocation5], 32  }
 0xabc   : > { %19224 = vsyncadd (%p18907_p0), [#allocation5], 4294967264 }
 0xabd PF: > { %p21_p12 = scmp.ge.s32.totalorder %s19404_s16, 4   ;;  %s21975_s21 = smov %s19231_s22 }
 0xabe   : > { %s21976_s22 = smov %s19235_s23  ;;  %s21977_s23 = smov %s19414_s17 }
 0xabf   : > { %s21978_s24 = smov %s19404_s16  ;;  %23 = sbr.rel (!%p21_p12) target bundleno = 9 (0x9), region = 114 }
 0xac6   :  { %16323 = vsyncpa [#allocation4], 1 }
 0xac7   :  { %16325 = vsyncpa [#allocation4 + $0x1], 1 }
 0xac8   :  { %16326 = vsyncpa [#allocation7], 1 }
 0xac9   :  { %16328 = vsyncpa [#allocation7 + $0x1], 1 }
 0xaca   :  { %16329 = vsyncpa [#allocation10], 1 }
 0xacb   :  { %16330 = vsyncpa [#allocation5], 1 }
 0xacc   :  { %16332 = vsyncpa [#allocation5 + $0x1], 1 }

</bundles_post_ra>
